<compile_context>
chip_gen: v7x
topology: tpu7x:2x2x1
jax: 0.10.0
libtpu: 0.0.40
codegen_flags: <defaults>
</compile_context>

<pallas_src>
import numpy as np
import jax
import jax.numpy as jnp
from jax import lax
from jax.experimental import pallas as pl
from jax.experimental.pallas import tpu as pltpu

# ----------------------------- configuration --------------------------------
# nOut must be divisible by k*k (so n == n1 and the grouped convs are valid)
# and nIn == nOut with stride == 1 so the residual add is well-defined.
N = 2
NIN = 25
NOUT = 25
H = W = 16
HW = H * W                    # 256 -> lane axis (2 x 128 lanes), lane-dense
D_RATES = (1, 2, 4, 8)
NBRANCH = len(D_RATES)        # dilated-conv branches (4)
K = NBRANCH + 1               # total branches (5)
NBR = NOUT // K               # channels per branch ("n" in the module) = 5
KSIZE = 5
TAPS = KSIZE * KSIZE
EPS = 1e-5


# ------------------------------ Pallas kernel --------------------------------
def _eesp_kernel(x_ref, wp_ref, pb_ref, pa_ref,
                 dww_ref, dwb_ref, mask_ref,
                 ecat_ref, ecab_ref,
                 brs_ref, brb_ref, bra_ref,
                 wexp_ref, exb_ref, acta_ref,
                 o_ref):
    """Whole EESP_V4 forward for one image, channels-major (C, H*W)."""
    x = x_ref[0]                                            # (NOUT, HW)

    # ---- proj_1x1: grouped 1x1 conv (block-diag dense; BN scale pre-folded
    #      into the weight rows) + BN bias + PReLU.
    y1 = lax.dot_general(wp_ref[...], x, (((1,), (0,)), ((), ())),
                         precision=lax.Precision.HIGHEST,
                         preferred_element_type=jnp.float32)   # (NBR, HW)
    y1 = y1 + pb_ref[...]
    y1 = jnp.where(y1 >= 0.0, y1, pa_ref[...] * y1)

    # ---- spp_dw: 4 dilated depthwise 5x5 convs (+ folded BN) as masked
    #      lane-shift MACs on a zero-extended flat row buffer; hierarchical
    #      feature fusion accumulated on the fly.
    zpad = jnp.zeros((NBR, HW), jnp.float32)
    xe = jnp.concatenate([zpad, y1, zpad], axis=1)          # (NBR, 3*HW)

    branches = []
    prev = None
    for bi, d in enumerate(D_RATES):
        wb = dww_ref[bi]                                    # (NBR, TAPS), hoisted
        mb = mask_ref[bi]                                   # (TAPS, HW), hoisted
        acc = jnp.zeros((NBR, HW), jnp.float32)
        for ki in range(KSIZE):
            oi = (ki - 2) * d
            if abs(oi) >= H:                                # tap fully outside
                continue
            for kj in range(KSIZE):
                oj = (kj - 2) * d
                if abs(oj) >= W:
                    continue
                t = ki * KSIZE + kj
                s = oi * W + oj                             # flat lane shift
                wcol = wb[:, t:t + 1]                       # (NBR, 1)
                if s == 0:
                    acc = acc + y1 * wcol                   # mask is all-ones
                else:
                    shifted = xe[:, HW + s:2 * HW + s]      # (NBR, HW) lane shift
                    acc = acc + shifted * (wcol * mb[t:t + 1, :])
        yb = acc + dwb_ref[bi]                              # folded BN bias
        prev = yb if prev is None else yb + prev            # hierarchical fusion
        branches.append(prev)

    # ---- ECA attention branch: GAP -> conv1d(k=3, zero pad) over channels ->
    #      sigmoid -> per-channel scale, fused with the running branch sum.
    #      (1/(H*W) and the tri-diagonal conv1d are folded into ecat.)
    tz = lax.dot_general(ecat_ref[...], y1, (((1,), (0,)), ((), ())),
                         precision=lax.Precision.HIGHEST,
                         preferred_element_type=jnp.float32)   # (NBR, HW)
    z = jnp.sum(tz, axis=1, keepdims=True) + ecab_ref[...]     # (NBR, 1)
    sig = 1.0 / (1.0 + jnp.exp(-z))
    branches.append(y1 * sig + prev)

    # ---- BR (BN+PReLU on the concat) -> grouped 1x1 expansion conv (BN scale
    #      folded) -> residual add -> PReLU.  Processed per branch so the
    #      channel concat is never materialized; output is concat-ordered.
    ye = x + exb_ref[...]
    for bi in range(K):
        yb = branches[bi] * brs_ref[bi] + brb_ref[bi]
        yb = jnp.where(yb >= 0.0, yb, bra_ref[bi] * yb)
        ye = ye + lax.dot_general(wexp_ref[bi], yb, (((1,), (0,)), ((), ())),
                                  precision=lax.Precision.HIGHEST,
                                  preferred_element_type=jnp.float32)
    o_ref[0] = jnp.where(ye >= 0.0, ye, acta_ref[...] * ye)


# ------------------------------ pallas_call wrapper --------------------------
def _tap_masks():
    """(NBRANCH, TAPS, H*W) float 0/1 validity masks for every dilated tap."""
    m = np.zeros((NBRANCH, TAPS, HW), np.float32)
    ii, jj = np.meshgrid(np.arange(H), np.arange(W), indexing='ij')
    for bi, d in enumerate(D_RATES):
        for ki in range(KSIZE):
            for kj in range(KSIZE):
                oi, oj = (ki - 2) * d, (kj - 2) * d
                valid = ((ii + oi >= 0) & (ii + oi < H) &
                         (jj + oj >= 0) & (jj + oj < W))
                m[bi, ki * KSIZE + kj] = valid.reshape(-1).astype(np.float32)
    return jnp.asarray(m)


def _proj_dense(w):
    """torch grouped 1x1 weight (NBR, NIN//K, 1, 1) -> dense (NBR, NIN)."""
    w2 = np.asarray(w[:, :, 0, 0])
    cin_pg = NIN // K
    dense = np.zeros((NBR, NIN), np.float32)
    for o in range(NBR):                                    # cout_per_group == 1
        dense[o, o * cin_pg:(o + 1) * cin_pg] = w2[o]
    return jnp.asarray(dense)


def _exp_dense(w):
    """torch grouped 1x1 weight (NOUT, NOUT//K, 1, 1) -> dense (NOUT, NOUT)."""
    w2 = np.asarray(w[:, :, 0, 0])
    cin_pg = NOUT // K
    cout_pg = NOUT // K
    dense = np.zeros((NOUT, NOUT), np.float32)
    for o in range(NOUT):
        g = o // cout_pg
        dense[o, g * cin_pg:(g + 1) * cin_pg] = w2[o]
    return jnp.asarray(dense)


def _bn_fold(bn):
    g, b, m, v = bn
    s = g / jnp.sqrt(v + EPS)
    return s, b - m * s


def eesp_v4_pallas(x_nchw, p):
    n = x_nchw.shape[0]
    xf = x_nchw.reshape(n, NIN, HW)                         # free reshape

    # proj_1x1 parameters (BN scale folded into the block-diag rows)
    s1, b1 = _bn_fold(p['bn1'])
    wp = _proj_dense(p['w_proj']) * s1[:, None]             # (NBR, NIN)
    pb = b1[:, None]
    pa = p['a1'][:, None]

    # dilated depthwise weights with per-branch BN scale folded in
    dws = jnp.stack([_bn_fold(bn)[0] for bn in p['bn_dw']])            # (4, NBR)
    dwbias = jnp.stack([_bn_fold(bn)[1] for bn in p['bn_dw']])         # (4, NBR)
    dww = (p['w_dw'][:, :, 0].reshape(NBRANCH, NBR, TAPS)
           * dws[:, :, None])                                          # (4, NBR, 25)
    dwb = dwbias[:, :, None]                                           # (4, NBR, 1)

    masks = _tap_masks()                                               # (4, 25, HW)

    # ECA conv1d(k=3, pad=1) as a tri-diagonal matrix with 1/(H*W) folded in
    ecat = ((p['eca_w'][0] * jnp.asarray(np.eye(NBR, k=-1), jnp.float32)
             + p['eca_w'][1] * jnp.asarray(np.eye(NBR), jnp.float32)
             + p['eca_w'][2] * jnp.asarray(np.eye(NBR, k=1), jnp.float32))
            * (1.0 / HW))
    ecab = p['eca_b'].reshape(1, 1)

    # BR + expansion conv parameters, grouped per branch
    brs, brb = _bn_fold(p['bn_br'])
    exs, exb = _bn_fold(p['bn_exp'])
    wexp_full = _exp_dense(p['w_exp']) * exs[:, None]                  # (NOUT, NOUT)
    wexp_g = jnp.stack([wexp_full[:, g * NBR:(g + 1) * NBR]
                        for g in range(K)], axis=0)                    # (K, NOUT, NBR)
    brs_g = brs.reshape(K, NBR, 1)
    brb_g = brb.reshape(K, NBR, 1)
    bra_g = p['a_br'].reshape(K, NBR, 1)

    out = pl.pallas_call(
        _eesp_kernel,
        out_shape=jax.ShapeDtypeStruct((n, NOUT, HW), jnp.float32),
        grid_spec=pltpu.PrefetchScalarGridSpec(
            num_scalar_prefetch=0,
            grid=(n,),
            in_specs=[
                pl.BlockSpec((1, NIN, HW), lambda b: (b, 0, 0)),        # x
                pl.BlockSpec((NBR, NIN), lambda b: (0, 0)),             # wp
                pl.BlockSpec((NBR, 1), lambda b: (0, 0)),               # proj bias
                pl.BlockSpec((NBR, 1), lambda b: (0, 0)),               # proj alpha
                pl.BlockSpec((NBRANCH, NBR, TAPS), lambda b: (0, 0, 0)),  # dw w
                pl.BlockSpec((NBRANCH, NBR, 1), lambda b: (0, 0, 0)),     # dw bias
                pl.BlockSpec((NBRANCH, TAPS, HW), lambda b: (0, 0, 0)),   # masks
                pl.BlockSpec((NBR, NBR), lambda b: (0, 0)),             # eca matrix
                pl.BlockSpec((1, 1), lambda b: (0, 0)),                 # eca bias
                pl.BlockSpec((K, NBR, 1), lambda b: (0, 0, 0)),         # br scale
                pl.BlockSpec((K, NBR, 1), lambda b: (0, 0, 0)),         # br bias
                pl.BlockSpec((K, NBR, 1), lambda b: (0, 0, 0)),         # br alpha
                pl.BlockSpec((K, NOUT, NBR), lambda b: (0, 0, 0)),      # exp weight
                pl.BlockSpec((NOUT, 1), lambda b: (0, 0)),              # exp bias
                pl.BlockSpec((NOUT, 1), lambda b: (0, 0)),              # act alpha
            ],
            out_specs=pl.BlockSpec((1, NOUT, HW), lambda b: (b, 0, 0)),
        ),
        compiler_params=pltpu.CompilerParams(
            dimension_semantics=("parallel",)),
    )(xf, wp, pb, pa, dww, dwb, masks, ecat, ecab,
      brs_g, brb_g, bra_g, wexp_g, exb[:, None], p['a_act'][:, None])

    return out.reshape(n, NOUT, H, W)                       # free reshape (NCHW)


# ------------------------------ parameters -----------------------------------
def _bn_params(key, c):
    k1, k2, k3, k4 = jax.random.split(key, 4)
    gamma = 1.0 + 0.2 * jax.random.normal(k1, (c,), jnp.float32)
    beta = 0.1 * jax.random.normal(k2, (c,), jnp.float32)
    mean = 0.1 * jax.random.normal(k3, (c,), jnp.float32)
    var = jax.random.uniform(k4, (c,), jnp.float32, 0.5, 1.5)
    return gamma, beta, mean, var


def _make_params(key):
    ks = jax.random.split(key, 10)
    p = {}
    p['w_proj'] = 0.3 * jax.random.normal(ks[0], (NBR, NIN // K, 1, 1), jnp.float32)
    p['bn1'] = _bn_params(ks[1], NBR)
    p['a1'] = jnp.full((NBR,), 0.25, jnp.float32)
    p['w_dw'] = 0.3 * jax.random.normal(
        ks[2], (NBRANCH, NBR, 1, KSIZE, KSIZE), jnp.float32)
    p['bn_dw'] = [_bn_params(k_, NBR) for k_ in jax.random.split(ks[3], NBRANCH)]
    p['eca_w'] = 0.5 * jax.random.normal(ks[4], (3,), jnp.float32)
    p['eca_b'] = 0.1 * jax.random.normal(ks[5], (), jnp.float32)
    p['bn_br'] = _bn_params(ks[6], NOUT)
    p['a_br'] = jnp.full((NOUT,), 0.25, jnp.float32)
    p['w_exp'] = 0.3 * jax.random.normal(ks[7], (NOUT, NOUT // K, 1, 1), jnp.float32)
    p['bn_exp'] = _bn_params(ks[8], NOUT)
    p['a_act'] = jnp.full((NOUT,), 0.25, jnp.float32)
    return p


# ------------------------------ pure-JAX reference ---------------------------
def _reference(x, p):
    def bn(y, bnp):
        g, b, m, v = bnp
        sh = (1, -1, 1, 1)
        return ((y - m.reshape(sh)) / jnp.sqrt(v.reshape(sh) + EPS)
                * g.reshape(sh) + b.reshape(sh))

    def prelu(y, a):
        return jnp.where(y >= 0, y, a.reshape(1, -1, 1, 1) * y)

    dn = ('NCHW', 'OIHW', 'NCHW')
    y = lax.conv_general_dilated(x, p['w_proj'], (1, 1), [(0, 0), (0, 0)],
                                 dimension_numbers=dn, feature_group_count=K,
                                 precision=lax.Precision.HIGHEST)
    y = prelu(bn(y, p['bn1']), p['a1'])

    outs, prev = [], None
    for bi, d in enumerate(D_RATES):
        z = lax.conv_general_dilated(y, p['w_dw'][bi], (1, 1),
                                     [(2 * d, 2 * d), (2 * d, 2 * d)],
                                     rhs_dilation=(d, d),
                                     dimension_numbers=dn,
                                     feature_group_count=NBR,
                                     precision=lax.Precision.HIGHEST)
        z = bn(z, p['bn_dw'][bi])
        prev = z if prev is None else z + prev
        outs.append(prev)

    gap = jnp.mean(y, axis=(2, 3))                     # (N, NBR)
    gpad = jnp.pad(gap, ((0, 0), (1, 1)))
    wc = p['eca_w']
    zc = (wc[0] * gpad[:, :-2] + wc[1] * gpad[:, 1:-1]
          + wc[2] * gpad[:, 2:] + p['eca_b'])
    sig = jax.nn.sigmoid(zc)
    prev = y * sig[:, :, None, None] + prev
    outs.append(prev)

    cat = jnp.concatenate(outs, axis=1)
    cat = prelu(bn(cat, p['bn_br']), p['a_br'])
    exp = lax.conv_general_dilated(cat, p['w_exp'], (1, 1), [(0, 0), (0, 0)],
                                   dimension_numbers=dn, feature_group_count=K,
                                   precision=lax.Precision.HIGHEST)
    exp = bn(exp, p['bn_exp']) + x
    return prelu(exp, p['a_act'])


# ----------------------------------- main ------------------------------------
if __name__ == "__main__":
    key = jax.random.PRNGKey(0)
    kx, kp = jax.random.split(key)
    x = jax.random.normal(kx, (N, NIN, H, W), jnp.float32)
    params = _make_params(kp)

    out = eesp_v4_pallas(x, params)
    out = jax.block_until_ready(out)

    ref = _reference(x, params)
    np.testing.assert_allclose(np.asarray(out), np.asarray(ref),
                               rtol=1e-2, atol=1e-2)
    print("KERNEL_OK")
</pallas_src>

<mosaic_0001>
module attributes {stable_mosaic.version = 11 : i64} {
  func.func @_eesp_kernel(%arg0: i32, %arg1: memref<1x25x256xf32, #tpu.memory_space<vmem>>, %arg2: memref<5x25xf32, #tpu.memory_space<vmem>>, %arg3: memref<5x1xf32, #tpu.memory_space<vmem>>, %arg4: memref<5x1xf32, #tpu.memory_space<vmem>>, %arg5: memref<4x5x25xf32, #tpu.memory_space<vmem>>, %arg6: memref<4x5x1xf32, #tpu.memory_space<vmem>>, %arg7: memref<4x25x256xf32, #tpu.memory_space<vmem>>, %arg8: memref<5x5xf32, #tpu.memory_space<vmem>>, %arg9: memref<1x1xf32, #tpu.memory_space<vmem>>, %arg10: memref<5x5x1xf32, #tpu.memory_space<vmem>>, %arg11: memref<5x5x1xf32, #tpu.memory_space<vmem>>, %arg12: memref<5x5x1xf32, #tpu.memory_space<vmem>>, %arg13: memref<5x25x5xf32, #tpu.memory_space<vmem>>, %arg14: memref<25x1xf32, #tpu.memory_space<vmem>>, %arg15: memref<25x1xf32, #tpu.memory_space<vmem>>, %arg16: memref<1x25x256xf32, #tpu.memory_space<vmem>>) attributes {dimension_semantics = [#tpu.dimension_semantics<parallel>], iteration_bounds = array<i64: 2>, scalar_prefetch = 0 : i64, scratch_operands = 0 : i64, tpu.core_type = #tpu.core_type<tc>, window_params = [{transform_indices = @transform_0, window_bounds = array<i64: 1, 25, 256>}, {pipeline_mode = #tpu.pipeline_mode<synchronous>, transform_indices = @transform_1, window_bounds = array<i64: 5, 25>}, {pipeline_mode = #tpu.pipeline_mode<synchronous>, transform_indices = @transform_2, window_bounds = array<i64: 5, 1>}, {pipeline_mode = #tpu.pipeline_mode<synchronous>, transform_indices = @transform_3, window_bounds = array<i64: 5, 1>}, {pipeline_mode = #tpu.pipeline_mode<synchronous>, transform_indices = @transform_4, window_bounds = array<i64: 4, 5, 25>}, {pipeline_mode = #tpu.pipeline_mode<synchronous>, transform_indices = @transform_5, window_bounds = array<i64: 4, 5, 1>}, {pipeline_mode = #tpu.pipeline_mode<synchronous>, transform_indices = @transform_6, window_bounds = array<i64: 4, 25, 256>}, {pipeline_mode = #tpu.pipeline_mode<synchronous>, transform_indices = @transform_7, window_bounds = array<i64: 5, 5>}, {pipeline_mode = #tpu.pipeline_mode<synchronous>, transform_indices = @transform_8, window_bounds = array<i64: 1, 1>}, {pipeline_mode = #tpu.pipeline_mode<synchronous>, transform_indices = @transform_9, window_bounds = array<i64: 5, 5, 1>}, {pipeline_mode = #tpu.pipeline_mode<synchronous>, transform_indices = @transform_10, window_bounds = array<i64: 5, 5, 1>}, {pipeline_mode = #tpu.pipeline_mode<synchronous>, transform_indices = @transform_11, window_bounds = array<i64: 5, 5, 1>}, {pipeline_mode = #tpu.pipeline_mode<synchronous>, transform_indices = @transform_12, window_bounds = array<i64: 5, 25, 5>}, {pipeline_mode = #tpu.pipeline_mode<synchronous>, transform_indices = @transform_13, window_bounds = array<i64: 25, 1>}, {pipeline_mode = #tpu.pipeline_mode<synchronous>, transform_indices = @transform_14, window_bounds = array<i64: 25, 1>}, {transform_indices = @transform_15, window_bounds = array<i64: 1, 25, 256>}]} {
    %c0 = arith.constant 0 : index
    %c0_0 = arith.constant 0 : index
    %c0_1 = arith.constant 0 : index
    %0 = vector.load %arg1[%c0, %c0_0, %c0_1] : memref<1x25x256xf32, #tpu.memory_space<vmem>>, vector<1x25x256xf32>
    %1 = vector.shape_cast %0 : vector<1x25x256xf32> to vector<25x256xf32>
    %c0_2 = arith.constant 0 : index
    %c0_3 = arith.constant 0 : index
    %2 = vector.load %arg2[%c0_2, %c0_3] : memref<5x25xf32, #tpu.memory_space<vmem>>, vector<5x25xf32>
    %cst = arith.constant dense<0.000000e+00> : vector<5x256xf32>
    %3 = tpu.matmul %2, %1, %cst {dimension_numbers = #tpu.dot_dimension_numbers<[1], [0], [0], [1], [0, 0, 1, 1], [], []>, precision = #tpu.contract_precision<fp32>} : vector<5x25xf32>, vector<25x256xf32>, vector<5x256xf32> -> vector<5x256xf32>
    %c0_4 = arith.constant 0 : index
    %c0_5 = arith.constant 0 : index
    %4 = vector.load %arg3[%c0_4, %c0_5] : memref<5x1xf32, #tpu.memory_space<vmem>>, vector<5x1xf32>
    %5 = vector.broadcast %4 : vector<5x1xf32> to vector<5x256xf32>
    %6 = arith.addf %3, %5 : vector<5x256xf32>
    %cst_6 = arith.constant 0.000000e+00 : f32
    %7 = vector.broadcast %cst_6 : f32 to vector<5x256xf32>
    %8 = arith.cmpf oge, %6, %7 : vector<5x256xf32>
    %c0_7 = arith.constant 0 : index
    %c0_8 = arith.constant 0 : index
    %9 = vector.load %arg4[%c0_7, %c0_8] : memref<5x1xf32, #tpu.memory_space<vmem>>, vector<5x1xf32>
    %10 = vector.broadcast %9 : vector<5x1xf32> to vector<5x256xf32>
    %11 = arith.mulf %10, %6 : vector<5x256xf32>
    %12 = arith.select %8, %6, %11 : vector<5x256xi1>, vector<5x256xf32>
    %cst_9 = arith.constant 0.000000e+00 : f32
    %13 = vector.broadcast %cst_9 : f32 to vector<5x256xf32>
    %14 = tpu.concatenate %13, %12, %13 in 1 : vector<5x256xf32>, vector<5x256xf32>, vector<5x256xf32> -> vector<5x768xf32>
    %c0_10 = arith.constant 0 : index
    %c0_11 = arith.constant 0 : index
    %c0_12 = arith.constant 0 : index
    %15 = vector.load %arg5[%c0_10, %c0_11, %c0_12] : memref<4x5x25xf32, #tpu.memory_space<vmem>>, vector<1x5x25xf32>
    %16 = vector.shape_cast %15 : vector<1x5x25xf32> to vector<5x25xf32>
    %c0_13 = arith.constant 0 : index
    %c0_14 = arith.constant 0 : index
    %c0_15 = arith.constant 0 : index
    %17 = vector.load %arg7[%c0_13, %c0_14, %c0_15] : memref<4x25x256xf32, #tpu.memory_space<vmem>>, vector<1x25x256xf32>
    %18 = vector.shape_cast %17 : vector<1x25x256xf32> to vector<25x256xf32>
    %cst_16 = arith.constant 0.000000e+00 : f32
    %19 = vector.broadcast %cst_16 : f32 to vector<5x256xf32>
    %20 = vector.extract_strided_slice %16 {offsets = [0, 0], sizes = [5, 1], strides = [1, 1]} : vector<5x25xf32> to vector<5x1xf32>
    %21 = vector.extract_strided_slice %14 {offsets = [0, 222], sizes = [5, 256], strides = [1, 1]} : vector<5x768xf32> to vector<5x256xf32>
    %22 = vector.extract_strided_slice %18 {offsets = [0, 0], sizes = [1, 256], strides = [1, 1]} : vector<25x256xf32> to vector<1x256xf32>
    %23 = vector.broadcast %20 : vector<5x1xf32> to vector<5x256xf32>
    %24 = vector.broadcast %22 : vector<1x256xf32> to vector<5x256xf32>
    %25 = arith.mulf %23, %24 : vector<5x256xf32>
    %26 = arith.mulf %21, %25 : vector<5x256xf32>
    %27 = arith.addf %19, %26 : vector<5x256xf32>
    %28 = vector.extract_strided_slice %16 {offsets = [0, 1], sizes = [5, 1], strides = [1, 1]} : vector<5x25xf32> to vector<5x1xf32>
    %29 = vector.extract_strided_slice %14 {offsets = [0, 223], sizes = [5, 256], strides = [1, 1]} : vector<5x768xf32> to vector<5x256xf32>
    %30 = vector.extract_strided_slice %18 {offsets = [1, 0], sizes = [1, 256], strides = [1, 1]} : vector<25x256xf32> to vector<1x256xf32>
    %31 = vector.broadcast %28 : vector<5x1xf32> to vector<5x256xf32>
    %32 = vector.broadcast %30 : vector<1x256xf32> to vector<5x256xf32>
    %33 = arith.mulf %31, %32 : vector<5x256xf32>
    %34 = arith.mulf %29, %33 : vector<5x256xf32>
    %35 = arith.addf %27, %34 : vector<5x256xf32>
    %36 = vector.extract_strided_slice %16 {offsets = [0, 2], sizes = [5, 1], strides = [1, 1]} : vector<5x25xf32> to vector<5x1xf32>
    %37 = vector.extract_strided_slice %14 {offsets = [0, 224], sizes = [5, 256], strides = [1, 1]} : vector<5x768xf32> to vector<5x256xf32>
    %38 = vector.extract_strided_slice %18 {offsets = [2, 0], sizes = [1, 256], strides = [1, 1]} : vector<25x256xf32> to vector<1x256xf32>
    %39 = vector.broadcast %36 : vector<5x1xf32> to vector<5x256xf32>
    %40 = vector.broadcast %38 : vector<1x256xf32> to vector<5x256xf32>
    %41 = arith.mulf %39, %40 : vector<5x256xf32>
    %42 = arith.mulf %37, %41 : vector<5x256xf32>
    %43 = arith.addf %35, %42 : vector<5x256xf32>
    %44 = vector.extract_strided_slice %16 {offsets = [0, 3], sizes = [5, 1], strides = [1, 1]} : vector<5x25xf32> to vector<5x1xf32>
    %45 = vector.extract_strided_slice %14 {offsets = [0, 225], sizes = [5, 256], strides = [1, 1]} : vector<5x768xf32> to vector<5x256xf32>
    %46 = vector.extract_strided_slice %18 {offsets = [3, 0], sizes = [1, 256], strides = [1, 1]} : vector<25x256xf32> to vector<1x256xf32>
    %47 = vector.broadcast %44 : vector<5x1xf32> to vector<5x256xf32>
    %48 = vector.broadcast %46 : vector<1x256xf32> to vector<5x256xf32>
    %49 = arith.mulf %47, %48 : vector<5x256xf32>
    %50 = arith.mulf %45, %49 : vector<5x256xf32>
    %51 = arith.addf %43, %50 : vector<5x256xf32>
    %52 = vector.extract_strided_slice %16 {offsets = [0, 4], sizes = [5, 1], strides = [1, 1]} : vector<5x25xf32> to vector<5x1xf32>
    %53 = vector.extract_strided_slice %14 {offsets = [0, 226], sizes = [5, 256], strides = [1, 1]} : vector<5x768xf32> to vector<5x256xf32>
    %54 = vector.extract_strided_slice %18 {offsets = [4, 0], sizes = [1, 256], strides = [1, 1]} : vector<25x256xf32> to vector<1x256xf32>
    %55 = vector.broadcast %52 : vector<5x1xf32> to vector<5x256xf32>
    %56 = vector.broadcast %54 : vector<1x256xf32> to vector<5x256xf32>
    %57 = arith.mulf %55, %56 : vector<5x256xf32>
    %58 = arith.mulf %53, %57 : vector<5x256xf32>
    %59 = arith.addf %51, %58 : vector<5x256xf32>
    %60 = vector.extract_strided_slice %16 {offsets = [0, 5], sizes = [5, 1], strides = [1, 1]} : vector<5x25xf32> to vector<5x1xf32>
    %61 = vector.extract_strided_slice %14 {offsets = [0, 238], sizes = [5, 256], strides = [1, 1]} : vector<5x768xf32> to vector<5x256xf32>
    %62 = vector.extract_strided_slice %18 {offsets = [5, 0], sizes = [1, 256], strides = [1, 1]} : vector<25x256xf32> to vector<1x256xf32>
    %63 = vector.broadcast %60 : vector<5x1xf32> to vector<5x256xf32>
    %64 = vector.broadcast %62 : vector<1x256xf32> to vector<5x256xf32>
    %65 = arith.mulf %63, %64 : vector<5x256xf32>
    %66 = arith.mulf %61, %65 : vector<5x256xf32>
    %67 = arith.addf %59, %66 : vector<5x256xf32>
    %68 = vector.extract_strided_slice %16 {offsets = [0, 6], sizes = [5, 1], strides = [1, 1]} : vector<5x25xf32> to vector<5x1xf32>
    %69 = vector.extract_strided_slice %14 {offsets = [0, 239], sizes = [5, 256], strides = [1, 1]} : vector<5x768xf32> to vector<5x256xf32>
    %70 = vector.extract_strided_slice %18 {offsets = [6, 0], sizes = [1, 256], strides = [1, 1]} : vector<25x256xf32> to vector<1x256xf32>
    %71 = vector.broadcast %68 : vector<5x1xf32> to vector<5x256xf32>
    %72 = vector.broadcast %70 : vector<1x256xf32> to vector<5x256xf32>
    %73 = arith.mulf %71, %72 : vector<5x256xf32>
    %74 = arith.mulf %69, %73 : vector<5x256xf32>
    %75 = arith.addf %67, %74 : vector<5x256xf32>
    %76 = vector.extract_strided_slice %16 {offsets = [0, 7], sizes = [5, 1], strides = [1, 1]} : vector<5x25xf32> to vector<5x1xf32>
    %77 = vector.extract_strided_slice %14 {offsets = [0, 240], sizes = [5, 256], strides = [1, 1]} : vector<5x768xf32> to vector<5x256xf32>
    %78 = vector.extract_strided_slice %18 {offsets = [7, 0], sizes = [1, 256], strides = [1, 1]} : vector<25x256xf32> to vector<1x256xf32>
    %79 = vector.broadcast %76 : vector<5x1xf32> to vector<5x256xf32>
    %80 = vector.broadcast %78 : vector<1x256xf32> to vector<5x256xf32>
    %81 = arith.mulf %79, %80 : vector<5x256xf32>
    %82 = arith.mulf %77, %81 : vector<5x256xf32>
    %83 = arith.addf %75, %82 : vector<5x256xf32>
    %84 = vector.extract_strided_slice %16 {offsets = [0, 8], sizes = [5, 1], strides = [1, 1]} : vector<5x25xf32> to vector<5x1xf32>
    %85 = vector.extract_strided_slice %14 {offsets = [0, 241], sizes = [5, 256], strides = [1, 1]} : vector<5x768xf32> to vector<5x256xf32>
    %86 = vector.extract_strided_slice %18 {offsets = [8, 0], sizes = [1, 256], strides = [1, 1]} : vector<25x256xf32> to vector<1x256xf32>
    %87 = vector.broadcast %84 : vector<5x1xf32> to vector<5x256xf32>
    %88 = vector.broadcast %86 : vector<1x256xf32> to vector<5x256xf32>
    %89 = arith.mulf %87, %88 : vector<5x256xf32>
    %90 = arith.mulf %85, %89 : vector<5x256xf32>
    %91 = arith.addf %83, %90 : vector<5x256xf32>
    %92 = vector.extract_strided_slice %16 {offsets = [0, 9], sizes = [5, 1], strides = [1, 1]} : vector<5x25xf32> to vector<5x1xf32>
    %93 = vector.extract_strided_slice %14 {offsets = [0, 242], sizes = [5, 256], strides = [1, 1]} : vector<5x768xf32> to vector<5x256xf32>
    %94 = vector.extract_strided_slice %18 {offsets = [9, 0], sizes = [1, 256], strides = [1, 1]} : vector<25x256xf32> to vector<1x256xf32>
    %95 = vector.broadcast %92 : vector<5x1xf32> to vector<5x256xf32>
    %96 = vector.broadcast %94 : vector<1x256xf32> to vector<5x256xf32>
    %97 = arith.mulf %95, %96 : vector<5x256xf32>
    %98 = arith.mulf %93, %97 : vector<5x256xf32>
    %99 = arith.addf %91, %98 : vector<5x256xf32>
    %100 = vector.extract_strided_slice %16 {offsets = [0, 10], sizes = [5, 1], strides = [1, 1]} : vector<5x25xf32> to vector<5x1xf32>
    %101 = vector.extract_strided_slice %14 {offsets = [0, 254], sizes = [5, 256], strides = [1, 1]} : vector<5x768xf32> to vector<5x256xf32>
    %102 = vector.extract_strided_slice %18 {offsets = [10, 0], sizes = [1, 256], strides = [1, 1]} : vector<25x256xf32> to vector<1x256xf32>
    %103 = vector.broadcast %100 : vector<5x1xf32> to vector<5x256xf32>
    %104 = vector.broadcast %102 : vector<1x256xf32> to vector<5x256xf32>
    %105 = arith.mulf %103, %104 : vector<5x256xf32>
    %106 = arith.mulf %101, %105 : vector<5x256xf32>
    %107 = arith.addf %99, %106 : vector<5x256xf32>
    %108 = vector.extract_strided_slice %16 {offsets = [0, 11], sizes = [5, 1], strides = [1, 1]} : vector<5x25xf32> to vector<5x1xf32>
    %109 = vector.extract_strided_slice %14 {offsets = [0, 255], sizes = [5, 256], strides = [1, 1]} : vector<5x768xf32> to vector<5x256xf32>
    %110 = vector.extract_strided_slice %18 {offsets = [11, 0], sizes = [1, 256], strides = [1, 1]} : vector<25x256xf32> to vector<1x256xf32>
    %111 = vector.broadcast %108 : vector<5x1xf32> to vector<5x256xf32>
    %112 = vector.broadcast %110 : vector<1x256xf32> to vector<5x256xf32>
    %113 = arith.mulf %111, %112 : vector<5x256xf32>
    %114 = arith.mulf %109, %113 : vector<5x256xf32>
    %115 = arith.addf %107, %114 : vector<5x256xf32>
    %116 = vector.extract_strided_slice %16 {offsets = [0, 12], sizes = [5, 1], strides = [1, 1]} : vector<5x25xf32> to vector<5x1xf32>
    %117 = vector.broadcast %116 : vector<5x1xf32> to vector<5x256xf32>
    %118 = arith.mulf %12, %117 : vector<5x256xf32>
    %119 = arith.addf %115, %118 : vector<5x256xf32>
    %120 = vector.extract_strided_slice %16 {offsets = [0, 13], sizes = [5, 1], strides = [1, 1]} : vector<5x25xf32> to vector<5x1xf32>
    %121 = vector.extract_strided_slice %14 {offsets = [0, 257], sizes = [5, 256], strides = [1, 1]} : vector<5x768xf32> to vector<5x256xf32>
    %122 = vector.extract_strided_slice %18 {offsets = [13, 0], sizes = [1, 256], strides = [1, 1]} : vector<25x256xf32> to vector<1x256xf32>
    %123 = vector.broadcast %120 : vector<5x1xf32> to vector<5x256xf32>
    %124 = vector.broadcast %122 : vector<1x256xf32> to vector<5x256xf32>
    %125 = arith.mulf %123, %124 : vector<5x256xf32>
    %126 = arith.mulf %121, %125 : vector<5x256xf32>
    %127 = arith.addf %119, %126 : vector<5x256xf32>
    %128 = vector.extract_strided_slice %16 {offsets = [0, 14], sizes = [5, 1], strides = [1, 1]} : vector<5x25xf32> to vector<5x1xf32>
    %129 = vector.extract_strided_slice %14 {offsets = [0, 258], sizes = [5, 256], strides = [1, 1]} : vector<5x768xf32> to vector<5x256xf32>
    %130 = vector.extract_strided_slice %18 {offsets = [14, 0], sizes = [1, 256], strides = [1, 1]} : vector<25x256xf32> to vector<1x256xf32>
    %131 = vector.broadcast %128 : vector<5x1xf32> to vector<5x256xf32>
    %132 = vector.broadcast %130 : vector<1x256xf32> to vector<5x256xf32>
    %133 = arith.mulf %131, %132 : vector<5x256xf32>
    %134 = arith.mulf %129, %133 : vector<5x256xf32>
    %135 = arith.addf %127, %134 : vector<5x256xf32>
    %136 = vector.extract_strided_slice %16 {offsets = [0, 15], sizes = [5, 1], strides = [1, 1]} : vector<5x25xf32> to vector<5x1xf32>
    %137 = vector.extract_strided_slice %14 {offsets = [0, 270], sizes = [5, 256], strides = [1, 1]} : vector<5x768xf32> to vector<5x256xf32>
    %138 = vector.extract_strided_slice %18 {offsets = [15, 0], sizes = [1, 256], strides = [1, 1]} : vector<25x256xf32> to vector<1x256xf32>
    %139 = vector.broadcast %136 : vector<5x1xf32> to vector<5x256xf32>
    %140 = vector.broadcast %138 : vector<1x256xf32> to vector<5x256xf32>
    %141 = arith.mulf %139, %140 : vector<5x256xf32>
    %142 = arith.mulf %137, %141 : vector<5x256xf32>
    %143 = arith.addf %135, %142 : vector<5x256xf32>
    %144 = vector.extract_strided_slice %16 {offsets = [0, 16], sizes = [5, 1], strides = [1, 1]} : vector<5x25xf32> to vector<5x1xf32>
    %145 = vector.extract_strided_slice %14 {offsets = [0, 271], sizes = [5, 256], strides = [1, 1]} : vector<5x768xf32> to vector<5x256xf32>
    %146 = vector.extract_strided_slice %18 {offsets = [16, 0], sizes = [1, 256], strides = [1, 1]} : vector<25x256xf32> to vector<1x256xf32>
    %147 = vector.broadcast %144 : vector<5x1xf32> to vector<5x256xf32>
    %148 = vector.broadcast %146 : vector<1x256xf32> to vector<5x256xf32>
    %149 = arith.mulf %147, %148 : vector<5x256xf32>
    %150 = arith.mulf %145, %149 : vector<5x256xf32>
    %151 = arith.addf %143, %150 : vector<5x256xf32>
    %152 = vector.extract_strided_slice %16 {offsets = [0, 17], sizes = [5, 1], strides = [1, 1]} : vector<5x25xf32> to vector<5x1xf32>
    %153 = vector.extract_strided_slice %14 {offsets = [0, 272], sizes = [5, 256], strides = [1, 1]} : vector<5x768xf32> to vector<5x256xf32>
    %154 = vector.extract_strided_slice %18 {offsets = [17, 0], sizes = [1, 256], strides = [1, 1]} : vector<25x256xf32> to vector<1x256xf32>
    %155 = vector.broadcast %152 : vector<5x1xf32> to vector<5x256xf32>
    %156 = vector.broadcast %154 : vector<1x256xf32> to vector<5x256xf32>
    %157 = arith.mulf %155, %156 : vector<5x256xf32>
    %158 = arith.mulf %153, %157 : vector<5x256xf32>
    %159 = arith.addf %151, %158 : vector<5x256xf32>
    %160 = vector.extract_strided_slice %16 {offsets = [0, 18], sizes = [5, 1], strides = [1, 1]} : vector<5x25xf32> to vector<5x1xf32>
    %161 = vector.extract_strided_slice %14 {offsets = [0, 273], sizes = [5, 256], strides = [1, 1]} : vector<5x768xf32> to vector<5x256xf32>
    %162 = vector.extract_strided_slice %18 {offsets = [18, 0], sizes = [1, 256], strides = [1, 1]} : vector<25x256xf32> to vector<1x256xf32>
    %163 = vector.broadcast %160 : vector<5x1xf32> to vector<5x256xf32>
    %164 = vector.broadcast %162 : vector<1x256xf32> to vector<5x256xf32>
    %165 = arith.mulf %163, %164 : vector<5x256xf32>
    %166 = arith.mulf %161, %165 : vector<5x256xf32>
    %167 = arith.addf %159, %166 : vector<5x256xf32>
    %168 = vector.extract_strided_slice %16 {offsets = [0, 19], sizes = [5, 1], strides = [1, 1]} : vector<5x25xf32> to vector<5x1xf32>
    %169 = vector.extract_strided_slice %14 {offsets = [0, 274], sizes = [5, 256], strides = [1, 1]} : vector<5x768xf32> to vector<5x256xf32>
    %170 = vector.extract_strided_slice %18 {offsets = [19, 0], sizes = [1, 256], strides = [1, 1]} : vector<25x256xf32> to vector<1x256xf32>
    %171 = vector.broadcast %168 : vector<5x1xf32> to vector<5x256xf32>
    %172 = vector.broadcast %170 : vector<1x256xf32> to vector<5x256xf32>
    %173 = arith.mulf %171, %172 : vector<5x256xf32>
    %174 = arith.mulf %169, %173 : vector<5x256xf32>
    %175 = arith.addf %167, %174 : vector<5x256xf32>
    %176 = vector.extract_strided_slice %16 {offsets = [0, 20], sizes = [5, 1], strides = [1, 1]} : vector<5x25xf32> to vector<5x1xf32>
    %177 = vector.extract_strided_slice %14 {offsets = [0, 286], sizes = [5, 256], strides = [1, 1]} : vector<5x768xf32> to vector<5x256xf32>
    %178 = vector.extract_strided_slice %18 {offsets = [20, 0], sizes = [1, 256], strides = [1, 1]} : vector<25x256xf32> to vector<1x256xf32>
    %179 = vector.broadcast %176 : vector<5x1xf32> to vector<5x256xf32>
    %180 = vector.broadcast %178 : vector<1x256xf32> to vector<5x256xf32>
    %181 = arith.mulf %179, %180 : vector<5x256xf32>
    %182 = arith.mulf %177, %181 : vector<5x256xf32>
    %183 = arith.addf %175, %182 : vector<5x256xf32>
    %184 = vector.extract_strided_slice %16 {offsets = [0, 21], sizes = [5, 1], strides = [1, 1]} : vector<5x25xf32> to vector<5x1xf32>
    %185 = vector.extract_strided_slice %14 {offsets = [0, 287], sizes = [5, 256], strides = [1, 1]} : vector<5x768xf32> to vector<5x256xf32>
    %186 = vector.extract_strided_slice %18 {offsets = [21, 0], sizes = [1, 256], strides = [1, 1]} : vector<25x256xf32> to vector<1x256xf32>
    %187 = vector.broadcast %184 : vector<5x1xf32> to vector<5x256xf32>
    %188 = vector.broadcast %186 : vector<1x256xf32> to vector<5x256xf32>
    %189 = arith.mulf %187, %188 : vector<5x256xf32>
    %190 = arith.mulf %185, %189 : vector<5x256xf32>
    %191 = arith.addf %183, %190 : vector<5x256xf32>
    %192 = vector.extract_strided_slice %16 {offsets = [0, 22], sizes = [5, 1], strides = [1, 1]} : vector<5x25xf32> to vector<5x1xf32>
    %193 = vector.extract_strided_slice %14 {offsets = [0, 288], sizes = [5, 256], strides = [1, 1]} : vector<5x768xf32> to vector<5x256xf32>
    %194 = vector.extract_strided_slice %18 {offsets = [22, 0], sizes = [1, 256], strides = [1, 1]} : vector<25x256xf32> to vector<1x256xf32>
    %195 = vector.broadcast %192 : vector<5x1xf32> to vector<5x256xf32>
    %196 = vector.broadcast %194 : vector<1x256xf32> to vector<5x256xf32>
    %197 = arith.mulf %195, %196 : vector<5x256xf32>
    %198 = arith.mulf %193, %197 : vector<5x256xf32>
    %199 = arith.addf %191, %198 : vector<5x256xf32>
    %200 = vector.extract_strided_slice %16 {offsets = [0, 23], sizes = [5, 1], strides = [1, 1]} : vector<5x25xf32> to vector<5x1xf32>
    %201 = vector.extract_strided_slice %14 {offsets = [0, 289], sizes = [5, 256], strides = [1, 1]} : vector<5x768xf32> to vector<5x256xf32>
    %202 = vector.extract_strided_slice %18 {offsets = [23, 0], sizes = [1, 256], strides = [1, 1]} : vector<25x256xf32> to vector<1x256xf32>
    %203 = vector.broadcast %200 : vector<5x1xf32> to vector<5x256xf32>
    %204 = vector.broadcast %202 : vector<1x256xf32> to vector<5x256xf32>
    %205 = arith.mulf %203, %204 : vector<5x256xf32>
    %206 = arith.mulf %201, %205 : vector<5x256xf32>
    %207 = arith.addf %199, %206 : vector<5x256xf32>
    %208 = vector.extract_strided_slice %16 {offsets = [0, 24], sizes = [5, 1], strides = [1, 1]} : vector<5x25xf32> to vector<5x1xf32>
    %209 = vector.extract_strided_slice %14 {offsets = [0, 290], sizes = [5, 256], strides = [1, 1]} : vector<5x768xf32> to vector<5x256xf32>
    %210 = vector.extract_strided_slice %18 {offsets = [24, 0], sizes = [1, 256], strides = [1, 1]} : vector<25x256xf32> to vector<1x256xf32>
    %211 = vector.broadcast %208 : vector<5x1xf32> to vector<5x256xf32>
    %212 = vector.broadcast %210 : vector<1x256xf32> to vector<5x256xf32>
    %213 = arith.mulf %211, %212 : vector<5x256xf32>
    %214 = arith.mulf %209, %213 : vector<5x256xf32>
    %215 = arith.addf %207, %214 : vector<5x256xf32>
    %c0_17 = arith.constant 0 : index
    %c0_18 = arith.constant 0 : index
    %c0_19 = arith.constant 0 : index
    %216 = vector.load %arg6[%c0_17, %c0_18, %c0_19] : memref<4x5x1xf32, #tpu.memory_space<vmem>>, vector<1x5x1xf32>
    %217 = vector.shape_cast %216 : vector<1x5x1xf32> to vector<5x1xf32>
    %218 = vector.broadcast %217 : vector<5x1xf32> to vector<5x256xf32>
    %219 = arith.addf %215, %218 : vector<5x256xf32>
    %c1 = arith.constant 1 : index
    %c0_20 = arith.constant 0 : index
    %c0_21 = arith.constant 0 : index
    %220 = vector.load %arg5[%c1, %c0_20, %c0_21] : memref<4x5x25xf32, #tpu.memory_space<vmem>>, vector<1x5x25xf32>
    %221 = vector.shape_cast %220 : vector<1x5x25xf32> to vector<5x25xf32>
    %c1_22 = arith.constant 1 : index
    %c0_23 = arith.constant 0 : index
    %c0_24 = arith.constant 0 : index
    %222 = vector.load %arg7[%c1_22, %c0_23, %c0_24] : memref<4x25x256xf32, #tpu.memory_space<vmem>>, vector<1x25x256xf32>
    %223 = vector.shape_cast %222 : vector<1x25x256xf32> to vector<25x256xf32>
    %cst_25 = arith.constant 0.000000e+00 : f32
    %224 = vector.broadcast %cst_25 : f32 to vector<5x256xf32>
    %225 = vector.extract_strided_slice %221 {offsets = [0, 0], sizes = [5, 1], strides = [1, 1]} : vector<5x25xf32> to vector<5x1xf32>
    %226 = vector.extract_strided_slice %14 {offsets = [0, 188], sizes = [5, 256], strides = [1, 1]} : vector<5x768xf32> to vector<5x256xf32>
    %227 = vector.extract_strided_slice %223 {offsets = [0, 0], sizes = [1, 256], strides = [1, 1]} : vector<25x256xf32> to vector<1x256xf32>
    %228 = vector.broadcast %225 : vector<5x1xf32> to vector<5x256xf32>
    %229 = vector.broadcast %227 : vector<1x256xf32> to vector<5x256xf32>
    %230 = arith.mulf %228, %229 : vector<5x256xf32>
    %231 = arith.mulf %226, %230 : vector<5x256xf32>
    %232 = arith.addf %224, %231 : vector<5x256xf32>
    %233 = vector.extract_strided_slice %221 {offsets = [0, 1], sizes = [5, 1], strides = [1, 1]} : vector<5x25xf32> to vector<5x1xf32>
    %234 = vector.extract_strided_slice %14 {offsets = [0, 190], sizes = [5, 256], strides = [1, 1]} : vector<5x768xf32> to vector<5x256xf32>
    %235 = vector.extract_strided_slice %223 {offsets = [1, 0], sizes = [1, 256], strides = [1, 1]} : vector<25x256xf32> to vector<1x256xf32>
    %236 = vector.broadcast %233 : vector<5x1xf32> to vector<5x256xf32>
    %237 = vector.broadcast %235 : vector<1x256xf32> to vector<5x256xf32>
    %238 = arith.mulf %236, %237 : vector<5x256xf32>
    %239 = arith.mulf %234, %238 : vector<5x256xf32>
    %240 = arith.addf %232, %239 : vector<5x256xf32>
    %241 = vector.extract_strided_slice %221 {offsets = [0, 2], sizes = [5, 1], strides = [1, 1]} : vector<5x25xf32> to vector<5x1xf32>
    %242 = vector.extract_strided_slice %14 {offsets = [0, 192], sizes = [5, 256], strides = [1, 1]} : vector<5x768xf32> to vector<5x256xf32>
    %243 = vector.extract_strided_slice %223 {offsets = [2, 0], sizes = [1, 256], strides = [1, 1]} : vector<25x256xf32> to vector<1x256xf32>
    %244 = vector.broadcast %241 : vector<5x1xf32> to vector<5x256xf32>
    %245 = vector.broadcast %243 : vector<1x256xf32> to vector<5x256xf32>
    %246 = arith.mulf %244, %245 : vector<5x256xf32>
    %247 = arith.mulf %242, %246 : vector<5x256xf32>
    %248 = arith.addf %240, %247 : vector<5x256xf32>
    %249 = vector.extract_strided_slice %221 {offsets = [0, 3], sizes = [5, 1], strides = [1, 1]} : vector<5x25xf32> to vector<5x1xf32>
    %250 = vector.extract_strided_slice %14 {offsets = [0, 194], sizes = [5, 256], strides = [1, 1]} : vector<5x768xf32> to vector<5x256xf32>
    %251 = vector.extract_strided_slice %223 {offsets = [3, 0], sizes = [1, 256], strides = [1, 1]} : vector<25x256xf32> to vector<1x256xf32>
    %252 = vector.broadcast %249 : vector<5x1xf32> to vector<5x256xf32>
    %253 = vector.broadcast %251 : vector<1x256xf32> to vector<5x256xf32>
    %254 = arith.mulf %252, %253 : vector<5x256xf32>
    %255 = arith.mulf %250, %254 : vector<5x256xf32>
    %256 = arith.addf %248, %255 : vector<5x256xf32>
    %257 = vector.extract_strided_slice %221 {offsets = [0, 4], sizes = [5, 1], strides = [1, 1]} : vector<5x25xf32> to vector<5x1xf32>
    %258 = vector.extract_strided_slice %14 {offsets = [0, 196], sizes = [5, 256], strides = [1, 1]} : vector<5x768xf32> to vector<5x256xf32>
    %259 = vector.extract_strided_slice %223 {offsets = [4, 0], sizes = [1, 256], strides = [1, 1]} : vector<25x256xf32> to vector<1x256xf32>
    %260 = vector.broadcast %257 : vector<5x1xf32> to vector<5x256xf32>
    %261 = vector.broadcast %259 : vector<1x256xf32> to vector<5x256xf32>
    %262 = arith.mulf %260, %261 : vector<5x256xf32>
    %263 = arith.mulf %258, %262 : vector<5x256xf32>
    %264 = arith.addf %256, %263 : vector<5x256xf32>
    %265 = vector.extract_strided_slice %221 {offsets = [0, 5], sizes = [5, 1], strides = [1, 1]} : vector<5x25xf32> to vector<5x1xf32>
    %266 = vector.extract_strided_slice %14 {offsets = [0, 220], sizes = [5, 256], strides = [1, 1]} : vector<5x768xf32> to vector<5x256xf32>
    %267 = vector.extract_strided_slice %223 {offsets = [5, 0], sizes = [1, 256], strides = [1, 1]} : vector<25x256xf32> to vector<1x256xf32>
    %268 = vector.broadcast %265 : vector<5x1xf32> to vector<5x256xf32>
    %269 = vector.broadcast %267 : vector<1x256xf32> to vector<5x256xf32>
    %270 = arith.mulf %268, %269 : vector<5x256xf32>
    %271 = arith.mulf %266, %270 : vector<5x256xf32>
    %272 = arith.addf %264, %271 : vector<5x256xf32>
    %273 = vector.extract_strided_slice %221 {offsets = [0, 6], sizes = [5, 1], strides = [1, 1]} : vector<5x25xf32> to vector<5x1xf32>
    %274 = vector.extract_strided_slice %14 {offsets = [0, 222], sizes = [5, 256], strides = [1, 1]} : vector<5x768xf32> to vector<5x256xf32>
    %275 = vector.extract_strided_slice %223 {offsets = [6, 0], sizes = [1, 256], strides = [1, 1]} : vector<25x256xf32> to vector<1x256xf32>
    %276 = vector.broadcast %273 : vector<5x1xf32> to vector<5x256xf32>
    %277 = vector.broadcast %275 : vector<1x256xf32> to vector<5x256xf32>
    %278 = arith.mulf %276, %277 : vector<5x256xf32>
    %279 = arith.mulf %274, %278 : vector<5x256xf32>
    %280 = arith.addf %272, %279 : vector<5x256xf32>
    %281 = vector.extract_strided_slice %221 {offsets = [0, 7], sizes = [5, 1], strides = [1, 1]} : vector<5x25xf32> to vector<5x1xf32>
    %282 = vector.extract_strided_slice %14 {offsets = [0, 224], sizes = [5, 256], strides = [1, 1]} : vector<5x768xf32> to vector<5x256xf32>
    %283 = vector.extract_strided_slice %223 {offsets = [7, 0], sizes = [1, 256], strides = [1, 1]} : vector<25x256xf32> to vector<1x256xf32>
    %284 = vector.broadcast %281 : vector<5x1xf32> to vector<5x256xf32>
    %285 = vector.broadcast %283 : vector<1x256xf32> to vector<5x256xf32>
    %286 = arith.mulf %284, %285 : vector<5x256xf32>
    %287 = arith.mulf %282, %286 : vector<5x256xf32>
    %288 = arith.addf %280, %287 : vector<5x256xf32>
    %289 = vector.extract_strided_slice %221 {offsets = [0, 8], sizes = [5, 1], strides = [1, 1]} : vector<5x25xf32> to vector<5x1xf32>
    %290 = vector.extract_strided_slice %14 {offsets = [0, 226], sizes = [5, 256], strides = [1, 1]} : vector<5x768xf32> to vector<5x256xf32>
    %291 = vector.extract_strided_slice %223 {offsets = [8, 0], sizes = [1, 256], strides = [1, 1]} : vector<25x256xf32> to vector<1x256xf32>
    %292 = vector.broadcast %289 : vector<5x1xf32> to vector<5x256xf32>
    %293 = vector.broadcast %291 : vector<1x256xf32> to vector<5x256xf32>
    %294 = arith.mulf %292, %293 : vector<5x256xf32>
    %295 = arith.mulf %290, %294 : vector<5x256xf32>
    %296 = arith.addf %288, %295 : vector<5x256xf32>
    %297 = vector.extract_strided_slice %221 {offsets = [0, 9], sizes = [5, 1], strides = [1, 1]} : vector<5x25xf32> to vector<5x1xf32>
    %298 = vector.extract_strided_slice %14 {offsets = [0, 228], sizes = [5, 256], strides = [1, 1]} : vector<5x768xf32> to vector<5x256xf32>
    %299 = vector.extract_strided_slice %223 {offsets = [9, 0], sizes = [1, 256], strides = [1, 1]} : vector<25x256xf32> to vector<1x256xf32>
    %300 = vector.broadcast %297 : vector<5x1xf32> to vector<5x256xf32>
    %301 = vector.broadcast %299 : vector<1x256xf32> to vector<5x256xf32>
    %302 = arith.mulf %300, %301 : vector<5x256xf32>
    %303 = arith.mulf %298, %302 : vector<5x256xf32>
    %304 = arith.addf %296, %303 : vector<5x256xf32>
    %305 = vector.extract_strided_slice %221 {offsets = [0, 10], sizes = [5, 1], strides = [1, 1]} : vector<5x25xf32> to vector<5x1xf32>
    %306 = vector.extract_strided_slice %14 {offsets = [0, 252], sizes = [5, 256], strides = [1, 1]} : vector<5x768xf32> to vector<5x256xf32>
    %307 = vector.extract_strided_slice %223 {offsets = [10, 0], sizes = [1, 256], strides = [1, 1]} : vector<25x256xf32> to vector<1x256xf32>
    %308 = vector.broadcast %305 : vector<5x1xf32> to vector<5x256xf32>
    %309 = vector.broadcast %307 : vector<1x256xf32> to vector<5x256xf32>
    %310 = arith.mulf %308, %309 : vector<5x256xf32>
    %311 = arith.mulf %306, %310 : vector<5x256xf32>
    %312 = arith.addf %304, %311 : vector<5x256xf32>
    %313 = vector.extract_strided_slice %221 {offsets = [0, 11], sizes = [5, 1], strides = [1, 1]} : vector<5x25xf32> to vector<5x1xf32>
    %314 = vector.extract_strided_slice %14 {offsets = [0, 254], sizes = [5, 256], strides = [1, 1]} : vector<5x768xf32> to vector<5x256xf32>
    %315 = vector.extract_strided_slice %223 {offsets = [11, 0], sizes = [1, 256], strides = [1, 1]} : vector<25x256xf32> to vector<1x256xf32>
    %316 = vector.broadcast %313 : vector<5x1xf32> to vector<5x256xf32>
    %317 = vector.broadcast %315 : vector<1x256xf32> to vector<5x256xf32>
    %318 = arith.mulf %316, %317 : vector<5x256xf32>
    %319 = arith.mulf %314, %318 : vector<5x256xf32>
    %320 = arith.addf %312, %319 : vector<5x256xf32>
    %321 = vector.extract_strided_slice %221 {offsets = [0, 12], sizes = [5, 1], strides = [1, 1]} : vector<5x25xf32> to vector<5x1xf32>
    %322 = vector.broadcast %321 : vector<5x1xf32> to vector<5x256xf32>
    %323 = arith.mulf %12, %322 : vector<5x256xf32>
    %324 = arith.addf %320, %323 : vector<5x256xf32>
    %325 = vector.extract_strided_slice %221 {offsets = [0, 13], sizes = [5, 1], strides = [1, 1]} : vector<5x25xf32> to vector<5x1xf32>
    %326 = vector.extract_strided_slice %14 {offsets = [0, 258], sizes = [5, 256], strides = [1, 1]} : vector<5x768xf32> to vector<5x256xf32>
    %327 = vector.extract_strided_slice %223 {offsets = [13, 0], sizes = [1, 256], strides = [1, 1]} : vector<25x256xf32> to vector<1x256xf32>
    %328 = vector.broadcast %325 : vector<5x1xf32> to vector<5x256xf32>
    %329 = vector.broadcast %327 : vector<1x256xf32> to vector<5x256xf32>
    %330 = arith.mulf %328, %329 : vector<5x256xf32>
    %331 = arith.mulf %326, %330 : vector<5x256xf32>
    %332 = arith.addf %324, %331 : vector<5x256xf32>
    %333 = vector.extract_strided_slice %221 {offsets = [0, 14], sizes = [5, 1], strides = [1, 1]} : vector<5x25xf32> to vector<5x1xf32>
    %334 = vector.extract_strided_slice %14 {offsets = [0, 260], sizes = [5, 256], strides = [1, 1]} : vector<5x768xf32> to vector<5x256xf32>
    %335 = vector.extract_strided_slice %223 {offsets = [14, 0], sizes = [1, 256], strides = [1, 1]} : vector<25x256xf32> to vector<1x256xf32>
    %336 = vector.broadcast %333 : vector<5x1xf32> to vector<5x256xf32>
    %337 = vector.broadcast %335 : vector<1x256xf32> to vector<5x256xf32>
    %338 = arith.mulf %336, %337 : vector<5x256xf32>
    %339 = arith.mulf %334, %338 : vector<5x256xf32>
    %340 = arith.addf %332, %339 : vector<5x256xf32>
    %341 = vector.extract_strided_slice %221 {offsets = [0, 15], sizes = [5, 1], strides = [1, 1]} : vector<5x25xf32> to vector<5x1xf32>
    %342 = vector.extract_strided_slice %14 {offsets = [0, 284], sizes = [5, 256], strides = [1, 1]} : vector<5x768xf32> to vector<5x256xf32>
    %343 = vector.extract_strided_slice %223 {offsets = [15, 0], sizes = [1, 256], strides = [1, 1]} : vector<25x256xf32> to vector<1x256xf32>
    %344 = vector.broadcast %341 : vector<5x1xf32> to vector<5x256xf32>
    %345 = vector.broadcast %343 : vector<1x256xf32> to vector<5x256xf32>
    %346 = arith.mulf %344, %345 : vector<5x256xf32>
    %347 = arith.mulf %342, %346 : vector<5x256xf32>
    %348 = arith.addf %340, %347 : vector<5x256xf32>
    %349 = vector.extract_strided_slice %221 {offsets = [0, 16], sizes = [5, 1], strides = [1, 1]} : vector<5x25xf32> to vector<5x1xf32>
    %350 = vector.extract_strided_slice %14 {offsets = [0, 286], sizes = [5, 256], strides = [1, 1]} : vector<5x768xf32> to vector<5x256xf32>
    %351 = vector.extract_strided_slice %223 {offsets = [16, 0], sizes = [1, 256], strides = [1, 1]} : vector<25x256xf32> to vector<1x256xf32>
    %352 = vector.broadcast %349 : vector<5x1xf32> to vector<5x256xf32>
    %353 = vector.broadcast %351 : vector<1x256xf32> to vector<5x256xf32>
    %354 = arith.mulf %352, %353 : vector<5x256xf32>
    %355 = arith.mulf %350, %354 : vector<5x256xf32>
    %356 = arith.addf %348, %355 : vector<5x256xf32>
    %357 = vector.extract_strided_slice %221 {offsets = [0, 17], sizes = [5, 1], strides = [1, 1]} : vector<5x25xf32> to vector<5x1xf32>
    %358 = vector.extract_strided_slice %14 {offsets = [0, 288], sizes = [5, 256], strides = [1, 1]} : vector<5x768xf32> to vector<5x256xf32>
    %359 = vector.extract_strided_slice %223 {offsets = [17, 0], sizes = [1, 256], strides = [1, 1]} : vector<25x256xf32> to vector<1x256xf32>
    %360 = vector.broadcast %357 : vector<5x1xf32> to vector<5x256xf32>
    %361 = vector.broadcast %359 : vector<1x256xf32> to vector<5x256xf32>
    %362 = arith.mulf %360, %361 : vector<5x256xf32>
    %363 = arith.mulf %358, %362 : vector<5x256xf32>
    %364 = arith.addf %356, %363 : vector<5x256xf32>
    %365 = vector.extract_strided_slice %221 {offsets = [0, 18], sizes = [5, 1], strides = [1, 1]} : vector<5x25xf32> to vector<5x1xf32>
    %366 = vector.extract_strided_slice %14 {offsets = [0, 290], sizes = [5, 256], strides = [1, 1]} : vector<5x768xf32> to vector<5x256xf32>
    %367 = vector.extract_strided_slice %223 {offsets = [18, 0], sizes = [1, 256], strides = [1, 1]} : vector<25x256xf32> to vector<1x256xf32>
    %368 = vector.broadcast %365 : vector<5x1xf32> to vector<5x256xf32>
    %369 = vector.broadcast %367 : vector<1x256xf32> to vector<5x256xf32>
    %370 = arith.mulf %368, %369 : vector<5x256xf32>
    %371 = arith.mulf %366, %370 : vector<5x256xf32>
    %372 = arith.addf %364, %371 : vector<5x256xf32>
    %373 = vector.extract_strided_slice %221 {offsets = [0, 19], sizes = [5, 1], strides = [1, 1]} : vector<5x25xf32> to vector<5x1xf32>
    %374 = vector.extract_strided_slice %14 {offsets = [0, 292], sizes = [5, 256], strides = [1, 1]} : vector<5x768xf32> to vector<5x256xf32>
    %375 = vector.extract_strided_slice %223 {offsets = [19, 0], sizes = [1, 256], strides = [1, 1]} : vector<25x256xf32> to vector<1x256xf32>
    %376 = vector.broadcast %373 : vector<5x1xf32> to vector<5x256xf32>
    %377 = vector.broadcast %375 : vector<1x256xf32> to vector<5x256xf32>
    %378 = arith.mulf %376, %377 : vector<5x256xf32>
    %379 = arith.mulf %374, %378 : vector<5x256xf32>
    %380 = arith.addf %372, %379 : vector<5x256xf32>
    %381 = vector.extract_strided_slice %221 {offsets = [0, 20], sizes = [5, 1], strides = [1, 1]} : vector<5x25xf32> to vector<5x1xf32>
    %382 = vector.extract_strided_slice %14 {offsets = [0, 316], sizes = [5, 256], strides = [1, 1]} : vector<5x768xf32> to vector<5x256xf32>
    %383 = vector.extract_strided_slice %223 {offsets = [20, 0], sizes = [1, 256], strides = [1, 1]} : vector<25x256xf32> to vector<1x256xf32>
    %384 = vector.broadcast %381 : vector<5x1xf32> to vector<5x256xf32>
    %385 = vector.broadcast %383 : vector<1x256xf32> to vector<5x256xf32>
    %386 = arith.mulf %384, %385 : vector<5x256xf32>
    %387 = arith.mulf %382, %386 : vector<5x256xf32>
    %388 = arith.addf %380, %387 : vector<5x256xf32>
    %389 = vector.extract_strided_slice %221 {offsets = [0, 21], sizes = [5, 1], strides = [1, 1]} : vector<5x25xf32> to vector<5x1xf32>
    %390 = vector.extract_strided_slice %14 {offsets = [0, 318], sizes = [5, 256], strides = [1, 1]} : vector<5x768xf32> to vector<5x256xf32>
    %391 = vector.extract_strided_slice %223 {offsets = [21, 0], sizes = [1, 256], strides = [1, 1]} : vector<25x256xf32> to vector<1x256xf32>
    %392 = vector.broadcast %389 : vector<5x1xf32> to vector<5x256xf32>
    %393 = vector.broadcast %391 : vector<1x256xf32> to vector<5x256xf32>
    %394 = arith.mulf %392, %393 : vector<5x256xf32>
    %395 = arith.mulf %390, %394 : vector<5x256xf32>
    %396 = arith.addf %388, %395 : vector<5x256xf32>
    %397 = vector.extract_strided_slice %221 {offsets = [0, 22], sizes = [5, 1], strides = [1, 1]} : vector<5x25xf32> to vector<5x1xf32>
    %398 = vector.extract_strided_slice %14 {offsets = [0, 320], sizes = [5, 256], strides = [1, 1]} : vector<5x768xf32> to vector<5x256xf32>
    %399 = vector.extract_strided_slice %223 {offsets = [22, 0], sizes = [1, 256], strides = [1, 1]} : vector<25x256xf32> to vector<1x256xf32>
    %400 = vector.broadcast %397 : vector<5x1xf32> to vector<5x256xf32>
    %401 = vector.broadcast %399 : vector<1x256xf32> to vector<5x256xf32>
    %402 = arith.mulf %400, %401 : vector<5x256xf32>
    %403 = arith.mulf %398, %402 : vector<5x256xf32>
    %404 = arith.addf %396, %403 : vector<5x256xf32>
    %405 = vector.extract_strided_slice %221 {offsets = [0, 23], sizes = [5, 1], strides = [1, 1]} : vector<5x25xf32> to vector<5x1xf32>
    %406 = vector.extract_strided_slice %14 {offsets = [0, 322], sizes = [5, 256], strides = [1, 1]} : vector<5x768xf32> to vector<5x256xf32>
    %407 = vector.extract_strided_slice %223 {offsets = [23, 0], sizes = [1, 256], strides = [1, 1]} : vector<25x256xf32> to vector<1x256xf32>
    %408 = vector.broadcast %405 : vector<5x1xf32> to vector<5x256xf32>
    %409 = vector.broadcast %407 : vector<1x256xf32> to vector<5x256xf32>
    %410 = arith.mulf %408, %409 : vector<5x256xf32>
    %411 = arith.mulf %406, %410 : vector<5x256xf32>
    %412 = arith.addf %404, %411 : vector<5x256xf32>
    %413 = vector.extract_strided_slice %221 {offsets = [0, 24], sizes = [5, 1], strides = [1, 1]} : vector<5x25xf32> to vector<5x1xf32>
    %414 = vector.extract_strided_slice %14 {offsets = [0, 324], sizes = [5, 256], strides = [1, 1]} : vector<5x768xf32> to vector<5x256xf32>
    %415 = vector.extract_strided_slice %223 {offsets = [24, 0], sizes = [1, 256], strides = [1, 1]} : vector<25x256xf32> to vector<1x256xf32>
    %416 = vector.broadcast %413 : vector<5x1xf32> to vector<5x256xf32>
    %417 = vector.broadcast %415 : vector<1x256xf32> to vector<5x256xf32>
    %418 = arith.mulf %416, %417 : vector<5x256xf32>
    %419 = arith.mulf %414, %418 : vector<5x256xf32>
    %420 = arith.addf %412, %419 : vector<5x256xf32>
    %c1_26 = arith.constant 1 : index
    %c0_27 = arith.constant 0 : index
    %c0_28 = arith.constant 0 : index
    %421 = vector.load %arg6[%c1_26, %c0_27, %c0_28] : memref<4x5x1xf32, #tpu.memory_space<vmem>>, vector<1x5x1xf32>
    %422 = vector.shape_cast %421 : vector<1x5x1xf32> to vector<5x1xf32>
    %423 = vector.broadcast %422 : vector<5x1xf32> to vector<5x256xf32>
    %424 = arith.addf %420, %423 : vector<5x256xf32>
    %425 = arith.addf %424, %219 : vector<5x256xf32>
    %c2 = arith.constant 2 : index
    %c0_29 = arith.constant 0 : index
    %c0_30 = arith.constant 0 : index
    %426 = vector.load %arg5[%c2, %c0_29, %c0_30] : memref<4x5x25xf32, #tpu.memory_space<vmem>>, vector<1x5x25xf32>
    %427 = vector.shape_cast %426 : vector<1x5x25xf32> to vector<5x25xf32>
    %c2_31 = arith.constant 2 : index
    %c0_32 = arith.constant 0 : index
    %c0_33 = arith.constant 0 : index
    %428 = vector.load %arg7[%c2_31, %c0_32, %c0_33] : memref<4x25x256xf32, #tpu.memory_space<vmem>>, vector<1x25x256xf32>
    %429 = vector.shape_cast %428 : vector<1x25x256xf32> to vector<25x256xf32>
    %cst_34 = arith.constant 0.000000e+00 : f32
    %430 = vector.broadcast %cst_34 : f32 to vector<5x256xf32>
    %431 = vector.extract_strided_slice %427 {offsets = [0, 0], sizes = [5, 1], strides = [1, 1]} : vector<5x25xf32> to vector<5x1xf32>
    %432 = vector.extract_strided_slice %14 {offsets = [0, 120], sizes = [5, 256], strides = [1, 1]} : vector<5x768xf32> to vector<5x256xf32>
    %433 = vector.extract_strided_slice %429 {offsets = [0, 0], sizes = [1, 256], strides = [1, 1]} : vector<25x256xf32> to vector<1x256xf32>
    %434 = vector.broadcast %431 : vector<5x1xf32> to vector<5x256xf32>
    %435 = vector.broadcast %433 : vector<1x256xf32> to vector<5x256xf32>
    %436 = arith.mulf %434, %435 : vector<5x256xf32>
    %437 = arith.mulf %432, %436 : vector<5x256xf32>
    %438 = arith.addf %430, %437 : vector<5x256xf32>
    %439 = vector.extract_strided_slice %427 {offsets = [0, 1], sizes = [5, 1], strides = [1, 1]} : vector<5x25xf32> to vector<5x1xf32>
    %440 = vector.extract_strided_slice %14 {offsets = [0, 124], sizes = [5, 256], strides = [1, 1]} : vector<5x768xf32> to vector<5x256xf32>
    %441 = vector.extract_strided_slice %429 {offsets = [1, 0], sizes = [1, 256], strides = [1, 1]} : vector<25x256xf32> to vector<1x256xf32>
    %442 = vector.broadcast %439 : vector<5x1xf32> to vector<5x256xf32>
    %443 = vector.broadcast %441 : vector<1x256xf32> to vector<5x256xf32>
    %444 = arith.mulf %442, %443 : vector<5x256xf32>
    %445 = arith.mulf %440, %444 : vector<5x256xf32>
    %446 = arith.addf %438, %445 : vector<5x256xf32>
    %447 = vector.extract_strided_slice %427 {offsets = [0, 2], sizes = [5, 1], strides = [1, 1]} : vector<5x25xf32> to vector<5x1xf32>
    %448 = vector.extract_strided_slice %14 {offsets = [0, 128], sizes = [5, 256], strides = [1, 1]} : vector<5x768xf32> to vector<5x256xf32>
    %449 = vector.extract_strided_slice %429 {offsets = [2, 0], sizes = [1, 256], strides = [1, 1]} : vector<25x256xf32> to vector<1x256xf32>
    %450 = vector.broadcast %447 : vector<5x1xf32> to vector<5x256xf32>
    %451 = vector.broadcast %449 : vector<1x256xf32> to vector<5x256xf32>
    %452 = arith.mulf %450, %451 : vector<5x256xf32>
    %453 = arith.mulf %448, %452 : vector<5x256xf32>
    %454 = arith.addf %446, %453 : vector<5x256xf32>
    %455 = vector.extract_strided_slice %427 {offsets = [0, 3], sizes = [5, 1], strides = [1, 1]} : vector<5x25xf32> to vector<5x1xf32>
    %456 = vector.extract_strided_slice %14 {offsets = [0, 132], sizes = [5, 256], strides = [1, 1]} : vector<5x768xf32> to vector<5x256xf32>
    %457 = vector.extract_strided_slice %429 {offsets = [3, 0], sizes = [1, 256], strides = [1, 1]} : vector<25x256xf32> to vector<1x256xf32>
    %458 = vector.broadcast %455 : vector<5x1xf32> to vector<5x256xf32>
    %459 = vector.broadcast %457 : vector<1x256xf32> to vector<5x256xf32>
    %460 = arith.mulf %458, %459 : vector<5x256xf32>
    %461 = arith.mulf %456, %460 : vector<5x256xf32>
    %462 = arith.addf %454, %461 : vector<5x256xf32>
    %463 = vector.extract_strided_slice %427 {offsets = [0, 4], sizes = [5, 1], strides = [1, 1]} : vector<5x25xf32> to vector<5x1xf32>
    %464 = vector.extract_strided_slice %14 {offsets = [0, 136], sizes = [5, 256], strides = [1, 1]} : vector<5x768xf32> to vector<5x256xf32>
    %465 = vector.extract_strided_slice %429 {offsets = [4, 0], sizes = [1, 256], strides = [1, 1]} : vector<25x256xf32> to vector<1x256xf32>
    %466 = vector.broadcast %463 : vector<5x1xf32> to vector<5x256xf32>
    %467 = vector.broadcast %465 : vector<1x256xf32> to vector<5x256xf32>
    %468 = arith.mulf %466, %467 : vector<5x256xf32>
    %469 = arith.mulf %464, %468 : vector<5x256xf32>
    %470 = arith.addf %462, %469 : vector<5x256xf32>
    %471 = vector.extract_strided_slice %427 {offsets = [0, 5], sizes = [5, 1], strides = [1, 1]} : vector<5x25xf32> to vector<5x1xf32>
    %472 = vector.extract_strided_slice %14 {offsets = [0, 184], sizes = [5, 256], strides = [1, 1]} : vector<5x768xf32> to vector<5x256xf32>
    %473 = vector.extract_strided_slice %429 {offsets = [5, 0], sizes = [1, 256], strides = [1, 1]} : vector<25x256xf32> to vector<1x256xf32>
    %474 = vector.broadcast %471 : vector<5x1xf32> to vector<5x256xf32>
    %475 = vector.broadcast %473 : vector<1x256xf32> to vector<5x256xf32>
    %476 = arith.mulf %474, %475 : vector<5x256xf32>
    %477 = arith.mulf %472, %476 : vector<5x256xf32>
    %478 = arith.addf %470, %477 : vector<5x256xf32>
    %479 = vector.extract_strided_slice %427 {offsets = [0, 6], sizes = [5, 1], strides = [1, 1]} : vector<5x25xf32> to vector<5x1xf32>
    %480 = vector.extract_strided_slice %14 {offsets = [0, 188], sizes = [5, 256], strides = [1, 1]} : vector<5x768xf32> to vector<5x256xf32>
    %481 = vector.extract_strided_slice %429 {offsets = [6, 0], sizes = [1, 256], strides = [1, 1]} : vector<25x256xf32> to vector<1x256xf32>
    %482 = vector.broadcast %479 : vector<5x1xf32> to vector<5x256xf32>
    %483 = vector.broadcast %481 : vector<1x256xf32> to vector<5x256xf32>
    %484 = arith.mulf %482, %483 : vector<5x256xf32>
    %485 = arith.mulf %480, %484 : vector<5x256xf32>
    %486 = arith.addf %478, %485 : vector<5x256xf32>
    %487 = vector.extract_strided_slice %427 {offsets = [0, 7], sizes = [5, 1], strides = [1, 1]} : vector<5x25xf32> to vector<5x1xf32>
    %488 = vector.extract_strided_slice %14 {offsets = [0, 192], sizes = [5, 256], strides = [1, 1]} : vector<5x768xf32> to vector<5x256xf32>
    %489 = vector.extract_strided_slice %429 {offsets = [7, 0], sizes = [1, 256], strides = [1, 1]} : vector<25x256xf32> to vector<1x256xf32>
    %490 = vector.broadcast %487 : vector<5x1xf32> to vector<5x256xf32>
    %491 = vector.broadcast %489 : vector<1x256xf32> to vector<5x256xf32>
    %492 = arith.mulf %490, %491 : vector<5x256xf32>
    %493 = arith.mulf %488, %492 : vector<5x256xf32>
    %494 = arith.addf %486, %493 : vector<5x256xf32>
    %495 = vector.extract_strided_slice %427 {offsets = [0, 8], sizes = [5, 1], strides = [1, 1]} : vector<5x25xf32> to vector<5x1xf32>
    %496 = vector.extract_strided_slice %14 {offsets = [0, 196], sizes = [5, 256], strides = [1, 1]} : vector<5x768xf32> to vector<5x256xf32>
    %497 = vector.extract_strided_slice %429 {offsets = [8, 0], sizes = [1, 256], strides = [1, 1]} : vector<25x256xf32> to vector<1x256xf32>
    %498 = vector.broadcast %495 : vector<5x1xf32> to vector<5x256xf32>
    %499 = vector.broadcast %497 : vector<1x256xf32> to vector<5x256xf32>
    %500 = arith.mulf %498, %499 : vector<5x256xf32>
    %501 = arith.mulf %496, %500 : vector<5x256xf32>
    %502 = arith.addf %494, %501 : vector<5x256xf32>
    %503 = vector.extract_strided_slice %427 {offsets = [0, 9], sizes = [5, 1], strides = [1, 1]} : vector<5x25xf32> to vector<5x1xf32>
    %504 = vector.extract_strided_slice %14 {offsets = [0, 200], sizes = [5, 256], strides = [1, 1]} : vector<5x768xf32> to vector<5x256xf32>
    %505 = vector.extract_strided_slice %429 {offsets = [9, 0], sizes = [1, 256], strides = [1, 1]} : vector<25x256xf32> to vector<1x256xf32>
    %506 = vector.broadcast %503 : vector<5x1xf32> to vector<5x256xf32>
    %507 = vector.broadcast %505 : vector<1x256xf32> to vector<5x256xf32>
    %508 = arith.mulf %506, %507 : vector<5x256xf32>
    %509 = arith.mulf %504, %508 : vector<5x256xf32>
    %510 = arith.addf %502, %509 : vector<5x256xf32>
    %511 = vector.extract_strided_slice %427 {offsets = [0, 10], sizes = [5, 1], strides = [1, 1]} : vector<5x25xf32> to vector<5x1xf32>
    %512 = vector.extract_strided_slice %14 {offsets = [0, 248], sizes = [5, 256], strides = [1, 1]} : vector<5x768xf32> to vector<5x256xf32>
    %513 = vector.extract_strided_slice %429 {offsets = [10, 0], sizes = [1, 256], strides = [1, 1]} : vector<25x256xf32> to vector<1x256xf32>
    %514 = vector.broadcast %511 : vector<5x1xf32> to vector<5x256xf32>
    %515 = vector.broadcast %513 : vector<1x256xf32> to vector<5x256xf32>
    %516 = arith.mulf %514, %515 : vector<5x256xf32>
    %517 = arith.mulf %512, %516 : vector<5x256xf32>
    %518 = arith.addf %510, %517 : vector<5x256xf32>
    %519 = vector.extract_strided_slice %427 {offsets = [0, 11], sizes = [5, 1], strides = [1, 1]} : vector<5x25xf32> to vector<5x1xf32>
    %520 = vector.extract_strided_slice %14 {offsets = [0, 252], sizes = [5, 256], strides = [1, 1]} : vector<5x768xf32> to vector<5x256xf32>
    %521 = vector.extract_strided_slice %429 {offsets = [11, 0], sizes = [1, 256], strides = [1, 1]} : vector<25x256xf32> to vector<1x256xf32>
    %522 = vector.broadcast %519 : vector<5x1xf32> to vector<5x256xf32>
    %523 = vector.broadcast %521 : vector<1x256xf32> to vector<5x256xf32>
    %524 = arith.mulf %522, %523 : vector<5x256xf32>
    %525 = arith.mulf %520, %524 : vector<5x256xf32>
    %526 = arith.addf %518, %525 : vector<5x256xf32>
    %527 = vector.extract_strided_slice %427 {offsets = [0, 12], sizes = [5, 1], strides = [1, 1]} : vector<5x25xf32> to vector<5x1xf32>
    %528 = vector.broadcast %527 : vector<5x1xf32> to vector<5x256xf32>
    %529 = arith.mulf %12, %528 : vector<5x256xf32>
    %530 = arith.addf %526, %529 : vector<5x256xf32>
    %531 = vector.extract_strided_slice %427 {offsets = [0, 13], sizes = [5, 1], strides = [1, 1]} : vector<5x25xf32> to vector<5x1xf32>
    %532 = vector.extract_strided_slice %14 {offsets = [0, 260], sizes = [5, 256], strides = [1, 1]} : vector<5x768xf32> to vector<5x256xf32>
    %533 = vector.extract_strided_slice %429 {offsets = [13, 0], sizes = [1, 256], strides = [1, 1]} : vector<25x256xf32> to vector<1x256xf32>
    %534 = vector.broadcast %531 : vector<5x1xf32> to vector<5x256xf32>
    %535 = vector.broadcast %533 : vector<1x256xf32> to vector<5x256xf32>
    %536 = arith.mulf %534, %535 : vector<5x256xf32>
    %537 = arith.mulf %532, %536 : vector<5x256xf32>
    %538 = arith.addf %530, %537 : vector<5x256xf32>
    %539 = vector.extract_strided_slice %427 {offsets = [0, 14], sizes = [5, 1], strides = [1, 1]} : vector<5x25xf32> to vector<5x1xf32>
    %540 = vector.extract_strided_slice %14 {offsets = [0, 264], sizes = [5, 256], strides = [1, 1]} : vector<5x768xf32> to vector<5x256xf32>
    %541 = vector.extract_strided_slice %429 {offsets = [14, 0], sizes = [1, 256], strides = [1, 1]} : vector<25x256xf32> to vector<1x256xf32>
    %542 = vector.broadcast %539 : vector<5x1xf32> to vector<5x256xf32>
    %543 = vector.broadcast %541 : vector<1x256xf32> to vector<5x256xf32>
    %544 = arith.mulf %542, %543 : vector<5x256xf32>
    %545 = arith.mulf %540, %544 : vector<5x256xf32>
    %546 = arith.addf %538, %545 : vector<5x256xf32>
    %547 = vector.extract_strided_slice %427 {offsets = [0, 15], sizes = [5, 1], strides = [1, 1]} : vector<5x25xf32> to vector<5x1xf32>
    %548 = vector.extract_strided_slice %14 {offsets = [0, 312], sizes = [5, 256], strides = [1, 1]} : vector<5x768xf32> to vector<5x256xf32>
    %549 = vector.extract_strided_slice %429 {offsets = [15, 0], sizes = [1, 256], strides = [1, 1]} : vector<25x256xf32> to vector<1x256xf32>
    %550 = vector.broadcast %547 : vector<5x1xf32> to vector<5x256xf32>
    %551 = vector.broadcast %549 : vector<1x256xf32> to vector<5x256xf32>
    %552 = arith.mulf %550, %551 : vector<5x256xf32>
    %553 = arith.mulf %548, %552 : vector<5x256xf32>
    %554 = arith.addf %546, %553 : vector<5x256xf32>
    %555 = vector.extract_strided_slice %427 {offsets = [0, 16], sizes = [5, 1], strides = [1, 1]} : vector<5x25xf32> to vector<5x1xf32>
    %556 = vector.extract_strided_slice %14 {offsets = [0, 316], sizes = [5, 256], strides = [1, 1]} : vector<5x768xf32> to vector<5x256xf32>
    %557 = vector.extract_strided_slice %429 {offsets = [16, 0], sizes = [1, 256], strides = [1, 1]} : vector<25x256xf32> to vector<1x256xf32>
    %558 = vector.broadcast %555 : vector<5x1xf32> to vector<5x256xf32>
    %559 = vector.broadcast %557 : vector<1x256xf32> to vector<5x256xf32>
    %560 = arith.mulf %558, %559 : vector<5x256xf32>
    %561 = arith.mulf %556, %560 : vector<5x256xf32>
    %562 = arith.addf %554, %561 : vector<5x256xf32>
    %563 = vector.extract_strided_slice %427 {offsets = [0, 17], sizes = [5, 1], strides = [1, 1]} : vector<5x25xf32> to vector<5x1xf32>
    %564 = vector.extract_strided_slice %14 {offsets = [0, 320], sizes = [5, 256], strides = [1, 1]} : vector<5x768xf32> to vector<5x256xf32>
    %565 = vector.extract_strided_slice %429 {offsets = [17, 0], sizes = [1, 256], strides = [1, 1]} : vector<25x256xf32> to vector<1x256xf32>
    %566 = vector.broadcast %563 : vector<5x1xf32> to vector<5x256xf32>
    %567 = vector.broadcast %565 : vector<1x256xf32> to vector<5x256xf32>
    %568 = arith.mulf %566, %567 : vector<5x256xf32>
    %569 = arith.mulf %564, %568 : vector<5x256xf32>
    %570 = arith.addf %562, %569 : vector<5x256xf32>
    %571 = vector.extract_strided_slice %427 {offsets = [0, 18], sizes = [5, 1], strides = [1, 1]} : vector<5x25xf32> to vector<5x1xf32>
    %572 = vector.extract_strided_slice %14 {offsets = [0, 324], sizes = [5, 256], strides = [1, 1]} : vector<5x768xf32> to vector<5x256xf32>
    %573 = vector.extract_strided_slice %429 {offsets = [18, 0], sizes = [1, 256], strides = [1, 1]} : vector<25x256xf32> to vector<1x256xf32>
    %574 = vector.broadcast %571 : vector<5x1xf32> to vector<5x256xf32>
    %575 = vector.broadcast %573 : vector<1x256xf32> to vector<5x256xf32>
    %576 = arith.mulf %574, %575 : vector<5x256xf32>
    %577 = arith.mulf %572, %576 : vector<5x256xf32>
    %578 = arith.addf %570, %577 : vector<5x256xf32>
    %579 = vector.extract_strided_slice %427 {offsets = [0, 19], sizes = [5, 1], strides = [1, 1]} : vector<5x25xf32> to vector<5x1xf32>
    %580 = vector.extract_strided_slice %14 {offsets = [0, 328], sizes = [5, 256], strides = [1, 1]} : vector<5x768xf32> to vector<5x256xf32>
    %581 = vector.extract_strided_slice %429 {offsets = [19, 0], sizes = [1, 256], strides = [1, 1]} : vector<25x256xf32> to vector<1x256xf32>
    %582 = vector.broadcast %579 : vector<5x1xf32> to vector<5x256xf32>
    %583 = vector.broadcast %581 : vector<1x256xf32> to vector<5x256xf32>
    %584 = arith.mulf %582, %583 : vector<5x256xf32>
    %585 = arith.mulf %580, %584 : vector<5x256xf32>
    %586 = arith.addf %578, %585 : vector<5x256xf32>
    %587 = vector.extract_strided_slice %427 {offsets = [0, 20], sizes = [5, 1], strides = [1, 1]} : vector<5x25xf32> to vector<5x1xf32>
    %588 = vector.extract_strided_slice %14 {offsets = [0, 376], sizes = [5, 256], strides = [1, 1]} : vector<5x768xf32> to vector<5x256xf32>
    %589 = vector.extract_strided_slice %429 {offsets = [20, 0], sizes = [1, 256], strides = [1, 1]} : vector<25x256xf32> to vector<1x256xf32>
    %590 = vector.broadcast %587 : vector<5x1xf32> to vector<5x256xf32>
    %591 = vector.broadcast %589 : vector<1x256xf32> to vector<5x256xf32>
    %592 = arith.mulf %590, %591 : vector<5x256xf32>
    %593 = arith.mulf %588, %592 : vector<5x256xf32>
    %594 = arith.addf %586, %593 : vector<5x256xf32>
    %595 = vector.extract_strided_slice %427 {offsets = [0, 21], sizes = [5, 1], strides = [1, 1]} : vector<5x25xf32> to vector<5x1xf32>
    %596 = vector.extract_strided_slice %14 {offsets = [0, 380], sizes = [5, 256], strides = [1, 1]} : vector<5x768xf32> to vector<5x256xf32>
    %597 = vector.extract_strided_slice %429 {offsets = [21, 0], sizes = [1, 256], strides = [1, 1]} : vector<25x256xf32> to vector<1x256xf32>
    %598 = vector.broadcast %595 : vector<5x1xf32> to vector<5x256xf32>
    %599 = vector.broadcast %597 : vector<1x256xf32> to vector<5x256xf32>
    %600 = arith.mulf %598, %599 : vector<5x256xf32>
    %601 = arith.mulf %596, %600 : vector<5x256xf32>
    %602 = arith.addf %594, %601 : vector<5x256xf32>
    %603 = vector.extract_strided_slice %427 {offsets = [0, 22], sizes = [5, 1], strides = [1, 1]} : vector<5x25xf32> to vector<5x1xf32>
    %604 = vector.extract_strided_slice %14 {offsets = [0, 384], sizes = [5, 256], strides = [1, 1]} : vector<5x768xf32> to vector<5x256xf32>
    %605 = vector.extract_strided_slice %429 {offsets = [22, 0], sizes = [1, 256], strides = [1, 1]} : vector<25x256xf32> to vector<1x256xf32>
    %606 = vector.broadcast %603 : vector<5x1xf32> to vector<5x256xf32>
    %607 = vector.broadcast %605 : vector<1x256xf32> to vector<5x256xf32>
    %608 = arith.mulf %606, %607 : vector<5x256xf32>
    %609 = arith.mulf %604, %608 : vector<5x256xf32>
    %610 = arith.addf %602, %609 : vector<5x256xf32>
    %611 = vector.extract_strided_slice %427 {offsets = [0, 23], sizes = [5, 1], strides = [1, 1]} : vector<5x25xf32> to vector<5x1xf32>
    %612 = vector.extract_strided_slice %14 {offsets = [0, 388], sizes = [5, 256], strides = [1, 1]} : vector<5x768xf32> to vector<5x256xf32>
    %613 = vector.extract_strided_slice %429 {offsets = [23, 0], sizes = [1, 256], strides = [1, 1]} : vector<25x256xf32> to vector<1x256xf32>
    %614 = vector.broadcast %611 : vector<5x1xf32> to vector<5x256xf32>
    %615 = vector.broadcast %613 : vector<1x256xf32> to vector<5x256xf32>
    %616 = arith.mulf %614, %615 : vector<5x256xf32>
    %617 = arith.mulf %612, %616 : vector<5x256xf32>
    %618 = arith.addf %610, %617 : vector<5x256xf32>
    %619 = vector.extract_strided_slice %427 {offsets = [0, 24], sizes = [5, 1], strides = [1, 1]} : vector<5x25xf32> to vector<5x1xf32>
    %620 = vector.extract_strided_slice %14 {offsets = [0, 392], sizes = [5, 256], strides = [1, 1]} : vector<5x768xf32> to vector<5x256xf32>
    %621 = vector.extract_strided_slice %429 {offsets = [24, 0], sizes = [1, 256], strides = [1, 1]} : vector<25x256xf32> to vector<1x256xf32>
    %622 = vector.broadcast %619 : vector<5x1xf32> to vector<5x256xf32>
    %623 = vector.broadcast %621 : vector<1x256xf32> to vector<5x256xf32>
    %624 = arith.mulf %622, %623 : vector<5x256xf32>
    %625 = arith.mulf %620, %624 : vector<5x256xf32>
    %626 = arith.addf %618, %625 : vector<5x256xf32>
    %c2_35 = arith.constant 2 : index
    %c0_36 = arith.constant 0 : index
    %c0_37 = arith.constant 0 : index
    %627 = vector.load %arg6[%c2_35, %c0_36, %c0_37] : memref<4x5x1xf32, #tpu.memory_space<vmem>>, vector<1x5x1xf32>
    %628 = vector.shape_cast %627 : vector<1x5x1xf32> to vector<5x1xf32>
    %629 = vector.broadcast %628 : vector<5x1xf32> to vector<5x256xf32>
    %630 = arith.addf %626, %629 : vector<5x256xf32>
    %631 = arith.addf %630, %425 : vector<5x256xf32>
    %c3 = arith.constant 3 : index
    %c0_38 = arith.constant 0 : index
    %c0_39 = arith.constant 0 : index
    %632 = vector.load %arg5[%c3, %c0_38, %c0_39] : memref<4x5x25xf32, #tpu.memory_space<vmem>>, vector<1x5x25xf32>
    %633 = vector.shape_cast %632 : vector<1x5x25xf32> to vector<5x25xf32>
    %c3_40 = arith.constant 3 : index
    %c0_41 = arith.constant 0 : index
    %c0_42 = arith.constant 0 : index
    %634 = vector.load %arg7[%c3_40, %c0_41, %c0_42] : memref<4x25x256xf32, #tpu.memory_space<vmem>>, vector<1x25x256xf32>
    %635 = vector.shape_cast %634 : vector<1x25x256xf32> to vector<25x256xf32>
    %cst_43 = arith.constant 0.000000e+00 : f32
    %636 = vector.broadcast %cst_43 : f32 to vector<5x256xf32>
    %637 = vector.extract_strided_slice %633 {offsets = [0, 6], sizes = [5, 1], strides = [1, 1]} : vector<5x25xf32> to vector<5x1xf32>
    %638 = vector.extract_strided_slice %14 {offsets = [0, 120], sizes = [5, 256], strides = [1, 1]} : vector<5x768xf32> to vector<5x256xf32>
    %639 = vector.extract_strided_slice %635 {offsets = [6, 0], sizes = [1, 256], strides = [1, 1]} : vector<25x256xf32> to vector<1x256xf32>
    %640 = vector.broadcast %637 : vector<5x1xf32> to vector<5x256xf32>
    %641 = vector.broadcast %639 : vector<1x256xf32> to vector<5x256xf32>
    %642 = arith.mulf %640, %641 : vector<5x256xf32>
    %643 = arith.mulf %638, %642 : vector<5x256xf32>
    %644 = arith.addf %636, %643 : vector<5x256xf32>
    %645 = vector.extract_strided_slice %633 {offsets = [0, 7], sizes = [5, 1], strides = [1, 1]} : vector<5x25xf32> to vector<5x1xf32>
    %646 = vector.extract_strided_slice %14 {offsets = [0, 128], sizes = [5, 256], strides = [1, 1]} : vector<5x768xf32> to vector<5x256xf32>
    %647 = vector.extract_strided_slice %635 {offsets = [7, 0], sizes = [1, 256], strides = [1, 1]} : vector<25x256xf32> to vector<1x256xf32>
    %648 = vector.broadcast %645 : vector<5x1xf32> to vector<5x256xf32>
    %649 = vector.broadcast %647 : vector<1x256xf32> to vector<5x256xf32>
    %650 = arith.mulf %648, %649 : vector<5x256xf32>
    %651 = arith.mulf %646, %650 : vector<5x256xf32>
    %652 = arith.addf %644, %651 : vector<5x256xf32>
    %653 = vector.extract_strided_slice %633 {offsets = [0, 8], sizes = [5, 1], strides = [1, 1]} : vector<5x25xf32> to vector<5x1xf32>
    %654 = vector.extract_strided_slice %14 {offsets = [0, 136], sizes = [5, 256], strides = [1, 1]} : vector<5x768xf32> to vector<5x256xf32>
    %655 = vector.extract_strided_slice %635 {offsets = [8, 0], sizes = [1, 256], strides = [1, 1]} : vector<25x256xf32> to vector<1x256xf32>
    %656 = vector.broadcast %653 : vector<5x1xf32> to vector<5x256xf32>
    %657 = vector.broadcast %655 : vector<1x256xf32> to vector<5x256xf32>
    %658 = arith.mulf %656, %657 : vector<5x256xf32>
    %659 = arith.mulf %654, %658 : vector<5x256xf32>
    %660 = arith.addf %652, %659 : vector<5x256xf32>
    %661 = vector.extract_strided_slice %633 {offsets = [0, 11], sizes = [5, 1], strides = [1, 1]} : vector<5x25xf32> to vector<5x1xf32>
    %662 = vector.extract_strided_slice %14 {offsets = [0, 248], sizes = [5, 256], strides = [1, 1]} : vector<5x768xf32> to vector<5x256xf32>
    %663 = vector.extract_strided_slice %635 {offsets = [11, 0], sizes = [1, 256], strides = [1, 1]} : vector<25x256xf32> to vector<1x256xf32>
    %664 = vector.broadcast %661 : vector<5x1xf32> to vector<5x256xf32>
    %665 = vector.broadcast %663 : vector<1x256xf32> to vector<5x256xf32>
    %666 = arith.mulf %664, %665 : vector<5x256xf32>
    %667 = arith.mulf %662, %666 : vector<5x256xf32>
    %668 = arith.addf %660, %667 : vector<5x256xf32>
    %669 = vector.extract_strided_slice %633 {offsets = [0, 12], sizes = [5, 1], strides = [1, 1]} : vector<5x25xf32> to vector<5x1xf32>
    %670 = vector.broadcast %669 : vector<5x1xf32> to vector<5x256xf32>
    %671 = arith.mulf %12, %670 : vector<5x256xf32>
    %672 = arith.addf %668, %671 : vector<5x256xf32>
    %673 = vector.extract_strided_slice %633 {offsets = [0, 13], sizes = [5, 1], strides = [1, 1]} : vector<5x25xf32> to vector<5x1xf32>
    %674 = vector.extract_strided_slice %14 {offsets = [0, 264], sizes = [5, 256], strides = [1, 1]} : vector<5x768xf32> to vector<5x256xf32>
    %675 = vector.extract_strided_slice %635 {offsets = [13, 0], sizes = [1, 256], strides = [1, 1]} : vector<25x256xf32> to vector<1x256xf32>
    %676 = vector.broadcast %673 : vector<5x1xf32> to vector<5x256xf32>
    %677 = vector.broadcast %675 : vector<1x256xf32> to vector<5x256xf32>
    %678 = arith.mulf %676, %677 : vector<5x256xf32>
    %679 = arith.mulf %674, %678 : vector<5x256xf32>
    %680 = arith.addf %672, %679 : vector<5x256xf32>
    %681 = vector.extract_strided_slice %633 {offsets = [0, 16], sizes = [5, 1], strides = [1, 1]} : vector<5x25xf32> to vector<5x1xf32>
    %682 = vector.extract_strided_slice %14 {offsets = [0, 376], sizes = [5, 256], strides = [1, 1]} : vector<5x768xf32> to vector<5x256xf32>
    %683 = vector.extract_strided_slice %635 {offsets = [16, 0], sizes = [1, 256], strides = [1, 1]} : vector<25x256xf32> to vector<1x256xf32>
    %684 = vector.broadcast %681 : vector<5x1xf32> to vector<5x256xf32>
    %685 = vector.broadcast %683 : vector<1x256xf32> to vector<5x256xf32>
    %686 = arith.mulf %684, %685 : vector<5x256xf32>
    %687 = arith.mulf %682, %686 : vector<5x256xf32>
    %688 = arith.addf %680, %687 : vector<5x256xf32>
    %689 = vector.extract_strided_slice %633 {offsets = [0, 17], sizes = [5, 1], strides = [1, 1]} : vector<5x25xf32> to vector<5x1xf32>
    %690 = vector.extract_strided_slice %14 {offsets = [0, 384], sizes = [5, 256], strides = [1, 1]} : vector<5x768xf32> to vector<5x256xf32>
    %691 = vector.extract_strided_slice %635 {offsets = [17, 0], sizes = [1, 256], strides = [1, 1]} : vector<25x256xf32> to vector<1x256xf32>
    %692 = vector.broadcast %689 : vector<5x1xf32> to vector<5x256xf32>
    %693 = vector.broadcast %691 : vector<1x256xf32> to vector<5x256xf32>
    %694 = arith.mulf %692, %693 : vector<5x256xf32>
    %695 = arith.mulf %690, %694 : vector<5x256xf32>
    %696 = arith.addf %688, %695 : vector<5x256xf32>
    %697 = vector.extract_strided_slice %633 {offsets = [0, 18], sizes = [5, 1], strides = [1, 1]} : vector<5x25xf32> to vector<5x1xf32>
    %698 = vector.extract_strided_slice %14 {offsets = [0, 392], sizes = [5, 256], strides = [1, 1]} : vector<5x768xf32> to vector<5x256xf32>
    %699 = vector.extract_strided_slice %635 {offsets = [18, 0], sizes = [1, 256], strides = [1, 1]} : vector<25x256xf32> to vector<1x256xf32>
    %700 = vector.broadcast %697 : vector<5x1xf32> to vector<5x256xf32>
    %701 = vector.broadcast %699 : vector<1x256xf32> to vector<5x256xf32>
    %702 = arith.mulf %700, %701 : vector<5x256xf32>
    %703 = arith.mulf %698, %702 : vector<5x256xf32>
    %704 = arith.addf %696, %703 : vector<5x256xf32>
    %c3_44 = arith.constant 3 : index
    %c0_45 = arith.constant 0 : index
    %c0_46 = arith.constant 0 : index
    %705 = vector.load %arg6[%c3_44, %c0_45, %c0_46] : memref<4x5x1xf32, #tpu.memory_space<vmem>>, vector<1x5x1xf32>
    %706 = vector.shape_cast %705 : vector<1x5x1xf32> to vector<5x1xf32>
    %707 = vector.broadcast %706 : vector<5x1xf32> to vector<5x256xf32>
    %708 = arith.addf %704, %707 : vector<5x256xf32>
    %709 = arith.addf %708, %631 : vector<5x256xf32>
    %c0_47 = arith.constant 0 : index
    %c0_48 = arith.constant 0 : index
    %710 = vector.load %arg8[%c0_47, %c0_48] : memref<5x5xf32, #tpu.memory_space<vmem>>, vector<5x5xf32>
    %cst_49 = arith.constant dense<0.000000e+00> : vector<5x256xf32>
    %711 = tpu.matmul %710, %12, %cst_49 {dimension_numbers = #tpu.dot_dimension_numbers<[1], [0], [0], [1], [0, 0, 1, 1], [], []>, precision = #tpu.contract_precision<fp32>} : vector<5x5xf32>, vector<5x256xf32>, vector<5x256xf32> -> vector<5x256xf32>
    %cst_50 = arith.constant dense<0.000000e+00> : vector<5xf32>
    %712 = vector.multi_reduction <add>, %711, %cst_50 [1] : vector<5x256xf32> to vector<5xf32>
    %713 = vector.shape_cast %712 : vector<5xf32> to vector<5x1xf32>
    %c0_51 = arith.constant 0 : index
    %c0_52 = arith.constant 0 : index
    %714 = vector.load %arg9[%c0_51, %c0_52] : memref<1x1xf32, #tpu.memory_space<vmem>>, vector<1x1xf32>
    %715 = vector.broadcast %714 : vector<1x1xf32> to vector<5x1xf32>
    %716 = arith.addf %713, %715 : vector<5x1xf32>
    %cst_53 = arith.constant 0.000000e+00 : f32
    %717 = vector.broadcast %cst_53 : f32 to vector<5x1xf32>
    %718 = arith.subf %717, %716 : vector<5x1xf32>
    %719 = math.exp %718 : vector<5x1xf32>
    %cst_54 = arith.constant 1.000000e+00 : f32
    %720 = vector.broadcast %cst_54 : f32 to vector<5x1xf32>
    %721 = arith.addf %720, %719 : vector<5x1xf32>
    %cst_55 = arith.constant 1.000000e+00 : f32
    %722 = vector.broadcast %cst_55 : f32 to vector<5x1xf32>
    %723 = arith.divf %722, %721 : vector<5x1xf32>
    %724 = vector.broadcast %723 : vector<5x1xf32> to vector<5x256xf32>
    %725 = arith.mulf %12, %724 : vector<5x256xf32>
    %726 = arith.addf %725, %709 : vector<5x256xf32>
    %c0_56 = arith.constant 0 : index
    %c0_57 = arith.constant 0 : index
    %727 = vector.load %arg14[%c0_56, %c0_57] : memref<25x1xf32, #tpu.memory_space<vmem>>, vector<25x1xf32>
    %728 = vector.broadcast %727 : vector<25x1xf32> to vector<25x256xf32>
    %729 = arith.addf %1, %728 : vector<25x256xf32>
    %c0_58 = arith.constant 0 : index
    %c0_59 = arith.constant 0 : index
    %c0_60 = arith.constant 0 : index
    %730 = vector.load %arg10[%c0_58, %c0_59, %c0_60] : memref<5x5x1xf32, #tpu.memory_space<vmem>>, vector<1x5x1xf32>
    %731 = vector.shape_cast %730 : vector<1x5x1xf32> to vector<5x1xf32>
    %732 = vector.broadcast %731 : vector<5x1xf32> to vector<5x256xf32>
    %733 = arith.mulf %219, %732 : vector<5x256xf32>
    %c0_61 = arith.constant 0 : index
    %c0_62 = arith.constant 0 : index
    %c0_63 = arith.constant 0 : index
    %734 = vector.load %arg11[%c0_61, %c0_62, %c0_63] : memref<5x5x1xf32, #tpu.memory_space<vmem>>, vector<1x5x1xf32>
    %735 = vector.shape_cast %734 : vector<1x5x1xf32> to vector<5x1xf32>
    %736 = vector.broadcast %735 : vector<5x1xf32> to vector<5x256xf32>
    %737 = arith.addf %733, %736 : vector<5x256xf32>
    %cst_64 = arith.constant 0.000000e+00 : f32
    %738 = vector.broadcast %cst_64 : f32 to vector<5x256xf32>
    %739 = arith.cmpf oge, %737, %738 : vector<5x256xf32>
    %c0_65 = arith.constant 0 : index
    %c0_66 = arith.constant 0 : index
    %c0_67 = arith.constant 0 : index
    %740 = vector.load %arg12[%c0_65, %c0_66, %c0_67] : memref<5x5x1xf32, #tpu.memory_space<vmem>>, vector<1x5x1xf32>
    %741 = vector.shape_cast %740 : vector<1x5x1xf32> to vector<5x1xf32>
    %742 = vector.broadcast %741 : vector<5x1xf32> to vector<5x256xf32>
    %743 = arith.mulf %742, %737 : vector<5x256xf32>
    %744 = arith.select %739, %737, %743 : vector<5x256xi1>, vector<5x256xf32>
    %c0_68 = arith.constant 0 : index
    %c0_69 = arith.constant 0 : index
    %c0_70 = arith.constant 0 : index
    %745 = vector.load %arg13[%c0_68, %c0_69, %c0_70] : memref<5x25x5xf32, #tpu.memory_space<vmem>>, vector<1x25x5xf32>
    %746 = vector.shape_cast %745 : vector<1x25x5xf32> to vector<25x5xf32>
    %cst_71 = arith.constant dense<0.000000e+00> : vector<25x256xf32>
    %747 = tpu.matmul %746, %744, %cst_71 {dimension_numbers = #tpu.dot_dimension_numbers<[1], [0], [0], [1], [0, 0, 1, 1], [], []>, precision = #tpu.contract_precision<fp32>} : vector<25x5xf32>, vector<5x256xf32>, vector<25x256xf32> -> vector<25x256xf32>
    %748 = arith.addf %729, %747 : vector<25x256xf32>
    %c1_72 = arith.constant 1 : index
    %c0_73 = arith.constant 0 : index
    %c0_74 = arith.constant 0 : index
    %749 = vector.load %arg10[%c1_72, %c0_73, %c0_74] : memref<5x5x1xf32, #tpu.memory_space<vmem>>, vector<1x5x1xf32>
    %750 = vector.shape_cast %749 : vector<1x5x1xf32> to vector<5x1xf32>
    %751 = vector.broadcast %750 : vector<5x1xf32> to vector<5x256xf32>
    %752 = arith.mulf %425, %751 : vector<5x256xf32>
    %c1_75 = arith.constant 1 : index
    %c0_76 = arith.constant 0 : index
    %c0_77 = arith.constant 0 : index
    %753 = vector.load %arg11[%c1_75, %c0_76, %c0_77] : memref<5x5x1xf32, #tpu.memory_space<vmem>>, vector<1x5x1xf32>
    %754 = vector.shape_cast %753 : vector<1x5x1xf32> to vector<5x1xf32>
    %755 = vector.broadcast %754 : vector<5x1xf32> to vector<5x256xf32>
    %756 = arith.addf %752, %755 : vector<5x256xf32>
    %cst_78 = arith.constant 0.000000e+00 : f32
    %757 = vector.broadcast %cst_78 : f32 to vector<5x256xf32>
    %758 = arith.cmpf oge, %756, %757 : vector<5x256xf32>
    %c1_79 = arith.constant 1 : index
    %c0_80 = arith.constant 0 : index
    %c0_81 = arith.constant 0 : index
    %759 = vector.load %arg12[%c1_79, %c0_80, %c0_81] : memref<5x5x1xf32, #tpu.memory_space<vmem>>, vector<1x5x1xf32>
    %760 = vector.shape_cast %759 : vector<1x5x1xf32> to vector<5x1xf32>
    %761 = vector.broadcast %760 : vector<5x1xf32> to vector<5x256xf32>
    %762 = arith.mulf %761, %756 : vector<5x256xf32>
    %763 = arith.select %758, %756, %762 : vector<5x256xi1>, vector<5x256xf32>
    %c1_82 = arith.constant 1 : index
    %c0_83 = arith.constant 0 : index
    %c0_84 = arith.constant 0 : index
    %764 = vector.load %arg13[%c1_82, %c0_83, %c0_84] : memref<5x25x5xf32, #tpu.memory_space<vmem>>, vector<1x25x5xf32>
    %765 = vector.shape_cast %764 : vector<1x25x5xf32> to vector<25x5xf32>
    %cst_85 = arith.constant dense<0.000000e+00> : vector<25x256xf32>
    %766 = tpu.matmul %765, %763, %cst_85 {dimension_numbers = #tpu.dot_dimension_numbers<[1], [0], [0], [1], [0, 0, 1, 1], [], []>, precision = #tpu.contract_precision<fp32>} : vector<25x5xf32>, vector<5x256xf32>, vector<25x256xf32> -> vector<25x256xf32>
    %767 = arith.addf %748, %766 : vector<25x256xf32>
    %c2_86 = arith.constant 2 : index
    %c0_87 = arith.constant 0 : index
    %c0_88 = arith.constant 0 : index
    %768 = vector.load %arg10[%c2_86, %c0_87, %c0_88] : memref<5x5x1xf32, #tpu.memory_space<vmem>>, vector<1x5x1xf32>
    %769 = vector.shape_cast %768 : vector<1x5x1xf32> to vector<5x1xf32>
    %770 = vector.broadcast %769 : vector<5x1xf32> to vector<5x256xf32>
    %771 = arith.mulf %631, %770 : vector<5x256xf32>
    %c2_89 = arith.constant 2 : index
    %c0_90 = arith.constant 0 : index
    %c0_91 = arith.constant 0 : index
    %772 = vector.load %arg11[%c2_89, %c0_90, %c0_91] : memref<5x5x1xf32, #tpu.memory_space<vmem>>, vector<1x5x1xf32>
    %773 = vector.shape_cast %772 : vector<1x5x1xf32> to vector<5x1xf32>
    %774 = vector.broadcast %773 : vector<5x1xf32> to vector<5x256xf32>
    %775 = arith.addf %771, %774 : vector<5x256xf32>
    %cst_92 = arith.constant 0.000000e+00 : f32
    %776 = vector.broadcast %cst_92 : f32 to vector<5x256xf32>
    %777 = arith.cmpf oge, %775, %776 : vector<5x256xf32>
    %c2_93 = arith.constant 2 : index
    %c0_94 = arith.constant 0 : index
    %c0_95 = arith.constant 0 : index
    %778 = vector.load %arg12[%c2_93, %c0_94, %c0_95] : memref<5x5x1xf32, #tpu.memory_space<vmem>>, vector<1x5x1xf32>
    %779 = vector.shape_cast %778 : vector<1x5x1xf32> to vector<5x1xf32>
    %780 = vector.broadcast %779 : vector<5x1xf32> to vector<5x256xf32>
    %781 = arith.mulf %780, %775 : vector<5x256xf32>
    %782 = arith.select %777, %775, %781 : vector<5x256xi1>, vector<5x256xf32>
    %c2_96 = arith.constant 2 : index
    %c0_97 = arith.constant 0 : index
    %c0_98 = arith.constant 0 : index
    %783 = vector.load %arg13[%c2_96, %c0_97, %c0_98] : memref<5x25x5xf32, #tpu.memory_space<vmem>>, vector<1x25x5xf32>
    %784 = vector.shape_cast %783 : vector<1x25x5xf32> to vector<25x5xf32>
    %cst_99 = arith.constant dense<0.000000e+00> : vector<25x256xf32>
    %785 = tpu.matmul %784, %782, %cst_99 {dimension_numbers = #tpu.dot_dimension_numbers<[1], [0], [0], [1], [0, 0, 1, 1], [], []>, precision = #tpu.contract_precision<fp32>} : vector<25x5xf32>, vector<5x256xf32>, vector<25x256xf32> -> vector<25x256xf32>
    %786 = arith.addf %767, %785 : vector<25x256xf32>
    %c3_100 = arith.constant 3 : index
    %c0_101 = arith.constant 0 : index
    %c0_102 = arith.constant 0 : index
    %787 = vector.load %arg10[%c3_100, %c0_101, %c0_102] : memref<5x5x1xf32, #tpu.memory_space<vmem>>, vector<1x5x1xf32>
    %788 = vector.shape_cast %787 : vector<1x5x1xf32> to vector<5x1xf32>
    %789 = vector.broadcast %788 : vector<5x1xf32> to vector<5x256xf32>
    %790 = arith.mulf %709, %789 : vector<5x256xf32>
    %c3_103 = arith.constant 3 : index
    %c0_104 = arith.constant 0 : index
    %c0_105 = arith.constant 0 : index
    %791 = vector.load %arg11[%c3_103, %c0_104, %c0_105] : memref<5x5x1xf32, #tpu.memory_space<vmem>>, vector<1x5x1xf32>
    %792 = vector.shape_cast %791 : vector<1x5x1xf32> to vector<5x1xf32>
    %793 = vector.broadcast %792 : vector<5x1xf32> to vector<5x256xf32>
    %794 = arith.addf %790, %793 : vector<5x256xf32>
    %cst_106 = arith.constant 0.000000e+00 : f32
    %795 = vector.broadcast %cst_106 : f32 to vector<5x256xf32>
    %796 = arith.cmpf oge, %794, %795 : vector<5x256xf32>
    %c3_107 = arith.constant 3 : index
    %c0_108 = arith.constant 0 : index
    %c0_109 = arith.constant 0 : index
    %797 = vector.load %arg12[%c3_107, %c0_108, %c0_109] : memref<5x5x1xf32, #tpu.memory_space<vmem>>, vector<1x5x1xf32>
    %798 = vector.shape_cast %797 : vector<1x5x1xf32> to vector<5x1xf32>
    %799 = vector.broadcast %798 : vector<5x1xf32> to vector<5x256xf32>
    %800 = arith.mulf %799, %794 : vector<5x256xf32>
    %801 = arith.select %796, %794, %800 : vector<5x256xi1>, vector<5x256xf32>
    %c3_110 = arith.constant 3 : index
    %c0_111 = arith.constant 0 : index
    %c0_112 = arith.constant 0 : index
    %802 = vector.load %arg13[%c3_110, %c0_111, %c0_112] : memref<5x25x5xf32, #tpu.memory_space<vmem>>, vector<1x25x5xf32>
    %803 = vector.shape_cast %802 : vector<1x25x5xf32> to vector<25x5xf32>
    %cst_113 = arith.constant dense<0.000000e+00> : vector<25x256xf32>
    %804 = tpu.matmul %803, %801, %cst_113 {dimension_numbers = #tpu.dot_dimension_numbers<[1], [0], [0], [1], [0, 0, 1, 1], [], []>, precision = #tpu.contract_precision<fp32>} : vector<25x5xf32>, vector<5x256xf32>, vector<25x256xf32> -> vector<25x256xf32>
    %805 = arith.addf %786, %804 : vector<25x256xf32>
    %c4 = arith.constant 4 : index
    %c0_114 = arith.constant 0 : index
    %c0_115 = arith.constant 0 : index
    %806 = vector.load %arg10[%c4, %c0_114, %c0_115] : memref<5x5x1xf32, #tpu.memory_space<vmem>>, vector<1x5x1xf32>
    %807 = vector.shape_cast %806 : vector<1x5x1xf32> to vector<5x1xf32>
    %808 = vector.broadcast %807 : vector<5x1xf32> to vector<5x256xf32>
    %809 = arith.mulf %726, %808 : vector<5x256xf32>
    %c4_116 = arith.constant 4 : index
    %c0_117 = arith.constant 0 : index
    %c0_118 = arith.constant 0 : index
    %810 = vector.load %arg11[%c4_116, %c0_117, %c0_118] : memref<5x5x1xf32, #tpu.memory_space<vmem>>, vector<1x5x1xf32>
    %811 = vector.shape_cast %810 : vector<1x5x1xf32> to vector<5x1xf32>
    %812 = vector.broadcast %811 : vector<5x1xf32> to vector<5x256xf32>
    %813 = arith.addf %809, %812 : vector<5x256xf32>
    %cst_119 = arith.constant 0.000000e+00 : f32
    %814 = vector.broadcast %cst_119 : f32 to vector<5x256xf32>
    %815 = arith.cmpf oge, %813, %814 : vector<5x256xf32>
    %c4_120 = arith.constant 4 : index
    %c0_121 = arith.constant 0 : index
    %c0_122 = arith.constant 0 : index
    %816 = vector.load %arg12[%c4_120, %c0_121, %c0_122] : memref<5x5x1xf32, #tpu.memory_space<vmem>>, vector<1x5x1xf32>
    %817 = vector.shape_cast %816 : vector<1x5x1xf32> to vector<5x1xf32>
    %818 = vector.broadcast %817 : vector<5x1xf32> to vector<5x256xf32>
    %819 = arith.mulf %818, %813 : vector<5x256xf32>
    %820 = arith.select %815, %813, %819 : vector<5x256xi1>, vector<5x256xf32>
    %c4_123 = arith.constant 4 : index
    %c0_124 = arith.constant 0 : index
    %c0_125 = arith.constant 0 : index
    %821 = vector.load %arg13[%c4_123, %c0_124, %c0_125] : memref<5x25x5xf32, #tpu.memory_space<vmem>>, vector<1x25x5xf32>
    %822 = vector.shape_cast %821 : vector<1x25x5xf32> to vector<25x5xf32>
    %cst_126 = arith.constant dense<0.000000e+00> : vector<25x256xf32>
    %823 = tpu.matmul %822, %820, %cst_126 {dimension_numbers = #tpu.dot_dimension_numbers<[1], [0], [0], [1], [0, 0, 1, 1], [], []>, precision = #tpu.contract_precision<fp32>} : vector<25x5xf32>, vector<5x256xf32>, vector<25x256xf32> -> vector<25x256xf32>
    %824 = arith.addf %805, %823 : vector<25x256xf32>
    %cst_127 = arith.constant 0.000000e+00 : f32
    %825 = vector.broadcast %cst_127 : f32 to vector<25x256xf32>
    %826 = arith.cmpf oge, %824, %825 : vector<25x256xf32>
    %c0_128 = arith.constant 0 : index
    %c0_129 = arith.constant 0 : index
    %827 = vector.load %arg15[%c0_128, %c0_129] : memref<25x1xf32, #tpu.memory_space<vmem>>, vector<25x1xf32>
    %828 = vector.broadcast %827 : vector<25x1xf32> to vector<25x256xf32>
    %829 = arith.mulf %828, %824 : vector<25x256xf32>
    %830 = arith.select %826, %824, %829 : vector<25x256xi1>, vector<25x256xf32>
    %c0_130 = arith.constant 0 : index
    %c0_131 = arith.constant 0 : index
    %c0_132 = arith.constant 0 : index
    %831 = vector.load %arg16[%c0_130, %c0_131, %c0_132] : memref<1x25x256xf32, #tpu.memory_space<vmem>>, vector<1x25x256xf32>
    %832 = vector.shape_cast %831 : vector<1x25x256xf32> to vector<25x256xf32>
    %833 = vector.shape_cast %830 : vector<25x256xf32> to vector<1x25x256xf32>
    tpu.vector_store %arg16[%c0_130, %c0_131, %c0_132], %833 {strides = array<i32>} : memref<1x25x256xf32, #tpu.memory_space<vmem>>, vector<1x25x256xf32>,
    return
  }
  func.func @transform_0(%arg0: i32) -> (i32, i32, i32) {
    %c0_i32 = arith.constant 0 : i32
    %c0_i32_0 = arith.constant 0 : i32
    %c0_i32_1 = arith.constant 0 : i32
    return %arg0, %c0_i32, %c0_i32_0 : i32, i32, i32
  }
  func.func @transform_1(%arg0: i32) -> (i32, i32) {
    %c0_i32 = arith.constant 0 : i32
    %c0_i32_0 = arith.constant 0 : i32
    %c0_i32_1 = arith.constant 0 : i32
    return %c0_i32, %c0_i32_0 : i32, i32
  }
  func.func @transform_2(%arg0: i32) -> (i32, i32) {
    %c0_i32 = arith.constant 0 : i32
    %c0_i32_0 = arith.constant 0 : i32
    %c0_i32_1 = arith.constant 0 : i32
    return %c0_i32, %c0_i32_0 : i32, i32
  }
  func.func @transform_3(%arg0: i32) -> (i32, i32) {
    %c0_i32 = arith.constant 0 : i32
    %c0_i32_0 = arith.constant 0 : i32
    %c0_i32_1 = arith.constant 0 : i32
    return %c0_i32, %c0_i32_0 : i32, i32
  }
  func.func @transform_4(%arg0: i32) -> (i32, i32, i32) {
    %c0_i32 = arith.constant 0 : i32
    %c0_i32_0 = arith.constant 0 : i32
    %c0_i32_1 = arith.constant 0 : i32
    %c0_i32_2 = arith.constant 0 : i32
    return %c0_i32, %c0_i32_0, %c0_i32_1 : i32, i32, i32
  }
  func.func @transform_5(%arg0: i32) -> (i32, i32, i32) {
    %c0_i32 = arith.constant 0 : i32
    %c0_i32_0 = arith.constant 0 : i32
    %c0_i32_1 = arith.constant 0 : i32
    %c0_i32_2 = arith.constant 0 : i32
    return %c0_i32, %c0_i32_0, %c0_i32_1 : i32, i32, i32
  }
  func.func @transform_6(%arg0: i32) -> (i32, i32, i32) {
    %c0_i32 = arith.constant 0 : i32
    %c0_i32_0 = arith.constant 0 : i32
    %c0_i32_1 = arith.constant 0 : i32
    %c0_i32_2 = arith.constant 0 : i32
    return %c0_i32, %c0_i32_0, %c0_i32_1 : i32, i32, i32
  }
  func.func @transform_7(%arg0: i32) -> (i32, i32) {
    %c0_i32 = arith.constant 0 : i32
    %c0_i32_0 = arith.constant 0 : i32
    %c0_i32_1 = arith.constant 0 : i32
    return %c0_i32, %c0_i32_0 : i32, i32
  }
  func.func @transform_8(%arg0: i32) -> (i32, i32) {
    %c0_i32 = arith.constant 0 : i32
    %c0_i32_0 = arith.constant 0 : i32
    %c0_i32_1 = arith.constant 0 : i32
    return %c0_i32, %c0_i32_0 : i32, i32
  }
  func.func @transform_9(%arg0: i32) -> (i32, i32, i32) {
    %c0_i32 = arith.constant 0 : i32
    %c0_i32_0 = arith.constant 0 : i32
    %c0_i32_1 = arith.constant 0 : i32
    %c0_i32_2 = arith.constant 0 : i32
    return %c0_i32, %c0_i32_0, %c0_i32_1 : i32, i32, i32
  }
  func.func @transform_10(%arg0: i32) -> (i32, i32, i32) {
    %c0_i32 = arith.constant 0 : i32
    %c0_i32_0 = arith.constant 0 : i32
    %c0_i32_1 = arith.constant 0 : i32
    %c0_i32_2 = arith.constant 0 : i32
    return %c0_i32, %c0_i32_0, %c0_i32_1 : i32, i32, i32
  }
  func.func @transform_11(%arg0: i32) -> (i32, i32, i32) {
    %c0_i32 = arith.constant 0 : i32
    %c0_i32_0 = arith.constant 0 : i32
    %c0_i32_1 = arith.constant 0 : i32
    %c0_i32_2 = arith.constant 0 : i32
    return %c0_i32, %c0_i32_0, %c0_i32_1 : i32, i32, i32
  }
  func.func @transform_12(%arg0: i32) -> (i32, i32, i32) {
    %c0_i32 = arith.constant 0 : i32
    %c0_i32_0 = arith.constant 0 : i32
    %c0_i32_1 = arith.constant 0 : i32
    %c0_i32_2 = arith.constant 0 : i32
    return %c0_i32, %c0_i32_0, %c0_i32_1 : i32, i32, i32
  }
  func.func @transform_13(%arg0: i32) -> (i32, i32) {
    %c0_i32 = arith.constant 0 : i32
    %c0_i32_0 = arith.constant 0 : i32
    %c0_i32_1 = arith.constant 0 : i32
    return %c0_i32, %c0_i32_0 : i32, i32
  }
  func.func @transform_14(%arg0: i32) -> (i32, i32) {
    %c0_i32 = arith.constant 0 : i32
    %c0_i32_0 = arith.constant 0 : i32
    %c0_i32_1 = arith.constant 0 : i32
    return %c0_i32, %c0_i32_0 : i32, i32
  }
  func.func @transform_15(%arg0: i32) -> (i32, i32, i32) {
    %c0_i32 = arith.constant 0 : i32
    %c0_i32_0 = arith.constant 0 : i32
    %c0_i32_1 = arith.constant 0 : i32
    return %arg0, %c0_i32, %c0_i32_0 : i32, i32, i32
  }
}

</mosaic_0001>

<bundles_post_ra>
// kernel: tpu_custom_call.1
= control target key start
LH: loop header
LB: loop body
LE: loop exit
PB: predicated region body
PF: predicated region fallthrough
CT: control target
= control target key end

     0   :  { %s9506_s20 = smov 0   ;;  %s13145_s0 = inlined_call_operand.vmem [shape: f32[2,25,256], index: 0, kind: input, shape index: {}]   ;;  %s13146_s1 = inlined_call_operand.vmem [shape: f32[5,25], index: 1, kind: input, shape index: {}]   ;;  %s13147_s2 = inlined_call_operand.vmem [shape: f32[5,1], index: 2, kind: input, shape index: {}]   ;;  %s13148_s3 = inlined_call_operand.vmem [shape: f32[5,1], index: 3, kind: input, shape index: {}]   ;;  %s13149_s4 = inlined_call_operand.vmem [shape: f32[4,5,25], index: 4, kind: input, shape index: {}]   ;;  %s13150_s5 = inlined_call_operand.vmem [shape: f32[4,5,1], index: 5, kind: input, shape index: {}]   ;;  %s13151_s6 = inlined_call_operand.vmem [shape: f32[4,25,256], index: 6, kind: input, shape index: {}]   ;;  %s13152_s7 = inlined_call_operand.vmem [shape: f32[5,5], index: 7, kind: input, shape index: {}]   ;;  %s13153_s8 = inlined_call_operand.<no memory space> [shape: f32[1,1], index: 8, kind: input, shape index: {}]   ;;  %s13154_s9 = inlined_call_operand.vmem [shape: f32[5,5,1], index: 9, kind: input, shape index: {}]   ;;  %s13155_s10 = inlined_call_operand.vmem [shape: f32[5,5,1], index: 10, kind: input, shape index: {}]   ;;  %s13156_s11 = inlined_call_operand.vmem [shape: f32[5,5,1], index: 11, kind: input, shape index: {}]   ;;  %s13157_s12 = inlined_call_operand.vmem [shape: f32[5,25,5], index: 12, kind: input, shape index: {}]   ;;  %s13158_s13 = inlined_call_operand.vmem [shape: f32[25,1], index: 13, kind: input, shape index: {}]   ;;  %s13159_s14 = inlined_call_operand.vmem [shape: f32[25,1], index: 14, kind: input, shape index: {}]   ;;  %s13160_s15 = inlined_call_operand.vmem [shape: f32[2,25,256], index: 15, kind: output, shape index: {}]  }
   0x1   :  { %13389 = sst [smem:[#allocation96_spill]] %s13145_s0  ;;  %v20_v0 = vstv %s13153_s8 }
   0x2   :  { %13390 = sst [smem:[#allocation97_spill]] %s13146_s1  ;;  %21 = vst [vmem:[#allocation2] sm:$0x1] %v20_v0 }
   0x3 LB: > { %s8750_s21 = sadd.s32 4294967295, %s9336_s20   ;;  %p8754_p0 = scmp.ge.s32.totalorder %s9336_s20, 1  ;;  %s9336_s20 = sphi %s9506_s20, %s27_s20  }
   0x4   : > { %p439_p1 = scmp.lt.s32.totalorder %s9336_s20, 3 }
   0x6   : > { %p440_p2 = pnand %p8754_p0, %p439_p1 }
   0x8   : > { %443 = sbr.rel (%p440_p2) target bundleno = 4646 (0x1226), region = 80 }
   0xf   : > { %v9517_v1 = vld [vmem:[%s13149_s4] sm:$0x1f]  ;;  %p487_p3 = scmp.lt.s32.totalorder %s8750_s21, 1  ;;  %v13208_v2 = vmov 0   ;;  %s13391_s1 = sld [smem:[#allocation97_spill]]  ;;  %vm512_vm0 = vcmask 203776  }
  0x10   : > { %9229 = vset.pattern.permute.xlu1 %v13208_v2  ;;  %v13186_v4 = vmov 0.0   ;;  %s13392_s0 = sld [smem:[#allocation96_spill]]  ;;  %v13184_v7 = vmov 13   ;;  %v13230_v8 = vmov 1   ;;  %vm516_vm1 = vcmask 1040384   ;;  %s13164_s8 = smov 94  }
  0x11   : > { %1089 = vperm.xlu1 %9229, %v9517_v1   ;;  %s13802_s21 = smov (!%p487_p3, %s8750_s21), 1  ;;  %595 = vmatprep.mubr.f32.mxu0 %v13186_v4  ;;  %v506_v31 = vld [vmem:[%s13147_s2] sm:$0x1f]  ;;  %v13232_v32 = vmov 2   ;;  %v13226_v54 = vmov 3   ;;  %s13196_s24 = smov 95  }
  0x12   : > { %4831 = vmatprep.mubr.f32.mxu1 %v13186_v4  ;;  %s13161_s25 = sshll.u32 %s13802_s21, 6  ;;  %9242 = vset.pattern.permute.xlu0 %v13184_v7  ;;  %v1068_v49 = vld [vmem:[%s13148_s3] sm:$0x1f]  ;;  %s13197_s26 = smov 96   ;;  %vm13265_vm4 = vcmask 1044480   ;;  %vm13262_vm5 = vcmask 39936  }
  0x13   : > { %1638 = vperm.xlu0 %9242, %v9517_v1   ;;  %s9361_s27 = smov 97   ;;  %s13162_s29 = smov 98   ;;  %vm1139_vm6 = vcmask 777216   ;;  %vm1185_vm7 = vcmask 785408   ;;  %vm1231_vm8 = vcmask 793600   ;;  %vm1277_vm9 = vcmask 801792  }
  0x14   : > { %s13201_s30 = smov 110   ;;  %s13202_s16 = smov 111   ;;  %vm1323_vm10 = vcmask 900096   ;;  %vm1369_vm11 = vcmask 908288   ;;  %vm13388_vm12 = vcmask 916480   ;;  %vm1458_vm13 = vcmask 924672  }
  0x15   : > { %v505_v3 = vld [vmem:[%s13391_s1] sm:$0x1f]  ;;  %9230 = vset.pattern.permute.xlu1 %v13230_v8  ;;  %s13203_s23 = smov 112   ;;  %s9367_s17 = smov 114   ;;  %vm1504_vm14 = vcmask 932864   ;;  %vm1202_vm15 = vcmask 1031168  }
  0x16   : > { %v514_v5 = vsel %vm512_vm0, %v505_v3, 0  ;;  %s9536_s28 = scalar_lea.vmem %s13392_s0, %s13161_s25  ;;  %1120 = vperm.xlu1 %9230, %v9517_v1   ;;  %s13296_s18 = smov 126   ;;  %vm1156_vm0 = vcmask 1039360   ;;  %v8760_v8 = vld [vmem:[%s13151_s6 + $0x38] ss:$0 sm:$0xff] }
  0x17   : > { %v9527_v6 = vand.u32 4294901760, %v514_v5  ;;  %v498_v9 = vld [vmem:[%s9536_s28 + $0x8] sm:$0xff]  ;;  %v500_v10 = vld [vmem:[%s9536_s28 + $0x18] sm:$0xff]  ;;  %v497_v11 = vld [vmem:[%s9536_s28] sm:$0xff]  ;;  %9243 = vset.pattern.permute.xlu0 %v13208_v2  ;;  %s9369_s19 = smov 127   ;;  %s9370_s22 = smov 1  }
  0x18   : > { %v523_v12 = vand.u32 4294901760, %v498_v9  ;;  %v527_v13 = vand.u32 4294901760, %v500_v10  ;;  %v499_v14 = vld [vmem:[%s9536_s28 + $0x10] sm:$0xff]  ;;  %v525_v15 = vand.u32 4294901760, %v497_v11  ;;  %v502_v16 = vld [vmem:[%s9536_s28 + $0x28] sm:$0xff]  ;;  %v501_v17 = vld [vmem:[%s9536_s28 + $0x20] sm:$0xff]  ;;  %509 = vperm.xlu0 %9243, %v506_v31  }
  0x19   : > { %v9549_v18 = vsub.f32 %v514_v5, %v9527_v6  ;;  %v529_v19 = vand.u32 4294901760, %v499_v14  ;;  %v504_v20 = vld [vmem:[%s9536_s28 + $0x38] sm:$0x1]  ;;  %v531_v21 = vand.u32 4294901760, %v502_v16  ;;  %v503_v22 = vld [vmem:[%s9536_s28 + $0x30] sm:$0x1] }
  0x1a   : > { %v9553_v23 = vpack.c.bf16 %v527_v13, %v523_v12  ;;  %v9555_v24 = vsub.f32 %v498_v9, %v523_v12  ;;  %v9557_v25 = vsub.f32 %v500_v10, %v527_v13  ;;  %v9559_v26 = vsub.f32 %v497_v11, %v525_v15  ;;  %9231 = vset.pattern.permute.xlu1 %v13232_v32  ;;  %s9373_s25 = smov 15   ;;  %s9415_s0 = smov 88  }
  0x1b   : > { %v9561_v27 = vpack.c.bf16 %v529_v19, %v525_v15  ;;  %v9563_v28 = vsub.f32 %v499_v14, %v529_v19  ;;  %v521_v29 = vsel %vm516_vm1, %v504_v20, 0  ;;  %v9566_v30 = vsub.f32 %v502_v16, %v531_v21  ;;  %1166 = vperm.xlu1 %9231, %v9517_v1   ;;  %s13654_s1 = smov 116  }
  0x1c   : > { %8827 = vmatprep.subr.bf16.mxu0 %v9553_v23  ;;  %v535_v33 = vand.u32 4294901760, %v521_v29  ;;  %v518_v34 = vsel %vm516_vm1, %v503_v22, 0  ;;  %v533_v35 = vand.u32 4294901760, %v501_v17  ;;  %v598_v36 = vand.u32 4294901760, %v9549_v18  ;;  %1071 = vperm.xlu0 %9243, %v1068_v49  }
  0x1d   : > { %8829 = vmatpush1.bf16.msra.mxu0 %v9561_v27  ;;  %v537_v37 = vand.u32 4294901760, %v518_v34  ;;  %v609_v38 = vand.u32 4294901760, %v9555_v24  ;;  %v621_v39 = vand.u32 4294901760, %v9557_v25  ;;  %v615_v40 = vand.u32 4294901760, %v9559_v26 }
  0x1e   : > { %v9581_v41 = vpack.c.bf16 %v535_v33, %v531_v21  ;;  %v9583_v42 = vsub.f32 %v521_v29, %v535_v33  ;;  %v9585_v43 = vsub.f32 %v501_v17, %v533_v35  ;;  %v599_v44 = vsub.f32 %v9549_v18, %v598_v36 }
  0x1f   : > { %v9590_v45 = vpack.c.bf16 %v537_v37, %v533_v35  ;;  %v9592_v46 = vsub.f32 %v518_v34, %v537_v37  ;;  %v610_v47 = vsub.f32 %v9555_v24, %v609_v38  ;;  %v622_v48 = vsub.f32 %v9557_v25, %v621_v39  ;;  %9232 = vset.pattern.permute.xlu1 %v13226_v54 }
  0x20   : > { %8831 = vmatprep.subr.bf16.mxu0 %v9581_v41  ;;  %v600_v50 = vand.u32 4294901760, %v599_v44  ;;  %v616_v51 = vsub.f32 %v9559_v26, %v615_v40  ;;  %v627_v52 = vand.u32 4294901760, %v9563_v28  ;;  %v633_v53 = vand.u32 4294901760, %v9566_v30  ;;  %1212 = vperm.xlu1 %9232, %v9517_v1  }
  0x21   : > { %8833 = vmatpush1.bf16.msra.mxu0 %v9590_v45  ;;  %v611_v55 = vand.u32 4294901760, %v610_v47  ;;  %v623_v56 = vand.u32 4294901760, %v622_v48  ;;  %v645_v57 = vand.u32 4294901760, %v9583_v42  ;;  %v639_v58 = vand.u32 4294901760, %v9585_v43 }
  0x22   : > { %v617_v59 = vand.u32 4294901760, %v616_v51  ;;  %v628_v60 = vsub.f32 %v9563_v28, %v627_v52  ;;  %v634_v61 = vsub.f32 %v9566_v30, %v633_v53  ;;  %v651_v62 = vand.u32 4294901760, %v9592_v46 }
  0x23   : > { %v8834_v63 = vpack.c.bf16 %v623_v56, %v611_v55  ;;  %v646_v0 = vsub.f32 %v9583_v42, %v645_v57  ;;  %v640_v3 = vsub.f32 %v9585_v43, %v639_v58  ;;  %v13224_v14 = vmov 4  }
  0x24   : > { %601 = vmatmul.mubr.f32.vlgmr.msra.gmra.mrb[0].mxu0 %v600_v50  ;;  %v629_v5 = vand.u32 4294901760, %v628_v60  ;;  %v635_v9 = vand.u32 4294901760, %v634_v61  ;;  %v652_v10 = vsub.f32 %v9592_v46, %v651_v62  ;;  %9233 = vset.pattern.permute.xlu1 %v13224_v14  ;;  %v8842_v19 = vpack.c.bf16 %v9557_v25, %v9555_v24 }
  0x25   : > { %8835 = vmatprep.subr.bf16.mxu0 %v8834_v63  ;;  %v647_v11 = vand.u32 4294901760, %v646_v0  ;;  %v641_v12 = vand.u32 4294901760, %v640_v3  ;;  %711 = vmatprep.mubr.f32.mxu0 %v13186_v4  ;;  %v13222_v20 = vmov 5   ;;  %v8844_v21 = vpack.c.bf16 %v9563_v28, %v9559_v26 }
  0x26   : > { %v8836_v13 = vpack.c.bf16 %v629_v5, %v617_v59  ;;  %v653_v15 = vand.u32 4294901760, %v652_v10  ;;  %1258 = vperm.xlu1 %9233, %v9517_v1   ;;  %v8846_v22 = vpack.c.bf16 %v9583_v42, %v9566_v30  ;;  %v13220_v29 = vmov 6  }
  0x27   : > { %v8838_v16 = vpack.c.bf16 %v647_v11, %v635_v9  ;;  %v8848_v31 = vpack.c.bf16 %v9592_v46, %v9585_v43  ;;  %v13210_v33 = vmov 7   ;;  %v8858_v34 = vpack.c.bf16 %v621_v39, %v609_v38  ;;  %v9703_v43 = vld [vmem:[%s13151_s6 + $0x8] sm:$0xff] }
  0x28   : > { %8837 = vmatpush1.bf16.msra.mxu0 %v8836_v13  ;;  %v8840_v17 = vpack.c.bf16 %v653_v15, %v641_v12  ;;  %v13218_v35 = vmov 8   ;;  %v8860_v37 = vpack.c.bf16 %v627_v52, %v615_v40  ;;  %v8862_v42 = vpack.c.bf16 %v645_v57, %v633_v53 }
  0x29   : > { %8839 = vmatprep.subr.bf16.mxu0 %v8838_v16  ;;  %v13214_v24 = vmov 9   ;;  %v8864_v25 = vpack.c.bf16 %v651_v62, %v639_v58  ;;  %v13228_v26 = vmov 10   ;;  %v13170_v28 = vmov 12  }
  0x2a   : > { %9234 = vset.pattern.permute.xlu1 %v13222_v20  ;;  %v13178_v30 = vmov 16   ;;  %v1092_v38 = vlaneseq  ;;  %vm1657_vm1 = vcmask 7168  }
  0x2b   : > { %1304 = vperm.xlu1 %9234, %v9517_v1  }
  0x2c   : > { %8841 = vmatpush1.bf16.msra.mxu0 %v8840_v17  ;;  %v1093_v39 = vshrl.u32 %v1092_v38, 7 }
  0x2d   : > { %8843 = vmatprep.subr.bf16.mxu0 %v8842_v19 }
  0x2e   : > { %v9693_v40 = vsub.s32 0, %v1093_v39  ;;  %v9709_v46 = vsub.s32 1, %v1093_v39  ;;  %v9717_v52 = vsub.s32 2, %v1093_v39  ;;  %v9725_v59 = vsub.s32 3, %v1093_v39 }
  0x2f   : > { %713 = vmatmul.mubr.f32.vlgmr.msra.gmra.mrb[0].mxu0 %v9527_v6  ;;  %9235 = vset.pattern.permute.xlu1 %v13220_v29  ;;  %v9733_v3 = vsub.s32 4, %v1093_v39  ;;  %v9739_v13 = vsub.s32 5, %v1093_v39  ;;  %v9755_v38 = vsub.s32 7, %v1093_v39 }
  0x30   : > { %8845 = vmatpush1.bf16.msra.mxu0 %v8844_v21  ;;  %1350 = vperm.xlu1 %9235, %v9517_v1   ;;  %13393 = vst [vmem:[#allocation3_spill] sm:$0xff] %v9709_v46  ;;  %v1130_v51 = vrot.slane %v9703_v43, %v9709_v46  ;;  %13394 = vst [vmem:[#allocation4_spill] sm:$0xff] %v9717_v52  ;;  %v1176_v58 = vrot.slane %v9703_v43, %v9717_v52 }
  0x31   : > { %8847 = vmatprep.subr.bf16.mxu0 %v8846_v22  ;;  %799 = vmatprep.mubr.f32.mxu0 %v13186_v4  ;;  %13395 = vst [vmem:[#allocation5_spill] sm:$0xff] %v9725_v59  ;;  %v1222_v0 = vrot.slane %v9703_v43, %v9725_v59  ;;  %13396 = vst [vmem:[#allocation6_spill] sm:$0xff] %v9733_v3  ;;  %v1268_v12 = vrot.slane %v9703_v43, %v9733_v3  ;;  %v9747_v22 = vsub.s32 6, %v1093_v39  ;;  %v9771_v39 = vld [vmem:[%s13151_s6 + $0x18] sm:$0xff] }
  0x32   : > { %13397 = vst [vmem:[#allocation7_spill] sm:$0xff] %v9739_v13  ;;  %v1314_v21 = vrot.slane %v9703_v43, %v9739_v13  ;;  %13399 = vst [vmem:[#allocation9_spill] sm:$0xff] %v9755_v38 }
  0x33   : > { %13398 = vst [vmem:[#allocation8_spill] sm:$0xff] %v9747_v22 }
  0x34   : > { %8849 = vmatpush1.bf16.msra.mxu0 %v8848_v31  ;;  %9236 = vset.pattern.permute.xlu1 %v13210_v33 }
  0x35   : > { %8851 = vmatprep.subr.bf16.mxu0 %v9553_v23  ;;  %1395 = vperm.xlu1 %9236, %v9517_v1  }
  0x37   : > { %802 = vmatmul.mubr.f32.vlgmr.msra.gmra.mrb[0].mxu0 %v9549_v18  ;;  %v13212_v18 = vmov 11  }
  0x38   : > { %8853 = vmatpush1.bf16.msra.mxu0 %v9561_v27  ;;  %880 = vmatprep.mubr.f32.mxu0 %v13186_v4 }
  0x39   : > { %8855 = vmatprep.subr.bf16.mxu0 %v9581_v41  ;;  %9237 = vset.pattern.permute.xlu1 %v13218_v35 }
  0x3a   : > { %1439 = vperm.xlu1 %9237, %v9517_v1  }
  0x3c   : > { %8857 = vmatpush1.bf16.msra.mxu0 %v9590_v45 }
  0x3d   : > { %8859 = vmatprep.subr.bf16.mxu0 %v8858_v34 }
  0x3e   : > { %9238 = vset.pattern.permute.xlu1 %v13214_v24 }
  0x3f   : > { %884 = vmatmul.mubr.f32.vlgmr.msra.gmra.mrb[0].mxu0 %v598_v36  ;;  %1485 = vperm.xlu1 %9238, %v9517_v1   ;;  %v13176_v36 = vmov 18  }
  0x40   : > { %8861 = vmatpush1.bf16.msra.mxu0 %v8860_v37  ;;  %978 = vmatprep.mubr.f32.mxu0 %v13186_v4 }
  0x41   : > { %8863 = vmatprep.subr.bf16.mxu0 %v8862_v42 }
  0x43   : > { %9239 = vset.pattern.permute.xlu1 %v13228_v26  ;;  %v8759_v26 = vld [vmem:[%s13151_s6 + $0x30] ss:$0 sm:$0xff] }
  0x44   : > { %8865 = vmatpush1.bf16.msra.mxu0 %v8864_v25  ;;  %1531 = vperm.xlu1 %9239, %v9517_v1   ;;  %v1360_v25 = vrot.slane %v9703_v43, %v9747_v22 }
  0x45   : > { %8867 = vmatprep.subr.bf16.mxu0 %v9553_v23  ;;  %v13169_v23 = vmov 14  }
  0x47   : > { %980 = vmatmul.mubr.f32.vlgmr.msra.gmra.mrb[0].mxu0 %v9527_v6 }
  0x48   : > { %8869 = vmatpush1.bf16.msra.mxu0 %v9561_v27  ;;  %1058 = vmatprep.mubr.f32.mxu0 %v13186_v4  ;;  %v13182_v27 = vmov 15  }
  0x49   : > { %8871 = vmatprep.subr.bf16.mxu0 %v9581_v41  ;;  %9240 = vset.pattern.permute.xlu1 %v13212_v18  ;;  %v9698_v41 = vld [vmem:[%s13151_s6] sm:$0xff] }
  0x4a   : > { %1575 = vperm.xlu1 %9240, %v9517_v1   ;;  %v1095_v44 = vrot.slane %v9698_v41, %v9693_v40  ;;  %v1126_v50 = vrot.slane %v9698_v41, %v9709_v46  ;;  %v1172_v57 = vrot.slane %v9698_v41, %v9717_v52  ;;  %v1218_v63 = vrot.slane %v9698_v41, %v9725_v59 }
  0x4b   : > { %v1264_v11 = vrot.slane %v9698_v41, %v9733_v3  ;;  %v1310_v19 = vrot.slane %v9698_v41, %v9739_v13  ;;  %v1356_v42 = vrot.slane %v9698_v41, %v9747_v22 }
  0x4c   : > { %8873 = vmatpush1.bf16.msra.mxu0 %v9590_v45  ;;  %v1099_v45 = vrot.slane %v9703_v43, %v9693_v40 }
  0x4e   : > { %9241 = vset.pattern.permute.xlu1 %v13170_v28 }
  0x4f   : > { %1060 = vmatmul.mubr.f32.vlgmr.msra.gmra.mrb[0].mxu0 %v9527_v6  ;;  %1619 = vperm.xlu1 %9241, %v9517_v1   ;;  %v13167_v6 = vmov 17  }
  0x50   : > { %4745 = vmatprep.mubr.f32.mxu0 %v13186_v4 }
  0x53   : > { %9244 = vset.pattern.permute.xlu1 %v13169_v23 }
  0x54   : > { %1684 = vperm.xlu1 %9244, %v9517_v1  }
  0x58   : > { %9245 = vset.pattern.permute.xlu1 %v13182_v27 }
  0x59   : > { %1730 = vperm.xlu1 %9245, %v9517_v1  }
  0x5d   : > { %9246 = vset.pattern.permute.xlu1 %v13178_v30 }
  0x5e   : > { %1776 = vperm.xlu1 %9246, %v9517_v1  }
  0x62   : > { %9247 = vset.pattern.permute.xlu1 %v13167_v6 }
  0x63   : > { %1822 = vperm.xlu1 %9247, %v9517_v1  }
  0x67   : > { %9248 = vset.pattern.permute.xlu1 %v13176_v36  ;;  %v13180_v36 = vmov 23  }
  0x90   : > { %v1090_v47 = vpop.permute.xlu1 %1089 }
  0x91   : > { %v1100_v48 = vmul.f32 %v1095_v44, %v1090_v47  ;;  %v1101_v49 = vmul.f32 %v1099_v45, %v1090_v47 }
  0x93   : > { %1104 = vrot.lane.b32.xlu1 %v1100_v48, %s13164_s8  ;;  %1106 = vrot.lane.b32.xlu0 %v1101_v49, %s13164_s8  ;;  %v1401_v48 = vrot.slane %v9698_v41, %v9755_v38  ;;  %v1405_v49 = vrot.slane %v9703_v43, %v9755_v38  ;;  %s9374_s8 = smov 16  }
  0x95   : > { %v1121_v53 = vpop.permute.xlu1 %1120 }
  0x96   : > { %v1131_v55 = vmul.f32 %v1126_v50, %v1121_v53  ;;  %v1132_v56 = vmul.f32 %v1130_v51, %v1121_v53  ;;  %v9766_v50 = vld [vmem:[%s13151_s6 + $0x10] sm:$0xff] }
  0x97   : > { %v1445_v43 = vrot.slane %v9766_v50, %v9693_v40 }
  0x98   : > { %1137 = vrot.lane.b32.xlu1 %v1132_v56, %s13196_s24  ;;  %1135 = vrot.lane.b32.xlu0 %v1131_v55, %s13196_s24  ;;  %v1449_v55 = vrot.slane %v9771_v39, %v9693_v40 }
  0x9a   : > { %v1167_v60 = vpop.permute.xlu1 %1166 }
  0x9b   : > { %v1177_v61 = vmul.f32 %v1172_v57, %v1167_v60  ;;  %v1178_v62 = vmul.f32 %v1176_v58, %v1167_v60  ;;  %v1491_v60 = vrot.slane %v9766_v50, %v9709_v46 }
  0x9d   : > { %1183 = vrot.lane.b32.xlu1 %v1178_v62, %s13197_s26  ;;  %1181 = vrot.lane.b32.xlu0 %v1177_v61, %s13197_s26  ;;  %v1495_v61 = vrot.slane %v9771_v39, %v9709_v46 }
  0x9f   : > { %v1213_v5 = vpop.permute.xlu1 %1212 }
  0xa0   : > { %v1223_v9 = vmul.f32 %v1218_v63, %v1213_v5  ;;  %v1224_v10 = vmul.f32 %v1222_v0, %v1213_v5  ;;  %v1537_v5 = vrot.slane %v9766_v50, %v9717_v52 }
  0xa2   : > { %1229 = vrot.lane.b32.xlu1 %v1224_v10, %s9361_s27  ;;  %1227 = vrot.lane.b32.xlu0 %v1223_v9, %s9361_s27  ;;  %s9366_s27 = smov 113   ;;  %v1541_v9 = vrot.slane %v9771_v39, %v9717_v52 }
  0xa5   : > { %v1259_v15 = vpop.permute.xlu1 %1258 }
  0xa6   : > { %v1269_v16 = vmul.f32 %v1264_v11, %v1259_v15  ;;  %v1270_v17 = vmul.f32 %v1268_v12, %v1259_v15  ;;  %v1581_v15 = vrot.slane %v9766_v50, %v9725_v59 }
  0xa8   : > { %1275 = vrot.lane.b32.xlu1 %v1270_v17, %s13162_s29  ;;  %1273 = vrot.lane.b32.xlu0 %v1269_v16, %s13162_s29  ;;  %v1585_v16 = vrot.slane %v9771_v39, %v9725_v59  ;;  %v1644_v17 = vrot.slane %v9766_v50, %v9739_v13  ;;  %s9376_s29 = smov 17  }
  0xaa   : > { %v1305_v31 = vpop.permute.xlu1 %1304 }
  0xab   : > { %v1315_v34 = vmul.f32 %v1310_v19, %v1305_v31  ;;  %v1316_v37 = vmul.f32 %v1314_v21, %v1305_v31  ;;  %v1639_v21 = vpop.permute.xlu0 %1638 }
  0xad   : > { %1321 = vrot.lane.b32.xlu1 %v1316_v37, %s13201_s30  ;;  %1319 = vrot.lane.b32.xlu0 %v1315_v34, %s13201_s30  ;;  %v1649_v37 = vmul.f32 %v1644_v17, %v1639_v21 }
  0xaf   : > { %v1351_v44 = vpop.permute.xlu1 %1350  ;;  %v510_v23 = vpop.permute.xlu0 %509 }
  0xb0   : > { %v1361_v45 = vmul.f32 %v1356_v42, %v1351_v44  ;;  %v1362_v47 = vmul.f32 %v1360_v25, %v1351_v44  ;;  %v1648_v42 = vrot.slane %v9771_v39, %v9739_v13  ;;  %v1690_v44 = vrot.slane %v9766_v50, %v9747_v22 }
  0xb2   : > { %1367 = vrot.lane.b32.xlu1 %v1362_v47, %s13202_s16  ;;  %1365 = vrot.lane.b32.xlu0 %v1361_v45, %s13202_s16  ;;  %v1650_v45 = vmul.f32 %v1648_v42, %v1639_v21  ;;  %v1694_v47 = vrot.slane %v9771_v39, %v9747_v22 }
  0xb3   : > { %v1072_v28 = vpop.permute.xlu0 %1071 }
  0xb4   : > { %v1396_v51 = vpop.permute.xlu1 %1395 }
  0xb5   : > { %v1406_v41 = vmul.f32 %v1401_v48, %v1396_v51  ;;  %v1407_v53 = vmul.f32 %v1405_v49, %v1396_v51  ;;  %v1736_v51 = vrot.slane %v9766_v50, %v9755_v38 }
  0xb7   : > { %1412 = vrot.lane.b32.xlu1 %v1407_v53, %s13203_s23  ;;  %1410 = vrot.lane.b32.xlu0 %v1406_v41, %s13203_s23  ;;  %v1740_v41 = vrot.slane %v9771_v39, %v9755_v38 }
  0xb9   : > { %v1440_v56 = vpop.permute.xlu1 %1439 }
  0xba   : > { %v1450_v57 = vmul.f32 %v1445_v43, %v1440_v56  ;;  %v1451_v58 = vmul.f32 %v1449_v55, %v1440_v56  ;;  %v9813_v43 = vld [vmem:[%s13151_s6 + $0x20] sm:$0xff]  ;;  %v9818_v55 = vld [vmem:[%s13151_s6 + $0x28] sm:$0xff] }
  0xbb   : > { %v1782_v39 = vrot.slane %v9813_v43, %v9693_v40 }
  0xbc   : > { %1456 = vrot.lane.b32.xlu1 %v1451_v58, %s9366_s27  ;;  %1454 = vrot.lane.b32.xlu0 %v1450_v57, %s9366_s27  ;;  %s13194_s27 = smov 2   ;;  %v1786_v58 = vrot.slane %v9818_v55, %v9693_v40 }
  0xbe   : > { %v1486_v62 = vpop.permute.xlu1 %1485 }
  0xbf   : > { %v1496_v63 = vmul.f32 %v1491_v60, %v1486_v62  ;;  %v1497_v0 = vmul.f32 %v1495_v61, %v1486_v62 }
  0xc1   : > { %1502 = vrot.lane.b32.xlu1 %v1497_v0, %s9367_s17  ;;  %1500 = vrot.lane.b32.xlu0 %v1496_v63, %s9367_s17  ;;  %v1828_v63 = vrot.slane %v9813_v43, %v9709_v46  ;;  %v1832_v0 = vrot.slane %v9818_v55, %v9709_v46  ;;  %s9378_s17 = smov 18  }
  0xc3   : > { %v1532_v10 = vpop.permute.xlu1 %1531 }
  0xc4   : > { %v1542_v11 = vmul.f32 %v1537_v5, %v1532_v10  ;;  %v1543_v12 = vmul.f32 %v1541_v9, %v1532_v10 }
  0xc6   : > { %1548 = vrot.lane.b32.xlu1 %v1543_v12, %s13296_s18  ;;  %1546 = vrot.lane.b32.xlu0 %v1542_v11, %s13296_s18  ;;  %v13174_v11 = vmov 19  }
  0xc9   : > { %v1576_v19 = vpop.permute.xlu1 %1575 }
  0xca   : > { %v1586_v31 = vmul.f32 %v1581_v15, %v1576_v19  ;;  %v1587_v34 = vmul.f32 %v1585_v16, %v1576_v19 }
  0xcc   : > { %1592 = vrot.lane.b32.xlu1 %v1587_v34, %s9369_s19  ;;  %1590 = vrot.lane.b32.xlu0 %v1586_v31, %s9369_s19 }
  0xce   : > { %v9799_v25 = vpop.permute.xlu1 %1619 }
  0xd0   : > { %1653 = vrot.lane.b32.xlu1 %v1649_v37, %s9370_s22 }
  0xd3   : > { %v1685_v48 = vpop.permute.xlu1 %1684 }
  0xd4   : > { %v1695_v49 = vmul.f32 %v1690_v44, %v1685_v48  ;;  %1655 = vrot.lane.b32.xlu1 %v1650_v45, %s9370_s22  ;;  %v1696_v53 = vmul.f32 %v1694_v47, %v1685_v48  ;;  %s9372_s22 = smov 14  }
  0xd6   : > { %1699 = vrot.lane.b32.xlu0 %v1695_v49, %s13194_s27 }
  0xd8   : > { %1701 = vrot.lane.b32.xlu1 %v1696_v53, %s13194_s27  ;;  %v1731_v50 = vpop.permute.xlu1 %1730  ;;  %s13401_s27 = smov 94  }
  0xd9   : > { %v1741_v56 = vmul.f32 %v1736_v51, %v1731_v50  ;;  %v1742_v57 = vmul.f32 %v1740_v41, %v1731_v50 }
  0xdb   : > { %1745 = vrot.lane.b32.xlu0 %v1741_v56, %s9372_s22 }
  0xdc   : > { %1747 = vrot.lane.b32.xlu1 %v1742_v57, %s9372_s22  ;;  %v1874_v57 = vrot.slane %v9813_v43, %v9717_v52  ;;  %s13192_s22 = smov 30  }
  0xdd   : > { %v1777_v60 = vpop.permute.xlu1 %1776 }
  0xde   : > { %v1787_v61 = vmul.f32 %v1782_v39, %v1777_v60  ;;  %v1788_v62 = vmul.f32 %v1786_v58, %v1777_v60  ;;  %v1878_v39 = vrot.slane %v9818_v55, %v9717_v52 }
  0xe0   : > { %1793 = vrot.lane.b32.xlu1 %v1788_v62, %s9373_s25  ;;  %1791 = vrot.lane.b32.xlu0 %v1787_v61, %s9373_s25  ;;  %v13166_v62 = vmov 20   ;;  %s9382_s25 = smov 31  }
  0xe2   : > { %v1823_v5 = vpop.permute.xlu1 %1822 }
  0xe3   : > { %v1833_v9 = vmul.f32 %v1828_v63, %v1823_v5  ;;  %v1834_v10 = vmul.f32 %v1832_v0, %v1823_v5  ;;  %v1920_v0 = vrot.slane %v9813_v43, %v9725_v59  ;;  %v1924_v5 = vrot.slane %v9818_v55, %v9725_v59 }
  0xe5   : > { %1839 = vrot.lane.b32.xlu1 %v1834_v10, %s9374_s8  ;;  %1837 = vrot.lane.b32.xlu0 %v1833_v9, %s9374_s8  ;;  %s13207_s8 = smov 125  }
  0xe9   : > { %1868 = vperm.xlu1 %9248, %v9517_v1  }
  0xed   : > { %9249 = vset.pattern.permute.xlu1 %v13174_v11 }
 0x105   : > { %v9831_v12 = vpop.permute.xlu1 %1104 }
 0x10a   : > { %v9833_v15 = vpop.permute.xlu1 %1137 }
 0x10f   : > { %v9835_v16 = vpop.permute.xlu1 %1183 }
 0x114   : > { %v9837_v17 = vpop.permute.xlu1 %1229 }
 0x11a   : > { %v9839_v19 = vpop.permute.xlu1 %1275 }
 0x11f   : > { %v9841_v21 = vpop.permute.xlu1 %1321 }
 0x122   : > { %v1061_v31 = vpop.f32.mrb[0].mxu0 }
 0x123   : > { %v1063_v34 = vpop.f32.mrb[1].mxu0 }
 0x124   : > { %v9843_v37 = vpop.permute.xlu1 %1367 }
 0x129   : > { %v9845_v42 = vpop.permute.xlu1 %1412 }
 0x12e   : > { %v9847_v44 = vpop.permute.xlu1 %1456 }
 0x133   : > { %v9849_v45 = vpop.permute.xlu1 %1502 }
 0x138   : > { %v9851_v47 = vpop.permute.xlu1 %1548 }
 0x13e   : > { %v9853_v48 = vpop.permute.xlu1 %1592 }
 0x142   : > { %v9855_v49 = vpop.permute.xlu1 %1653 }
 0x146   : > { %v9857_v51 = vpop.permute.xlu1 %1655 }
 0x14a   : > { %v9859_v41 = vpop.permute.xlu1 %1701 }
 0x14e   : > { %v9861_v53 = vpop.permute.xlu1 %1747 }
 0x152   : > { %v9863_v50 = vpop.permute.xlu1 %1793 }
 0x157   : > { %v9865_v56 = vpop.permute.xlu1 %1839 }
 0x168   : > { %v1869_v58 = vpop.permute.xlu1 %1868 }
 0x169   : > { %v1879_v60 = vmul.f32 %v1874_v57, %v1869_v58  ;;  %v1880_v61 = vmul.f32 %v1878_v39, %v1869_v58  ;;  %v13216_v39 = vmov 21  }
 0x16b   : > { %1885 = vrot.lane.b32.xlu1 %v1880_v61, %s9376_s29  ;;  %1883 = vrot.lane.b32.xlu0 %v1879_v60, %s9376_s29  ;;  %v1966_v60 = vrot.slane %v9813_v43, %v9733_v3  ;;  %v1970_v61 = vrot.slane %v9818_v55, %v9733_v3  ;;  %s13205_s29 = smov 124  }
 0x16f   : > { %1914 = vperm.xlu1 %9249, %v9517_v1  }
 0x173   : > { %9250 = vset.pattern.permute.xlu1 %v13166_v62 }
 0x1dd   : > { %v9873_v63 = vpop.permute.xlu1 %1885 }
 0x1ee   : > { %v1915_v9 = vpop.permute.xlu1 %1914 }
 0x1ef   : > { %v1925_v10 = vmul.f32 %v1920_v0, %v1915_v9  ;;  %v1926_v57 = vmul.f32 %v1924_v5, %v1915_v9  ;;  %v13172_v5 = vmov 22  }
 0x1f1   : > { %1931 = vrot.lane.b32.xlu1 %v1926_v57, %s9378_s17  ;;  %1929 = vrot.lane.b32.xlu0 %v1925_v10, %s9378_s17  ;;  %v2012_v10 = vrot.slane %v9813_v43, %v9739_v13  ;;  %v2016_v57 = vrot.slane %v9818_v55, %v9739_v13  ;;  %s13190_s17 = smov 32  }
 0x1f5   : > { %1960 = vperm.xlu1 %9250, %v9517_v1  }
 0x1f9   : > { %9251 = vset.pattern.permute.xlu1 %v13216_v39 }
 0x263   : > { %v9881_v58 = vpop.permute.xlu1 %1931 }
 0x274   : > { %v1961_v62 = vpop.permute.xlu1 %1960 }
 0x275   : > { %v1971_v6 = vmul.f32 %v1966_v60, %v1961_v62  ;;  %v1972_v0 = vmul.f32 %v1970_v61, %v1961_v62 }
 0x277   : > { %1977 = vrot.lane.b32.xlu1 %v1972_v0, %s13192_s22  ;;  %1975 = vrot.lane.b32.xlu0 %v1971_v6, %s13192_s22  ;;  %v8874_v6 = vadd.f32 %v1061_v31, %v510_v23  ;;  %v8875_v0 = vadd.f32 %v1063_v34, %v510_v23  ;;  %s9391_s22 = smov 93  }
 0x279   : > { %v1075_v11 = vmul.f32 %v8875_v0, %v1072_v28  ;;  %vm1066_vm2 = vcmp.ge.f32.partialorder %v8874_v6, 0.0  ;;  %vm1067_vm3 = vcmp.ge.f32.partialorder %v8875_v0, 0.0 }
 0x27b   : > { %2006 = vperm.xlu1 %9251, %v9517_v1  }
 0x27f   : > { %9252 = vset.pattern.permute.xlu1 %v13172_v5  ;;  %v1074_v5 = vmul.f32 %v8874_v6, %v1072_v28 }
 0x281   : > { %v9899_v30 = vsel %vm1066_vm2, %v8874_v6, %v1074_v5  ;;  %vm1703_vm2 = vcmask 15360  }
 0x282   : > { %v4674_v23 = vsel %vm13265_vm4, %v9899_v30, 0 }
 0x283   : > { %v4681_v34 = vand.u32 4294901760, %v4674_v23 }
 0x285   : > { %v4764_v28 = vsub.f32 %v4674_v23, %v4681_v34 }
 0x287   : > { %v4765_v5 = vand.u32 4294901760, %v4764_v28 }
 0x2e9   : > { %v9891_v9 = vpop.permute.xlu1 %1977 }
 0x2fa   : > { %v2007_v60 = vpop.permute.xlu1 %2006 }
 0x2fb   : > { %v2017_v62 = vmul.f32 %v2012_v10, %v2007_v60  ;;  %v2018_v61 = vmul.f32 %v2016_v57, %v2007_v60  ;;  %v9901_v10 = vsel %vm1067_vm3, %v8875_v0, %v1075_v11  ;;  %v4766_v0 = vsub.f32 %v4764_v28, %v4765_v5 }
 0x2fc   : > { %v4677_v57 = vsel %vm13265_vm4, %v9901_v10, 0  ;;  %vm1749_vm3 = vcmask 113664   ;;  %vm13268_vm4 = vcmask 556032  }
 0x2fd   : > { %2023 = vrot.lane.b32.xlu1 %v2018_v61, %s9382_s25  ;;  %2021 = vrot.lane.b32.xlu0 %v2017_v62, %s9382_s25  ;;  %v4679_v31 = vand.u32 4294901760, %v4677_v57  ;;  %v4667_v62 = vld [vmem:[%s13152_s7] sm:$0x1f]  ;;  %v4767_v27 = vand.u32 4294901760, %v4766_v0  ;;  %s9386_s25 = smov 33  }
 0x2fe   : > { %v4670_v61 = vsel %vm13262_vm5, %v4667_v62, 0  ;;  %vm13272_vm5 = vcmask 539648  }
 0x2ff   : > { %v4758_v60 = vsub.f32 %v4677_v57, %v4679_v31  ;;  %4680 = vmatprep.subr.mxu0 %v4679_v31  ;;  %v4746_v7 = vand.u32 4294901760, %v4670_v61 }
 0x300   : > { %4682 = vmatpush1.msra.mxu0 %v4681_v34 }
 0x301   : > { %2052 = vperm.xlu1 %9252, %v9517_v1   ;;  %v4759_v11 = vand.u32 4294901760, %v4758_v60  ;;  %v9912_v57 = vsub.f32 %v4670_v61, %v4746_v7 }
 0x303   : > { %v4760_v6 = vsub.f32 %v4758_v60, %v4759_v11  ;;  %13400 = vst [vmem:[#allocation10_spill] sm:$0xff] %v9912_v57  ;;  %v13188_v23 = vand.u32 4294901760, %v9912_v57 }
 0x305   : > { %9253 = vset.pattern.permute.xlu1 %v13180_v36  ;;  %v4761_v36 = vand.u32 4294901760, %v4760_v6 }
 0x307   : > { %4762 = vmatprep.subr.mxu1 %v4761_v36  ;;  %v2058_v36 = vrot.slane %v9813_v43, %v9747_v22 }
 0x308   : > { %4768 = vmatpush1.msra.mxu1 %v4767_v27 }
 0x309   : > { %4833 = vmatmul.mubr.f32.vlgmr.msra.gmra.mrb[0].mxu1 %v4746_v7  ;;  %4841 = vmatprep.subr.mxu1 %v4758_v60  ;;  %v2062_v60 = vrot.slane %v9818_v55, %v9747_v22 }
 0x30a   : > { %4844 = vmatpush1.msra.mxu1 %v4764_v28  ;;  %4907 = vmatprep.mubr.f32.mxu1 %v13186_v4 }
 0x30b   : > { %4917 = vmatprep.subr.mxu1 %v4679_v31 }
 0x311   : > { %4910 = vmatmul.mubr.f32.vlgmr.msra.gmra.mrb[0].mxu1 %v9912_v57 }
 0x312   : > { %4919 = vmatpush1.msra.mxu1 %v4681_v34  ;;  %4982 = vmatprep.mubr.f32.mxu1 %v13186_v4 }
 0x313   : > { %4995 = vmatprep.subr.mxu1 %v4759_v11 }
 0x319   : > { %4986 = vmatmul.mubr.f32.vlgmr.msra.gmra.mrb[0].mxu1 %v13188_v23 }
 0x31a   : > { %4999 = vmatpush1.msra.mxu1 %v4765_v5  ;;  %5062 = vmatprep.mubr.f32.mxu1 %v13186_v4 }
 0x31b   : > { %5071 = vmatprep.subr.mxu1 %v4679_v31  ;;  %v9931_v31 = vpop.permute.xlu0 %1106 }
 0x31f   : > { %v1136_v5 = vpop.permute.xlu0 %1135 }
 0x320   : > { %v1144_v23 = vmul.f32 0.0, %v1136_v5 }
 0x321   : > { %5064 = vmatmul.mubr.f32.vlgmr.msra.gmra.mrb[0].mxu1 %v4746_v7 }
 0x322   : > { %5073 = vmatpush1.msra.mxu1 %v4681_v34  ;;  %5136 = vmatprep.mubr.f32.mxu1 %v13186_v4  ;;  %v13189_v34 = vmov 24  }
 0x323   : > { %v1182_v61 = vpop.permute.xlu0 %1181 }
 0x327   : > { %v1228_v6 = vpop.permute.xlu0 %1227 }
 0x329   : > { %5138 = vmatmul.mubr.f32.vlgmr.msra.gmra.mrb[0].mxu1 %v4746_v7 }
 0x32a   : > { %6939 = vmatprep.mubr.f32.mxu1 %v13186_v4  ;;  %v1140_v4 = vsel %vm1139_vm6, %v1136_v5, %v9833_v15  ;;  %v1232_v5 = vsel %vm1231_vm8, %v1228_v6, %v9837_v17  ;;  %vm1795_vm8 = vcmask 121856  }
 0x36f   : > { %v9920_v27 = vpop.permute.xlu1 %2023 }
 0x380   : > { %v2053_v28 = vpop.permute.xlu1 %2052 }
 0x381   : > { %v2063_v62 = vmul.f32 %v2058_v36, %v2053_v28  ;;  %v2064_v11 = vmul.f32 %v2062_v60, %v2053_v28  ;;  %v1274_v36 = vpop.permute.xlu0 %1273  ;;  %v2104_v60 = vrot.slane %v9813_v43, %v9755_v38  ;;  %v1186_v43 = vsel %vm1185_vm7, %v1182_v61, %v9835_v16 }
 0x383   : > { %2069 = vrot.lane.b32.xlu1 %v2064_v11, %s13190_s17  ;;  %2067 = vrot.lane.b32.xlu0 %v2063_v62, %s13190_s17  ;;  %s13199_s17 = smov 108  }
 0x385   : > { %v1320_v11 = vpop.permute.xlu0 %1319 }
 0x387   : > { %2098 = vperm.xlu1 %9253, %v9517_v1   ;;  %v2108_v1 = vrot.slane %v9818_v55, %v9755_v38  ;;  %v1190_v55 = vmul.f32 0.0, %v1182_v61  ;;  %v1278_v61 = vsel %vm1277_vm9, %v1274_v36, %v9839_v19 }
 0x38b   : > { %9254 = vset.pattern.permute.xlu1 %v13189_v34  ;;  %v1145_v34 = vmul.f32 %v1140_v4, %v9899_v30  ;;  %v1237_v4 = vmul.f32 %v1232_v5, %v9899_v30 }
 0x3f5   : > { %v9933_v0 = vpop.permute.xlu1 %2069 }
 0x406   : > { %v2099_v7 = vpop.permute.xlu1 %2098 }
 0x407   : > { %v2109_v28 = vmul.f32 %v2104_v60, %v2099_v7  ;;  %v2110_v62 = vmul.f32 %v2108_v1, %v2099_v7  ;;  %v1366_v60 = vpop.permute.xlu0 %1365  ;;  %v1191_v1 = vmul.f32 %v1186_v43, %v9899_v30  ;;  %v1236_v7 = vmul.f32 0.0, %v1228_v6 }
 0x408   : > { %v1324_v6 = vsel %vm1323_vm10, %v1320_v11, %v9841_v21 }
 0x409   : > { %2115 = vrot.lane.b32.xlu1 %v2110_v62, %s9386_s25  ;;  %2113 = vrot.lane.b32.xlu0 %v2109_v28, %s9386_s25  ;;  %v1283_v28 = vmul.f32 %v1278_v61, %v9899_v30  ;;  %v1328_v62 = vmul.f32 0.0, %v1320_v11  ;;  %v1329_v43 = vmul.f32 %v1324_v6, %v9899_v30  ;;  %s13200_s25 = smov 109  }
 0x40d   : > { %1150 = vrot.lane.b32.xlu0 %v1144_v23, %s9369_s19  ;;  %1152 = vrot.lane.b32.xlu1 %v1145_v34, %s9369_s19  ;;  %v1411_v23 = vpop.permute.xlu0 %1410  ;;  %v1282_v34 = vmul.f32 0.0, %v1274_v36  ;;  %v1374_v36 = vmul.f32 0.0, %v1366_v60 }
 0x40e   : > { %v1418_v11 = vmul.f32 0.0, %v1411_v23 }
 0x411   : > { %1196 = vrot.lane.b32.xlu0 %v1190_v55, %s13296_s18  ;;  %1198 = vrot.lane.b32.xlu1 %v1191_v1, %s13296_s18  ;;  %v1455_v55 = vpop.permute.xlu0 %1454  ;;  %v1370_v1 = vsel %vm1369_vm11, %v1366_v60, %v9843_v37 }
 0x412   : > { %v1375_v5 = vmul.f32 %v1370_v1, %v9899_v30  ;;  %v1463_v60 = vmul.f32 0.0, %v1455_v55 }
 0x415   : > { %1242 = vrot.lane.b32.xlu0 %v1236_v7, %s13207_s8  ;;  %1244 = vrot.lane.b32.xlu1 %v1237_v4, %s13207_s8  ;;  %v1414_v7 = vsel %vm13388_vm12, %v1411_v23, %v9845_v42  ;;  %v1501_v4 = vpop.permute.xlu0 %1500  ;;  %s13303_s8 = smov 62  }
 0x416   : > { %v1419_v61 = vmul.f32 %v1414_v7, %v9899_v30  ;;  %v1509_v23 = vmul.f32 0.0, %v1501_v4 }
 0x419   : > { %1288 = vrot.lane.b32.xlu0 %v1282_v34, %s13205_s29  ;;  %1290 = vrot.lane.b32.xlu1 %v1283_v28, %s13205_s29  ;;  %v1459_v34 = vsel %vm1458_vm13, %v1455_v55, %v9847_v44  ;;  %v1547_v6 = vpop.permute.xlu0 %1546  ;;  %vm1841_vm13 = vcmask 130048   ;;  %s9399_s29 = smov 63  }
 0x41a   : > { %v1464_v28 = vmul.f32 %v1459_v34, %v9899_v30  ;;  %v1550_v1 = vsel %vm1202_vm15, %v1547_v6, %v9851_v47  ;;  %v1554_v55 = vmul.f32 0.0, %v1547_v6  ;;  %v1623_v34 = vmul.f32 %v9799_v25, %v9901_v10 }
 0x41d   : > { %1334 = vrot.lane.b32.xlu0 %v1328_v62, %s13203_s23  ;;  %1336 = vrot.lane.b32.xlu1 %v1329_v43, %s13203_s23  ;;  %v1505_v62 = vsel %vm1504_vm14, %v1501_v4, %v9849_v45  ;;  %vm1887_vm14 = vcmask 138240   ;;  %s13306_s23 = smov 64  }
 0x41e   : > { %v1510_v43 = vmul.f32 %v1505_v62, %v9899_v30 }
 0x421   : > { %1380 = vrot.lane.b32.xlu0 %v1374_v36, %s13202_s16  ;;  %1382 = vrot.lane.b32.xlu1 %v1375_v5, %s13202_s16  ;;  %v1591_v36 = vpop.permute.xlu0 %1590  ;;  %v1555_v5 = vmul.f32 %v1550_v1, %v9899_v30  ;;  %v1756_v1 = vmul.f32 0.0, %v9861_v53  ;;  %s9397_s16 = smov 76  }
 0x422   : > { %v1594_v7 = vsel %vm1156_vm0, %v1591_v36, %v9853_v48  ;;  %v1598_v4 = vmul.f32 0.0, %v1591_v36 }
 0x425   : > { %1424 = vrot.lane.b32.xlu0 %v1418_v11, %s13201_s30  ;;  %1426 = vrot.lane.b32.xlu1 %v1419_v61, %s13201_s30  ;;  %v1599_v11 = vmul.f32 %v1594_v7, %v9899_v30  ;;  %v9990_v61 = vpop.permute.xlu0 %1699  ;;  %s9396_s30 = smov 77  }
 0x429   : > { %1469 = vrot.lane.b32.xlu0 %v1463_v60, %s13200_s25  ;;  %1471 = vrot.lane.b32.xlu1 %v1464_v28, %s13200_s25  ;;  %v1664_v60 = vmul.f32 0.0, %v9857_v51  ;;  %v1658_v28 = vsel %vm1657_vm1, %v9855_v49, %v9857_v51  ;;  %v9999_v6 = vpop.permute.xlu0 %1745  ;;  %s9395_s25 = smov 78   ;;  %vm1933_vm1 = vcmask 146432  }
 0x42a   : > { %v1663_v62 = vmul.f32 %v1658_v28, %v9901_v10  ;;  %v1894_v28 = vmul.f32 0.0, %v9873_v63 }
 0x42d   : > { %1515 = vrot.lane.b32.xlu0 %v1509_v23, %s13199_s17  ;;  %1517 = vrot.lane.b32.xlu1 %v1510_v43, %s13199_s17  ;;  %v1710_v23 = vmul.f32 0.0, %v9859_v41  ;;  %v1704_v43 = vsel %vm1703_vm2, %v9990_v61, %v9859_v41  ;;  %v10012_v36 = vpop.permute.xlu0 %1791  ;;  %s9394_s17 = smov 79  }
 0x42e   : > { %v1709_v51 = vmul.f32 %v1704_v43, %v9901_v10  ;;  %v1796_v7 = vsel %vm1795_vm8, %v10012_v36, %v9863_v50  ;;  %v1940_v43 = vmul.f32 0.0, %v9881_v58  ;;  %vm2025_vm8 = vcmask 252928  }
 0x431   : > { %1560 = vrot.lane.b32.xlu0 %v1554_v55, %s13197_s26  ;;  %1562 = vrot.lane.b32.xlu1 %v1555_v5, %s13197_s26  ;;  %v1750_v55 = vsel %vm1749_vm3, %v9999_v6, %v9861_v53  ;;  %s9393_s26 = smov 80   ;;  %v1802_v5 = vmul.f32 0.0, %v9863_v50  ;;  %v1801_v53 = vmul.f32 %v1796_v7, %v9901_v10  ;;  %vm13336_vm3 = vcmask 244736  }
 0x432   : > { %v1755_v41 = vmul.f32 %v1750_v55, %v9901_v10  ;;  %v1986_v55 = vmul.f32 0.0, %v9891_v9  ;;  %v2032_v7 = vmul.f32 0.0, %v9920_v27 }
 0x435   : > { %1604 = vrot.lane.b32.xlu0 %v1598_v4, %s13196_s24  ;;  %1606 = vrot.lane.b32.xlu1 %v1599_v11, %s13196_s24  ;;  %s13283_s24 = smov 92   ;;  %v1838_v4 = vpop.permute.xlu0 %1837  ;;  %v1848_v11 = vmul.f32 0.0, %v9865_v56 }
 0x439   : > { %1672 = vrot.lane.b32.xlu0 %v1664_v60, %s9391_s22  ;;  %1628 = vrot.lane.b32.xlu1 %v1623_v34, %s13401_s27  ;;  %v1842_v34 = vsel %vm1841_vm13, %v1838_v4, %v9865_v56  ;;  %v1884_v60 = vpop.permute.xlu0 %1883  ;;  %vm13341_vm13 = vcmask 261120  }
 0x43a   : > { %v1847_v50 = vmul.f32 %v1842_v34, %v9901_v10  ;;  %v2078_v34 = vmul.f32 0.0, %v9933_v0 }
 0x43d   : > { %1718 = vrot.lane.b32.xlu0 %v1710_v23, %s13283_s24  ;;  %1670 = vrot.lane.b32.xlu1 %v1663_v62, %s9391_s22  ;;  %v1888_v62 = vsel %vm1887_vm14, %v1884_v60, %v9873_v63  ;;  %v1930_v23 = vpop.permute.xlu0 %1929  ;;  %vm2117_vm14 = vcmask 269312  }
 0x43e   : > { %v1893_v56 = vmul.f32 %v1888_v62, %v9901_v10  ;;  %v1662_v62 = vmul.f32 %v9855_v49, %v9899_v30  ;;  %v1892_v49 = vmul.f32 %v1884_v60, %v9899_v30 }
 0x441   : > { %1764 = vrot.lane.b32.xlu0 %v1756_v1, %s9393_s26  ;;  %1716 = vrot.lane.b32.xlu1 %v1709_v51, %s13283_s24  ;;  %v1934_v51 = vsel %vm1933_vm1, %v1930_v23, %v9881_v58  ;;  %v1976_v1 = vpop.permute.xlu0 %1975  ;;  %vm13333_vm1 = vcmask 277504  }
 0x442   : > { %v1939_v63 = vmul.f32 %v1934_v51, %v9901_v10 }
 0x445   : > { %1810 = vrot.lane.b32.xlu0 %v1802_v5, %s9394_s17  ;;  %1762 = vrot.lane.b32.xlu1 %v1755_v41, %s9393_s26  ;;  %v1980_v41 = vsel %vm13336_vm3, %v1976_v1, %v9891_v9  ;;  %v2022_v5 = vpop.permute.xlu0 %2021 }
 0x446   : > { %v1985_v58 = vmul.f32 %v1980_v41, %v9901_v10 }
 0x449   : > { %1856 = vrot.lane.b32.xlu0 %v1848_v11, %s9395_s25  ;;  %1808 = vrot.lane.b32.xlu1 %v1801_v53, %s9394_s17  ;;  %v2026_v53 = vsel %vm2025_vm8, %v2022_v5, %v9920_v27  ;;  %v2068_v11 = vpop.permute.xlu0 %2067  ;;  %v1622_v27 = vmul.f32 %v9799_v25, %v9899_v30  ;;  %v1800_v25 = vmul.f32 %v10012_v36, %v9899_v30  ;;  %vm2088_vm8 = vcmask 506880  }
 0x44a   : > { %v2031_v9 = vmul.f32 %v2026_v53, %v9901_v10 }
 0x44d   : > { %1902 = vrot.lane.b32.xlu0 %v1894_v28, %s9396_s30  ;;  %1854 = vrot.lane.b32.xlu1 %v1847_v50, %s9395_s25  ;;  %v2072_v50 = vsel %vm13341_vm13, %v2068_v11, %v9933_v0  ;;  %v1708_v0 = vmul.f32 %v9990_v61, %v9899_v30  ;;  %v1938_v61 = vmul.f32 %v1930_v23, %v9899_v30 }
 0x44e   : > { %v2077_v28 = vmul.f32 %v2072_v50, %v9901_v10  ;;  %v2030_v23 = vmul.f32 %v2022_v5, %v9899_v30 }
 0x451   : > { %1948 = vrot.lane.b32.xlu0 %v1940_v43, %s9397_s16  ;;  %1900 = vrot.lane.b32.xlu1 %v1893_v56, %s9396_s30  ;;  %v1754_v56 = vmul.f32 %v9999_v6, %v9899_v30  ;;  %v1846_v43 = vmul.f32 %v1838_v4, %v9899_v30  ;;  %v1984_v4 = vmul.f32 %v1976_v1, %v9899_v30 }
 0x452   : > { %v2076_v1 = vmul.f32 %v2068_v11, %v9899_v30 }
 0x455   : > { %1994 = vrot.lane.b32.xlu0 %v1986_v55, %s13306_s23  ;;  %1946 = vrot.lane.b32.xlu1 %v1939_v63, %s9397_s16 }
 0x459   : > { %2040 = vrot.lane.b32.xlu0 %v2032_v7, %s9399_s29  ;;  %1992 = vrot.lane.b32.xlu1 %v1985_v58, %s13306_s23  ;;  %v9315_v58 = vld [vmem:[%s13149_s4] sm:$0x1f] }
 0x45d   : > { %2086 = vrot.lane.b32.xlu0 %v2078_v34, %s13303_s8  ;;  %2038 = vrot.lane.b32.xlu1 %v2031_v9, %s9399_s29 }
 0x461   : > { %1626 = vrot.lane.b32.xlu0 %v1622_v27, %s13401_s27  ;;  %2084 = vrot.lane.b32.xlu1 %v2077_v28, %s13303_s8  ;;  %v1146_v27 = vmul.f32 %v9833_v15, %v9901_v10  ;;  %v1192_v28 = vmul.f32 %v9835_v16, %v9901_v10  ;;  %v1330_v16 = vmul.f32 %v9841_v21, %v9901_v10 }
 0x462   : > { %v1465_v21 = vmul.f32 %v9847_v44, %v9901_v10  ;;  %v1600_v44 = vmul.f32 %v9853_v48, %v9901_v10 }
 0x465   : > { %1668 = vrot.lane.b32.xlu0 %v1662_v62, %s9391_s22  ;;  %s13423_s22 = smov 108  }
 0x469   : > { %1714 = vrot.lane.b32.xlu0 %v1708_v0, %s13283_s24 }
 0x46d   : > { %1760 = vrot.lane.b32.xlu0 %v1754_v56, %s9393_s26  ;;  %s9401_s26 = smov 61   ;;  %v1238_v56 = vmul.f32 %v9837_v17, %v9901_v10  ;;  %v1376_v17 = vmul.f32 %v9843_v37, %v9901_v10  ;;  %v1511_v37 = vmul.f32 %v9849_v45, %v9901_v10 }
 0x471   : > { %1806 = vrot.lane.b32.xlu0 %v1800_v25, %s9394_s17  ;;  %s13414_s17 = smov 112  }
 0x475   : > { %1852 = vrot.lane.b32.xlu0 %v1846_v43, %s9395_s25  ;;  %v1284_v43 = vmul.f32 %v9839_v19, %v9901_v10  ;;  %s13419_s25 = smov 110  }
 0x479   : > { %1898 = vrot.lane.b32.xlu0 %v1892_v49, %s9396_s30  ;;  %s13422_s30 = smov 109  }
 0x47b   : > { %v10078_v51 = vpop.permute.xlu1 %2115  ;;  %v2114_v6 = vpop.permute.xlu0 %2113 }
 0x47c   : > { %v2118_v63 = vsel %vm2117_vm14, %v2114_v6, %v10078_v51  ;;  %v2122_v5 = vmul.f32 %v2114_v6, %v9899_v30  ;;  %v2124_v45 = vmul.f32 0.0, %v10078_v51  ;;  %vm13329_vm14 = vcmask 523264  }
 0x47d   : > { %v2123_v36 = vmul.f32 %v2118_v63, %v9901_v10  ;;  %1944 = vrot.lane.b32.xlu0 %v1938_v61, %s9397_s16  ;;  %s13409_s16 = smov 125  }
 0x47f   : > { %v10084_v55 = vpop.permute.xlu0 %1150  ;;  %2130 = vrot.lane.b32.xlu1 %v2123_v36, %s9401_s26  ;;  %v10087_v60 = vpop.permute.xlu1 %1152  ;;  %v1420_v36 = vmul.f32 %v9845_v42, %v9901_v10  ;;  %v1556_v42 = vmul.f32 %v9851_v47, %v9901_v10 }
 0x480   : > { %13402 = vst [vmem:[#allocation11_spill] sm:$0xff] %v10084_v55 }
 0x481   : > { %1990 = vrot.lane.b32.xlu0 %v1984_v4, %s13306_s23 }
 0x483   : > { %v10091_v41 = vpop.permute.xlu0 %1196  ;;  %2144 = vperm.xlu1 %9254, %v9315_v58   ;;  %v10096_v7 = vpop.permute.xlu1 %1198 }
 0x484   : > { %13403 = vst [vmem:[#allocation12_spill] sm:$0xff] %v10091_v41 }
 0x485   : > { %2036 = vrot.lane.b32.xlu0 %v2030_v23, %s9399_s29  ;;  %s13416_s29 = smov 111  }
 0x487   : > { %v10100_v53 = vpop.permute.xlu0 %1242  ;;  %9255 = vset.pattern.permute.xlu1 %v13208_v2  ;;  %v10103_v9 = vpop.permute.xlu1 %1244 }
 0x488   : > { %13404 = vst [vmem:[#allocation13_spill] sm:$0xff] %v10100_v53 }
 0x489   : > { %2082 = vrot.lane.b32.xlu0 %v2076_v1, %s13303_s8 }
 0x48b   : > { %v10107_v34 = vpop.permute.xlu0 %1288  ;;  %v10110_v50 = vpop.permute.xlu1 %1290 }
 0x48c   : > { %13405 = vst [vmem:[#allocation14_spill] sm:$0xff] %v10107_v34 }
 0x48d   : > { %2128 = vrot.lane.b32.xlu0 %v2122_v5, %s9401_s26 }
 0x48f   : > { %v10114_v11 = vpop.permute.xlu0 %1334  ;;  %v10121_v0 = vpop.permute.xlu1 %1336 }
 0x490   : > { %13406 = vst [vmem:[#allocation15_spill] sm:$0xff] %v10114_v11 }
 0x491   : > { %1154 = vrot.lane.b32.xlu0 %v1146_v27, %s9369_s19  ;;  %s13411_s19 = smov 124  }
 0x493   : > { %v10119_v62 = vpop.permute.xlu0 %1380  ;;  %v10129_v15 = vpop.permute.xlu1 %1382 }
 0x494   : > { %13407 = vst [vmem:[#allocation16_spill] sm:$0xff] %v10119_v62 }
 0x495   : > { %1200 = vrot.lane.b32.xlu0 %v1192_v28, %s13296_s18 }
 0x497   : > { %v10126_v25 = vpop.permute.xlu0 %1424  ;;  %v10140_v6 = vpop.permute.xlu1 %1426 }
 0x498   : > { %13408 = vst [vmem:[#allocation17_spill] sm:$0xff] %v10126_v25  ;;  %13413 = vst [vmem:[#allocation20_spill] sm:$0xff] %v10140_v6 }
 0x499   : > { %1246 = vrot.lane.b32.xlu0 %v1238_v56, %s13409_s16  ;;  %s13426_s16 = smov 96  }
 0x49b   : > { %v10133_v49 = vpop.permute.xlu0 %1469  ;;  %v10148_v19 = vpop.permute.xlu1 %1471 }
 0x49c   : > { %13410 = vst [vmem:[#allocation18_spill] sm:$0xff] %v10133_v49  ;;  %13417 = vst [vmem:[#allocation22_spill] sm:$0xff] %v10148_v19 }
 0x49d   : > { %1292 = vrot.lane.b32.xlu0 %v1284_v43, %s13411_s19 }
 0x49f   : > { %v10138_v61 = vpop.permute.xlu0 %1515  ;;  %v10157_v23 = vpop.permute.xlu1 %1517 }
 0x4a0   : > { %13412 = vst [vmem:[#allocation19_spill] sm:$0xff] %v10138_v61  ;;  %13420 = vst [vmem:[#allocation24_spill] sm:$0xff] %v10157_v23 }
 0x4a1   : > { %1338 = vrot.lane.b32.xlu0 %v1330_v16, %s13414_s17 }
 0x4a3   : > { %v10145_v63 = vpop.permute.xlu0 %1560  ;;  %v10165_v1 = vpop.permute.xlu1 %1562 }
 0x4a4   : > { %13415 = vst [vmem:[#allocation21_spill] sm:$0xff] %v10145_v63  ;;  %13424 = vst [vmem:[#allocation26_spill] sm:$0xff] %v10165_v1 }
 0x4a5   : > { %1384 = vrot.lane.b32.xlu0 %v1376_v17, %s13416_s29  ;;  %s13429_s29 = smov 95  }
 0x4a7   : > { %v10152_v4 = vpop.permute.xlu0 %1604  ;;  %v10174_v27 = vpop.permute.xlu1 %1606 }
 0x4a8   : > { %13418 = vst [vmem:[#allocation23_spill] sm:$0xff] %v10152_v4  ;;  %13427 = vst [vmem:[#allocation28_spill] sm:$0xff] %v10174_v27 }
 0x4a9   : > { %1428 = vrot.lane.b32.xlu0 %v1420_v36, %s13419_s25  ;;  %s9404_s25 = smov 66  }
 0x4ab   : > { %v10159_v58 = vpop.permute.xlu0 %1672  ;;  %v10181_v56 = vpop.permute.xlu1 %1628 }
 0x4ac   : > { %13421 = vst [vmem:[#allocation25_spill] sm:$0xff] %v10159_v58  ;;  %13430 = vst [vmem:[#allocation30_spill] sm:$0xff] %v10181_v56 }
 0x4ad   : > { %1473 = vrot.lane.b32.xlu0 %v1465_v21, %s13422_s30  ;;  %s13278_s30 = smov 122  }
 0x4af   : > { %v10169_v5 = vpop.permute.xlu0 %1718  ;;  %v10185_v43 = vpop.permute.xlu1 %1670 }
 0x4b0   : > { %13425 = vst [vmem:[#allocation27_spill] sm:$0xff] %v10169_v5  ;;  %13432 = vst [vmem:[#allocation32_spill] sm:$0xff] %v10185_v43 }
 0x4b1   : > { %1519 = vrot.lane.b32.xlu0 %v1511_v37, %s13423_s22  ;;  %s13276_s22 = smov 120  }
 0x4b3   : > { %v10176_v28 = vpop.permute.xlu0 %1764  ;;  %v10189_v17 = vpop.permute.xlu1 %1716 }
 0x4b4   : > { %13428 = vst [vmem:[#allocation29_spill] sm:$0xff] %v10176_v28  ;;  %13434 = vst [vmem:[#allocation34_spill] sm:$0xff] %v10189_v17 }
 0x4b5   : > { %1564 = vrot.lane.b32.xlu0 %v1556_v42, %s13426_s16 }
 0x4b7   : > { %v10183_v47 = vpop.permute.xlu0 %1810  ;;  %v10193_v36 = vpop.permute.xlu1 %1762 }
 0x4b8   : > { %13431 = vst [vmem:[#allocation31_spill] sm:$0xff] %v10183_v47  ;;  %13436 = vst [vmem:[#allocation36_spill] sm:$0xff] %v10193_v36 }
 0x4b9   : > { %1608 = vrot.lane.b32.xlu0 %v1600_v44, %s13429_s29  ;;  %s13249_s29 = smov 34  }
 0x4bb   : > { %v10187_v16 = vpop.permute.xlu0 %1856  ;;  %v10197_v37 = vpop.permute.xlu1 %1808 }
 0x4bc   : > { %13433 = vst [vmem:[#allocation33_spill] sm:$0xff] %v10187_v16  ;;  %13438 = vst [vmem:[#allocation38_spill] sm:$0xff] %v10197_v37 }
 0x4bd   : > { %2132 = vrot.lane.b32.xlu0 %v2124_v45, %s9401_s26  ;;  %s13285_s26 = smov 60  }
 0x4bf   : > { %v10191_v48 = vpop.permute.xlu0 %1902  ;;  %v10201_v42 = vpop.permute.xlu1 %1854 }
 0x4c0   : > { %13435 = vst [vmem:[#allocation35_spill] sm:$0xff] %v10191_v48  ;;  %13440 = vst [vmem:[#allocation40_spill] sm:$0xff] %v10201_v42  ;;  %v10308_v42 = vld [vmem:[%s13151_s6 + $0x48] sm:$0xff] }
 0x4c1   : > { %v2221_v5 = vrot.slane %v10308_v42, %v9693_v40  ;;  %v2251_v25 = vrot.slane %v10308_v42, %v9709_v46  ;;  %v2519_v53 = vrot.slane %v10308_v42, %v9755_v38 }
 0x4c3   : > { %v10195_v21 = vpop.permute.xlu0 %1948  ;;  %v10205_v45 = vpop.permute.xlu1 %1900 }
 0x4c4   : > { %13437 = vst [vmem:[#allocation37_spill] sm:$0xff] %v10195_v21  ;;  %13442 = vst [vmem:[#allocation42_spill] sm:$0xff] %v10205_v45 }
 0x4c7   : > { %v10199_v51 = vpop.permute.xlu0 %1994  ;;  %v10209_v33 = vpop.permute.xlu1 %1946 }
 0x4c8   : > { %13439 = vst [vmem:[#allocation39_spill] sm:$0xff] %v10199_v51  ;;  %13444 = vst [vmem:[#allocation44_spill] sm:$0xff] %v10209_v33 }
 0x4cb   : > { %v10203_v44 = vpop.permute.xlu0 %2040  ;;  %v10213_v24 = vpop.permute.xlu1 %1992 }
 0x4cc   : > { %13441 = vst [vmem:[#allocation41_spill] sm:$0xff] %v10203_v44  ;;  %13446 = vst [vmem:[#allocation46_spill] sm:$0xff] %v10213_v24 }
 0x4cf   : > { %v10207_v2 = vpop.permute.xlu0 %2086  ;;  %v10217_v35 = vpop.permute.xlu1 %2038 }
 0x4d0   : > { %13443 = vst [vmem:[#allocation43_spill] sm:$0xff] %v10207_v2  ;;  %13448 = vst [vmem:[#allocation48_spill] sm:$0xff] %v10217_v35 }
 0x4d3   : > { %v10211_v18 = vpop.permute.xlu0 %1626  ;;  %v10221_v20 = vpop.permute.xlu1 %2084 }
 0x4d4   : > { %13445 = vst [vmem:[#allocation45_spill] sm:$0xff] %v10211_v18  ;;  %13450 = vst [vmem:[#allocation50_spill] sm:$0xff] %v10221_v20 }
 0x4d7   : > { %v10215_v39 = vpop.permute.xlu0 %1668 }
 0x4d8   : > { %13447 = vst [vmem:[#allocation47_spill] sm:$0xff] %v10215_v39 }
 0x4db   : > { %v10219_v29 = vpop.permute.xlu0 %1714 }
 0x4dc   : > { %13449 = vst [vmem:[#allocation49_spill] sm:$0xff] %v10219_v29 }
 0x4df   : > { %v10223_v14 = vpop.permute.xlu0 %1760 }
 0x4e0   : > { %13451 = vst [vmem:[#allocation51_spill] sm:$0xff] %v10223_v14 }
 0x4e3   : > { %v10233_v32 = vpop.permute.xlu0 %1806 }
 0x4e4   : > { %13453 = vst [vmem:[#allocation53_spill] sm:$0xff] %v10233_v32 }
 0x4e7   : > { %v10237_v51 = vpop.permute.xlu0 %1852 }
 0x4e8   : > { %13454 = vst [vmem:[#allocation54_spill] sm:$0xff] %v10237_v51  ;;  %v2189_v51 = vld [vmem:[%s13150_s5] sm:$0x1f] }
 0x4f1   : > { %v10225_v54 = vpop.permute.xlu1 %2130 }
 0x4f2   : > { %13452 = vst [vmem:[#allocation52_spill] sm:$0xff] %v10225_v54  ;;  %v10239_v54 = vpop.permute.xlu0 %1898 }
 0x4f3   : > { %13455 = vst [vmem:[#allocation55_spill] sm:$0xff] %v10239_v54 }
 0x4f6   : > { %v10241_v20 = vpop.permute.xlu0 %1944 }
 0x4f7   : > { %13456 = vst [vmem:[#allocation56_spill] sm:$0xff] %v10241_v20 }
 0x4fa   : > { %v10243_v21 = vpop.permute.xlu0 %1990 }
 0x4fb   : > { %13457 = vst [vmem:[#allocation57_spill] sm:$0xff] %v10243_v21 }
 0x4fe   : > { %v10245_v35 = vpop.permute.xlu0 %2036 }
 0x4ff   : > { %13458 = vst [vmem:[#allocation58_spill] sm:$0xff] %v10245_v35 }
 0x502   : > { %v2145_v57 = vpop.permute.xlu1 %2144  ;;  %v10247_v48 = vpop.permute.xlu0 %2082 }
 0x503   : > { %v2155_v2 = vmul.f32 %v8759_v26, %v2145_v57  ;;  %v2156_v44 = vmul.f32 %v8760_v8, %v2145_v57  ;;  %13459 = vst [vmem:[#allocation59_spill] sm:$0xff] %v10247_v48 }
 0x505   : > { %2161 = vrot.lane.b32.xlu1 %v2156_v44, %s13249_s29  ;;  %2159 = vrot.lane.b32.xlu0 %v2155_v2, %s13249_s29  ;;  %s13327_s29 = smov 68  }
 0x506   : > { %v10249_v24 = vpop.permute.xlu0 %2128 }
 0x507   : > { %13460 = vst [vmem:[#allocation60_spill] sm:$0xff] %v10249_v24 }
 0x50a   : > { %v10251_v8 = vpop.permute.xlu0 %1154 }
 0x50e   : > { %v10253_v26 = vpop.permute.xlu0 %1200 }
 0x512   : > { %v10255_v57 = vpop.permute.xlu0 %1246 }
 0x516   : > { %v10257_v2 = vpop.permute.xlu0 %1292 }
 0x51a   : > { %v10259_v44 = vpop.permute.xlu0 %1338 }
 0x51e   : > { %v10261_v16 = vpop.permute.xlu0 %1384 }
 0x522   : > { %v10263_v20 = vpop.permute.xlu0 %1428 }
 0x523   : > { %13461 = vst [vmem:[#allocation61_spill] sm:$0xff] %v10263_v20 }
 0x526   : > { %v10265_v21 = vpop.permute.xlu0 %1473 }
 0x527   : > { %13462 = vst [vmem:[#allocation62_spill] sm:$0xff] %v10265_v21  ;;  %v10688_v21 = vld [vmem:[%s13151_s6 + $0x80] sm:$0xff] }
 0x528   : > { %v3347_v6 = vrot.slane %v10688_v21, %v9709_v46 }
 0x52a   : > { %v10267_v35 = vpop.permute.xlu0 %1519 }
 0x52b   : > { %13463 = vst [vmem:[#allocation63_spill] sm:$0xff] %v10267_v35 }
 0x52e   : > { %v10269_v48 = vpop.permute.xlu0 %1564 }
 0x52f   : > { %13464 = vst [vmem:[#allocation64_spill] sm:$0xff] %v10269_v48 }
 0x532   : > { %v10271_v24 = vpop.permute.xlu0 %1608 }
 0x533   : > { %13465 = vst [vmem:[#allocation65_spill] sm:$0xff] %v10271_v24 }
 0x536   : > { %v10273_v33 = vpop.permute.xlu0 %2132 }
 0x537   : > { %13466 = vst [vmem:[#allocation66_spill] sm:$0xff] %v10273_v33  ;;  %v10287_v33 = vld [vmem:[%s13149_s4 + $0x8] sm:$0x1f] }
 0x577   : > { %v2162_v47 = vpop.permute.xlu1 %2161  ;;  %v2160_v54 = vpop.permute.xlu0 %2159 }
 0x578   : > { %v2164_v45 = vsel %vm13333_vm1, %v2160_v54, %v2162_v47  ;;  %v2168_v4 = vmul.f32 %v2160_v54, %v9899_v30  ;;  %v2170_v63 = vmul.f32 0.0, %v2162_v47  ;;  %v13467_v54 = vmov 2  }
 0x579   : > { %v2169_v28 = vmul.f32 %v2164_v45, %v9901_v10 }
 0x57a   : > { %2174 = vrot.lane.b32.xlu0 %v2168_v4, %s13285_s26  ;;  %v13468_v4 = vmov 1  }
 0x57b   : > { %2176 = vrot.lane.b32.xlu1 %v2169_v28, %s13285_s26  ;;  %v13469_v28 = vmov 10  }
 0x57e   : > { %2178 = vrot.lane.b32.xlu0 %v2170_v63, %s13285_s26  ;;  %v10299_v63 = vld [vmem:[%s13151_s6 + $0x40] sm:$0xff] }
 0x57f   : > { %2192 = vperm.xlu1 %9255, %v2189_v51   ;;  %v2217_v45 = vrot.slane %v10299_v63, %v9693_v40  ;;  %v2247_v49 = vrot.slane %v10299_v63, %v9709_v46 }
 0x582   : > { %2211 = vperm.xlu0 %9243, %v10287_v33  }
 0x583   : > { %9257 = vset.pattern.permute.xlu1 %v13467_v54 }
 0x586   : > { %9256 = vset.pattern.permute.xlu0 %v13468_v4 }
 0x587   : > { %2241 = vperm.xlu0 %9256, %v10287_v33  }
 0x58b   : > { %9264 = vset.pattern.permute.xlu0 %v13469_v28 }
 0x5ec   : > { %v10294_v47 = vpop.permute.xlu0 %2174 }
 0x5ed   : > { %13470 = vst [vmem:[#allocation67_spill] sm:$0xff] %v10294_v47  ;;  %v10320_v14 = vpop.permute.xlu1 %2176 }
 0x5ee   : > { %13472 = vst [vmem:[#allocation69_spill] sm:$0xff] %v10320_v14 }
 0x5f0   : > { %v10301_v51 = vpop.permute.xlu0 %2178 }
 0x5f1   : > { %13471 = vst [vmem:[#allocation68_spill] sm:$0xff] %v10301_v51 }
 0x601   : > { %v2212_v61 = vpop.permute.xlu0 %2211 }
 0x602   : > { %v2222_v47 = vmul.f32 %v2217_v45, %v2212_v61  ;;  %v2223_v32 = vmul.f32 %v2221_v5, %v2212_v61  ;;  %v10322_v45 = vpop.permute.xlu1 %2192 }
 0x603   : > { %13473 = vst [vmem:[#allocation70_spill] sm:$0xff] %v10322_v45 }
 0x604   : > { %2226 = vrot.lane.b32.xlu1 %v2222_v47, %s13285_s26 }
 0x606   : > { %v2242_v51 = vpop.permute.xlu0 %2241 }
 0x607   : > { %v2252_v37 = vmul.f32 %v2247_v49, %v2242_v51  ;;  %v2253_v58 = vmul.f32 %v2251_v25, %v2242_v51 }
 0x608   : > { %2228 = vrot.lane.b32.xlu1 %v2223_v32, %s13285_s26  ;;  %s9408_s26 = smov 100  }
 0x60c   : > { %2256 = vrot.lane.b32.xlu1 %v2252_v37, %s13303_s8  ;;  %v13476_v37 = vmov 3  }
 0x610   : > { %2258 = vrot.lane.b32.xlu1 %v2253_v58, %s13303_s8 }
 0x676   : > { %v10324_v47 = vpop.permute.xlu1 %2226 }
 0x677   : > { %13474 = vst [vmem:[#allocation71_spill] sm:$0xff] %v10324_v47 }
 0x67a   : > { %v10326_v36 = vpop.permute.xlu1 %2228 }
 0x67b   : > { %13475 = vst [vmem:[#allocation72_spill] sm:$0xff] %v10326_v36 }
 0x67e   : > { %v2257_v61 = vpop.permute.xlu1 %2256 }
 0x67f   : > { %v2264_v5 = vmul.f32 0.0, %v2257_v61 }
 0x681   : > { %2270 = vrot.lane.b32.xlu0 %v2264_v5, %s13296_s18  ;;  %v2291_v5 = vrot.slane %v10299_v63, %v9717_v52 }
 0x682   : > { %v2259_v32 = vpop.permute.xlu1 %2258 }
 0x683   : > { %v2260_v49 = vsel %vm2088_vm8, %v2257_v61, %v2259_v32  ;;  %v2266_v25 = vmul.f32 %v2259_v32, %v9901_v10  ;;  %v2295_v61 = vrot.slane %v10308_v42, %v9717_v52 }
 0x684   : > { %v2265_v58 = vmul.f32 %v2260_v49, %v9899_v30 }
 0x685   : > { %2274 = vrot.lane.b32.xlu0 %v2266_v25, %s13296_s18 }
 0x686   : > { %2272 = vrot.lane.b32.xlu1 %v2265_v58, %s13296_s18 }
 0x68a   : > { %2285 = vperm.xlu1 %9257, %v10287_v33  }
 0x68e   : > { %9258 = vset.pattern.permute.xlu1 %v13476_v37 }
 0x6f3   : > { %v10344_v49 = vpop.permute.xlu0 %2270 }
 0x6f4   : > { %13478 = vst [vmem:[#allocation74_spill] sm:$0xff] %v10344_v49 }
 0x6f7   : > { %v10346_v25 = vpop.permute.xlu0 %2274 }
 0x6f8   : > { %v10336_v51 = vpop.permute.xlu1 %2272  ;;  %13479 = vst [vmem:[#allocation75_spill] sm:$0xff] %v10346_v25 }
 0x6f9   : > { %13477 = vst [vmem:[#allocation73_spill] sm:$0xff] %v10336_v51 }
 0x709   : > { %v2286_v36 = vpop.permute.xlu1 %2285 }
 0x70a   : > { %v2296_v32 = vmul.f32 %v2291_v5, %v2286_v36  ;;  %v2297_v47 = vmul.f32 %v2295_v61, %v2286_v36  ;;  %v2335_v61 = vrot.slane %v10299_v63, %v9725_v59 }
 0x70c   : > { %2302 = vrot.lane.b32.xlu1 %v2297_v47, %s13306_s23  ;;  %2300 = vrot.lane.b32.xlu0 %v2296_v32, %s13306_s23  ;;  %v13480_v47 = vmov 4  }
 0x77e   : > { %v2303_v58 = vpop.permute.xlu1 %2302  ;;  %v2301_v51 = vpop.permute.xlu0 %2300 }
 0x77f   : > { %v2304_v45 = vsel %vm13329_vm14, %v2301_v51, %v2303_v58  ;;  %v2308_v14 = vmul.f32 0.0, %v2301_v51  ;;  %v2310_v36 = vmul.f32 %v2303_v58, %v9901_v10  ;;  %vm2815_vm14 = vcmask 31744  }
 0x780   : > { %v2309_v62 = vmul.f32 %v2304_v45, %v9899_v30  ;;  %v2339_v45 = vrot.slane %v10308_v42, %v9725_v59 }
 0x781   : > { %2314 = vrot.lane.b32.xlu0 %v2308_v14, %s13411_s19 }
 0x782   : > { %2316 = vrot.lane.b32.xlu1 %v2309_v62, %s13411_s19 }
 0x785   : > { %2318 = vrot.lane.b32.xlu0 %v2310_v36, %s13411_s19 }
 0x786   : > { %2329 = vperm.xlu1 %9258, %v10287_v33  }
 0x78a   : > { %9259 = vset.pattern.permute.xlu1 %v13480_v47 }
 0x7f3   : > { %v10364_v62 = vpop.permute.xlu0 %2314 }
 0x7f4   : > { %v10356_v5 = vpop.permute.xlu1 %2316  ;;  %13482 = vst [vmem:[#allocation77_spill] sm:$0xff] %v10364_v62 }
 0x7f5   : > { %13481 = vst [vmem:[#allocation76_spill] sm:$0xff] %v10356_v5 }
 0x7f7   : > { %v10366_v58 = vpop.permute.xlu0 %2318 }
 0x7f8   : > { %13483 = vst [vmem:[#allocation78_spill] sm:$0xff] %v10366_v58 }
 0x805   : > { %v2330_v51 = vpop.permute.xlu1 %2329 }
 0x806   : > { %v2340_v14 = vmul.f32 %v2335_v61, %v2330_v51  ;;  %v2341_v32 = vmul.f32 %v2339_v45, %v2330_v51  ;;  %v13484_v45 = vmov 5  }
 0x808   : > { %2346 = vrot.lane.b32.xlu1 %v2341_v32, %s9404_s25  ;;  %2344 = vrot.lane.b32.xlu0 %v2340_v14, %s9404_s25 }
 0x87a   : > { %v2347_v36 = vpop.permute.xlu1 %2346  ;;  %v2345_v25 = vpop.permute.xlu0 %2344 }
 0x87b   : > { %v2349_v5 = vsel %vm13272_vm5, %v2345_v25, %v2347_v36  ;;  %v2353_v49 = vmul.f32 0.0, %v2345_v25  ;;  %v2355_v61 = vmul.f32 %v2347_v36, %v9901_v10  ;;  %v2381_v25 = vrot.slane %v10299_v63, %v9733_v3 }
 0x87c   : > { %v2354_v11 = vmul.f32 %v2349_v5, %v9899_v30  ;;  %v2385_v5 = vrot.slane %v10308_v42, %v9733_v3  ;;  %vm1108_vm5 = vcmask 769024  }
 0x87d   : > { %2359 = vrot.lane.b32.xlu0 %v2353_v49, %s13278_s30 }
 0x87e   : > { %2361 = vrot.lane.b32.xlu1 %v2354_v11, %s13278_s30 }
 0x881   : > { %2363 = vrot.lane.b32.xlu0 %v2355_v61, %s13278_s30  ;;  %s13308_s30 = smov 4  }
 0x882   : > { %2375 = vperm.xlu1 %9259, %v10287_v33  }
 0x886   : > { %9260 = vset.pattern.permute.xlu1 %v13484_v45 }
 0x8ef   : > { %v10384_v11 = vpop.permute.xlu0 %2359 }
 0x8f0   : > { %v10376_v51 = vpop.permute.xlu1 %2361  ;;  %13486 = vst [vmem:[#allocation80_spill] sm:$0xff] %v10384_v11 }
 0x8f1   : > { %13485 = vst [vmem:[#allocation79_spill] sm:$0xff] %v10376_v51 }
 0x8f3   : > { %v10386_v36 = vpop.permute.xlu0 %2363 }
 0x8f4   : > { %13487 = vst [vmem:[#allocation81_spill] sm:$0xff] %v10386_v36 }
 0x901   : > { %v2376_v14 = vpop.permute.xlu1 %2375 }
 0x902   : > { %v2386_v49 = vmul.f32 %v2381_v25, %v2376_v14  ;;  %v2387_v32 = vmul.f32 %v2385_v5, %v2376_v14  ;;  %v13488_v5 = vmov 6  }
 0x904   : > { %2392 = vrot.lane.b32.xlu1 %v2387_v32, %s13327_s29  ;;  %2390 = vrot.lane.b32.xlu0 %v2386_v49, %s13327_s29 }
 0x976   : > { %v2393_v61 = vpop.permute.xlu1 %2392  ;;  %v2391_v58 = vpop.permute.xlu0 %2390 }
 0x977   : > { %v2395_v51 = vsel %vm13268_vm4, %v2391_v58, %v2393_v61  ;;  %v2399_v62 = vmul.f32 0.0, %v2391_v58  ;;  %v2401_v25 = vmul.f32 %v2393_v61, %v9901_v10  ;;  %v2427_v58 = vrot.slane %v10299_v63, %v9739_v13 }
 0x978   : > { %v2400_v34 = vmul.f32 %v2395_v51, %v9899_v30  ;;  %v2431_v51 = vrot.slane %v10308_v42, %v9739_v13  ;;  %vm1720_vm4 = vcmask 752640  }
 0x979   : > { %2405 = vrot.lane.b32.xlu0 %v2399_v62, %s13276_s22 }
 0x97a   : > { %2407 = vrot.lane.b32.xlu1 %v2400_v34, %s13276_s22 }
 0x97d   : > { %2409 = vrot.lane.b32.xlu0 %v2401_v25, %s13276_s22  ;;  %s13516_s22 = smov 30  }
 0x97e   : > { %2421 = vperm.xlu1 %9260, %v10287_v33  }
 0x982   : > { %9261 = vset.pattern.permute.xlu1 %v13488_v5 }
 0x9eb   : > { %v10404_v34 = vpop.permute.xlu0 %2405 }
 0x9ec   : > { %v10396_v14 = vpop.permute.xlu1 %2407  ;;  %13490 = vst [vmem:[#allocation83_spill] sm:$0xff] %v10404_v34 }
 0x9ed   : > { %13489 = vst [vmem:[#allocation82_spill] sm:$0xff] %v10396_v14 }
 0x9ef   : > { %v10406_v61 = vpop.permute.xlu0 %2409 }
 0x9f0   : > { %13491 = vst [vmem:[#allocation84_spill] sm:$0xff] %v10406_v61 }
 0x9fd   : > { %v2422_v49 = vpop.permute.xlu1 %2421 }
 0x9fe   : > { %v2432_v62 = vmul.f32 %v2427_v58, %v2422_v49  ;;  %v2433_v32 = vmul.f32 %v2431_v51, %v2422_v49  ;;  %v13492_v51 = vmov 8  }
 0xa00   : > { %2438 = vrot.lane.b32.xlu1 %v2433_v32, %s13283_s24  ;;  %2436 = vrot.lane.b32.xlu0 %v2432_v62, %s13283_s24  ;;  %v2471_v62 = vrot.slane %v10299_v63, %v9747_v22  ;;  %s13509_s24 = smov 98  }
 0xa72   : > { %v2439_v25 = vpop.permute.xlu1 %2438  ;;  %v2437_v36 = vpop.permute.xlu0 %2436 }
 0xa73   : > { %v2440_v14 = vsel %vm1720_vm4, %v2437_v36, %v2439_v25  ;;  %v2444_v11 = vmul.f32 0.0, %v2437_v36  ;;  %v2446_v58 = vmul.f32 %v2439_v25, %v9901_v10  ;;  %v2475_v36 = vrot.slane %v10308_v42, %v9747_v22 }
 0xa74   : > { %v2445_v29 = vmul.f32 %v2440_v14, %v9899_v30 }
 0xa75   : > { %2450 = vrot.lane.b32.xlu0 %v2444_v11, %s13426_s16 }
 0xa76   : > { %2452 = vrot.lane.b32.xlu1 %v2445_v29, %s13426_s16 }
 0xa79   : > { %2454 = vrot.lane.b32.xlu0 %v2446_v58, %s13426_s16 }
 0xa7a   : > { %2465 = vperm.xlu1 %9261, %v10287_v33  }
 0xa7e   : > { %9262 = vset.pattern.permute.xlu1 %v13492_v51 }
 0xae7   : > { %v10424_v29 = vpop.permute.xlu0 %2450 }
 0xae8   : > { %v10416_v49 = vpop.permute.xlu1 %2452  ;;  %13494 = vst [vmem:[#allocation86_spill] sm:$0xff] %v10424_v29  ;;  %v13506_v29 = vmov 23  }
 0xae9   : > { %13493 = vst [vmem:[#allocation85_spill] sm:$0xff] %v10416_v49 }
 0xaeb   : > { %v10426_v25 = vpop.permute.xlu0 %2454 }
 0xaec   : > { %13495 = vst [vmem:[#allocation87_spill] sm:$0xff] %v10426_v25  ;;  %v13505_v25 = vmov 22  }
 0xaf9   : > { %v2466_v14 = vpop.permute.xlu1 %2465 }
 0xafa   : > { %v2476_v11 = vmul.f32 %v2471_v62, %v2466_v14  ;;  %v2477_v32 = vmul.f32 %v2475_v36, %v2466_v14  ;;  %v13496_v62 = vmov 21   ;;  %v13497_v36 = vmov 9  }
 0xafb   : > { %v13501_v14 = vmov 15  }
 0xafc   : > { %2482 = vrot.lane.b32.xlu1 %v2477_v32, %s13401_s27  ;;  %2480 = vrot.lane.b32.xlu0 %v2476_v11, %s13401_s27  ;;  %v13503_v11 = vmov 18   ;;  %v13504_v32 = vmov 19  }
 0xb6e   : > { %v10428_v58 = vpop.permute.xlu1 %2482  ;;  %v2481_v61 = vpop.permute.xlu0 %2480 }
 0xb6f   : > { %v2484_v49 = vsel %vm1108_vm5, %v2481_v61, %v10428_v58  ;;  %v2488_v34 = vmul.f32 0.0, %v2481_v61  ;;  %v10444_v61 = vld [vmem:[%s13149_s4 + $0x10] sm:$0x1f] }
 0xb70   : > { %v2489_v17 = vmul.f32 %v2484_v49, %v9899_v30  ;;  %v13500_v49 = vmov 13  }
 0xb71   : > { %2494 = vrot.lane.b32.xlu0 %v2488_v34, %s13401_s27  ;;  %v13499_v34 = vmov 7  }
 0xb72   : > { %2496 = vrot.lane.b32.xlu1 %v2489_v17, %s13401_s27  ;;  %v13498_v17 = vmov 11  }
 0xb75   : > { %2644 = vperm.xlu0 %9264, %v10287_v33  }
 0xb76   : > { %2553 = vperm.xlu1 %9262, %v10287_v33  }
 0xb79   : > { %9271 = vset.pattern.permute.xlu0 %v13496_v62 }
 0xb7a   : > { %3096 = vperm.xlu0 %9271, %v10287_v33   ;;  %9263 = vset.pattern.permute.xlu1 %v13497_v36 }
 0xb7b   : > { %2598 = vperm.xlu1 %9263, %v10287_v33  }
 0xb7e   : > { %9276 = vset.pattern.permute.xlu0 %v13480_v47  ;;  %v13502_v47 = vmov 16  }
 0xb7f   : > { %3459 = vperm.xlu0 %9276, %v10444_v61   ;;  %9265 = vset.pattern.permute.xlu1 %v13498_v17 }
 0xb80   : > { %2688 = vperm.xlu1 %9265, %v10287_v33  }
 0xb83   : > { %9277 = vset.pattern.permute.xlu0 %v13499_v34 }
 0xb84   : > { %2509 = vperm.xlu0 %9277, %v10287_v33   ;;  %9266 = vset.pattern.permute.xlu1 %v13500_v49 }
 0xb85   : > { %2751 = vperm.xlu1 %9266, %v10287_v33  }
 0xb88   : > { %3592 = vperm.xlu0 %9277, %v10444_v61  }
 0xb89   : > { %9267 = vset.pattern.permute.xlu1 %v13501_v14 }
 0xb8a   : > { %2842 = vperm.xlu1 %9267, %v10287_v33  }
 0xb8c   : > { %9282 = vset.pattern.permute.xlu0 %v13498_v17 }
 0xb8e   : > { %9268 = vset.pattern.permute.xlu1 %v13502_v47 }
 0xb8f   : > { %2887 = vperm.xlu1 %9268, %v10287_v33  }
 0xb93   : > { %9269 = vset.pattern.permute.xlu1 %v13503_v11 }
 0xb94   : > { %2975 = vperm.xlu1 %9269, %v10287_v33  }
 0xb98   : > { %9270 = vset.pattern.permute.xlu1 %v13504_v32 }
 0xb99   : > { %3020 = vperm.xlu1 %9270, %v10287_v33  }
 0xb9d   : > { %9272 = vset.pattern.permute.xlu1 %v13505_v25 }
 0xb9e   : > { %3140 = vperm.xlu1 %9272, %v10287_v33  }
 0xba2   : > { %9273 = vset.pattern.permute.xlu1 %v13506_v29 }
 0xba3   : > { %3184 = vperm.xlu1 %9273, %v10287_v33  }
 0xba7   : > { %9274 = vset.pattern.permute.xlu1 %v13468_v4 }
 0xba8   : > { %3341 = vperm.xlu1 %9274, %v10444_v61  }
 0xbac   : > { %9275 = vset.pattern.permute.xlu1 %v13476_v37 }
 0xbad   : > { %3414 = vperm.xlu1 %9275, %v10444_v61  }
 0xbb1   : > { %9278 = vset.pattern.permute.xlu1 %v13484_v45 }
 0xbb2   : > { %3504 = vperm.xlu1 %9278, %v10444_v61  }
 0xbb6   : > { %9279 = vset.pattern.permute.xlu1 %v13488_v5  ;;  %v2515_v5 = vrot.slane %v10299_v63, %v9755_v38 }
 0xbb7   : > { %3548 = vperm.xlu1 %9279, %v10444_v61  }
 0xbbb   : > { %9280 = vset.pattern.permute.xlu1 %v13492_v51 }
 0xbbc   : > { %3636 = vperm.xlu1 %9280, %v10444_v61  }
 0xbc0   : > { %9281 = vset.pattern.permute.xlu1 %v13497_v36  ;;  %v10496_v36 = vld [vmem:[%s13151_s6 + $0x50] sm:$0xff] }
 0xbc1   : > { %3681 = vperm.xlu1 %9281, %v10444_v61   ;;  %v2604_v18 = vrot.slane %v10496_v36, %v9709_v46 }
 0xbc5   : > { %9287 = vset.pattern.permute.xlu1 %v13501_v14  ;;  %v10501_v14 = vld [vmem:[%s13151_s6 + $0x58] sm:$0xff] }
 0xbc6   : > { %v2563_v63 = vrot.slane %v10501_v14, %v9693_v40  ;;  %v2608_v27 = vrot.slane %v10501_v14, %v9709_v46 }
 0xbe3   : > { %v10481_v4 = vpop.permute.xlu0 %2494 }
 0xbe4   : > { %13507 = vst [vmem:[#allocation88_spill] sm:$0xff] %v10481_v4  ;;  %v10485_v17 = vpop.permute.xlu1 %2496 }
 0xbe5   : > { %13508 = vst [vmem:[#allocation89_spill] sm:$0xff] %v10485_v17  ;;  %v2559_v17 = vrot.slane %v10496_v36, %v9693_v40 }
 0xbf4   : > { %v2645_v37 = vpop.permute.xlu0 %2644 }
 0xbf5   : > { %v2554_v4 = vpop.permute.xlu1 %2553 }
 0xbf6   : > { %v2564_v43 = vmul.f32 %v2559_v17, %v2554_v4  ;;  %v2565_v55 = vmul.f32 %v2563_v63, %v2554_v4  ;;  %v13511_v17 = vmov 14   ;;  %v2761_v63 = vrot.slane %v10501_v14, %v9739_v13 }
 0xbf9   : > { %v10483_v45 = vpop.permute.xlu0 %3096 }
 0xbfa   : > { %v2599_v56 = vpop.permute.xlu1 %2598 }
 0xbfb   : > { %v2609_v24 = vmul.f32 %v2604_v18, %v2599_v56  ;;  %v2694_v18 = vrot.slane %v10496_v36, %v9725_v59 }
 0xbfe   : > { %v10487_v34 = vpop.permute.xlu0 %3459 }
 0xc03   : > { %v2510_v41 = vpop.permute.xlu0 %2509 }
 0xc04   : > { %v2520_v39 = vmul.f32 %v2515_v5, %v2510_v41  ;;  %v2521_v42 = vmul.f32 %v2519_v53, %v2510_v41  ;;  %v2610_v5 = vmul.f32 %v2608_v27, %v2599_v56  ;;  %v13510_v41 = vmov 12  }
 0xc05   : > { %v2698_v56 = vrot.slane %v10501_v14, %v9725_v59 }
 0xc06   : > { %2524 = vrot.lane.b32.xlu0 %v2520_v39, %s13426_s16  ;;  %2526 = vrot.lane.b32.xlu1 %v2521_v42, %s13426_s16  ;;  %v2650_v39 = vrot.slane %v10496_v36, %v9717_v52  ;;  %s13513_s16 = smov 2  }
 0xc08   : > { %v2655_v53 = vmul.f32 %v2650_v39, %v2645_v37 }
 0xc0a   : > { %2570 = vrot.lane.b32.xlu1 %v2565_v55, %s13509_s24  ;;  %2568 = vrot.lane.b32.xlu0 %v2564_v43, %s13509_s24  ;;  %v2654_v55 = vrot.slane %v10501_v14, %v9717_v52  ;;  %s13517_s24 = smov 32  }
 0xc0c   : > { %v2656_v27 = vmul.f32 %v2654_v55, %v2645_v37  ;;  %v2757_v37 = vrot.slane %v10496_v36, %v9739_v13 }
 0xc0e   : > { %3757 = vperm.xlu0 %9282, %v10444_v61   ;;  %2613 = vrot.lane.b32.xlu1 %v2609_v24, %s9408_s26  ;;  %v2689_v24 = vpop.permute.xlu1 %2688 }
 0xc0f   : > { %v2699_v43 = vmul.f32 %v2694_v18, %v2689_v24  ;;  %v2700_v4 = vmul.f32 %v2698_v56, %v2689_v24 }
 0xc12   : > { %9283 = vset.pattern.permute.xlu0 %v13510_v41  ;;  %2615 = vrot.lane.b32.xlu1 %v2610_v5, %s9408_s26  ;;  %v2752_v42 = vpop.permute.xlu1 %2751  ;;  %v13512_v5 = vmov 17   ;;  %s13518_s26 = smov 34  }
 0xc13   : > { %2732 = vperm.xlu0 %9283, %v10287_v33   ;;  %v2762_v39 = vmul.f32 %v2757_v37, %v2752_v42  ;;  %v2763_v55 = vmul.f32 %v2761_v63, %v2752_v42 }
 0xc16   : > { %2659 = vrot.lane.b32.xlu1 %v2655_v53, %s13411_s19  ;;  %v10547_v53 = vpop.permute.xlu0 %3592  ;;  %v2843_v63 = vpop.permute.xlu1 %2842 }
 0xc17   : > { %9284 = vset.pattern.permute.xlu0 %v13500_v49  ;;  %v10574_v49 = vld [vmem:[%s13151_s6 + $0x60] sm:$0xff] }
 0xc18   : > { %3820 = vperm.xlu0 %9284, %v10444_v61   ;;  %13514 = vst [vmem:[#allocation90_spill] sm:$0xff] %v10574_v49 }
 0xc1a   : > { %2661 = vrot.lane.b32.xlu1 %v2656_v27, %s13411_s19 }
 0xc1c   : > { %9285 = vset.pattern.permute.xlu0 %v13511_v17  ;;  %v2802_v17 = vrot.slane %v10496_v36, %v9747_v22 }
 0xc1d   : > { %2796 = vperm.xlu0 %9285, %v10287_v33  }
 0xc1e   : > { %2703 = vrot.lane.b32.xlu1 %v2699_v43, %s13296_s18 }
 0xc21   : > { %3864 = vperm.xlu0 %9285, %v10444_v61  }
 0xc22   : > { %2705 = vrot.lane.b32.xlu1 %v2700_v4, %s13296_s18  ;;  %v2806_v4 = vrot.slane %v10501_v14, %v9747_v22  ;;  %s13301_s18 = smov 28  }
 0xc25   : > { %9286 = vset.pattern.permute.xlu0 %v13512_v5 }
 0xc26   : > { %2931 = vperm.xlu0 %9286, %v10287_v33   ;;  %3908 = vperm.xlu1 %9287, %v10444_v61  }
 0xc2a   : > { %2768 = vrot.lane.b32.xlu0 %v2763_v55, %s13513_s16  ;;  %2766 = vrot.lane.b32.xlu1 %v2762_v39, %s13513_s16  ;;  %s9411_s16 = smov 36  }
 0xc2b   : > { %9288 = vset.pattern.permute.xlu1 %v13502_v47  ;;  %v2852_v47 = vrot.slane %v10501_v14, %v9755_v38 }
 0xc2e   : > { %3952 = vperm.xlu1 %9288, %v10444_v61  }
 0xc32   : > { %9290 = vset.pattern.permute.xlu1 %v13504_v32  ;;  %v2848_v32 = vrot.slane %v10496_v36, %v9755_v38  ;;  %v10579_v36 = vld [vmem:[%s13151_s6 + $0x68] sm:$0xff] }
 0xc33   : > { %13515 = vst [vmem:[#allocation91_spill] sm:$0xff] %v10579_v36  ;;  %v2941_v14 = vrot.slane %v10579_v36, %v9709_v46  ;;  %v2897_v48 = vrot.slane %v10579_v36, %v9693_v40 }
 0xc34   : > { %v2853_v55 = vmul.f32 %v2848_v32, %v2843_v63  ;;  %v2854_v32 = vmul.f32 %v2852_v47, %v2843_v63  ;;  %v3026_v47 = vrot.slane %v10574_v49, %v9725_v59 }
 0xc78   : > { %v10549_v18 = vpop.permute.xlu0 %2524 }
 0xc7c   : > { %v10551_v24 = vpop.permute.xlu0 %2568 }
 0xc8d   : > { %v10553_v27 = vpop.permute.xlu0 %3757 }
 0xc92   : > { %v10555_v56 = vpop.permute.xlu0 %2732 }
 0xc97   : > { %v10557_v43 = vpop.permute.xlu0 %3820 }
 0xc9c   : > { %v2797_v37 = vpop.permute.xlu0 %2796 }
 0xc9d   : > { %v2807_v42 = vmul.f32 %v2802_v17, %v2797_v37  ;;  %v2808_v39 = vmul.f32 %v2806_v4, %v2797_v37  ;;  %v2893_v17 = vrot.slane %v10574_v49, %v9693_v40  ;;  %v2888_v4 = vpop.permute.xlu1 %2887 }
 0xc9e   : > { %v2899_v63 = vmul.f32 %v2897_v48, %v2888_v4 }
 0xc9f   : > { %2811 = vrot.lane.b32.xlu0 %v2807_v42, %s13308_s30  ;;  %2813 = vrot.lane.b32.xlu1 %v2808_v39, %s13308_s30  ;;  %v2898_v37 = vmul.f32 %v2893_v17, %v2888_v4  ;;  %v2985_v39 = vrot.slane %v10579_v36, %v9717_v52  ;;  %v3030_v4 = vrot.slane %v10579_v36, %v9725_v59  ;;  %s13323_s30 = smov 8  }
 0xca0   : > { %v10569_v5 = vpop.permute.xlu0 %3864 }
 0xca3   : > { %3996 = vperm.xlu0 %9286, %v10444_v61   ;;  %2857 = vrot.lane.b32.xlu1 %v2853_v55, %s13301_s18  ;;  %v2976_v55 = vpop.permute.xlu1 %2975 }
 0xca4   : > { %v2987_v23 = vmul.f32 %v2985_v39, %v2976_v55  ;;  %v3190_v39 = vrot.slane %v10574_v49, %v9755_v38 }
 0xca5   : > { %v2932_v42 = vpop.permute.xlu0 %2931 }
 0xca6   : > { %v2943_v1 = vmul.f32 %v2941_v14, %v2932_v42 }
 0xca7   : > { %9289 = vset.pattern.permute.xlu0 %v13503_v11  ;;  %2859 = vrot.lane.b32.xlu1 %v2854_v32, %s13301_s18  ;;  %v3021_v17 = vpop.permute.xlu1 %3020  ;;  %v2937_v32 = vrot.slane %v10574_v49, %v9709_v46  ;;  %v8770_v11 = vld [vmem:[%s13151_s6 + $0x70] ss:$0 sm:$0xff]  ;;  %s13526_s18 = smov 92  }
 0xca8   : > { %4040 = vperm.xlu0 %9289, %v10444_v61   ;;  %v3031_v14 = vmul.f32 %v3026_v47, %v3021_v17 }
 0xcab   : > { %2902 = vrot.lane.b32.xlu1 %v2898_v37, %s13516_s22  ;;  %v2981_v37 = vrot.slane %v10574_v49, %v9717_v52 }
 0xcac   : > { %2948 = vrot.lane.b32.xlu0 %v2943_v1, %s13517_s24  ;;  %v2942_v1 = vmul.f32 %v2937_v32, %v2932_v42  ;;  %v3146_v32 = vrot.slane %v10574_v49, %v9747_v22 }
 0xcad   : > { %9292 = vset.pattern.permute.xlu0 %v13506_v29  ;;  %v2986_v48 = vmul.f32 %v2981_v37, %v2976_v55  ;;  %v3141_v29 = vpop.permute.xlu1 %3140  ;;  %v3032_v55 = vmul.f32 %v3030_v4, %v3021_v17  ;;  %v3150_v37 = vrot.slane %v10579_v36, %v9747_v22 }
 0xcaf   : > { %2904 = vrot.lane.b32.xlu1 %v2899_v63, %s13516_s22  ;;  %v3106_v63 = vrot.slane %v10579_v36, %v9739_v13 }
 0xcb0   : > { %2992 = vrot.lane.b32.xlu0 %v2987_v23, %s13518_s26  ;;  %v13519_v23 = vmov 24  }
 0xcb1   : > { %v3185_v42 = vpop.permute.xlu1 %3184  ;;  %v3108_v17 = vmul.f32 %v3106_v63, %v10483_v45 }
 0xcb2   : > { %v3195_v47 = vmul.f32 %v3190_v39, %v3185_v42 }
 0xcb3   : > { %4084 = vperm.xlu1 %9290, %v10444_v61  }
 0xcb4   : > { %3035 = vrot.lane.b32.xlu0 %v3031_v14, %s9411_s16 }
 0xcb7   : > { %2946 = vrot.lane.b32.xlu1 %v2942_v1, %s13517_s24  ;;  %v3152_v1 = vmul.f32 %v3150_v37, %v3141_v29 }
 0xcb8   : > { %4231 = vperm.xlu0 %9292, %v10444_v61   ;;  %9291 = vset.pattern.permute.xlu1 %v13496_v62  ;;  %v3102_v62 = vrot.slane %v10574_v49, %v9739_v13 }
 0xcba   : > { %v3107_v14 = vmul.f32 %v3102_v62, %v10483_v45  ;;  %v10640_v62 = vpop.permute.xlu0 %2768 }
 0xcbb   : > { %2990 = vrot.lane.b32.xlu1 %v2986_v48, %s13518_s26  ;;  %v3194_v48 = vrot.slane %v10579_v36, %v9755_v38  ;;  %v8771_v36 = vld [vmem:[%s13151_s6 + $0x78] ss:$0 sm:$0xff] }
 0xcbc   : > { %9293 = vset.pattern.permute.xlu0 %v13519_v23  ;;  %v3342_v23 = vpop.permute.xlu1 %3341 }
 0xcbd   : > { %3228 = vperm.xlu0 %9293, %v10287_v33  }
 0xcbf   : > { %4158 = vperm.xlu1 %9291, %v10444_v61  }
 0xcc0   : > { %v3415_v4 = vpop.permute.xlu1 %3414 }
 0xcc1   : > { %4275 = vperm.xlu0 %9293, %v10444_v61  }
 0xcc3   : > { %3037 = vrot.lane.b32.xlu1 %v3032_v55, %s9411_s16  ;;  %s13524_s16 = smov 60  }
 0xcc4   : > { %9294 = vset.pattern.permute.xlu1 %v13467_v54  ;;  %v3151_v54 = vmul.f32 %v3146_v32, %v3141_v29  ;;  %v3505_v45 = vpop.permute.xlu1 %3504 }
 0xcc5   : > { %3199 = vrot.lane.b32.xlu0 %v3195_v47, %s9404_s25 }
 0xcc6   : > { %9295 = vset.pattern.permute.xlu0 %v13469_v28  ;;  %v3196_v28 = vmul.f32 %v3194_v48, %v3185_v42 }
 0xcc7   : > { %3111 = vrot.lane.b32.xlu1 %v3107_v14, %s13303_s8 }
 0xcc8   : > { %v10638_v39 = vpop.permute.xlu1 %3548 }
 0xccb   : > { %3113 = vrot.lane.b32.xlu1 %v3108_v17, %s13303_s8  ;;  %s13527_s8 = smov 64  }
 0xccc   : > { %v10642_v55 = vpop.permute.xlu1 %3636 }
 0xccf   : > { %3155 = vrot.lane.b32.xlu1 %v3151_v54, %s13306_s23 }
 0xcd0   : > { %v10648_v63 = vpop.permute.xlu1 %3681 }
 0xcd3   : > { %3157 = vrot.lane.b32.xlu1 %v3152_v1, %s13306_s23  ;;  %s13523_s23 = smov 4  }
 0xcd4   : > { %v10652_v14 = vpop.permute.xlu1 %2526 }
 0xcd7   : > { %3201 = vrot.lane.b32.xlu1 %v3196_v28, %s9404_s25  ;;  %v10669_v28 = vld [vmem:[%s13151_s6 + $0x88] sm:$0xff]  ;;  %s13325_s25 = smov 56  }
 0xcd8   : > { %v10658_v37 = vpop.permute.xlu1 %2570  ;;  %v3351_v49 = vrot.slane %v10669_v28, %v9709_v46  ;;  %v3424_v19 = vrot.slane %v10669_v28, %v9725_v59 }
 0xcdc   : > { %v10662_v1 = vpop.permute.xlu1 %2613 }
 0xd11   : > { %v10644_v29 = vpop.permute.xlu0 %2811 }
 0xd22   : > { %v10646_v47 = vpop.permute.xlu0 %3996 }
 0xd27   : > { %v10650_v42 = vpop.permute.xlu0 %4040 }
 0xd28   : > { %13520 = vst [vmem:[#allocation92_spill] sm:$0xff] %v10650_v42  ;;  %v3353_v42 = vmul.f32 %v3351_v49, %v3342_v23  ;;  %v3420_v49 = vrot.slane %v10688_v21, %v9725_v59 }
 0xd2b   : > { %v10654_v32 = vpop.permute.xlu0 %2948 }
 0xd2f   : > { %v10656_v17 = vpop.permute.xlu0 %2992 }
 0xd33   : > { %v10660_v54 = vpop.permute.xlu0 %3035 }
 0xd34   : > { %13521 = vst [vmem:[#allocation93_spill] sm:$0xff] %v10660_v54  ;;  %v10679_v54 = vpop.permute.xlu1 %2615 }
 0xd37   : > { %v10664_v48 = vpop.permute.xlu0 %4231 }
 0xd38   : > { %13522 = vst [vmem:[#allocation94_spill] sm:$0xff] %v10664_v48  ;;  %v10692_v20 = vpop.permute.xlu1 %2659 }
 0xd3c   : > { %v3229_v35 = vpop.permute.xlu0 %3228 }
 0xd3d   : > { %v3239_v48 = vmul.f32 %v8770_v11, %v3229_v35  ;;  %v3240_v25 = vmul.f32 %v8771_v36, %v3229_v35  ;;  %v3426_v11 = vmul.f32 %v3424_v19, %v3415_v4  ;;  %v3469_v35 = vrot.slane %v10669_v28, %v9733_v3  ;;  %v10702_v36 = vpop.permute.xlu1 %2661 }
 0xd3e   : > { %v3465_v19 = vrot.slane %v10688_v21, %v9733_v3 }
 0xd3f   : > { %3245 = vrot.lane.b32.xlu1 %v3240_v25, %s13327_s29  ;;  %3243 = vrot.lane.b32.xlu0 %v3239_v48, %s13327_s29  ;;  %v3352_v25 = vmul.f32 %v3347_v6, %v3342_v23  ;;  %v3425_v48 = vmul.f32 %v3420_v49, %v3415_v4  ;;  %v3514_v6 = vrot.slane %v10669_v28, %v9739_v13  ;;  %s9414_s29 = smov 90  }
 0xd40   : > { %v3554_v23 = vrot.slane %v10688_v21, %v9747_v22 }
 0xd41   : > { %v10717_v3 = vpop.permute.xlu1 %2703 }
 0xd42   : > { %v3559_v4 = vmul.f32 %v3554_v23, %v10638_v39  ;;  %v2534_v23 = vmul.f32 %v10652_v14, %v9901_v10 }
 0xd43   : > { %3385 = vperm.xlu1 %9294, %v10444_v61   ;;  %3358 = vrot.lane.b32.xlu0 %v3353_v42, %s13411_s19  ;;  %v3471_v42 = vmul.f32 %v3469_v35, %v10487_v34 }
 0xd45   : > { %v10724_v49 = vpop.permute.xlu1 %2705 }
 0xd47   : > { %3356 = vrot.lane.b32.xlu1 %v3352_v25, %s13411_s19  ;;  %3431 = vrot.lane.b32.xlu0 %v3426_v11, %s13523_s23  ;;  %v3470_v11 = vmul.f32 %v3465_v19, %v10487_v34  ;;  %v3510_v25 = vrot.slane %v10688_v21, %v9739_v13  ;;  %v2490_v34 = vmul.f32 %v10428_v58, %v9901_v10 }
 0xd48   : > { %9297 = vset.pattern.permute.xlu1 %v13510_v41  ;;  %v3516_v41 = vmul.f32 %v3514_v6, %v3505_v45  ;;  %v3558_v19 = vrot.slane %v10669_v28, %v9747_v22  ;;  %v3602_v58 = vrot.slane %v10669_v28, %v9755_v38  ;;  %v2528_v6 = vsel %vm1185_vm7, %v10549_v18, %v10652_v14 }
 0xd49   : > { %v3515_v35 = vmul.f32 %v3510_v25, %v3505_v45  ;;  %v13525_v45 = vmov 20  }
 0xd4a   : > { %v3604_v28 = vmul.f32 %v3602_v58, %v10547_v53  ;;  %v2578_v58 = vmul.f32 %v10658_v37, %v9901_v10 }
 0xd4b   : > { %3476 = vrot.lane.b32.xlu0 %v3471_v42, %s13323_s30  ;;  %3429 = vrot.lane.b32.xlu1 %v3425_v48, %s13523_s23  ;;  %v10732_v42 = vpop.permute.xlu1 %3908  ;;  %v2532_v48 = vmul.f32 0.0, %v10549_v18  ;;  %v2572_v18 = vsel %vm1277_vm9, %v10551_v24, %v10658_v37  ;;  %vm2617_vm9 = vcmask 818176  }
 0xd4f   : > { %3474 = vrot.lane.b32.xlu1 %v3470_v11, %s13323_s30  ;;  %3521 = vrot.lane.b32.xlu0 %v3516_v41, %s13325_s25  ;;  %v3560_v41 = vmul.f32 %v3558_v19, %v10638_v39  ;;  %v10746_v11 = vpop.permute.xlu1 %2766  ;;  %v2533_v39 = vmul.f32 %v2528_v6, %v9899_v30  ;;  %v2622_v6 = vmul.f32 0.0, %v10662_v1  ;;  %s13530_s30 = smov 56  }
 0xd53   : > { %3519 = vrot.lane.b32.xlu1 %v3515_v35, %s13325_s25  ;;  %3563 = vrot.lane.b32.xlu0 %v3559_v4, %s13524_s16  ;;  %v10754_v25 = vpop.permute.xlu1 %3952  ;;  %v10765_v4 = vld [vmem:[%s13151_s6 + $0x90] sm:$0xff]  ;;  %s13528_s25 = smov 68  }
 0xd54   : > { %v3642_v35 = vrot.slane %v10765_v4, %v9693_v40 }
 0xd57   : > { %2498 = vrot.lane.b32.xlu1 %v2490_v34, %s13401_s27  ;;  %3727 = vperm.xlu0 %9295, %v10444_v61   ;;  %v2577_v34 = vmul.f32 %v2572_v18, %v9899_v30  ;;  %v10771_v19 = vpop.permute.xlu1 %2813  ;;  %v3687_v18 = vrot.slane %v10765_v4, %v9709_v46 }
 0xd5b   : > { %3565 = vrot.lane.b32.xlu1 %v3560_v41, %s13524_s16  ;;  %9296 = vset.pattern.permute.xlu0 %v13525_v45  ;;  %v2576_v41 = vmul.f32 0.0, %v10551_v24  ;;  %v10778_v45 = vld [vmem:[%s13151_s6 + $0x98] sm:$0xff] }
 0xd5c   : > { %3066 = vperm.xlu0 %9296, %v10287_v33   ;;  %v3598_v33 = vrot.slane %v10688_v21, %v9755_v38 }
 0xd5e   : > { %v3603_v14 = vmul.f32 %v3598_v33, %v10547_v53  ;;  %v3647_v53 = vmul.f32 %v3642_v35, %v10642_v55  ;;  %v3691_v33 = vrot.slane %v10778_v45, %v9709_v46 }
 0xd5f   : > { %2538 = vrot.lane.b32.xlu1 %v2532_v48, %s13526_s18  ;;  %v3646_v48 = vrot.slane %v10778_v45, %v9693_v40 }
 0xd60   : > { %2542 = vrot.lane.b32.xlu0 %v2534_v23, %s13526_s18  ;;  %v10786_v23 = vpop.permute.xlu1 %2857 }
 0xd61   : > { %v3648_v24 = vmul.f32 %v3646_v48, %v10642_v55  ;;  %v3693_v55 = vmul.f32 %v3691_v33, %v10648_v63  ;;  %v3767_v33 = vrot.slane %v10778_v45, %v9725_v59 }
 0xd63   : > { %2540 = vrot.lane.b32.xlu1 %v2533_v39, %s13526_s18  ;;  %v2618_v39 = vsel %vm2617_vm9, %v10662_v1, %v10679_v54  ;;  %v3692_v1 = vmul.f32 %v3687_v18, %v10648_v63  ;;  %vm1294_vm9 = vcmask 1014784   ;;  %v2707_v63 = vsel %vm1202_vm15, %v10717_v3, %v10724_v49  ;;  %s9417_s18 = smov 58  }
 0xd64   : > { %3609 = vrot.lane.b32.xlu0 %v3604_v28, %s13527_s8  ;;  %v2624_v28 = vmul.f32 %v10679_v54, %v9901_v10  ;;  %v10796_v37 = vpop.permute.xlu1 %2859  ;;  %v2667_v54 = vmul.f32 0.0, %v10692_v20 }
 0xd67   : > { %3607 = vrot.lane.b32.xlu1 %v3603_v14, %s13527_s8  ;;  %v2623_v14 = vmul.f32 %v2618_v39, %v9899_v30  ;;  %v2713_v39 = vmul.f32 %v10724_v49, %v9901_v10  ;;  %v2736_v49 = vmul.f32 %v10555_v56, %v9901_v10 }
 0xd68   : > { %2584 = vrot.lane.b32.xlu0 %v2577_v34, %s9414_s29  ;;  %v10805_v35 = vpop.permute.xlu1 %2902  ;;  %v2663_v34 = vsel %vm1294_vm9, %v10692_v20, %v10702_v36  ;;  %v2712_v20 = vmul.f32 %v2707_v63, %v9899_v30  ;;  %v2816_v63 = vsel %vm2815_vm14, %v10644_v29, %v10771_v19 }
 0xd69   : > { %v2668_v48 = vmul.f32 %v2663_v34, %v9899_v30 }
 0xd6b   : > { %2582 = vrot.lane.b32.xlu1 %v2576_v41, %s9414_s29  ;;  %v2669_v41 = vmul.f32 %v10702_v36, %v9901_v10 }
 0xd6c   : > { %3651 = vrot.lane.b32.xlu0 %v3647_v53, %s13528_s25  ;;  %v10818_v53 = vpop.permute.xlu1 %2904 }
 0xd6f   : > { %2586 = vrot.lane.b32.xlu1 %v2578_v58, %s9414_s29  ;;  %s13330_s29 = smov 72   ;;  %v3763_v58 = vrot.slane %v10765_v4, %v9725_v59 }
 0xd70   : > { %2628 = vrot.lane.b32.xlu0 %v2622_v6, %s9415_s0  ;;  %v10826_v36 = vpop.permute.xlu1 %4084  ;;  %v2711_v6 = vmul.f32 0.0, %v10717_v3  ;;  %v3769_v3 = vmul.f32 %v3767_v33, %v10553_v27  ;;  %v2866_v33 = vmul.f32 %v10786_v23, %v9899_v30 }
 0xd73   : > { %3653 = vrot.lane.b32.xlu1 %v3648_v24, %s13528_s25  ;;  %v3768_v24 = vmul.f32 %v3763_v58, %v10553_v27  ;;  %v2770_v27 = vsel %vm1703_vm2, %v10746_v11, %v10640_v62  ;;  %vm13332_vm2 = vcmask 228352  }
 0xd74   : > { %2632 = vrot.lane.b32.xlu0 %v2624_v28, %s9415_s0  ;;  %v2735_v28 = vmul.f32 %v10555_v56, %v9899_v30  ;;  %v10840_v18 = vpop.permute.xlu1 %2946  ;;  %v2775_v34 = vmul.f32 %v2770_v27, %v9901_v10 }
 0xd77   : > { %2630 = vrot.lane.b32.xlu1 %v2623_v14, %s9415_s0  ;;  %s13529_s0 = smov 62  }
 0xd78   : > { %3698 = vrot.lane.b32.xlu0 %v3693_v55, %s13330_s29  ;;  %v10848_v14 = vpop.permute.xlu1 %2990  ;;  %v3830_v55 = vrot.slane %v10778_v45, %v9739_v13 }
 0xd7a   : > { %v3832_v56 = vmul.f32 %v3830_v55, %v10557_v43 }
 0xd7b   : > { %3696 = vrot.lane.b32.xlu1 %v3692_v1, %s13330_s29  ;;  %v2776_v1 = vmul.f32 0.0, %v10640_v62  ;;  %s9418_s29 = smov 26  }
 0xd7c   : > { %2673 = vrot.lane.b32.xlu0 %v2667_v54, %s13527_s8  ;;  %v3826_v54 = vrot.slane %v10765_v4, %v9739_v13 }
 0xd7e   : > { %v3831_v62 = vmul.f32 %v3826_v54, %v10557_v43  ;;  %v3874_v43 = vrot.slane %v10778_v45, %v9747_v22 }
 0xd7f   : > { %3801 = vperm.xlu1 %9297, %v10444_v61  }
 0xd80   : > { %2677 = vrot.lane.b32.xlu0 %v2669_v41, %s13527_s8  ;;  %v10863_v41 = vpop.permute.xlu1 %4158 }
 0xd83   : > { %2675 = vrot.lane.b32.xlu1 %v2668_v48, %s13527_s8  ;;  %v2821_v48 = vmul.f32 %v2816_v63, %v9901_v10  ;;  %v10935_v63 = vld [vmem:[%s13151_s6 + $0xa8] sm:$0xff] }
 0xd84   : > { %2719 = vrot.lane.b32.xlu0 %v2712_v20, %s13529_s0  ;;  %9299 = vset.pattern.permute.xlu1 %v13492_v51  ;;  %v2774_v51 = vmul.f32 %v10746_v11, %v9899_v30  ;;  %v3870_v11 = vrot.slane %v10765_v4, %v9747_v22  ;;  %v10874_v58 = vpop.permute.xlu1 %3037  ;;  %v2820_v20 = vmul.f32 %v10644_v29, %v9899_v30  ;;  %v13541_v22 = vmov 22  }
 0xd85   : > { %v3876_v29 = vmul.f32 %v3874_v43, %v10569_v5 }
 0xd87   : > { %2717 = vrot.lane.b32.xlu1 %v2711_v6, %s13529_s0  ;;  %v3875_v6 = vmul.f32 %v3870_v11, %v10569_v5 }
 0xd88   : > { %3772 = vrot.lane.b32.xlu0 %v3768_v24, %s13411_s19  ;;  %v2822_v24 = vmul.f32 0.0, %v10771_v19  ;;  %v2868_v19 = vmul.f32 0.0, %v10796_v37 }
 0xd8b   : > { %2721 = vrot.lane.b32.xlu1 %v2713_v39, %s13529_s0  ;;  %s13531_s0 = smov 8   ;;  %v10887_v39 = vpop.permute.xlu1 %3111 }
 0xd8c   : > { %2739 = vrot.lane.b32.xlu0 %v2735_v28, %s13524_s16  ;;  %v3918_v28 = vrot.slane %v10778_v45, %v9755_v38  ;;  %v10906_v45 = vpop.permute.xlu0 %4275 }
 0xd8e   : > { %v3920_v55 = vmul.f32 %v3918_v28, %v10732_v42  ;;  %v2956_v28 = vmul.f32 0.0, %v10654_v32 }
 0xd8f   : > { %3774 = vrot.lane.b32.xlu1 %v3769_v3, %s13411_s19  ;;  %v2862_v3 = vsel %vm13332_vm2, %v10786_v23, %v10796_v37  ;;  %v2906_v23 = vsel %vm13336_vm3, %v10805_v35, %v10818_v53  ;;  %vm1248_vm2 = vcmask 1022976   ;;  %vm1521_vm3 = vcmask 883712  }
 0xd90   : > { %2780 = vrot.lane.b32.xlu0 %v2774_v51, %s9417_s18  ;;  %v10899_v51 = vpop.permute.xlu1 %3113  ;;  %v2867_v5 = vmul.f32 %v2862_v3, %v9901_v10  ;;  %v2911_v27 = vmul.f32 %v2906_v23, %v9901_v10  ;;  %v1204_v23 = vsel %vm1202_vm15, %v10096_v7, %v10253_v26 }
 0xd93   : > { %2741 = vrot.lane.b32.xlu1 %v2736_v49, %s13524_s16  ;;  %v3914_v49 = vrot.slane %v10765_v4, %v9755_v38  ;;  %v10917_v4 = vld [vmem:[%s13151_s6 + $0xa0] sm:$0xff] }
 0xd94   : > { %2784 = vrot.lane.b32.xlu0 %v2776_v1, %s9417_s18  ;;  %v3958_v1 = vrot.slane %v10917_v4, %v9693_v40  ;;  %v10922_v54 = vpop.permute.xlu1 %3155 }
 0xd95   : > { %v3919_v37 = vmul.f32 %v3914_v49, %v10732_v42  ;;  %v2910_v42 = vmul.f32 %v10805_v35, %v9899_v30  ;;  %v2912_v35 = vmul.f32 0.0, %v10818_v53  ;;  %v2950_v53 = vsel %vm13341_vm13, %v10840_v18, %v10654_v32 }
 0xd96   : > { %v1158_v49 = vsel %vm1156_vm0, %v10087_v60, %v10251_v8  ;;  %vm3039_vm13 = vcmask 293888  }
 0xd97   : > { %2782 = vrot.lane.b32.xlu1 %v2775_v34, %s9417_s18  ;;  %v10925_v34 = vpop.permute.xlu0 %3199  ;;  %s13565_s18 = smov 72  }
 0xd98   : > { %3837 = vrot.lane.b32.xlu0 %v3832_v56, %s13523_s23  ;;  %v3963_v56 = vmul.f32 %v3958_v1, %v10754_v25 }
 0xd9b   : > { %3835 = vrot.lane.b32.xlu1 %v3831_v62, %s13523_s23  ;;  %v10937_v62 = vpop.permute.xlu1 %3157 }
 0xd9c   : > { %2828 = vrot.lane.b32.xlu0 %v2821_v48, %s13530_s30  ;;  %v3962_v48 = vrot.slane %v10935_v63, %v9693_v40 }
 0xd9f   : > { %2826 = vrot.lane.b32.xlu1 %v2820_v20, %s13530_s30  ;;  %v3964_v20 = vmul.f32 %v3962_v48, %v10754_v25  ;;  %v4006_v25 = vrot.slane %v10935_v63, %v9709_v46 }
 0xda0   : > { %3879 = vrot.lane.b32.xlu0 %v3875_v6, %s13531_s0  ;;  %v10948_v6 = vpop.permute.xlu1 %3201 }
 0xda3   : > { %2830 = vrot.lane.b32.xlu1 %v2822_v24, %s13530_s30  ;;  %v13532_v24 = vmov 0  }
 0xda4   : > { %2872 = vrot.lane.b32.xlu0 %v2866_v33, %s13517_s24  ;;  %v2954_v33 = vmul.f32 %v10840_v18, %v9899_v30  ;;  %v4002_v18 = vrot.slane %v10917_v4, %v9709_v46 }
 0xda7   : > { %3881 = vrot.lane.b32.xlu1 %v3876_v29, %s13531_s0 }
 0xda8   : > { %2876 = vrot.lane.b32.xlu0 %v2868_v19, %s13517_s24  ;;  %v1109_v19 = vsel %vm1108_vm5, %v9831_v12, %v9931_v31 }
 0xda9   : > { %v1114_v32 = vmul.f32 %v1109_v19, %v9899_v30  ;;  %v2994_v19 = vsel %vm13333_vm1, %v10848_v14, %v10656_v17  ;;  %vm1475_vm1 = vcmask 891904  }
 0xdab   : > { %2874 = vrot.lane.b32.xlu1 %v2867_v5, %s13517_s24  ;;  %v2955_v5 = vmul.f32 %v2950_v53, %v9901_v10  ;;  %v1163_v1 = vadd.f32 %v1158_v49, %v1114_v32  ;;  %v4050_v32 = vrot.slane %v10935_v63, %v9717_v52  ;;  %s13570_s24 = smov 126  }
 0xdac   : > { %3925 = vrot.lane.b32.xlu0 %v3920_v55, %s13530_s30 }
 0xdaf   : > { %3923 = vrot.lane.b32.xlu1 %v3919_v37, %s13530_s30  ;;  %v4008_v37 = vmul.f32 %v4006_v25, %v10646_v47  ;;  %v1342_v25 = vsel %vm13388_vm12, %v10121_v0, %v10259_v44 }
 0xdb0   : > { %2918 = vrot.lane.b32.xlu0 %v2911_v27, %s13516_s22  ;;  %v1250_v27 = vsel %vm1248_vm2, %v10103_v9, %v10255_v57 }
 0xdb1   : > { %v10939_v11 = vpop.permute.xlu0 %3243  ;;  %v10960_v29 = vpop.permute.xlu1 %3245 }
 0xdb3   : > { %2916 = vrot.lane.b32.xlu1 %v2910_v42, %s13516_s22  ;;  %v4007_v42 = vmul.f32 %v4002_v18, %v10646_v47  ;;  %v11004_v47 = vld [vmem:[%s13149_s4 + $0x18] sm:$0x1f]  ;;  %v1115_v18 = vmul.f32 %v9931_v31, %v9901_v10 }
 0xdb4   : > { %3967 = vrot.lane.b32.xlu0 %v3963_v56, %s13524_s16  ;;  %v1209_v56 = vadd.f32 %v1204_v23, %v1163_v1  ;;  %v3000_v23 = vmul.f32 0.0, %v10656_v17 }
 0xdb5   : > { %v10950_v43 = vpop.permute.xlu0 %3358 }
 0xdb6   : > { %v1255_v53 = vadd.f32 %v1250_v27, %v1209_v56  ;;  %v13535_v27 = vld [vmem:[#allocation61_spill] sm:$0xff]  ;;  %v4046_v56 = vrot.slane %v10917_v4, %v9717_v52 }
 0xdb7   : > { %2920 = vrot.lane.b32.xlu1 %v2912_v35, %s13516_s22  ;;  %s13533_s22 = smov 28  }
 0xdb8   : > { %4128 = vperm.xlu0 %9296, %v10444_v61  }
 0xdb9   : > { %v10966_v3 = vpop.permute.xlu0 %3431 }
 0xdbb   : > { %3969 = vrot.lane.b32.xlu1 %v3964_v20, %s13524_s16  ;;  %v1296_v20 = vsel %vm1294_vm9, %v10110_v50, %v10257_v2 }
 0xdbc   : > { %9298 = vset.pattern.permute.xlu0 %v13532_v24 }
 0xdbd   : > { %3311 = vperm.xlu0 %9298, %v10444_v61   ;;  %v10991_v48 = vpop.permute.xlu0 %3476 }
 0xdbf   : > { %2960 = vrot.lane.b32.xlu1 %v2954_v33, %s13533_s22  ;;  %v2998_v33 = vmul.f32 %v10848_v14, %v9899_v30  ;;  %v1164_v14 = vadd.f32 %v10251_v8, %v1115_v18  ;;  %v13540_v18 = vld [vmem:[#allocation92_spill] sm:$0xff] }
 0xdc0   : > { %v4052_v46 = vmul.f32 %v4050_v32, %v13540_v18 }
 0xdc1   : > { %2964 = vrot.lane.b32.xlu0 %v2956_v28, %s13533_s22  ;;  %v1301_v28 = vadd.f32 %v1296_v20, %v1255_v53  ;;  %v11023_v1 = vpop.permute.xlu0 %3521  ;;  %v2999_v20 = vmul.f32 %v2994_v19, %v9901_v10  ;;  %v1210_v53 = vadd.f32 %v10253_v26, %v1164_v14 }
 0xdc2   : > { %v10979_v55 = vpop.permute.xlu1 %3385  ;;  %13534 = vst [vmem:[#allocation95_spill] sm:$0xff] %v11023_v1  ;;  %v13543_v1 = vld [vmem:[#allocation24_spill] sm:$0xff] }
 0xdc3   : > { %2962 = vrot.lane.b32.xlu1 %v2955_v5, %s13533_s22  ;;  %v1387_v5 = vsel %vm1369_vm11, %v10129_v15, %v10261_v16  ;;  %v1256_v19 = vadd.f32 %v10255_v57, %v1210_v53  ;;  %v13548_v57 = vld [vmem:[#allocation93_spill] sm:$0xff]  ;;  %v13550_v53 = vld [vmem:[#allocation28_spill] sm:$0xff]  ;;  %s9419_s22 = smov 24  }
 0xdc5   : > { %4013 = vrot.lane.b32.xlu0 %v4008_v37, %s13527_s8  ;;  %v1347_v37 = vadd.f32 %v1342_v25, %v1301_v28  ;;  %v13538_v25 = vld [vmem:[#allocation62_spill] sm:$0xff]  ;;  %v11046_v14 = vpop.permute.xlu0 %3563  ;;  %v1302_v32 = vadd.f32 %v10257_v2, %v1256_v19 }
 0xdc6   : > { %v10993_v35 = vpop.permute.xlu1 %3356  ;;  %v13539_v28 = vld [vmem:[#allocation22_spill] sm:$0xff] }
 0xdc7   : > { %4011 = vrot.lane.b32.xlu1 %v4007_v42, %s13527_s8  ;;  %v13536_v42 = vld [vmem:[#allocation20_spill] sm:$0xff]  ;;  %v1477_v8 = vsel %vm1475_vm1, %v13539_v28, %v13538_v25 }
 0xdc8   : > { %v1431_v31 = vsel %vm1323_vm10, %v13536_v42, %v13535_v27  ;;  %13544 = vst [vmem:[#allocation20_spill] sm:$0xff] %v11046_v14 }
 0xdc9   : > { %3004 = vrot.lane.b32.xlu0 %v2998_v33, %s9418_s29  ;;  %v1392_v33 = vadd.f32 %v1387_v5, %v1347_v37  ;;  %v4051_v37 = vmul.f32 %v4046_v56, %v13540_v18  ;;  %v3040_v18 = vsel %vm3039_vm13, %v13548_v57, %v10874_v58  ;;  %vm1674_vm13 = vcmask 760832  }
 0xdca   : > { %v11012_v49 = vpop.permute.xlu1 %3429 }
 0xdcb   : > { %4415 = vperm.xlu1 %9299, %v11004_v47   ;;  %v1436_v24 = vadd.f32 %v1431_v31, %v1392_v33  ;;  %v13546_v31 = vld [vmem:[#allocation64_spill] sm:$0xff]  ;;  %v3044_v33 = vmul.f32 %v13548_v57, %v9899_v30  ;;  %v3045_v57 = vmul.f32 %v3040_v18, %v9901_v10  ;;  %v4090_v18 = vrot.slane %v10917_v4, %v9725_v59 }
 0xdcd   : > { %3008 = vrot.lane.b32.xlu0 %v3000_v23, %s9418_s29  ;;  %v13542_v23 = vld [vmem:[#allocation63_spill] sm:$0xff]  ;;  %v1482_v26 = vadd.f32 %v1477_v8, %v1436_v24  ;;  %v13549_v24 = vld [vmem:[#allocation65_spill] sm:$0xff] }
 0xdce   : > { %v11032_v17 = vpop.permute.xlu1 %3474  ;;  %v1523_v5 = vsel %vm1521_vm3, %v13543_v1, %v13542_v23  ;;  %v1611_v8 = vsel %vm1139_vm6, %v13550_v53, %v13549_v24 }
 0xdcf   : > { %13537 = vst [vmem:[#allocation61_spill] sm:$0xff] %v11032_v17  ;;  %3006 = vrot.lane.b32.xlu1 %v2999_v20, %s9418_s29  ;;  %v13547_v20 = vld [vmem:[#allocation26_spill] sm:$0xff]  ;;  %v1528_v56 = vadd.f32 %v1523_v5, %v1482_v26  ;;  %v3046_v5 = vmul.f32 0.0, %v10874_v58 }
 0xdd0   : > { %9300 = vset.pattern.permute.xlu1 %v13541_v22  ;;  %v1567_v22 = vsel %vm1185_vm7, %v13547_v20, %v13546_v31  ;;  %v13554_v26 = vld [vmem:[#allocation90_spill] sm:$0xff] }
 0xdd1   : > { %4057 = vrot.lane.b32.xlu0 %v4052_v46, %s13528_s25  ;;  %v1348_v46 = vadd.f32 %v10259_v44, %v1302_v32  ;;  %v1572_v2 = vadd.f32 %v1567_v22, %v1528_v56 }
 0xdd2   : > { %v11048_v17 = vpop.permute.xlu1 %3519 }
 0xdd3   : > { %13545 = vst [vmem:[#allocation62_spill] sm:$0xff] %v11048_v17  ;;  %4055 = vrot.lane.b32.xlu1 %v4051_v37, %s13528_s25  ;;  %v1393_v17 = vadd.f32 %v10261_v16, %v1348_v46  ;;  %v1616_v44 = vadd.f32 %v1611_v8, %v1572_v2  ;;  %v13553_v37 = vld [vmem:[#allocation6_spill] sm:$0xff]  ;;  %v13557_v16 = vld [vmem:[#allocation45_spill] sm:$0xff]  ;;  %v4094_v2 = vrot.slane %v10935_v63, %v9725_v59 }
 0xdd4   : > { %v3072_v32 = vrot.slane %v13554_v26, %v13553_v37  ;;  %v13566_v59 = vld [vmem:[#allocation34_spill] sm:$0xff] }
 0xdd5   : > { %3050 = vrot.lane.b32.xlu0 %v3044_v33, %s9419_s22  ;;  %v13555_v33 = vld [vmem:[#allocation91_spill] sm:$0xff]  ;;  %v1437_v56 = vadd.f32 %v13535_v27, %v1393_v17  ;;  %v13558_v27 = vmov 13  }
 0xdd6   : > { %v11063_v19 = vpop.permute.xlu0 %3727  ;;  %v11065_v14 = vpop.permute.xlu1 %2498  ;;  %v3076_v22 = vrot.slane %v13555_v33, %v13553_v37 }
 0xdd7   : > { %13551 = vst [vmem:[#allocation22_spill] sm:$0xff] %v11063_v19  ;;  %13552 = vst [vmem:[#allocation92_spill] sm:$0xff] %v11065_v14  ;;  %4202 = vperm.xlu1 %9300, %v10444_v61   ;;  %v13556_v14 = vld [vmem:[#allocation30_spill] sm:$0xff]  ;;  %v1483_v61 = vadd.f32 %v13538_v25, %v1437_v56 }
 0xdd8   : > { %v1630_v58 = vsel %vm1108_vm5, %v13557_v16, %v13556_v14 }
 0xdd9   : > { %3054 = vrot.lane.b32.xlu0 %v3046_v5, %s9419_s22  ;;  %v1635_v8 = vadd.f32 %v1630_v58, %v1616_v44  ;;  %v1529_v17 = vadd.f32 %v13542_v23, %v1483_v61  ;;  %v13559_v5 = vld [vmem:[#allocation11_spill] sm:$0xff]  ;;  %v1113_v44 = vmul.f32 0.0, %v9831_v12  ;;  %v13563_v58 = vld [vmem:[#allocation12_spill] sm:$0xff] }
 0xdda   : > { %v11076_v19 = vpop.permute.xlu1 %3565  ;;  %v1157_v37 = vsel %vm1156_vm0, %v13559_v5, %v10087_v60  ;;  %v1203_v60 = vsel %vm1202_vm15, %v13563_v58, %v10096_v7  ;;  %v13564_v5 = vld [vmem:[#allocation13_spill] sm:$0xff]  ;;  %vm1766_vm0 = vcmask 654336  }
 0xddb   : > { %v3067_v46 = vpop.permute.xlu0 %3066  ;;  %3052 = vrot.lane.b32.xlu1 %v3045_v57, %s9419_s22  ;;  %v1573_v23 = vadd.f32 %v13546_v31, %v1529_v17  ;;  %v1249_v31 = vsel %vm1248_vm2, %v13564_v5, %v10103_v9  ;;  %v3119_v9 = vmul.f32 %v10887_v39, %v9899_v30  ;;  %v4168_v5 = vrot.slane %v10935_v63, %v9739_v13  ;;  %s13366_s22 = smov 116  }
 0xddc   : > { %v3077_v26 = vmul.f32 %v3072_v32, %v3067_v46  ;;  %v3078_v33 = vmul.f32 %v3076_v22, %v3067_v46  ;;  %9301 = vset.pattern.permute.xlu1 %v13558_v27  ;;  %v13560_v32 = vld [vmem:[#allocation32_spill] sm:$0xff]  ;;  %v13561_v22 = vld [vmem:[#allocation47_spill] sm:$0xff]  ;;  %v4096_v46 = vmul.f32 %v4094_v2, %v10826_v36  ;;  %v4095_v27 = vmul.f32 %v4090_v18, %v10826_v36 }
 0xddd   : > { %v1675_v56 = vsel %vm1674_vm13, %v13561_v22, %v13560_v32  ;;  %v1617_v12 = vadd.f32 %v13549_v24, %v1573_v23  ;;  %v13568_v24 = vld [vmem:[#allocation14_spill] sm:$0xff]  ;;  %v3115_v23 = vsel %vm2088_vm8, %v10887_v39, %v10899_v51  ;;  %vm13594_vm2 = vcmask 539648  }
 0xdde   : > { %3083 = vrot.lane.b32.xlu0 %v3078_v33, %s13524_s16  ;;  %v11092_v25 = vpop.permute.xlu1 %2538  ;;  %v1681_v61 = vadd.f32 %v1675_v56, %v1635_v8  ;;  %v1162_v33 = vadd.f32 %v1157_v37, %v1113_v44  ;;  %v1295_v36 = vsel %vm1294_vm9, %v13568_v24, %v10110_v50  ;;  %v13569_v44 = vld [vmem:[#allocation15_spill] sm:$0xff]  ;;  %v3120_v24 = vmul.f32 %v3115_v23, %v9901_v10 }
 0xddf   : > { %v11099_v57 = vpop.permute.xlu0 %2542  ;;  %3081 = vrot.lane.b32.xlu1 %v3077_v26, %s13524_s16  ;;  %v1636_v18 = vadd.f32 %v13556_v14, %v1617_v12  ;;  %v1341_v56 = vsel %vm13388_vm12, %v13569_v44, %v10121_v0  ;;  %v13573_v14 = vld [vmem:[#allocation51_spill] sm:$0xff]  ;;  %v13574_v0 = vld [vmem:[#allocation25_spill] sm:$0xff]  ;;  %vm3010_vm12 = vcmask 211968  }
 0xde0   : > { %13562 = vst [vmem:[#allocation63_spill] sm:$0xff] %v11099_v57  ;;  %v1208_v26 = vadd.f32 %v1203_v60, %v1162_v33  ;;  %v13567_v57 = vld [vmem:[#allocation49_spill] sm:$0xff]  ;;  %v13571_v60 = vld [vmem:[#allocation16_spill] sm:$0xff]  ;;  %v1676_v39 = vsel %vm1674_vm13, %v13560_v32, %v13574_v0 }
 0xde1   : > { %v1721_v7 = vsel %vm1720_vm4, %v13567_v57, %v13566_v59  ;;  %v13577_v44 = vld [vmem:[#allocation53_spill] sm:$0xff] }
 0xde2   : > { %4101 = vrot.lane.b32.xlu0 %v4096_v46, %s13565_s18  ;;  %v11112_v17 = vpop.permute.xlu1 %2540  ;;  %v1727_v37 = vadd.f32 %v1721_v7, %v1681_v61  ;;  %v1254_v2 = vadd.f32 %v1249_v31, %v1208_v26  ;;  %v1386_v61 = vsel %vm1369_vm11, %v13571_v60, %v10129_v15  ;;  %v13572_v46 = vld [vmem:[#allocation36_spill] sm:$0xff]  ;;  %v3121_v31 = vmul.f32 0.0, %v10899_v51 }
 0xde3   : > { %v11117_v8 = vpop.permute.xlu0 %3609  ;;  %4099 = vrot.lane.b32.xlu1 %v4095_v27, %s13565_s18  ;;  %v1767_v33 = vsel %vm1766_vm0, %v13573_v14, %v13572_v46  ;;  %v1682_v15 = vadd.f32 %v1676_v39, %v1636_v18  ;;  %v4164_v7 = vrot.slane %v10917_v4, %v9739_v13  ;;  %vm1812_vm11 = vcmask 646144   ;;  %s13595_s18 = smov 122  }
 0xde4   : > { %v1300_v50 = vadd.f32 %v1295_v36, %v1254_v2  ;;  %v1773_v27 = vadd.f32 %v1767_v33, %v1727_v37  ;;  %v13575_v36 = vld [vmem:[#allocation17_spill] sm:$0xff]  ;;  %v13576_v2 = vld [vmem:[#allocation38_spill] sm:$0xff]  ;;  %v4170_v33 = vmul.f32 %v4168_v5, %v10863_v41  ;;  %v13583_v5 = vld [vmem:[#allocation40_spill] sm:$0xff]  ;;  %v3391_v13 = vrot.slane %v10688_v21, %v9717_v52 }
 0xde5   : > { %v1813_v51 = vsel %vm1812_vm11, %v13577_v44, %v13576_v2 }
 0xde6   : > { %3125 = vrot.lane.b32.xlu0 %v3119_v9, %s13570_s24  ;;  %v11133_v58 = vpop.permute.xlu1 %3607  ;;  %v1346_v26 = vadd.f32 %v1341_v56, %v1300_v50  ;;  %v1430_v9 = vsel %vm1323_vm10, %v13575_v36, %v13536_v42  ;;  %v13578_v56 = vld [vmem:[#allocation18_spill] sm:$0xff]  ;;  %v13579_v50 = vld [vmem:[#allocation27_spill] sm:$0xff]  ;;  %v1819_v60 = vadd.f32 %v1813_v51, %v1773_v27  ;;  %vm13581_vm10 = vcmask 523264  }
 0xde7   : > { %v11141_v12 = vpop.permute.xlu0 %2584  ;;  %4508 = vperm.xlu1 %9301, %v11004_v47   ;;  %v1476_v23 = vsel %vm1475_vm1, %v13578_v56, %v13539_v28  ;;  %v1722_v42 = vsel %vm1720_vm4, %v13566_v59, %v13579_v50  ;;  %vm1858_vm1 = vcmask 637952   ;;  %v13584_v36 = vld [vmem:[#allocation54_spill] sm:$0xff]  ;;  %vm13598_vm13 = vmmov %vm13581_vm10 }
 0xde8   : > { %v1391_v37 = vadd.f32 %v1386_v61, %v1346_v26  ;;  %v13580_v61 = vmov 18   ;;  %v1728_v39 = vadd.f32 %v1722_v42, %v1682_v15  ;;  %v3159_v26 = vsel %vm13581_vm10, %v10922_v54, %v10937_v62 }
 0xde9   : > { %v1859_v15 = vsel %vm1858_vm1, %v13584_v36, %v13583_v5  ;;  %v3164_v56 = vmul.f32 %v3159_v26, %v9901_v10  ;;  %v3163_v42 = vmul.f32 %v10922_v54, %v9899_v30  ;;  %v8772_v54 = vld [vmem:[%s13150_s5 + $0x8] sm:$0x1f] }
 0xdea   : > { %3129 = vrot.lane.b32.xlu0 %v3121_v31, %s13570_s24  ;;  %v11157_v32 = vpop.permute.xlu1 %2582  ;;  %v1435_v0 = vadd.f32 %v1430_v9, %v1391_v37  ;;  %v4169_v31 = vmul.f32 %v4164_v7, %v10863_v41  ;;  %v13585_v41 = vld [vmem:[#allocation21_spill] sm:$0xff]  ;;  %v1865_v51 = vadd.f32 %v1859_v15, %v1819_v60  ;;  %v3165_v15 = vmul.f32 0.0, %v10937_v62 }
 0xdeb   : > { %v11162_v18 = vpop.permute.xlu0 %3651  ;;  %3127 = vrot.lane.b32.xlu1 %v3120_v24, %s13570_s24  ;;  %v13582_v24 = vld [vmem:[#allocation19_spill] sm:$0xff]  ;;  %v1566_v7 = vsel %vm1185_vm7, %v13585_v41, %v13547_v20  ;;  %v13586_v37 = vld [vmem:[#allocation29_spill] sm:$0xff]  ;;  %v4241_v62 = vrot.slane %v10935_v63, %v9755_v38  ;;  %s13605_s24 = smov 120  }
 0xdec   : > { %9302 = vset.pattern.permute.xlu1 %v13580_v61  ;;  %v1522_v28 = vsel %vm1521_vm3, %v13582_v24, %v13543_v1  ;;  %v1481_v27 = vadd.f32 %v1476_v23, %v1435_v0  ;;  %v1768_v1 = vsel %vm1766_vm0, %v13572_v46, %v13586_v37  ;;  %vm1904_vm3 = vcmask 629760   ;;  %v13589_v46 = vld [vmem:[#allocation55_spill] sm:$0xff]  ;;  %v13591_v37 = vld [vmem:[#allocation44_spill] sm:$0xff]  ;;  %v13597_v63 = vld [vmem:[#allocation57_spill] sm:$0xff] }
 0xded   : > { %v1774_v50 = vadd.f32 %v1768_v1, %v1728_v39  ;;  %v13590_v39 = vld [vmem:[#allocation31_spill] sm:$0xff]  ;;  %v13592_v1 = vld [vmem:[#allocation56_spill] sm:$0xff]  ;;  %vm2042_vm0 = vcmask 515072  }
 0xdee   : > { %4175 = vrot.lane.b32.xlu0 %v4170_v33, %s13411_s19  ;;  %v11181_v59 = vpop.permute.xlu1 %2586  ;;  %v1527_v23 = vadd.f32 %v1522_v28, %v1481_v27  ;;  %v13587_v33 = vld [vmem:[#allocation23_spill] sm:$0xff] }
 0xdef   : > { %v11186_v9 = vpop.permute.xlu0 %2628  ;;  %4173 = vrot.lane.b32.xlu1 %v4169_v31, %s13411_s19  ;;  %v1610_v61 = vsel %vm1139_vm6, %v13587_v33, %v13550_v53  ;;  %v13588_v31 = vld [vmem:[#allocation42_spill] sm:$0xff]  ;;  %v1814_v53 = vsel %vm1812_vm11, %v13576_v2, %v13590_v39  ;;  %vm1950_vm6 = vcmask 621568   ;;  %v13593_v2 = vld [vmem:[#allocation33_spill] sm:$0xff]  ;;  %vm2134_vm11 = vcmask 498688  }
 0xdf0   : > { %v1571_v0 = vadd.f32 %v1566_v7, %v1527_v23  ;;  %v1905_v60 = vsel %vm1904_vm3, %v13589_v46, %v13588_v31  ;;  %v1820_v27 = vadd.f32 %v1814_v53, %v1774_v50 }
 0xdf1   : > { %v1911_v24 = vadd.f32 %v1905_v60, %v1865_v51  ;;  %v1860_v51 = vsel %vm1858_vm1, %v13583_v5, %v13593_v2  ;;  %vm2180_vm1 = vcmask 490496  }
 0xdf2   : > { %3171 = vrot.lane.b32.xlu0 %v3164_v56, %s13411_s19  ;;  %v11202_v20 = vpop.permute.xlu1 %3653  ;;  %v1615_v28 = vadd.f32 %v1610_v61, %v1571_v0  ;;  %v1951_v56 = vsel %vm1950_vm6, %v13592_v1, %v13591_v37  ;;  %v1866_v33 = vadd.f32 %v1860_v51, %v1820_v27  ;;  %v3207_v61 = vmul.f32 %v10925_v34, %v9899_v30 }
 0xdf3   : > { %v11207_v26 = vpop.permute.xlu0 %2632  ;;  %3169 = vrot.lane.b32.xlu1 %v3163_v42, %s13411_s19  ;;  %v1957_v50 = vadd.f32 %v1951_v56, %v1911_v24  ;;  %v3209_v42 = vmul.f32 0.0, %v10948_v6  ;;  %v3203_v0 = vsel %vm13594_vm2, %v10925_v34, %v10948_v6  ;;  %v13600_v24 = vld [vmem:[#allocation35_spill] sm:$0xff]  ;;  %vm2832_vm2 = vcmask 457728  }
 0xdf4   : > { %v1634_v7 = vadd.f32 %v13557_v16, %v1615_v28  ;;  %v1906_v34 = vsel %vm1904_vm3, %v13588_v31, %v13600_v24  ;;  %v13601_v28 = vld [vmem:[#allocation94_spill] sm:$0xff]  ;;  %v3208_v56 = vmul.f32 %v3203_v0, %v9901_v10  ;;  %v13607_v24 = vld [vmem:[#allocation59_spill] sm:$0xff]  ;;  %vm13609_vm3 = vcmask 556032  }
 0xdf5   : > { %v4243_v27 = vmul.f32 %v4241_v62, %v13601_v28  ;;  %v13603_v31 = vld [vmem:[#allocation58_spill] sm:$0xff] }
 0xdf6   : > { %3275 = vperm.xlu0 %9298, %v8772_v54   ;;  %v11217_v41 = vpop.permute.xlu1 %2630  ;;  %v1680_v16 = vadd.f32 %v13561_v22, %v1634_v7  ;;  %v13596_v54 = vld [vmem:[#allocation46_spill] sm:$0xff]  ;;  %v13599_v22 = vmov 6   ;;  %v4237_v7 = vrot.slane %v10917_v4, %v9755_v38 }
 0xdf7   : > { %v11223_v23 = vpop.permute.xlu0 %3698  ;;  %3173 = vrot.lane.b32.xlu1 %v3165_v15, %s13411_s19  ;;  %v1997_v39 = vsel %vm13598_vm13, %v13597_v63, %v13596_v54  ;;  %vm13642_vm13 = vmmov %vm13581_vm10 }
 0xdf8   : > { %v1726_v5 = vadd.f32 %v13567_v57, %v1680_v16  ;;  %v2003_v6 = vadd.f32 %v1997_v39, %v1957_v50  ;;  %v1912_v57 = vadd.f32 %v1906_v34, %v1866_v33  ;;  %v3251_v33 = vmul.f32 %v10939_v11, %v9899_v30 }
 0xdfa   : > { %3217 = vrot.lane.b32.xlu0 %v3209_v42, %s13595_s18  ;;  %v11239_v60 = vpop.permute.xlu1 %3696  ;;  %v1772_v15 = vadd.f32 %v13573_v14, %v1726_v5  ;;  %v13602_v42 = vld [vmem:[#allocation48_spill] sm:$0xff]  ;;  %v13604_v14 = vld [vmem:[#allocation37_spill] sm:$0xff] }
 0xdfb   : > { %v11245_v53 = vpop.permute.xlu0 %2673  ;;  %3213 = vrot.lane.b32.xlu1 %v3207_v61, %s13595_s18  ;;  %9303 = vset.pattern.permute.xlu0 %v13599_v22  ;;  %v2043_v50 = vsel %vm2042_vm0, %v13603_v31, %v13602_v42  ;;  %v1952_v4 = vsel %vm1950_vm6, %v13591_v37, %v13604_v14  ;;  %v13606_v22 = vld [vmem:[#allocation50_spill] sm:$0xff]  ;;  %vm3478_vm6 = vcmask 64512  }
 0xdfc   : > { %v1818_v51 = vadd.f32 %v13577_v44, %v1772_v15  ;;  %v2049_v16 = vadd.f32 %v2043_v50, %v2003_v6  ;;  %v1958_v0 = vadd.f32 %v1952_v4, %v1912_v57  ;;  %v4242_v44 = vmul.f32 %v4237_v7, %v13601_v28  ;;  %v13608_v6 = vld [vmem:[#allocation39_spill] sm:$0xff]  ;;  %v8783_v57 = vld [vmem:[%s13151_s6 + $0xb8] ss:$0 sm:$0xff]  ;;  %v13611_v50 = vld [vmem:[#allocation60_spill] sm:$0xff] }
 0xdfd   : > { %v2089_v34 = vsel %vm2088_vm8, %v13607_v24, %v13606_v22  ;;  %v3247_v7 = vsel %vm13609_vm3, %v10939_v11, %v10960_v29  ;;  %v13613_v4 = vld [vmem:[#allocation67_spill] sm:$0xff] }
 0xdfe   : > { %4248 = vrot.lane.b32.xlu0 %v4243_v27, %s13523_s23  ;;  %v11258_v2 = vpop.permute.xlu1 %3801  ;;  %v1864_v61 = vadd.f32 %v13584_v36, %v1818_v51  ;;  %v1998_v36 = vsel %vm13581_vm10, %v13596_v54, %v13608_v6  ;;  %v2095_v28 = vadd.f32 %v2089_v34, %v2049_v16  ;;  %v3253_v27 = vmul.f32 0.0, %v10960_v29  ;;  %v13610_v51 = vld [vmem:[#allocation52_spill] sm:$0xff] }
 0xdff   : > { %v11264_v62 = vpop.permute.xlu0 %2677  ;;  %3215 = vrot.lane.b32.xlu1 %v3208_v56, %s13595_s18  ;;  %v2135_v14 = vsel %vm2134_vm11, %v13611_v50, %v13610_v51  ;;  %v8782_v6 = vld [vmem:[%s13151_s6 + $0xb0] ss:$0 sm:$0xff]  ;;  %s9422_s18 = smov 48  }
 0xe00   : > { %v1910_v39 = vadd.f32 %v13589_v46, %v1864_v61  ;;  %v2004_v46 = vadd.f32 %v1998_v36, %v1958_v0  ;;  %v13614_v61 = vld [vmem:[#allocation41_spill] sm:$0xff]  ;;  %v2141_v29 = vadd.f32 %v2135_v14, %v2095_v28  ;;  %v4287_v0 = vmul.f32 %v8783_v57, %v10906_v45  ;;  %v13615_v28 = vld [vmem:[#allocation43_spill] sm:$0xff] }
 0xe01   : > { %v2044_v11 = vsel %vm2042_vm0, %v13602_v42, %v13614_v61  ;;  %v13618_v57 = vmov 7   ;;  %v4286_v14 = vmul.f32 %v8782_v6, %v10906_v45  ;;  %vm13644_vm0 = vmmov %vm13609_vm3  ;;  %vm2365_vm3 = vcmask 998400  }
 0xe02   : > { %3257 = vrot.lane.b32.xlu0 %v3251_v33, %s13605_s24  ;;  %v11275_v5 = vpop.permute.xlu1 %2675  ;;  %v1956_v15 = vadd.f32 %v13592_v1, %v1910_v39  ;;  %v13612_v1 = vld [vmem:[#allocation69_spill] sm:$0xff]  ;;  %v3252_v39 = vmul.f32 %v3247_v7, %v9901_v10 }
 0xe03   : > { %v11281_v37 = vpop.permute.xlu0 %2719  ;;  %4246 = vrot.lane.b32.xlu1 %v4242_v44, %s13523_s23  ;;  %v2181_v16 = vsel %vm2180_vm1, %v13613_v4, %v13612_v1  ;;  %v2050_v44 = vadd.f32 %v2044_v11, %v2004_v46  ;;  %s9421_s23 = smov 52  }
 0xe04   : > { %v2002_v54 = vadd.f32 %v13597_v63, %v1956_v15  ;;  %v2187_v34 = vadd.f32 %v2181_v16, %v2141_v29  ;;  %v13616_v15 = vld [vmem:[#allocation70_spill] sm:$0xff]  ;;  %v13620_v29 = vld [vmem:[#allocation68_spill] sm:$0xff] }
 0xe06   : > { %3261 = vrot.lane.b32.xlu0 %v3253_v27, %s13605_s24  ;;  %v11296_v56 = vpop.permute.xlu1 %2717  ;;  %v2048_v63 = vadd.f32 %v13603_v31, %v2002_v54  ;;  %v2090_v31 = vsel %vm2088_vm8, %v13606_v22, %v13615_v28  ;;  %v11328_v46 = vadd.f32 %v13616_v15, %v2187_v34  ;;  %v13619_v22 = vld [vmem:[#allocation66_spill] sm:$0xff] }
 0xe07   : > { %v11305_v33 = vpop.permute.xlu0 %3772  ;;  %4611 = vperm.xlu1 %9302, %v11004_v47   ;;  %v2096_v54 = vadd.f32 %v2090_v31, %v2050_v44  ;;  %v2136_v11 = vsel %vm2134_vm11, %v13610_v51, %v13619_v22  ;;  %vm3700_vm11 = vcmask 588800  }
 0xe08   : > { %v2094_v27 = vadd.f32 %v13607_v24, %v2048_v63  ;;  %13617 = vst [vmem:[#allocation24_spill] sm:$0xff] %v11328_v46 }
 0xe09   : > { %v2142_v45 = vadd.f32 %v2136_v11, %v2096_v54  ;;  %v13626_v54 = vld [vmem:[#allocation10_spill] sm:$0xff] }
 0xe0a   : > { %4292 = vrot.lane.b32.xlu0 %v4287_v0, %s13531_s0  ;;  %v11318_v36 = vpop.permute.xlu1 %2721  ;;  %v2140_v7 = vadd.f32 %v13611_v50, %v2094_v27  ;;  %v2182_v50 = vsel %vm2180_vm1, %v13612_v1, %v13620_v29 }
 0xe0b   : > { %v11321_v42 = vpop.permute.xlu0 %2739  ;;  %3259 = vrot.lane.b32.xlu1 %v3252_v39, %s13605_s24  ;;  %v2188_v44 = vadd.f32 %v2182_v50, %v2142_v45  ;;  %v13629_v50 = vmov 0.0  }
 0xe0c   : > { %9304 = vset.pattern.permute.xlu1 %v13618_v57  ;;  %v2186_v24 = vadd.f32 %v13613_v4, %v2140_v7 }
 0xe0d   : > { %v11357_v39 = vadd.f32 %v13616_v15, %v2188_v44 }
 0xe0e   : > { %v11333_v16 = vpop.permute.xlu1 %3774  ;;  %3286 = vrot.lane.b32.xlu0 %v11328_v46, %s13401_s27  ;;  %v11348_v0 = vadd.f32 %v13616_v15, %v2186_v24 }
 0xe0f   : > { %v11338_v61 = vpop.permute.xlu0 %2780  ;;  %4290 = vrot.lane.b32.xlu1 %v4286_v14, %s13531_s0  ;;  %13622 = vst [vmem:[#allocation26_spill] sm:$0xff] %v11357_v39  ;;  %v13627_v14 = vand.u32 4294901760, %v13626_v54 }
 0xe10   : > { %13621 = vst [vmem:[#allocation64_spill] sm:$0xff] %v11348_v0 }
 0xe11   : > { %v4749_v24 = vsub.f32 %v13626_v54, %v13627_v14  ;;  %v3317_v54 = vrot.slane %v10688_v21, %v9693_v40  ;;  %v9316_v14 = vld [vmem:[%s13151_s6 + $0x88] sm:$0xff]  ;;  %v3396_v21 = vmul.f32 %v3391_v13, %v10979_v55 }
 0xe12   : > { %v11350_v63 = vpop.permute.xlu1 %2741 }
 0xe13   : > { %v11352_v4 = vpop.permute.xlu0 %2784  ;;  %3284 = vrot.lane.b32.xlu1 %v11348_v0, %s13401_s27  ;;  %v4750_v22 = vand.u32 4294901760, %v4749_v24  ;;  %v3321_v24 = vrot.slane %v9316_v14, %v9693_v40 }
 0xe15   : > { %4751 = vmatmul.mubr.f32.vlgmr.msra.gmra.mrb[2].mxu0 %v4750_v22 }
 0xe16   : > { %v11359_v51 = vpop.permute.xlu1 %2782  ;;  %5347 = vmatprep.mubr.f32.mxu0 %v13629_v50 }
 0xe17   : > { %v11361_v34 = vpop.permute.xlu0 %3837  ;;  %3288 = vrot.lane.b32.xlu1 %v11357_v39, %s13401_s27 }
 0xe1a   : > { %v11365_v1 = vpop.permute.xlu1 %3835 }
 0xe1b   : > { %v11367_v6 = vpop.permute.xlu0 %2828 }
 0xe1e   : > { %v11369_v27 = vpop.permute.xlu1 %2826 }
 0xe1f   : > { %13623 = vst [vmem:[#allocation93_spill] sm:$0xff] %v11369_v27  ;;  %v11371_v28 = vpop.permute.xlu0 %3879 }
 0xe22   : > { %v11373_v31 = vpop.permute.xlu1 %2830 }
 0xe23   : > { %v11375_v57 = vpop.permute.xlu0 %2872 }
 0xe24   : > { %13624 = vst [vmem:[#allocation65_spill] sm:$0xff] %v11375_v57 }
 0xe26   : > { %v11377_v15 = vpop.permute.xlu1 %3881 }
 0xe27   : > { %v11379_v7 = vpop.permute.xlu0 %2876 }
 0xe28   : > { %13625 = vst [vmem:[#allocation28_spill] sm:$0xff] %v11379_v7  ;;  %v3395_v7 = vrot.slane %v9316_v14, %v9717_v52  ;;  %v13636_v14 = vld [vmem:[#allocation61_spill] sm:$0xff] }
 0xe2a   : > { %v11384_v11 = vpop.permute.xlu1 %2874 }
 0xe2b   : > { %13628 = vst [vmem:[#allocation90_spill] sm:$0xff] %v11384_v11  ;;  %v11386_v29 = vpop.permute.xlu0 %3925  ;;  %v3366_v11 = vmul.f32 %v10950_v43, %v9899_v30 }
 0xe2e   : > { %v11389_v45 = vpop.permute.xlu1 %3923 }
 0xe2f   : > { %v11391_v44 = vpop.permute.xlu0 %2918 }
 0xe30   : > { %13630 = vst [vmem:[#allocation91_spill] sm:$0xff] %v11391_v44  ;;  %v3360_v44 = vsel %vm1294_vm9, %v10993_v35, %v10950_v43 }
 0xe32   : > { %v11393_v0 = vpop.permute.xlu1 %2916 }
 0xe33   : > { %13631 = vst [vmem:[#allocation30_spill] sm:$0xff] %v11393_v0  ;;  %v11395_v46 = vpop.permute.xlu0 %3967 }
 0xe36   : > { %v11397_v39 = vpop.permute.xlu1 %2920 }
 0xe37   : > { %13632 = vst [vmem:[#allocation45_spill] sm:$0xff] %v11397_v39  ;;  %v11399_v38 = vpop.permute.xlu0 %4128 }
 0xe3a   : > { %v11407_v22 = vpop.permute.xlu1 %3969 }
 0xe3c   : > { %v3312_v50 = vpop.permute.xlu0 %3311 }
 0xe3d   : > { %v3322_v0 = vmul.f32 %v3317_v54, %v3312_v50  ;;  %v3323_v57 = vmul.f32 %v3321_v24, %v3312_v50  ;;  %v3365_v50 = vmul.f32 0.0, %v3360_v44  ;;  %v3433_v44 = vsel %vm2815_vm14, %v11012_v49, %v10966_v3 }
 0xe3e   : > { %v11414_v39 = vpop.permute.xlu1 %2960 }
 0xe3f   : > { %13633 = vst [vmem:[#allocation11_spill] sm:$0xff] %v11414_v39  ;;  %3328 = vrot.lane.b32.xlu1 %v3323_v57, %s13605_s24  ;;  %3326 = vrot.lane.b32.xlu0 %v3322_v0, %s13605_s24  ;;  %v3397_v0 = vmul.f32 %v3395_v7, %v10979_v55  ;;  %v3398_v57 = vmul.f32 0.0, %v3396_v21  ;;  %v3364_v39 = vmul.f32 0.0, %v10993_v35  ;;  %v3439_v35 = vmul.f32 %v10966_v3, %v9901_v10 }
 0xe40   : > { %v11418_v27 = vpop.permute.xlu0 %2964  ;;  %v3479_v21 = vsel %vm3478_vm6, %v13636_v14, %v10991_v48 }
 0xe41   : > { %13634 = vst [vmem:[#allocation32_spill] sm:$0xff] %v11418_v27  ;;  %v3399_v43 = vmul.f32 %v3397_v0, %v9899_v30  ;;  %v3484_v0 = vmul.f32 %v3479_v21, %v9899_v30 }
 0xe42   : > { %v11424_v54 = vpop.permute.xlu1 %2962 }
 0xe43   : > { %3374 = vrot.lane.b32.xlu1 %v3366_v11, %s13411_s19  ;;  %3372 = vrot.lane.b32.xlu0 %v3365_v50, %s13411_s19  ;;  %v3437_v11 = vmul.f32 0.0, %v11012_v49  ;;  %v3483_v50 = vmul.f32 0.0, %v13636_v14 }
 0xe44   : > { %v11428_v24 = vpop.permute.xlu0 %4013 }
 0xe46   : > { %v11432_v27 = vpop.permute.xlu1 %4011 }
 0xe47   : > { %3402 = vrot.lane.b32.xlu1 %v3398_v57, %s13605_s24  ;;  %3370 = vrot.lane.b32.xlu0 %v3364_v39, %s13411_s19  ;;  %v3438_v39 = vmul.f32 %v3433_v44, %v9899_v30 }
 0xe48   : > { %v11436_v13 = vpop.permute.xlu0 %3004 }
 0xe49   : > { %13635 = vst [vmem:[#allocation47_spill] sm:$0xff] %v11436_v13 }
 0xe4a   : > { %v11443_v55 = vpop.permute.xlu1 %4415 }
 0xe4b   : > { %3443 = vrot.lane.b32.xlu1 %v3437_v11, %s13366_s22  ;;  %3404 = vrot.lane.b32.xlu0 %v3399_v43, %s13605_s24  ;;  %v3485_v43 = vmul.f32 %v10991_v48, %v9901_v10  ;;  %v13638_v11 = vld [vmem:[#allocation62_spill] sm:$0xff]  ;;  %v13641_v48 = vld [vmem:[#allocation20_spill] sm:$0xff] }
 0xe4c   : > { %v11450_v7 = vpop.permute.xlu0 %3008  ;;  %v3527_v44 = vmul.f32 0.0, %v13638_v11  ;;  %v3567_v13 = vsel %vm2180_vm1, %v13641_v48, %v11076_v19 }
 0xe4e   : > { %v11455_v49 = vpop.permute.xlu1 %3006 }
 0xe4f   : > { %13637 = vst [vmem:[#allocation12_spill] sm:$0xff] %v11455_v49  ;;  %3447 = vrot.lane.b32.xlu1 %v3439_v35, %s13366_s22  ;;  %3445 = vrot.lane.b32.xlu0 %v3438_v39, %s13366_s22  ;;  %v13639_v35 = vld [vmem:[#allocation95_spill] sm:$0xff] }
 0xe50   : > { %v11463_v3 = vpop.permute.xlu0 %4057  ;;  %v3523_v39 = vsel %vm2832_vm2, %v13638_v11, %v13639_v35  ;;  %v3529_v21 = vmul.f32 %v13639_v35, %v9901_v10  ;;  %v3571_v11 = vmul.f32 0.0, %v13641_v48 }
 0xe52   : > { %v11461_v57 = vpop.permute.xlu1 %4055 }
 0xe53   : > { %3491 = vrot.lane.b32.xlu1 %v3484_v0, %s13414_s17  ;;  %3489 = vrot.lane.b32.xlu0 %v3483_v50, %s13414_s17  ;;  %v3528_v50 = vmul.f32 %v3523_v39, %v9899_v30  ;;  %v3573_v39 = vmul.f32 %v11076_v19, %v9901_v10  ;;  %v3655_v19 = vsel %vm13644_vm0, %v11162_v18, %v11202_v20 }
 0xe54   : > { %v11480_v0 = vpop.permute.xlu0 %3050 }
 0xe55   : > { %13640 = vst [vmem:[#allocation13_spill] sm:$0xff] %v11480_v0  ;;  %v3615_v0 = vmul.f32 0.0, %v11133_v58 }
 0xe56   : > { %v11473_v14 = vpop.permute.xlu1 %4202 }
 0xe57   : > { %3533 = vrot.lane.b32.xlu1 %v3527_v44, %s13527_s8  ;;  %3493 = vrot.lane.b32.xlu0 %v3485_v43, %s13414_s17  ;;  %v3572_v43 = vmul.f32 %v3567_v13, %v9899_v30  ;;  %v3617_v13 = vmul.f32 %v11117_v8, %v9901_v10 }
 0xe58   : > { %v11493_v35 = vpop.permute.xlu0 %3054 }
 0xe5a   : > { %v11485_v49 = vpop.permute.xlu1 %3052 }
 0xe5b   : > { %3537 = vrot.lane.b32.xlu1 %v3529_v21, %s13527_s8  ;;  %3535 = vrot.lane.b32.xlu0 %v3528_v50, %s13527_s8  ;;  %v3611_v21 = vsel %vm13642_vm13, %v11133_v58, %v11117_v8  ;;  %v3659_v58 = vmul.f32 0.0, %v11162_v18  ;;  %v3701_v18 = vsel %vm3700_vm11, %v11239_v60, %v11223_v23  ;;  %vm2411_vm13 = vcmask 982016  }
 0xe5c   : > { %v3616_v48 = vmul.f32 %v3611_v21, %v9899_v30  ;;  %v3661_v21 = vmul.f32 %v11202_v20, %v9901_v10  ;;  %v9318_v20 = vld [vmem:[%s13151_s6 + $0x98] sm:$0xff] }
 0xe5e   : > { %v11491_v44 = vpop.permute.xlu1 %3081 }
 0xe5f   : > { %3579 = vrot.lane.b32.xlu1 %v3572_v43, %s13524_s16  ;;  %3577 = vrot.lane.b32.xlu0 %v3571_v11, %s13524_s16  ;;  %v11510_v11 = vpop.permute.xlu0 %3083 }
 0xe60   : > { %13643 = vst [vmem:[#allocation34_spill] sm:$0xff] %v11510_v11 }
 0xe62   : > { %v11503_v50 = vpop.permute.xlu1 %4099 }
 0xe63   : > { %3621 = vrot.lane.b32.xlu1 %v3615_v0, %s13530_s30  ;;  %3581 = vrot.lane.b32.xlu0 %v3573_v39, %s13524_s16  ;;  %v3660_v0 = vmul.f32 %v3655_v19, %v9899_v30  ;;  %v11521_v8 = vpop.permute.xlu0 %4101 }
 0xe66   : > { %v11515_v43 = vpop.permute.xlu1 %4508 }
 0xe67   : > { %13645 = vst [vmem:[#allocation49_spill] sm:$0xff] %v11515_v43  ;;  %3625 = vrot.lane.b32.xlu1 %v3617_v13, %s13530_s30  ;;  %3623 = vrot.lane.b32.xlu0 %v3616_v48, %s13530_s30  ;;  %v3705_v13 = vmul.f32 0.0, %v11239_v60  ;;  %v9317_v48 = vld [vmem:[%s13151_s6 + $0x90] sm:$0xff]  ;;  %v3707_v60 = vmul.f32 %v11223_v23, %v9901_v10 }
 0xe68   : > { %v3733_v19 = vrot.slane %v9317_v48, %v9717_v52  ;;  %v13648_v48 = vld [vmem:[#allocation22_spill] sm:$0xff] }
 0xe6a   : > { %v11523_v39 = vpop.permute.xlu1 %3127  ;;  %v3738_v43 = vmul.f32 %v3733_v19, %v13648_v48  ;;  %v3804_v19 = vmul.f32 %v11258_v2, %v9899_v30 }
 0xe6b   : > { %13646 = vst [vmem:[#allocation14_spill] sm:$0xff] %v11523_v39  ;;  %3667 = vrot.lane.b32.xlu1 %v3660_v0, %s9421_s23  ;;  %3665 = vrot.lane.b32.xlu0 %v3659_v58, %s9421_s23  ;;  %v3737_v58 = vrot.slane %v9318_v20, %v9717_v52  ;;  %v3706_v0 = vmul.f32 %v3701_v18, %v9899_v30 }
 0xe6c   : > { %v3776_v20 = vsel %vm1294_vm9, %v11305_v33, %v11333_v16 }
 0xe6d   : > { %v3739_v39 = vmul.f32 %v3737_v58, %v13648_v48  ;;  %v3781_v18 = vmul.f32 %v3776_v20, %v9899_v30  ;;  %v3780_v58 = vmul.f32 0.0, %v11305_v33 }
 0xe6f   : > { %3711 = vrot.lane.b32.xlu1 %v3705_v13, %s9422_s18  ;;  %3669 = vrot.lane.b32.xlu0 %v3661_v21, %s9421_s23  ;;  %v11546_v13 = vpop.permute.xlu0 %3125  ;;  %v11548_v21 = vpop.permute.xlu1 %4173 }
 0xe70   : > { %13647 = vst [vmem:[#allocation15_spill] sm:$0xff] %v11546_v13 }
 0xe73   : > { %3715 = vrot.lane.b32.xlu1 %v3707_v60, %s9422_s18  ;;  %3713 = vrot.lane.b32.xlu0 %v3706_v0, %s9422_s18  ;;  %v11557_v52 = vpop.permute.xlu0 %3129  ;;  %v11559_v23 = vpop.permute.xlu1 %3169  ;;  %v3782_v60 = vmul.f32 %v11333_v16, %v9901_v10  ;;  %v3805_v16 = vmul.f32 %v11258_v2, %v9901_v10  ;;  %v3883_v2 = vsel %vm3478_vm6, %v11371_v28, %v11377_v15 }
 0xe74   : > { %13649 = vst [vmem:[#allocation16_spill] sm:$0xff] %v11557_v52  ;;  %13650 = vst [vmem:[#allocation36_spill] sm:$0xff] %v11559_v23  ;;  %v13675_v52 = vld [vmem:[#allocation75_spill] sm:$0xff] }
 0xe77   : > { %3744 = vrot.lane.b32.xlu1 %v3739_v39, %s13605_s24  ;;  %3742 = vrot.lane.b32.xlu0 %v3738_v43, %s13605_s24  ;;  %v11571_v0 = vpop.permute.xlu0 %4175  ;;  %v11573_v48 = vpop.permute.xlu1 %3173  ;;  %v3843_v43 = vmul.f32 %v11365_v1, %v9899_v30  ;;  %v3839_v39 = vsel %vm2815_vm14, %v11365_v1, %v11361_v34  ;;  %v3887_v1 = vmul.f32 %v11371_v28, %v9899_v30 }
 0xe78   : > { %13651 = vst [vmem:[#allocation51_spill] sm:$0xff] %v11573_v48 }
 0xe7b   : > { %3790 = vrot.lane.b32.xlu1 %v3782_v60, %s13411_s19  ;;  %3788 = vrot.lane.b32.xlu0 %v3781_v18, %s13411_s19  ;;  %v11584_v20 = vpop.permute.xlu0 %3171  ;;  %v11586_v33 = vpop.permute.xlu1 %3213  ;;  %v3845_v18 = vmul.f32 0.0, %v11361_v34  ;;  %v3844_v60 = vmul.f32 %v3839_v39, %v9901_v10  ;;  %v3889_v34 = vmul.f32 0.0, %v11377_v15  ;;  %v3927_v39 = vsel %vm2832_vm2, %v11389_v45, %v11386_v29 }
 0xe7c   : > { %13652 = vst [vmem:[#allocation25_spill] sm:$0xff] %v11584_v20  ;;  %13653 = vst [vmem:[#allocation17_spill] sm:$0xff] %v11586_v33 }
 0xe7f   : > { %3808 = vrot.lane.b32.xlu1 %v3804_v19, %s13605_s24  ;;  %3786 = vrot.lane.b32.xlu0 %v3780_v58, %s13411_s19  ;;  %v3888_v19 = vmul.f32 %v3883_v2, %v9901_v10  ;;  %v11600_v58 = vpop.permute.xlu0 %3275  ;;  %v3932_v2 = vmul.f32 %v3927_v39, %v9901_v10  ;;  %v13663_v39 = vmov 11  }
 0xe80   : > { %13655 = vst [vmem:[#allocation38_spill] sm:$0xff] %v11600_v58 }
 0xe83   : > { %3849 = vrot.lane.b32.xlu1 %v3843_v43, %s13654_s1  ;;  %3810 = vrot.lane.b32.xlu0 %v3805_v16, %s13605_s24  ;;  %v11602_v16 = vpop.permute.xlu1 %3215  ;;  %v3931_v43 = vmul.f32 %v11389_v45, %v9899_v30  ;;  %v11612_v28 = vpop.permute.xlu0 %3217  ;;  %v3971_v45 = vsel %vm2180_vm1, %v11395_v46, %v11407_v22 }
 0xe84   : > { %13656 = vst [vmem:[#allocation53_spill] sm:$0xff] %v11602_v16  ;;  %13657 = vst [vmem:[#allocation18_spill] sm:$0xff] %v11612_v28  ;;  %v13669_v28 = vld [vmem:[#allocation71_spill] sm:$0xff] }
 0xe85   : > { %v2234_v48 = vmul.f32 0.0, %v13669_v28 }
 0xe87   : > { %3853 = vrot.lane.b32.xlu1 %v3845_v18, %s13654_s1  ;;  %3851 = vrot.lane.b32.xlu0 %v3844_v60, %s13654_s1  ;;  %v11614_v18 = vpop.permute.xlu1 %4246  ;;  %v3933_v60 = vmul.f32 0.0, %v11386_v29  ;;  %v11622_v15 = vpop.permute.xlu0 %4248  ;;  %v3975_v29 = vmul.f32 %v11395_v46, %v9899_v30  ;;  %v4015_v46 = vsel %vm13581_vm10, %v11432_v27, %v11428_v24  ;;  %vm2588_vm10 = vcmask 736256  }
 0xe88   : > { %13658 = vst [vmem:[#allocation27_spill] sm:$0xff] %v11614_v18  ;;  %13659 = vst [vmem:[#allocation19_spill] sm:$0xff] %v11622_v15  ;;  %v4063_v18 = vmul.f32 %v11461_v57, %v9899_v30 }
 0xe8b   : > { %3895 = vrot.lane.b32.xlu1 %v3888_v19, %s13414_s17  ;;  %3893 = vrot.lane.b32.xlu0 %v3887_v1, %s13414_s17  ;;  %v11624_v1 = vpop.permute.xlu1 %4611  ;;  %v3976_v19 = vmul.f32 %v3971_v45, %v9901_v10  ;;  %v13665_v45 = vld [vmem:[#allocation73_spill] sm:$0xff] }
 0xe8c   : > { %13660 = vst [vmem:[#allocation40_spill] sm:$0xff] %v11624_v1  ;;  %v4019_v1 = vmul.f32 %v11432_v27, %v9899_v30  ;;  %v13670_v27 = vld [vmem:[#allocation76_spill] sm:$0xff] }
 0xe8f   : > { %3937 = vrot.lane.b32.xlu1 %v3931_v43, %s13527_s8  ;;  %3897 = vrot.lane.b32.xlu0 %v3889_v34, %s13414_s17  ;;  %v11634_v34 = vpop.permute.xlu0 %3257  ;;  %v11636_v43 = vpop.permute.xlu1 %3259 }
 0xe90   : > { %13661 = vst [vmem:[#allocation54_spill] sm:$0xff] %v11634_v34  ;;  %13662 = vst [vmem:[#allocation21_spill] sm:$0xff] %v11636_v43  ;;  %v13671_v34 = vld [vmem:[#allocation77_spill] sm:$0xff] }
 0xe93   : > { %3941 = vrot.lane.b32.xlu1 %v3933_v60, %s13527_s8  ;;  %3939 = vrot.lane.b32.xlu0 %v3932_v2, %s13527_s8  ;;  %v13664_v60 = vmov 12   ;;  %v3977_v2 = vmul.f32 0.0, %v11407_v22  ;;  %v11655_v22 = vpop.permute.xlu0 %3261  ;;  %v11657_v58 = vpop.permute.xlu1 %4290 }
 0xe94   : > { %13667 = vst [vmem:[#allocation29_spill] sm:$0xff] %v11655_v22  ;;  %13668 = vst [vmem:[#allocation23_spill] sm:$0xff] %v11657_v58  ;;  %v13674_v22 = vld [vmem:[#allocation80_spill] sm:$0xff] }
 0xe97   : > { %4386 = vperm.xlu1 %9304, %v11004_v47   ;;  %4356 = vperm.xlu0 %9303, %v11004_v47  }
 0xe9b   : > { %3981 = vrot.lane.b32.xlu1 %v3975_v29, %s13524_s16  ;;  %3983 = vrot.lane.b32.xlu0 %v3976_v19, %s13524_s16  ;;  %v13666_v29 = vld [vmem:[#allocation74_spill] sm:$0xff] }
 0xe9c   : > { %9305 = vset.pattern.permute.xlu1 %v13663_v39  ;;  %9306 = vset.pattern.permute.xlu0 %v13664_v60  ;;  %v2276_v19 = vsel %vm1202_vm15, %v13666_v29, %v13665_v45  ;;  %v4021_v39 = vmul.f32 0.0, %v11428_v24  ;;  %v4020_v60 = vmul.f32 %v4015_v46, %v9901_v10  ;;  %v13673_v46 = vld [vmem:[#allocation79_spill] sm:$0xff] }
 0xe9d   : > { %v2281_v29 = vadd.f32 %v2276_v19, %v2234_v48  ;;  %v2366_v43 = vsel %vm2365_vm3, %v13674_v22, %v13673_v46  ;;  %v11679_v48 = vpop.permute.xlu0 %4292  ;;  %v11681_v19 = vpop.permute.xlu1 %3284  ;;  %v13680_v22 = vld [vmem:[#allocation78_spill] sm:$0xff] }
 0xe9e   : > { %13678 = vst [vmem:[#allocation42_spill] sm:$0xff] %v11679_v48  ;;  %13679 = vst [vmem:[#allocation55_spill] sm:$0xff] %v11681_v19  ;;  %v13687_v19 = vmov 17  }
 0xe9f   : > { %3985 = vrot.lane.b32.xlu1 %v3977_v2, %s13524_s16  ;;  %4025 = vrot.lane.b32.xlu0 %v4019_v1, %s13530_s30  ;;  %v2320_v2 = vsel %vm1294_vm9, %v13671_v34, %v13670_v27  ;;  %v13672_v1 = vld [vmem:[#allocation72_spill] sm:$0xff]  ;;  %v4059_v34 = vsel %vm13644_vm0, %v11461_v57, %v11463_v3  ;;  %v4065_v57 = vmul.f32 0.0, %v11463_v3  ;;  %vm13694_vm0 = vcmask 523264  }
 0xea0   : > { %v2236_v24 = vmul.f32 %v13672_v1, %v9901_v10  ;;  %v2325_v33 = vadd.f32 %v2320_v2, %v2281_v29  ;;  %v13681_v2 = vld [vmem:[#allocation85_spill] sm:$0xff]  ;;  %v13682_v29 = vld [vmem:[#allocation86_spill] sm:$0xff]  ;;  %v4064_v13 = vmul.f32 %v4059_v34, %v9901_v10  ;;  %v4107_v34 = vmul.f32 %v11503_v50, %v9899_v30 }
 0xea1   : > { %v2456_v20 = vsel %vm1185_vm7, %v13682_v29, %v13681_v2  ;;  %v13686_v29 = vld [vmem:[#allocation88_spill] sm:$0xff] }
 0xea2   : > { %v2283_v58 = vadd.f32 %v13675_v52, %v2236_v24  ;;  %v2371_v24 = vadd.f32 %v2366_v43, %v2325_v33  ;;  %v13684_v33 = vld [vmem:[#allocation84_spill] sm:$0xff]  ;;  %v13685_v43 = vld [vmem:[#allocation89_spill] sm:$0xff] }
 0xea3   : > { %4027 = vrot.lane.b32.xlu1 %v4020_v60, %s13530_s30  ;;  %4029 = vrot.lane.b32.xlu0 %v4021_v39, %s13530_s30  ;;  %v13676_v39 = vld [vmem:[#allocation82_spill] sm:$0xff]  ;;  %v13677_v60 = vld [vmem:[#allocation83_spill] sm:$0xff]  ;;  %v2500_v3 = vsel %vm1108_vm5, %v13686_v29, %v13685_v43  ;;  %v2230_v29 = vsel %vm2180_vm1, %v13669_v28, %v13672_v1 }
 0xea4   : > { %v2412_v16 = vsel %vm2411_vm13, %v13677_v60, %v13676_v39  ;;  %v2327_v23 = vadd.f32 %v13680_v22, %v2283_v58  ;;  %v13683_v60 = vld [vmem:[#allocation81_spill] sm:$0xff]  ;;  %v11735_v28 = vld [vmem:[%s13151_s6 + $0xa8] sm:$0xff] }
 0xea5   : > { %v2417_v48 = vadd.f32 %v2412_v16, %v2371_v24  ;;  %v13688_v16 = vld [vmem:[#allocation6_spill] sm:$0xff]  ;;  %v13690_v24 = vld [vmem:[#allocation87_spill] sm:$0xff] }
 0xea6   : > { %v2373_v15 = vadd.f32 %v13683_v60, %v2327_v23  ;;  %v11705_v23 = vld [vmem:[%s13151_s6 + $0xa0] sm:$0xff]  ;;  %v4138_v1 = vrot.slane %v11735_v28, %v13688_v16 }
 0xea7   : > { %4459 = vperm.xlu1 %9305, %v11004_v47   ;;  %4069 = vrot.lane.b32.xlu0 %v4063_v18, %s9421_s23  ;;  %v4103_v47 = vsel %vm3700_vm11, %v11503_v50, %v11521_v8  ;;  %v2461_v18 = vadd.f32 %v2456_v20, %v2417_v48  ;;  %v11714_v48 = vpop.permute.xlu1 %3288  ;;  %vm2634_vm11 = vcmask 719872   ;;  %v2277_v50 = vsel %vm1202_vm15, %v13665_v45, %v13675_v52 }
 0xea8   : > { %v2419_v58 = vadd.f32 %v13684_v33, %v2373_v15  ;;  %v4108_v20 = vmul.f32 %v4103_v47, %v9901_v10  ;;  %v11712_v15 = vpop.permute.xlu0 %3286  ;;  %13689 = vst [vmem:[#allocation31_spill] sm:$0xff] %v11714_v48  ;;  %v13691_v47 = vld [vmem:[#allocation92_spill] sm:$0xff] }
 0xea9   : > { %v2505_v11 = vadd.f32 %v2500_v3, %v2461_v18  ;;  %v4109_v3 = vmul.f32 0.0, %v11521_v8  ;;  %v2321_v8 = vsel %vm1294_vm9, %v13670_v27, %v13680_v22 }
 0xeab   : > { %4071 = vrot.lane.b32.xlu1 %v4064_v13, %s9421_s23  ;;  %4073 = vrot.lane.b32.xlu0 %v4065_v57, %s9421_s23  ;;  %v4134_v13 = vrot.slane %v11705_v23, %v13688_v16  ;;  %v2544_v57 = vsel %vm1720_vm4, %v11092_v25, %v11112_v17  ;;  %v2589_v25 = vsel %vm2588_vm10, %v11157_v32, %v11141_v12  ;;  %v13693_v32 = vld [vmem:[#allocation63_spill] sm:$0xff]  ;;  %v11753_v16 = vld [vmem:[%s13151_s6 + $0xd0] sm:$0xff] }
 0xeac   : > { %9308 = vset.pattern.permute.xlu1 %v13687_v19  ;;  %v2463_v19 = vadd.f32 %v13690_v24, %v2419_v58  ;;  %v2549_v48 = vadd.f32 %v2544_v57, %v2505_v11  ;;  %v4421_v27 = vrot.slane %v11753_v16, %v9693_v40 }
 0xead   : > { %v4139_v18 = vmul.f32 %v4134_v13, %v11399_v38 }
 0xeae   : > { %v2507_v58 = vadd.f32 %v13691_v47, %v2463_v19  ;;  %v2594_v13 = vadd.f32 %v2589_v25, %v2549_v48 }
 0xeaf   : > { %4113 = vrot.lane.b32.xlu1 %v4107_v34, %s9422_s18  ;;  %4115 = vrot.lane.b32.xlu0 %v4108_v20, %s9422_s18  ;;  %v2235_v34 = vmul.f32 %v2230_v29, %v9899_v30  ;;  %v2635_v20 = vsel %vm2634_vm11, %v11186_v9, %v11217_v41  ;;  %v2679_v9 = vsel %vm13694_vm0, %v11245_v53, %v11275_v5  ;;  %vm2786_vm0 = vcmask 474112  }
 0xeb0   : > { %v2551_v11 = vadd.f32 %v13693_v32, %v2507_v58  ;;  %v2367_v29 = vsel %vm2365_vm3, %v13673_v46, %v13683_v60  ;;  %v2640_v58 = vadd.f32 %v2635_v20, %v2594_v13  ;;  %v2723_v53 = vsel %vm2088_vm8, %v11296_v56, %v11281_v37  ;;  %v11781_v46 = vld [vmem:[%s13151_s6 + $0xd8] sm:$0xff]  ;;  %v13695_v13 = vld [vmem:[#allocation8_spill] sm:$0xff] }
 0xeb1   : > { %v11741_v52 = vpop.permute.xlu1 %3328  ;;  %v11743_v45 = vpop.permute.xlu0 %3326  ;;  %v2282_v19 = vadd.f32 %v2277_v50, %v2235_v34 }
 0xeb2   : > { %13692 = vst [vmem:[#allocation44_spill] sm:$0xff] %v11743_v45  ;;  %v2596_v57 = vadd.f32 %v11181_v59, %v2551_v11  ;;  %v4140_v45 = vmul.f32 %v4138_v1, %v11399_v38  ;;  %v2413_v38 = vsel %vm2411_vm13, %v13676_v39, %v13684_v33  ;;  %v2684_v60 = vadd.f32 %v2679_v9, %v2640_v58  ;;  %v11790_v1 = vld [vmem:[%s13149_s4 + $0x18] sm:$0x1f] }
 0xeb3   : > { %4117 = vrot.lane.b32.xlu1 %v4109_v3, %s9422_s18  ;;  %4143 = vrot.lane.b32.xlu0 %v4139_v18, %s13605_s24  ;;  %v2326_v50 = vadd.f32 %v2321_v8, %v2282_v19  ;;  %v2457_v3 = vsel %vm1185_vm7, %v13681_v2, %v13690_v24  ;;  %v4425_v39 = vrot.slane %v11781_v46, %v9693_v40  ;;  %v13696_v24 = vmov 16  }
 0xeb4   : > { %v2642_v25 = vadd.f32 %v11207_v26, %v2596_v57  ;;  %v2728_v34 = vadd.f32 %v2723_v53, %v2684_v60  ;;  %v4426_v33 = vmul.f32 %v4421_v27, %v11443_v55  ;;  %v4208_v19 = vrot.slane %v11705_v23, %v13695_v13  ;;  %v13697_v60 = vld [vmem:[#allocation28_spill] sm:$0xff] }
 0xeb5   : > { %v11770_v22 = vpop.permute.xlu1 %3374  ;;  %v11772_v48 = vpop.permute.xlu0 %3372  ;;  %v2372_v56 = vadd.f32 %v2367_v29, %v2326_v50  ;;  %v2788_v2 = vsel %vm2786_vm0, %v11359_v51, %v11352_v4  ;;  %v2501_v29 = vsel %vm1108_vm5, %v13685_v43, %v13691_v47  ;;  %v2545_v23 = vsel %vm1720_vm4, %v11112_v17, %v13693_v32 }
 0xeb6   : > { %v2686_v18 = vadd.f32 %v11264_v62, %v2642_v25  ;;  %v2747_v57 = vadd.f32 %v11321_v42, %v2728_v34  ;;  %v2834_v4 = vsel %vm2832_vm2, %v11367_v6, %v11373_v31  ;;  %v4427_v50 = vmul.f32 %v4425_v39, %v11443_v55 }
 0xeb7   : > { %4145 = vrot.lane.b32.xlu1 %v4140_v45, %s13605_s24  ;;  %4489 = vperm.xlu0 %9306, %v11790_v1   ;;  %v2418_v20 = vadd.f32 %v2413_v38, %v2372_v56  ;;  %v4213_v47 = vmul.f32 %v4208_v19, %v11473_v14  ;;  %v4177_v38 = vsel %vm1294_vm9, %v11548_v21, %v11571_v0  ;;  %v13698_v56 = vld [vmem:[#allocation90_spill] sm:$0xff]  ;;  %vm13699_vm4 = vcmask 261120  }
 0xeb8   : > { %v2730_v8 = vadd.f32 %v11318_v36, %v2686_v18  ;;  %v2792_v27 = vadd.f32 %v11338_v61, %v2747_v57  ;;  %v4181_v17 = vmul.f32 %v11548_v21, %v9899_v30  ;;  %v2879_v31 = vsel %vm13699_vm4, %v13698_v56, %v13697_v60  ;;  %v13700_v18 = vld [vmem:[#allocation93_spill] sm:$0xff] }
 0xeb9   : > { %v11800_v45 = vpop.permute.xlu1 %3402  ;;  %v11802_v11 = vpop.permute.xlu0 %3370  ;;  %v2462_v9 = vadd.f32 %v2457_v3, %v2418_v20  ;;  %v2590_v55 = vsel %vm2588_vm10, %v11141_v12, %v11181_v59  ;;  %v13702_v20 = vld [vmem:[#allocation91_spill] sm:$0xff]  ;;  %vm13703_vm7 = vcmask 244736   ;;  %v2636_v12 = vsel %vm2634_vm11, %v11217_v41, %v11207_v26  ;;  %v13705_v59 = vld [vmem:[#allocation65_spill] sm:$0xff]  ;;  %v13710_v41 = vld [vmem:[#allocation12_spill] sm:$0xff] }
 0xeba   : > { %v2749_v58 = vadd.f32 %v11350_v63, %v2730_v8  ;;  %v2838_v3 = vadd.f32 %v13700_v18, %v2792_v27  ;;  %v4182_v8 = vmul.f32 %v4177_v38, %v9901_v10  ;;  %vm13707_vm10 = vcmask 228352  }
 0xebb   : > { %4430 = vrot.lane.b32.xlu1 %v4426_v33, %s13531_s0  ;;  %9307 = vset.pattern.permute.xlu0 %v13696_v24  ;;  %v2506_v32 = vadd.f32 %v2501_v29, %v2462_v9  ;;  %v13701_v33 = vld [vmem:[#allocation45_spill] sm:$0xff]  ;;  %v4215_v29 = vmul.f32 %v4213_v47, %v9901_v10  ;;  %vm13708_vm4 = vcmask 523264   ;;  %vm3056_vm11 = vcmask 195584  }
 0xebc   : > { %4552 = vperm.xlu0 %9307, %v11790_v1   ;;  %v2794_v43 = vadd.f32 %v2788_v2, %v2749_v58  ;;  %v2923_v21 = vsel %vm13703_vm7, %v13702_v20, %v13701_v33  ;;  %v13704_v2 = vmov 0   ;;  %v2883_v24 = vadd.f32 %v13705_v59, %v2838_v3 }
 0xebd   : > { %v11826_v25 = vpop.permute.xlu1 %3443  ;;  %v11828_v53 = vpop.permute.xlu0 %3404  ;;  %v2550_v39 = vadd.f32 %v2545_v23, %v2506_v32  ;;  %v13706_v23 = vld [vmem:[#allocation32_spill] sm:$0xff]  ;;  %v3012_v47 = vsel %vm3010_vm12, %v13710_v41, %v11450_v7  ;;  %v4183_v32 = vmul.f32 0.0, %v11571_v0  ;;  %v3058_v0 = vsel %vm3056_vm11, %v11485_v49, %v11493_v35 }
 0xebe   : > { %v2840_v34 = vadd.f32 %v2834_v4, %v2794_v43  ;;  %v2967_v27 = vsel %vm13707_vm10, %v11424_v54, %v13706_v23  ;;  %v2680_v4 = vsel %vm13708_vm4, %v11275_v5, %v11264_v62  ;;  %v8784_v62 = vld [vmem:[%s13150_s5 + $0x10] sm:$0x1f]  ;;  %v2724_v5 = vsel %vm2088_vm8, %v11281_v37, %v11318_v36  ;;  %v13715_v23 = vld [vmem:[#allocation34_spill] sm:$0xff] }
 0xebf   : > { %4432 = vrot.lane.b32.xlu1 %v4427_v50, %s13531_s0  ;;  %v2595_v58 = vadd.f32 %v2590_v55, %v2550_v39  ;;  %v13709_v50 = vld [vmem:[#allocation30_spill] sm:$0xff]  ;;  %v13711_v55 = vld [vmem:[#allocation11_spill] sm:$0xff]  ;;  %v3089_v37 = vmul.f32 %v11491_v44, %v9899_v30  ;;  %vm13721_vm8 = vcmask 261120  }
 0xec0   : > { %4187 = vrot.lane.b32.xlu0 %v4181_v17, %s13411_s19  ;;  %v2885_v9 = vadd.f32 %v2879_v31, %v2840_v34  ;;  %v2927_v43 = vadd.f32 %v13709_v50, %v2883_v24  ;;  %v4212_v17 = vrot.slane %v11735_v28, %v13695_v13  ;;  %v2743_v28 = vsel %vm2180_vm1, %v11321_v42, %v11350_v63  ;;  %v13712_v39 = vld [vmem:[#allocation47_spill] sm:$0xff]  ;;  %v13714_v63 = vld [vmem:[#allocation13_spill] sm:$0xff] }
 0xec1   : > { %v11849_v19 = vpop.permute.xlu1 %3447  ;;  %v11851_v57 = vpop.permute.xlu0 %3445  ;;  %9309 = vset.pattern.permute.xlu0 %v13704_v2  ;;  %v2641_v26 = vadd.f32 %v2636_v12, %v2595_v58  ;;  %v13713_v12 = vld [vmem:[#allocation7_spill] sm:$0xff] }
 0xec2   : > { %v2929_v38 = vadd.f32 %v2923_v21, %v2885_v9  ;;  %v2971_v3 = vadd.f32 %v13711_v55, %v2927_v43  ;;  %v4214_v35 = vmul.f32 %v4212_v17, %v11473_v14  ;;  %v4518_v24 = vrot.slane %v11781_v46, %v13713_v12 }
 0xec3   : > { %4189 = vrot.lane.b32.xlu1 %v4182_v8, %s13411_s19  ;;  %v2685_v34 = vadd.f32 %v2680_v4, %v2641_v26  ;;  %v2787_v8 = vsel %vm2786_vm0, %v11338_v61, %v11359_v51  ;;  %v13716_v4 = vld [vmem:[#allocation19_spill] sm:$0xff]  ;;  %v13717_v26 = vld [vmem:[#allocation14_spill] sm:$0xff]  ;;  %v2833_v51 = vsel %vm2832_vm2, %v13700_v18, %v11367_v6  ;;  %vm13727_vm0 = vmmov %vm13703_vm7 }
 0xec4   : > { %4219 = vrot.lane.b32.xlu0 %v4215_v29, %s13605_s24  ;;  %v2973_v7 = vadd.f32 %v2967_v27, %v2929_v38  ;;  %v3016_v33 = vadd.f32 %v13712_v39, %v2971_v3  ;;  %v3091_v27 = vmul.f32 0.0, %v13715_v23  ;;  %v4256_v43 = vmul.f32 0.0, %v13716_v4  ;;  %vm13729_vm7 = vmmov %vm13707_vm10 }
 0xec5   : > { %v11874_v60 = vpop.permute.xlu1 %3491  ;;  %v11876_v31 = vpop.permute.xlu0 %3489  ;;  %v2729_v36 = vadd.f32 %v2724_v5, %v2685_v34  ;;  %v13720_v5 = vld [vmem:[#allocation36_spill] sm:$0xff] }
 0xec6   : > { %v3018_v21 = vadd.f32 %v3012_v47, %v2973_v7  ;;  %v3062_v29 = vadd.f32 %v13714_v63, %v3016_v33  ;;  %v13718_v47 = vld [vmem:[#allocation15_spill] sm:$0xff] }
 0xec7   : > { %4191 = vrot.lane.b32.xlu1 %v4183_v32, %s13411_s19  ;;  %v2748_v38 = vadd.f32 %v2743_v28, %v2729_v36  ;;  %v3131_v61 = vsel %vm1202_vm15, %v13718_v47, %v13717_v26  ;;  %v4216_v32 = vmul.f32 0.0, %v4214_v35  ;;  %v13726_v35 = vld [vmem:[#allocation23_spill] sm:$0xff] }
 0xec8   : > { %4322 = vperm.xlu0 %9309, %v8784_v62   ;;  %v3064_v58 = vadd.f32 %v3058_v0, %v3018_v21  ;;  %v3092_v14 = vadd.f32 %v3089_v37, %v3062_v29  ;;  %v13719_v62 = vld [vmem:[#allocation25_spill] sm:$0xff] }
 0xec9   : > { %v11901_v9 = vpop.permute.xlu1 %3533  ;;  %v11903_v42 = vpop.permute.xlu0 %3493  ;;  %v2793_v17 = vadd.f32 %v2787_v8, %v2748_v38  ;;  %v3175_v3 = vsel %vm1294_vm9, %v13720_v5, %v13719_v62  ;;  %v13722_v0 = vld [vmem:[#allocation49_spill] sm:$0xff]  ;;  %v13725_v8 = vld [vmem:[#allocation42_spill] sm:$0xff]  ;;  %v13730_v38 = vld [vmem:[#allocation27_spill] sm:$0xff] }
 0xeca   : > { %v4520_v28 = vmul.f32 %v4518_v24, %v13722_v0  ;;  %v3094_v6 = vadd.f32 %v3091_v27, %v3064_v58  ;;  %v3136_v18 = vadd.f32 %v3131_v61, %v3092_v14  ;;  %v13723_v21 = vld [vmem:[#allocation53_spill] sm:$0xff]  ;;  %v4294_v29 = vsel %vm3478_vm6, %v13726_v35, %v13725_v8 }
 0xecb   : > { %4582 = vperm.xlu1 %9308, %v11790_v1   ;;  %v2878_v1 = vsel %vm13721_vm8, %v13705_v59, %v13698_v56  ;;  %v2839_v33 = vadd.f32 %v2833_v51, %v2793_v17  ;;  %v13724_v37 = vld [vmem:[#allocation17_spill] sm:$0xff]  ;;  %v13728_v56 = vld [vmem:[#allocation16_spill] sm:$0xff]  ;;  %v2966_v27 = vsel %vm13729_vm7, %v13711_v55, %v11424_v54  ;;  %v4254_v47 = vmul.f32 %v13730_v38, %v9901_v10  ;;  %v13732_v51 = vld [vmem:[#allocation54_spill] sm:$0xff] }
 0xecc   : > { %4264 = vrot.lane.b32.xlu0 %v4256_v43, %s13654_s1  ;;  %v3219_v36 = vsel %vm2365_vm3, %v13724_v37, %v13723_v21  ;;  %v2922_v43 = vsel %vm13727_vm0, %v13709_v50, %v13702_v20  ;;  %v3138_v59 = vadd.f32 %v13728_v56, %v3094_v6  ;;  %v3180_v24 = vadd.f32 %v3175_v3, %v3136_v18  ;;  %v13731_v61 = vld [vmem:[#allocation21_spill] sm:$0xff]  ;;  %v13733_v17 = vld [vmem:[#allocation51_spill] sm:$0xff] }
 0xecd   : > { %v11919_v7 = vpop.permute.xlu1 %3537  ;;  %v11921_v34 = vpop.permute.xlu0 %3535  ;;  %v2884_v58 = vadd.f32 %v2878_v1, %v2839_v33  ;;  %v3263_v14 = vsel %vm2411_vm13, %v13732_v51, %v13731_v61  ;;  %v4299_v3 = vmul.f32 0.0, %v4294_v29  ;;  %v3011_v55 = vsel %vm3010_vm12, %v13712_v39, %v13710_v41  ;;  %v8801_v41 = vld [vmem:[%s13154_s9 + $0x10] sm:$0x1f]  ;;  %v13734_v39 = vld [vmem:[#allocation18_spill] sm:$0xff] }
 0xece   : > { %v3224_v5 = vadd.f32 %v3219_v36, %v3180_v24  ;;  %v3085_v1 = vsel %vm2180_vm1, %v11491_v44, %v13715_v23  ;;  %v4514_v18 = vrot.slane %v11753_v16, %v13713_v12  ;;  %v3057_v44 = vsel %vm3056_vm11, %v13714_v63, %v11485_v49  ;;  %v13735_v12 = vld [vmem:[#allocation55_spill] sm:$0xff] }
 0xecf   : > { %4221 = vrot.lane.b32.xlu1 %v4216_v32, %s13605_s24  ;;  %v3182_v32 = vadd.f32 %v13733_v17, %v3138_v59  ;;  %v2928_v54 = vadd.f32 %v2922_v43, %v2884_v58  ;;  %v3090_v29 = vmul.f32 %v3085_v1, %v9901_v10  ;;  %v3290_v43 = vsel %vm1108_vm5, %v13735_v12, %v11712_v15  ;;  %v13736_v59 = vld [vmem:[#allocation29_spill] sm:$0xff]  ;;  %v13737_v58 = vld [vmem:[#allocation38_spill] sm:$0xff] }
 0xed0   : > { %4525 = vrot.lane.b32.xlu0 %v4520_v28, %s13531_s0  ;;  %9310 = vset.pattern.permute.xlu1 %v13704_v2  ;;  %v4250_v2 = vsel %vm2815_vm14, %v13730_v38, %v13716_v4  ;;  %v3268_v28 = vadd.f32 %v3263_v14, %v3224_v5  ;;  %v3132_v51 = vsel %vm1202_vm15, %v13717_v26, %v13728_v56  ;;  %v11997_v5 = vld [vmem:[%s13151_s6 + $0xe0] sm:$0xff]  ;;  %vm3449_vm12 = vcmask 949248  }
 0xed1   : > { %v11948_v20 = vpop.permute.xlu1 %3579  ;;  %v11950_v50 = vpop.permute.xlu0 %3577  ;;  %v2972_v6 = vadd.f32 %v2966_v27, %v2928_v54  ;;  %v4255_v4 = vmul.f32 0.0, %v4250_v2  ;;  %v3226_v23 = vadd.f32 %v13734_v39, %v3182_v32  ;;  %v4298_v54 = vmul.f32 %v13726_v35, %v9901_v10 }
 0xed2   : > { %v3278_v27 = vadd.f32 %v13737_v58, %v3268_v28  ;;  %v3336_v35 = vmul.f32 %v11741_v52, %v9899_v30  ;;  %vm13742_vm15 = vcmask 916480   ;;  %vm13747_vm8 = vcmask 1044480  }
 0xed3   : > { %4260 = vrot.lane.b32.xlu1 %v4254_v47, %s13654_s1  ;;  %v3017_v36 = vadd.f32 %v3011_v55, %v2972_v6  ;;  %v3270_v24 = vadd.f32 %v13736_v59, %v3226_v23  ;;  %v4519_v47 = vmul.f32 %v4514_v18, %v13722_v0  ;;  %v3176_v0 = vsel %vm1294_vm9, %v13719_v62, %v13733_v17  ;;  %v13739_v17 = vld [vmem:[#allocation4_spill] sm:$0xff]  ;;  %v13740_v6 = vld [vmem:[#allocation31_spill] sm:$0xff]  ;;  %vm13743_vm14 = vmmov %vm13742_vm15 }
 0xed4   : > { %4306 = vrot.lane.b32.xlu0 %v4299_v3, %s13414_s17  ;;  %v11992_v14 = vadd.f32 %v3290_v43, %v3278_v27  ;;  %v13738_v3 = vld [vmem:[#allocation44_spill] sm:$0xff]  ;;  %v3220_v62 = vsel %vm2365_vm3, %v13723_v21, %v13734_v39  ;;  %v4617_v28 = vrot.slane %v11997_v5, %v13739_v17  ;;  %v3264_v21 = vsel %vm2411_vm13, %v13731_v61, %v13736_v59  ;;  %vm13744_vm3 = vmmov %vm13708_vm4 }
 0xed5   : > { %v11966_v33 = vpop.permute.xlu1 %3621  ;;  %v11968_v37 = vpop.permute.xlu0 %3581  ;;  %v3063_v38 = vadd.f32 %v3057_v44, %v3017_v36  ;;  %v3280_v2 = vadd.f32 %v13737_v58, %v3270_v24  ;;  %v3330_v26 = vsel %vm2411_vm13, %v13738_v3, %v11741_v52  ;;  %v3406_v39 = vsel %vm2411_vm13, %v11800_v45, %v11828_v53  ;;  %v13741_v24 = vld [vmem:[#allocation40_spill] sm:$0xff]  ;;  %vm13745_vm10 = vmmov %vm13744_vm3 }
 0xed6   : > { %v3335_v44 = vmul.f32 0.0, %v3330_v26  ;;  %v4300_v36 = vmul.f32 0.0, %v13725_v8  ;;  %v3383_v52 = vadd.f32 %v11770_v22, %v3336_v35  ;;  %v4622_v27 = vmul.f32 %v4617_v28, %v13741_v24  ;;  %v12087_v35 = vld [vmem:[%s13151_s6 + $0xe8] sm:$0xff]  ;;  %vm13746_vm11 = vmmov %vm13743_vm14 }
 0xed7   : > { %4262 = vrot.lane.b32.xlu1 %v4255_v4, %s13654_s1  ;;  %v3093_v32 = vadd.f32 %v3090_v29, %v3063_v38  ;;  %v12019_v18 = vadd.f32 %v13740_v6, %v3280_v2  ;;  %v3377_v4 = vsel %vm1294_vm9, %v11772_v48, %v11770_v22  ;;  %v3450_v61 = vsel %vm3449_vm12, %v11826_v25, %v11851_v57  ;;  %v5217_v2 = vld [vmem:[%s13154_s9] sm:$0x1f]  ;;  %vm13748_vm0 = vmmov %vm13746_vm11 }
 0xed8   : > { %6593 = vperm.xlu0 %9309, %v8801_v41   ;;  %v3382_v29 = vadd.f32 %v3377_v4, %v3335_v44  ;;  %v3451_v59 = vsel %vm3449_vm12, %v11851_v57, %v11849_v19  ;;  %v3412_v8 = vadd.f32 %v11828_v53, %v3383_v52  ;;  %v3495_v22 = vsel %vm13742_vm15, %v11876_v31, %v11874_v60  ;;  %v8802_v19 = vld [vmem:[%s13155_s10 + $0x10] sm:$0x1f]  ;;  %vm13749_vm7 = vmmov %vm13747_vm8 }
 0xed9   : > { %v11985_v49 = vpop.permute.xlu1 %3625  ;;  %v11987_v63 = vpop.permute.xlu0 %3623  ;;  %v3137_v56 = vadd.f32 %v3132_v51, %v3093_v32  ;;  %v3496_v51 = vsel %vm13743_vm14, %v11874_v60, %v11903_v42  ;;  %v3291_v26 = vsel %vm1108_vm5, %v11712_v15, %v13740_v6  ;;  %v3539_v60 = vsel %vm13744_vm3, %v11901_v9, %v11921_v34  ;;  %v8803_v52 = vld [vmem:[%s13156_s11 + $0x10] sm:$0x1f]  ;;  %vm13750_vm15 = vmmov %vm13744_vm3 }
 0xeda   : > { %v3457_v32 = vadd.f32 %v3451_v59, %v3412_v8  ;;  %v3540_v42 = vsel %vm13745_vm10, %v11921_v34, %v11919_v7  ;;  %v3583_v28 = vsel %vm2180_vm1, %v11950_v50, %v11948_v20  ;;  %v3584_v15 = vsel %vm2180_vm1, %v11948_v20, %v11968_v37  ;;  %vm13751_vm14 = vmmov %vm13744_vm3 }
 0xedb   : > { %4523 = vrot.lane.b32.xlu1 %v4519_v47, %s13531_s0  ;;  %v3181_v41 = vadd.f32 %v3176_v0, %v3137_v56  ;;  %v3411_v47 = vadd.f32 %v3406_v39, %v3382_v29  ;;  %vm3671_vm5 = vcmask 424960   ;;  %v3627_v20 = vsel %vm2832_vm2, %v11966_v33, %v11987_v63 }
 0xedc   : > { %4331 = vrot.lane.b32.xlu0 %v11992_v14, %s13524_s16  ;;  %v3628_v37 = vsel %vm2832_vm2, %v11987_v63, %v11985_v49  ;;  %vm3717_vm4 = vcmask 392192   ;;  %v4621_v49 = vrot.slane %v12087_v35, %v13739_v17 }
 0xedd   : > { %v3668_v55 = vpop.permute.xlu1 %3667  ;;  %v12011_v1 = vpop.permute.xlu0 %3665  ;;  %v3225_v23 = vadd.f32 %v3220_v62, %v3181_v41  ;;  %v3456_v57 = vadd.f32 %v3450_v61, %v3411_v47  ;;  %v3502_v62 = vadd.f32 %v3496_v51, %v3457_v32 }
 0xede   : > { %v3672_v39 = vsel %vm3671_vm5, %v12011_v1, %v3668_v55 }
 0xedf   : > { %4304 = vrot.lane.b32.xlu1 %v4298_v54, %s13414_s17  ;;  %v3269_v38 = vadd.f32 %v3264_v21, %v3225_v23  ;;  %v3501_v54 = vadd.f32 %v3495_v22, %v3456_v57  ;;  %v3546_v41 = vadd.f32 %v3540_v42, %v3502_v62  ;;  %v4623_v22 = vmul.f32 %v4621_v49, %v13741_v24 }
 0xee0   : > { %4335 = vrot.lane.b32.xlu0 %v12019_v18, %s13524_s16 }
 0xee1   : > { %v12037_v12 = vpop.permute.xlu1 %3711  ;;  %v3670_v43 = vpop.permute.xlu0 %3669  ;;  %v3279_v56 = vadd.f32 %v13737_v58, %v3269_v38  ;;  %v3545_v4 = vadd.f32 %v3539_v60, %v3501_v54  ;;  %v5238_v58 = vld [vmem:[%s13156_s11] sm:$0x1f]  ;;  %v3590_v21 = vadd.f32 %v3584_v15, %v3546_v41 }
 0xee2   : > { %v3673_v23 = vsel %vm3671_vm5, %v3668_v55, %v3670_v43 }
 0xee3   : > { %4308 = vrot.lane.b32.xlu1 %v4300_v36, %s13414_s17  ;;  %v12077_v6 = vadd.f32 %v3291_v26, %v3279_v56  ;;  %v3589_v44 = vadd.f32 %v3583_v28, %v3545_v4  ;;  %v3634_v29 = vadd.f32 %v3628_v37, %v3590_v21 }
 0xee4   : > { %4626 = vrot.lane.b32.xlu0 %v4622_v27, %s13531_s0 }
 0xee5   : > { %v3716_v0 = vpop.permute.xlu1 %3715  ;;  %v3714_v53 = vpop.permute.xlu0 %3713  ;;  %v3633_v63 = vadd.f32 %v3627_v20, %v3589_v44  ;;  %v3679_v38 = vadd.f32 %v3673_v23, %v3634_v29 }
 0xee6   : > { %v3718_v59 = vsel %vm3717_vm4, %v12037_v12, %v3714_v53  ;;  %v3719_v55 = vsel %vm3717_vm4, %v3714_v53, %v3716_v0  ;;  %v5226_v53 = vld [vmem:[%s13155_s10] sm:$0x1f] }
 0xee7   : > { %6603 = vperm.xlu1 %9310, %v8802_v19   ;;  %v3678_v43 = vadd.f32 %v3672_v39, %v3633_v63  ;;  %v3725_v51 = vadd.f32 %v3719_v55, %v3679_v38 }
 0xee8   : > { %5220 = vperm.xlu0 %9309, %v5217_v2   ;;  %v4752_v23 = vpop.f32.mrb[2].mxu0 }
 0xee9   : > { %v3745_v7 = vpop.permute.xlu1 %3744  ;;  %v12079_v34 = vpop.permute.xlu0 %3742  ;;  %v3724_v17 = vadd.f32 %v3718_v59, %v3678_v43 }
 0xeea   : > { %v3746_v36 = vsel %vm2411_vm13, %v12079_v34, %v3745_v7  ;;  %v3752_v47 = vmul.f32 %v3745_v7, %v9901_v10  ;;  %v5139_v7 = vpop.f32.mrb[0].mxu1  ;;  %v4754_v49 = vpop.f32.mrb[3].mxu0 }
 0xeeb   : > { %4333 = vrot.lane.b32.xlu1 %v12077_v6, %s13524_s16  ;;  %v3751_v8 = vmul.f32 %v3746_v36, %v9899_v30  ;;  %v5141_v37 = vpop.f32.mrb[1].mxu1 }
 0xeec   : > { %5241 = vperm.xlu0 %9309, %v5238_v58   ;;  %v3755_v32 = vadd.f32 %v3752_v47, %v3725_v51  ;;  %v8877_v63 = vadd.f32 %v5141_v37, %v4754_v49 }
 0xeed   : > { %v3791_v27 = vpop.permute.xlu1 %3790  ;;  %v12107_v61 = vpop.permute.xlu0 %3788  ;;  %v3754_v2 = vadd.f32 %v3751_v8, %v3724_v17 }
 0xeee   : > { %v3793_v0 = vsel %vm1294_vm9, %v12107_v61, %v3791_v27  ;;  %v3799_v42 = vadd.f32 %v3791_v27, %v3755_v32  ;;  %v5145_v43 = vsel %vm13749_vm7, %v8877_v63, 0.0  ;;  %vm13762_vm7 = vmmov %vm13748_vm0 }
 0xeef   : > { %6616 = vperm.xlu1 %9310, %v8803_v52   ;;  %v3798_v56 = vadd.f32 %v3793_v0, %v3754_v2  ;;  %v8876_v52 = vadd.f32 %v5139_v7, %v4752_v23  ;;  %v8786_v0 = vld [vmem:[%s13151_s6 + $0xc0] sm:$0xff] }
 0xef1   : > { %v12115_v19 = vpop.permute.xlu1 %3808  ;;  %v12117_v57 = vpop.permute.xlu0 %3786  ;;  %v5144_v59 = vsel %vm13747_vm8, %v8876_v52, 0.0  ;;  %vm13761_vm8 = vmmov %vm13748_vm0 }
 0xef2   : > { %v12141_v47 = vadd.f32 %v5145_v43, %v5144_v59 }
 0xef3   : > { %4628 = vrot.lane.b32.xlu1 %v4623_v22, %s13531_s0 }
 0xef5   : > { %v12125_v26 = vpop.permute.xlu1 %3849  ;;  %v3811_v24 = vpop.permute.xlu0 %3810 }
 0xef6   : > { %v3812_v60 = vsel %vm2411_vm13, %v12115_v19, %v3811_v24  ;;  %v3818_v62 = vadd.f32 %v3811_v24, %v3799_v42  ;;  %v13752_v24 = vld [vmem:[#allocation9_spill] sm:$0xff] }
 0xef7   : > { %5229 = vperm.xlu1 %9310, %v5226_v53   ;;  %v3817_v54 = vadd.f32 %v3812_v60, %v3798_v56  ;;  %v8787_v53 = vld [vmem:[%s13151_s6 + $0xc8] sm:$0xff]  ;;  %v4392_v60 = vrot.slane %v8786_v0, %v13752_v24  ;;  %v4362_v56 = vrot.slane %v8786_v0, %v13695_v13 }
 0xef8   : > { %v4396_v42 = vrot.slane %v8787_v53, %v13752_v24 }
 0xef9   : > { %v3854_v28 = vpop.permute.xlu1 %3853  ;;  %v3852_v15 = vpop.permute.xlu0 %3851 }
 0xefa   : > { %v3855_v4 = vsel %vm3449_vm12, %v12125_v26, %v3852_v15  ;;  %v3856_v41 = vsel %vm3449_vm12, %v3852_v15, %v3854_v28 }
 0xefb   : > { %v3861_v58 = vadd.f32 %v3855_v4, %v3817_v54  ;;  %v3862_v20 = vadd.f32 %v3856_v41, %v3818_v62  ;;  %v4366_v54 = vrot.slane %v8787_v53, %v13695_v13 }
 0xefd   : > { %v3896_v44 = vpop.permute.xlu1 %3895  ;;  %v12132_v21 = vpop.permute.xlu0 %3893 }
 0xefe   : > { %v3899_v39 = vsel %vm13746_vm11, %v12132_v21, %v3896_v44  ;;  %vm13760_vm11 = vmmov %vm13748_vm0 }
 0xeff   : > { %v3905_v36 = vadd.f32 %v3899_v39, %v3861_v58 }
 0xf01   : > { %v12136_v29 = vpop.permute.xlu1 %3937  ;;  %v3898_v27 = vpop.permute.xlu0 %3897 }
 0xf02   : > { %v3900_v55 = vsel %vm13748_vm0, %v3896_v44, %v3898_v27 }
 0xf03   : > { %v3906_v38 = vadd.f32 %v3900_v55, %v3862_v20 }
 0xf05   : > { %v3942_v8 = vpop.permute.xlu1 %3941  ;;  %v3940_v22 = vpop.permute.xlu0 %3939 }
 0xf06   : > { %v3943_v17 = vsel %vm13750_vm15, %v12136_v29, %v3940_v22  ;;  %v3944_v51 = vsel %vm13751_vm14, %v3940_v22, %v3942_v8  ;;  %v3376_v8 = vsel %vm1294_vm9, %v11802_v11, %v11772_v48  ;;  %v3334_v22 = vmul.f32 0.0, %v13738_v3  ;;  %vm13763_vm15 = vmmov %vm13748_vm0 }
 0xf07   : > { %v12146_v32 = vadd.f32 %v3943_v17, %v3905_v36  ;;  %v3950_v2 = vadd.f32 %v3944_v51, %v3906_v38  ;;  %vm13764_vm14 = vmmov %vm13748_vm0 }
 0xf08   : > { %v3381_v17 = vadd.f32 %v3376_v8, %v3334_v22 }
 0xf0a   : > { %v3410_v0 = vadd.f32 %v11800_v45, %v3381_v17 }
 0xf16   : > { %v4387_v62 = vpop.permute.xlu1 %4386  ;;  %v4357_v28 = vpop.permute.xlu0 %4356 }
 0xf17   : > { %v4397_v15 = vmul.f32 %v4392_v60, %v4387_v62  ;;  %v4398_v4 = vmul.f32 %v4396_v42, %v4387_v62  ;;  %v4367_v41 = vmul.f32 %v4362_v56, %v4357_v28  ;;  %v4368_v7 = vmul.f32 %v4366_v54, %v4357_v28  ;;  %v13753_v62 = vld [vmem:[#allocation5_spill] sm:$0xff] }
 0xf18   : > { %v3455_v60 = vadd.f32 %v11826_v25, %v3410_v0  ;;  %v4469_v28 = vrot.slane %v11781_v46, %v13753_v62 }
 0xf19   : > { %4373 = vrot.lane.b32.xlu0 %v4368_v7, %s13605_s24  ;;  %4371 = vrot.lane.b32.xlu1 %v4367_v41, %s13605_s24  ;;  %v4399_v37 = vmul.f32 0.0, %v4397_v15  ;;  %v4400_v44 = vmul.f32 %v4398_v4, %v9899_v30  ;;  %v4465_v41 = vrot.slane %v11753_v16, %v13753_v62 }
 0xf1a   : > { %v12160_v58 = vpop.permute.xlu1 %3981  ;;  %v12162_v20 = vpop.permute.xlu0 %3983  ;;  %v3500_v48 = vadd.f32 %v11876_v31, %v3455_v60 }
 0xf1c   : > { %v3544_v11 = vadd.f32 %v11901_v9, %v3500_v48 }
 0xf1d   : > { %4405 = vrot.lane.b32.xlu0 %v4400_v44, %s13605_s24  ;;  %4403 = vrot.lane.b32.xlu1 %v4399_v37, %s13605_s24 }
 0xf1e   : > { %v3986_v13 = vpop.permute.xlu1 %3985  ;;  %v12167_v39 = vpop.permute.xlu0 %4025  ;;  %v3588_v25 = vadd.f32 %v11950_v50, %v3544_v11  ;;  %v3750_v50 = vmul.f32 0.0, %v12079_v34 }
 0xf1f   : > { %v3988_v23 = vsel %vm2180_vm1, %v12162_v20, %v3986_v13 }
 0xf20   : > { %v12171_v36 = vadd.f32 %v3988_v23, %v3950_v2  ;;  %v3632_v9 = vadd.f32 %v11966_v33, %v3588_v25  ;;  %v3792_v33 = vsel %vm1294_vm9, %v12117_v57, %v12107_v61 }
 0xf22   : > { %v12173_v52 = vpop.permute.xlu1 %4027  ;;  %v12175_v49 = vpop.permute.xlu0 %4029  ;;  %v3677_v44 = vadd.f32 %v12011_v1, %v3632_v9 }
 0xf23   : > { %v4031_v11 = vsel %vm2832_vm2, %v12167_v39, %v12173_v52 }
 0xf24   : > { %v3723_v16 = vadd.f32 %v12037_v12, %v3677_v44 }
 0xf26   : > { %v4460_v63 = vpop.permute.xlu1 %4459  ;;  %v12177_v27 = vpop.permute.xlu0 %4069  ;;  %v3753_v1 = vadd.f32 %v3750_v50, %v3723_v16 }
 0xf27   : > { %v4471_v46 = vmul.f32 %v4469_v28, %v4460_v63  ;;  %v4470_v13 = vmul.f32 %v4465_v41, %v4460_v63 }
 0xf28   : > { %v3797_v63 = vadd.f32 %v3792_v33, %v3753_v1 }
 0xf2a   : > { %v12179_v59 = vpop.permute.xlu1 %4071  ;;  %v12181_v55 = vpop.permute.xlu0 %4073  ;;  %v3816_v0 = vadd.f32 %v12115_v19, %v3797_v63 }
 0xf2c   : > { %v3860_v57 = vadd.f32 %v12125_v26, %v3816_v0  ;;  %v4075_v26 = vsel %vm3671_vm5, %v12177_v27, %v12179_v59 }
 0xf2e   : > { %v12183_v43 = vpop.permute.xlu1 %4113  ;;  %v12185_v38 = vpop.permute.xlu0 %4115  ;;  %v3904_v48 = vadd.f32 %v12132_v21, %v3860_v57 }
 0xf30   : > { %v3948_v19 = vadd.f32 %v12136_v29, %v3904_v48  ;;  %v4032_v29 = vsel %vm2832_vm2, %v12173_v52, %v12175_v49  ;;  %vm13756_vm2 = vmmov %vm13748_vm0 }
 0xf32   : > { %v12191_v51 = vpop.permute.xlu1 %4117  ;;  %v12193_v2 = vpop.permute.xlu0 %4143  ;;  %v3992_v21 = vadd.f32 %v12160_v58, %v3948_v19 }
 0xf33   : > { %v4151_v50 = vmul.f32 %v12193_v2, %v9899_v30 }
 0xf36   : > { %v12196_v53 = vpop.permute.xlu1 %4145  ;;  %v4490_v24 = vpop.permute.xlu0 %4489 }
 0xf37   : > { %v4493_v8 = vmul.f32 %v4490_v24, %v9901_v10  ;;  %v4492_v34 = vmul.f32 %v4490_v24, %v9899_v30  ;;  %v3987_v24 = vsel %vm2180_vm1, %v12160_v58, %v12162_v20  ;;  %v4147_v20 = vsel %vm2411_vm13, %v12193_v2, %v12196_v53 }
 0xf38   : > { %v4152_v41 = vmul.f32 %v4147_v20, %v9901_v10  ;;  %v4038_v58 = vadd.f32 %v4032_v29, %v12171_v36  ;;  %v4562_v36 = vrot.slane %v12087_v35, %v9693_v40  ;;  %v4120_v2 = vsel %vm3717_vm4, %v12185_v38, %v12191_v51 }
 0xf3a   : > { %v4431_v42 = vpop.permute.xlu1 %4430 }
 0xf3b   : > { %v4438_v56 = vmul.f32 0.0, %v4431_v42  ;;  %v12199_v54 = vpop.permute.xlu0 %4552 }
 0xf3d   : > { %4444 = vrot.lane.b32.xlu1 %v4438_v56, %s13414_s17 }
 0xf3e   : > { %v4433_v3 = vpop.permute.xlu1 %4432 }
 0xf3f   : > { %v4434_v45 = vsel %vm3478_vm6, %v4431_v42, %v4433_v3  ;;  %v4440_v15 = vmul.f32 %v4433_v3, %v9901_v10  ;;  %v12208_v4 = vpop.permute.xlu0 %4187  ;;  %v3993_v3 = vadd.f32 %v3987_v24, %v12146_v32  ;;  %v4119_v32 = vsel %vm3717_vm4, %v12183_v43, %v12185_v38 }
 0xf40   : > { %v4439_v31 = vmul.f32 %v4434_v45, %v9899_v30 }
 0xf41   : > { %4448 = vrot.lane.b32.xlu1 %v4440_v15, %s13414_s17  ;;  %v4037_v45 = vadd.f32 %v4031_v11, %v3993_v3  ;;  %v4036_v15 = vadd.f32 %v12167_v39, %v3992_v21 }
 0xf42   : > { %v12216_v7 = vpop.permute.xlu1 %4189  ;;  %4446 = vrot.lane.b32.xlu0 %v4439_v31, %s13414_s17  ;;  %v4558_v31 = vrot.slane %v11997_v5, %v9693_v40  ;;  %v4153_v40 = vmul.f32 0.0, %v12196_v53 }
 0xf43   : > { %v12219_v37 = vpop.permute.xlu0 %4219  ;;  %v4081_v25 = vadd.f32 %v4075_v26, %v4037_v45  ;;  %v4080_v44 = vadd.f32 %v12177_v27, %v4036_v15  ;;  %v4193_v63 = vsel %vm1294_vm9, %v12208_v4, %v12216_v7  ;;  %v8792_v26 = vld [vmem:[%s13150_s5 + $0x18] sm:$0x1f] }
 0xf44   : > { %v4563_v57 = vmul.f32 %v4558_v31, %v12199_v54 }
 0xf45   : > { %4476 = vrot.lane.b32.xlu1 %v4471_v46, %s13605_s24  ;;  %v4076_v46 = vsel %vm3671_vm5, %v12179_v59, %v12181_v55  ;;  %v4125_v39 = vadd.f32 %v4119_v32, %v4081_v25  ;;  %v13754_v55 = vld [vmem:[#allocation3_spill] sm:$0xff] }
 0xf46   : > { %v12225_v23 = vpop.permute.xlu1 %4191  ;;  %4474 = vrot.lane.b32.xlu0 %v4470_v13, %s13605_s24  ;;  %v4588_v33 = vrot.slane %v11997_v5, %v13754_v55  ;;  %v4082_v27 = vadd.f32 %v4076_v46, %v4038_v58  ;;  %v4592_v38 = vrot.slane %v12087_v35, %v13754_v55 }
 0xf47   : > { %v12232_v22 = vpop.permute.xlu0 %4322  ;;  %v4194_v59 = vsel %vm1294_vm9, %v12216_v7, %v12225_v23  ;;  %v4155_v1 = vadd.f32 %v4152_v41, %v4125_v39  ;;  %vm13755_vm9 = vmmov %vm13748_vm0 }
 0xf48   : > { %v4126_v51 = vadd.f32 %v4120_v2, %v4082_v27 }
 0xf49   : > { %4498 = vrot.lane.b32.xlu1 %v4493_v8, %s13605_s24  ;;  %v4124_v8 = vadd.f32 %v12183_v43, %v4080_v44  ;;  %v4199_v24 = vadd.f32 %v4194_v59, %v4155_v1 }
 0xf4a   : > { %v12236_v17 = vpop.permute.xlu1 %4582  ;;  %4496 = vrot.lane.b32.xlu0 %v4492_v34, %s13605_s24  ;;  %v4156_v19 = vadd.f32 %v4153_v40, %v4126_v51 }
 0xf4b   : > { %v12239_v12 = vpop.permute.xlu0 %4264  ;;  %v4154_v43 = vadd.f32 %v4151_v50, %v4124_v8  ;;  %v4593_v3 = vmul.f32 %v4588_v33, %v12236_v17  ;;  %v4594_v20 = vmul.f32 %v4592_v38, %v12236_v17  ;;  %v8810_v38 = vld [vmem:[%s13156_s11 + $0x18] sm:$0x1f] }
 0xf4c   : > { %v4200_v45 = vadd.f32 %v12225_v23, %v4156_v19 }
 0xf4d   : > { %v4198_v48 = vadd.f32 %v4193_v63, %v4154_v43  ;;  %v4595_v25 = vmul.f32 %v4593_v3, %v9901_v10  ;;  %v4596_v31 = vmul.f32 0.0, %v4594_v20  ;;  %v13757_v43 = vld [vmem:[#allocation26_spill] sm:$0xff] }
 0xf4e   : > { %v12242_v60 = vpop.permute.xlu1 %4221 }
 0xf4f   : > { %v4526_v61 = vpop.permute.xlu0 %4525  ;;  %v4223_v5 = vsel %vm2411_vm13, %v12219_v37, %v12242_v60  ;;  %v4227_v29 = vadd.f32 %v12219_v37, %v4198_v48  ;;  %v4229_v41 = vadd.f32 %v12242_v60, %v4200_v45 }
 0xf50   : > { %v4533_v0 = vmul.f32 0.0, %v4526_v61  ;;  %v4228_v4 = vadd.f32 %v4223_v5, %v4199_v24 }
 0xf52   : > { %v12245_v42 = vpop.permute.xlu1 %4260 }
 0xf53   : > { %v12250_v56 = vpop.permute.xlu0 %4306  ;;  %v4271_v17 = vadd.f32 %v12245_v42, %v4227_v29 }
 0xf56   : > { %v4263_v62 = vpop.permute.xlu1 %4262 }
 0xf57   : > { %v12264_v28 = vpop.permute.xlu0 %6593  ;;  %v4266_v53 = vsel %vm3449_vm12, %v12245_v42, %v4263_v62 }
 0xf58   : > { %v4272_v21 = vadd.f32 %v4266_v53, %v4228_v4 }
 0xf5a   : > { %v4524_v9 = vpop.permute.xlu1 %4523 }
 0xf5b   : > { %v4527_v52 = vsel %vm3478_vm6, %v4524_v9, %v4526_v61  ;;  %v4531_v49 = vmul.f32 %v4524_v9, %v9899_v30  ;;  %v12287_v16 = vpop.permute.xlu0 %4331  ;;  %v4564_v61 = vmul.f32 %v4562_v36, %v12199_v54  ;;  %v4267_v54 = vsel %vm3449_vm12, %v4263_v62, %v12239_v12 }
 0xf5c   : > { %v4532_v13 = vmul.f32 %v4527_v52, %v9901_v10  ;;  %v4273_v58 = vadd.f32 %v4267_v54, %v4229_v41  ;;  %v8796_v41 = vld [vmem:[%s13156_s11 + $0x8] sm:$0x1f] }
 0xf5d   : > { %4537 = vrot.lane.b32.xlu0 %v4531_v49, %s13414_s17 }
 0xf5e   : > { %v4305_v34 = vpop.permute.xlu1 %4304  ;;  %4539 = vrot.lane.b32.xlu1 %v4532_v13, %s13414_s17 }
 0xf5f   : > { %v4336_v7 = vpop.permute.xlu0 %4335  ;;  %v4310_v35 = vsel %vm13755_vm9, %v4305_v34, %v12250_v56  ;;  %v4315_v37 = vadd.f32 %v4305_v34, %v4271_v17  ;;  %v8808_v34 = vld [vmem:[%s13154_s9 + $0x18] sm:$0x1f] }
 0xf60   : > { %v4316_v32 = vadd.f32 %v4310_v35, %v4272_v21 }
 0xf61   : > { %4541 = vrot.lane.b32.xlu0 %v4533_v0, %s13414_s17 }
 0xf62   : > { %v4309_v11 = vpop.permute.xlu1 %4308  ;;  %4567 = vrot.lane.b32.xlu1 %v4563_v57, %s13605_s24  ;;  %v4326_v12 = vadd.f32 %v12232_v22, %v4316_v32 }
 0xf63   : > { %v4311_v23 = vsel %vm13756_vm2, %v12250_v56, %v4309_v11  ;;  %v4627_v9 = vpop.permute.xlu0 %4626  ;;  %v4325_v56 = vadd.f32 %v12232_v22, %v4315_v37  ;;  %v13759_v11 = vld [vmem:[#allocation64_spill] sm:$0xff] }
 0xf64   : > { %v4317_v62 = vadd.f32 %v4311_v23, %v4273_v58  ;;  %v4634_v52 = vmul.f32 %v4627_v9, %v9901_v10 }
 0xf65   : > { %4569 = vrot.lane.b32.xlu0 %v4564_v61, %s13605_s24  ;;  %v12351_v36 = vadd.f32 %v12287_v16, %v4325_v56 }
 0xf66   : > { %v6604_v15 = vpop.permute.xlu1 %6603  ;;  %4658 = vperm.xlu1 %9310, %v8792_v26   ;;  %v4327_v39 = vadd.f32 %v12232_v22, %v4317_v62 }
 0xf67   : > { %v6596_v22 = vmul.f32 %v12264_v28, %v12351_v36  ;;  %v5221_v1 = vpop.permute.xlu0 %5220 }
 0xf68   : > { %v5225_v57 = vmul.f32 %v5221_v1, %v13757_v43  ;;  %v5223_v61 = vmul.f32 %v5221_v1, %v13759_v11 }
 0xf69   : > { %4599 = vrot.lane.b32.xlu0 %v4595_v25, %s13605_s24  ;;  %v6606_v0 = vadd.f32 %v6604_v15, %v6596_v22  ;;  %v8795_v25 = vld [vmem:[%s13155_s10 + $0x8] sm:$0x1f] }
 0xf6a   : > { %v4334_v46 = vpop.permute.xlu1 %4333  ;;  %4601 = vrot.lane.b32.xlu1 %v4596_v31, %s13605_s24 }
 0xf6b   : > { %v4337_v60 = vsel %vm2180_vm1, %v12287_v16, %v4334_v46  ;;  %v4338_v49 = vsel %vm2180_vm1, %v4334_v46, %v4336_v7  ;;  %v8809_v16 = vld [vmem:[%s13155_s10 + $0x18] sm:$0x1f]  ;;  %v5242_v19 = vpop.permute.xlu0 %5241  ;;  %vm6609_vm3 = vcmp.ge.f32.partialorder %v6606_v0, 0.0 }
 0xf6c   : > { %v12340_v42 = vadd.f32 %v4337_v60, %v4326_v12  ;;  %v12348_v13 = vadd.f32 %v4338_v49, %v4327_v39 }
 0xf6d   : > { %4640 = vrot.lane.b32.xlu0 %v4634_v52, %s13414_s17 }
 0xf6e   : > { %v6617_v44 = vpop.permute.xlu1 %6616  ;;  %v6597_v50 = vmul.f32 %v12264_v28, %v12340_v42  ;;  %v6598_v2 = vmul.f32 %v12264_v28, %v12348_v13  ;;  %v13758_v28 = vld [vmem:[#allocation24_spill] sm:$0xff] }
 0xf6f   : > { %v5224_v24 = vmul.f32 %v5221_v1, %v13758_v28  ;;  %v6619_v51 = vmul.f32 %v6617_v44, %v6606_v0 }
 0xf70   : > { %v6607_v27 = vadd.f32 %v6604_v15, %v6597_v50  ;;  %v6608_v63 = vadd.f32 %v6604_v15, %v6598_v2  ;;  %v8794_v15 = vld [vmem:[%s13154_s9 + $0x8] sm:$0x1f] }
 0xf71   : > { %v6622_v3 = vsel %vm6609_vm3, %v6606_v0, %v6619_v51 }
 0xf72   : > { %v4629_v59 = vpop.permute.xlu1 %4628  ;;  %v6620_v40 = vmul.f32 %v6617_v44, %v6607_v27  ;;  %vm6610_vm1 = vcmp.ge.f32.partialorder %v6607_v27, 0.0  ;;  %v6621_v4 = vmul.f32 %v6617_v44, %v6608_v63  ;;  %vm6611_vm12 = vcmp.ge.f32.partialorder %v6608_v63, 0.0 }
 0xf73   : > { %v4630_v55 = vsel %vm3478_vm6, %v4627_v9, %v4629_v59  ;;  %v4636_v33 = vmul.f32 0.0, %v4629_v59 }
 0xf74   : > { %v4635_v8 = vmul.f32 0.0, %v4630_v55  ;;  %v6623_v48 = vsel %vm6610_vm1, %v6607_v27, %v6620_v40  ;;  %v6624_v20 = vsel %vm6611_vm12, %v6608_v63, %v6621_v4 }
 0xf75   : > { %4644 = vrot.lane.b32.xlu0 %v4636_v33, %s13414_s17 }
 0xf76   : > { %4642 = vrot.lane.b32.xlu1 %v4635_v8, %s13414_s17  ;;  %v5230_v5 = vpop.permute.xlu1 %5229 }
 0xf77   : > { %v5234_v53 = vadd.f32 %v5230_v5, %v5225_v57  ;;  %v5233_v7 = vadd.f32 %v5230_v5, %v5224_v24  ;;  %v5232_v26 = vadd.f32 %v5230_v5, %v5223_v61 }
 0xf79   : > { %7291 = vperm.xlu0 %9309, %v8809_v16   ;;  %v5246_v35 = vmul.f32 %v5242_v19, %v5234_v53  ;;  %vm5237_vm10 = vcmp.ge.f32.partialorder %v5234_v53, 0.0  ;;  %v5245_v21 = vmul.f32 %v5242_v19, %v5233_v7  ;;  %vm5236_vm5 = vcmp.ge.f32.partialorder %v5233_v7, 0.0 }
 0xf7a   : > { %7281 = vperm.xlu1 %9310, %v8808_v34   ;;  %v5244_v54 = vmul.f32 %v5242_v19, %v5232_v26  ;;  %vm5235_vm4 = vcmp.ge.f32.partialorder %v5232_v26, 0.0 }
 0xf7b   : > { %v5249_v45 = vsel %vm5237_vm10, %v5234_v53, %v5246_v35  ;;  %v5248_v29 = vsel %vm5236_vm5, %v5233_v7, %v5245_v21  ;;  %vm13769_vm10 = vcmask 1044480  }
 0xf7c   : > { %v5247_v32 = vsel %vm5235_vm4, %v5232_v26, %v5244_v54  ;;  %vm13771_vm4 = vmmov %vm13769_vm10 }
 0xf7d   : > { %6635 = vrot.lane.b32.xlu0 %v6623_v48, %s13531_s0 }
 0xf7e   : > { %7304 = vperm.xlu1 %9310, %v8810_v38  }
 0xf81   : > { %6633 = vrot.lane.b32.xlu0 %v6622_v3, %s13531_s0 }
 0xf82   : > { %6637 = vrot.lane.b32.xlu1 %v6624_v20, %s13531_s0 }
 0xf85   : > { %5261 = vrot.lane.b32.xlu0 %v5249_v45, %s13518_s26 }
 0xf86   : > { %5259 = vrot.lane.b32.xlu1 %v5248_v29, %s13518_s26 }
 0xf8a   : > { %5257 = vrot.lane.b32.xlu1 %v5247_v32, %s13518_s26 }
 0xf8b   : > { %v4374_v31 = vpop.permute.xlu0 %4373  ;;  %v4372_v17 = vpop.permute.xlu1 %4371 }
 0xf8c   : > { %v4375_v44 = vsel %vm2411_vm13, %v4372_v17, %v4374_v31  ;;  %v4381_v33 = vmul.f32 %v4374_v31, %v9899_v30  ;;  %v4379_v27 = vmul.f32 0.0, %v4372_v17 }
 0xf8d   : > { %v4380_v50 = vmul.f32 0.0, %v4375_v44 }
 0xf8e   : > { %5905 = vperm.xlu1 %9310, %v8794_v15  }
 0xf8f   : > { %v4406_v23 = vpop.permute.xlu0 %4405  ;;  %v4404_v9 = vpop.permute.xlu1 %4403 }
 0xf90   : > { %v4407_v59 = vsel %vm2411_vm13, %v4404_v9, %v4406_v23  ;;  %v4413_v16 = vadd.f32 %v4406_v23, %v4381_v33  ;;  %v4411_v0 = vadd.f32 %v4404_v9, %v4379_v27  ;;  %v8804_v33 = vld [vmem:[%s13157_s12 + $0x40] sm:$0xff] }
 0xf91   : > { %v4412_v22 = vadd.f32 %v4407_v59, %v4380_v50 }
 0xf92   : > { %5915 = vperm.xlu1 %9310, %v8795_v25  }
 0xf96   : > { %5928 = vperm.xlu1 %9310, %v8796_v41  }
 0xfa4   : > { %5147 = vadd.xlane.f32.xlu0 %v12141_v47 }
 0xfaf   : > { %v4445_v37 = vpop.permute.xlu1 %4444 }
 0xfb0   : > { %v4455_v38 = vadd.f32 %v4445_v37, %v4411_v0 }
 0xfb3   : > { %v4449_v12 = vpop.permute.xlu1 %4448 }
 0xfb4   : > { %v4447_v58 = vpop.permute.xlu0 %4446 }
 0xfb5   : > { %v4450_v8 = vsel %vm13760_vm11, %v4445_v37, %v4447_v58  ;;  %v4451_v2 = vsel %vm13761_vm8, %v4447_v58, %v4449_v12 }
 0xfb6   : > { %v4456_v63 = vadd.f32 %v4450_v8, %v4412_v22  ;;  %v4457_v5 = vadd.f32 %v4451_v2, %v4413_v16  ;;  %v5251_v8 = vld [vmem:[%s13157_s12 + $0x8] sm:$0xff] }
 0xfb7   : > { %v4477_v52 = vpop.permute.xlu1 %4476 }
 0xfb8   : > { %v4475_v46 = vpop.permute.xlu0 %4474  ;;  %v4484_v1 = vmul.f32 %v4477_v52, %v9901_v10 }
 0xfb9   : > { %v4478_v47 = vsel %vm2411_vm13, %v4475_v46, %v4477_v52  ;;  %v4482_v43 = vmul.f32 0.0, %v4475_v46 }
 0xfba   : > { %v4483_v34 = vmul.f32 %v4478_v47, %v9899_v30  ;;  %v4487_v28 = vadd.f32 %v4484_v1, %v4457_v5 }
 0xfbb   : > { %v4499_v56 = vpop.permute.xlu1 %4498  ;;  %v4485_v4 = vadd.f32 %v4482_v43, %v4455_v38 }
 0xfbc   : > { %v4497_v62 = vpop.permute.xlu0 %4496  ;;  %v4486_v24 = vadd.f32 %v4483_v34, %v4456_v63  ;;  %v4506_v61 = vadd.f32 %v4499_v56, %v4487_v28 }
 0xfbd   : > { %v4500_v51 = vsel %vm2411_vm13, %v4497_v62, %v4499_v56  ;;  %v4504_v29 = vadd.f32 %v4497_v62, %v4485_v4 }
 0xfbe   : > { %v4505_v19 = vadd.f32 %v4500_v51, %v4486_v24  ;;  %v8805_v24 = vld [vmem:[%s13157_s12 + $0x48] sm:$0xff] }
 0xfcf   : > { %v4538_v60 = vpop.permute.xlu0 %4537 }
 0xfd0   : > { %v4540_v39 = vpop.permute.xlu1 %4539  ;;  %v4548_v41 = vadd.f32 %v4538_v60, %v4504_v29  ;;  %v8806_v29 = vld [vmem:[%s13157_s12 + $0x50] sm:$0xff] }
 0xfd1   : > { %v4543_v7 = vsel %vm13748_vm0, %v4538_v60, %v4540_v39  ;;  %vm13773_vm0 = vcmask 277504  }
 0xfd2   : > { %v4549_v21 = vadd.f32 %v4543_v7, %v4505_v19 }
 0xfd3   : > { %v4542_v49 = vpop.permute.xlu0 %4541 }
 0xfd4   : > { %v4568_v40 = vpop.permute.xlu1 %4567  ;;  %v4544_v11 = vsel %vm13762_vm7, %v4540_v39, %v4542_v49  ;;  %v5250_v39 = vld [vmem:[%s13157_s12] sm:$0xff] }
 0xfd5   : > { %v4550_v45 = vadd.f32 %v4544_v11, %v4506_v61  ;;  %v4575_v32 = vmul.f32 %v4568_v40, %v9899_v30 }
 0xfd7   : > { %v4570_v55 = vpop.permute.xlu0 %4569  ;;  %v4578_v46 = vadd.f32 %v4575_v32, %v4548_v41 }
 0xfd8   : > { %v4571_v53 = vsel %vm2411_vm13, %v4568_v40, %v4570_v55  ;;  %v4577_v35 = vmul.f32 0.0, %v4570_v55 }
 0xfd9   : > { %v4576_v3 = vmul.f32 %v4571_v53, %v9901_v10 }
 0xfda   : > { %v4580_v25 = vadd.f32 %v4577_v35, %v4550_v45 }
 0xfdb   : > { %v4600_v57 = vpop.permute.xlu0 %4599  ;;  %v4579_v15 = vadd.f32 %v4576_v3, %v4549_v21 }
 0xfdc   : > { %v4607_v56 = vadd.f32 %v4600_v57, %v4578_v46 }
 0xfdf   : > { %v4641_v26 = vpop.permute.xlu0 %4640 }
 0xfe0   : > { %v4651_v62 = vadd.f32 %v4641_v26, %v4607_v56 }
 0xfe5   : > { %v4659_v48 = vpop.permute.xlu1 %4658 }
 0xfe6   : > { %v4661_v60 = vadd.f32 %v4659_v48, %v4651_v62 }
 0xfe7   : > { %v4645_v31 = vpop.permute.xlu0 %4644 }
 0xfe8   : > { %v12422_v2 = vadd.f32 %v4661_v60, %v12351_v36  ;;  %v5252_v36 = vld [vmem:[%s13157_s12 + $0x10] sm:$0xff] }
 0xfe9   : > { %v4602_v20 = vpop.permute.xlu1 %4601 }
 0xfea   : > { %v4603_v54 = vsel %vm2411_vm13, %v4600_v57, %v4602_v20  ;;  %v4609_v9 = vadd.f32 %v4602_v20, %v4580_v25  ;;  %vm13765_vm13 = vcmask 39936   ;;  %v5253_v20 = vld [vmem:[%s13157_s12 + $0x18] sm:$0x1] }
 0xfeb   : > { %v4608_v23 = vadd.f32 %v4603_v54, %v4579_v15  ;;  %v5266_v50 = vsel %vm13765_vm13, %v5250_v39, 0  ;;  %vm13766_vm9 = vmmov %vm13765_vm13 }
 0xfec   : > { %v12426_v16 = vand.u32 4294901760, %v5266_v50  ;;  %vm13767_vm2 = vmmov %vm13766_vm9 }
 0xfed   : > { %v4643_v17 = vpop.permute.xlu1 %4642  ;;  %v5269_v5 = vsel %vm13767_vm2, %v5251_v8, 0  ;;  %vm13768_vm12 = vmmov %vm13767_vm2 }
 0xfee   : > { %v4646_v58 = vsel %vm13763_vm15, %v4641_v26, %v4643_v17  ;;  %v4647_v37 = vsel %vm13764_vm14, %v4643_v17, %v4645_v31  ;;  %v12435_v57 = vsub.f32 %v5266_v50, %v12426_v16  ;;  %v12442_v38 = vand.u32 4294901760, %v5269_v5  ;;  %vm13770_vm5 = vmmov %vm13767_vm2 }
 0xfef   : > { %v4652_v12 = vadd.f32 %v4646_v58, %v4608_v23  ;;  %v4653_v52 = vadd.f32 %v4647_v37, %v4609_v9  ;;  %v5272_v7 = vsel %vm13768_vm12, %v5252_v36, 0  ;;  %v6645_v35 = vsel %vm13770_vm5, %v8805_v24, 0  ;;  %vm13772_vm8 = vmmov %vm13767_vm2 }
 0xff0   : > { %v5350_v26 = vand.u32 4294901760, %v12435_v57  ;;  %v12461_v54 = vsub.f32 %v5269_v5, %v12442_v38  ;;  %v12463_v32 = vand.u32 4294901760, %v5272_v7  ;;  %v12474_v58 = vand.u32 4294901760, %v6645_v35  ;;  %vm13774_vm7 = vmmov %vm13767_vm2 }
 0xff1   : > { %v4662_v49 = vadd.f32 %v4659_v48, %v4652_v12  ;;  %v4663_v44 = vadd.f32 %v4659_v48, %v4653_v52  ;;  %v5275_v37 = vsel %vm13772_vm8, %v5253_v20, 0  ;;  %v6648_v56 = vsel %vm13774_vm7, %v8806_v29, 0  ;;  %vm13775_vm15 = vmmov %vm13771_vm4 }
 0xff2   : > { %v5351_v52 = vsub.f32 %v12435_v57, %v5350_v26  ;;  %vm13776_vm14 = vmmov %vm13773_vm0  ;;  %v13778_v5 = vmov 0.0  }
 0xff3   : > { %v12410_v47 = vadd.f32 %v4662_v49, %v12340_v42  ;;  %v12413_v55 = vadd.f32 %v4663_v44, %v12348_v13  ;;  %v6642_v13 = vsel %vm13766_vm9, %v8804_v33, 0  ;;  %v5361_v49 = vand.u32 4294901760, %v12461_v54  ;;  %v8807_v33 = vld [vmem:[%s13157_s12 + $0x58] sm:$0x1]  ;;  %vm13777_vm13 = vmmov %vm13771_vm4 }
 0xff4   : > { %v12437_v28 = vand.u32 4294901760, %v6642_v13  ;;  %v12486_v44 = vsub.f32 %v5272_v7, %v12463_v32  ;;  %vm13779_vm9 = vmmov %vm13767_vm2 }
 0xff5   : > { %v6651_v36 = vsel %vm13779_vm9, %v8807_v33, 0 }
 0xff6   : > { %v12468_v17 = vsub.f32 %v6642_v13, %v12437_v28 }
 0xff8   : > { %v7292_v59 = vpop.permute.xlu0 %7291  ;;  %v6726_v33 = vand.u32 4294901760, %v12468_v17 }
 0xff9   : > { %v7282_v27 = vpop.permute.xlu1 %7281 }
 0xffa   : > { %v7285_v22 = vmul.f32 %v7282_v27, %v12410_v47  ;;  %v7286_v42 = vmul.f32 %v7282_v27, %v12413_v55  ;;  %v7284_v1 = vmul.f32 %v7282_v27, %v12422_v2  ;;  %v12494_v27 = vand.u32 4294901760, %v5275_v37 }
 0xffc   : > { %v7295_v34 = vadd.f32 %v7292_v59, %v7285_v22  ;;  %v7296_v40 = vadd.f32 %v7292_v59, %v7286_v42  ;;  %v6636_v63 = vpop.permute.xlu0 %6635  ;;  %v7294_v51 = vadd.f32 %v7292_v59, %v7284_v1  ;;  %v12499_v22 = vsub.f32 %v6645_v35, %v12474_v58 }
 0xffd   : > { %v7305_v0 = vpop.permute.xlu1 %7304 }
 0xffe   : > { %v7308_v43 = vmul.f32 %v7305_v0, %v7295_v34  ;;  %vm7298_vm1 = vcmp.ge.f32.partialorder %v7295_v34, 0.0  ;;  %v7309_v53 = vmul.f32 %v7305_v0, %v7296_v40  ;;  %vm7299_vm3 = vcmp.ge.f32.partialorder %v7296_v40, 0.0 }
 0xfff   : > { %v7307_v15 = vmul.f32 %v7305_v0, %v7294_v51  ;;  %vm7297_vm11 = vcmp.ge.f32.partialorder %v7294_v51, 0.0  ;;  %v5362_v0 = vsub.f32 %v12461_v54, %v5361_v49 }
0x1000   : > { %v6634_v48 = vpop.permute.xlu0 %6633  ;;  %v7311_v4 = vsel %vm7298_vm1, %v7295_v34, %v7308_v43  ;;  %v7312_v31 = vsel %vm7299_vm3, %v7296_v40, %v7309_v53  ;;  %v5352_v34 = vand.u32 4294901760, %v5351_v52  ;;  %v12512_v40 = vand.u32 4294901760, %v6648_v56  ;;  %vm13780_vm3 = vmmov %vm13770_vm5 }
0x1001   : > { %v6639_v11 = vsel %vm3478_vm6, %v6634_v48, %v6636_v63  ;;  %v6638_v61 = vpop.permute.xlu1 %6637  ;;  %7323 = vrot.lane.b32.xlu1 %v7311_v4, %s13531_s0  ;;  %v7310_v50 = vsel %vm7297_vm11, %v7294_v51, %v7307_v15  ;;  %v5372_v53 = vand.u32 4294901760, %v12486_v44  ;;  %v12529_v48 = vsub.f32 %v5275_v37, %v12494_v27  ;;  %vm13782_vm5 = vmmov %vm13780_vm3 }
0x1002   : > { %v6653_v19 = vsel %vm13769_vm10, %v6639_v11, 0  ;;  %v6640_v3 = vsel %vm3478_vm6, %v6636_v63, %v6638_v61  ;;  %v12540_v61 = vsub.f32 %v6648_v56, %v12512_v40  ;;  %v5363_v35 = vand.u32 4294901760, %v5362_v0  ;;  %vm13781_vm10 = vmmov %vm13780_vm3 }
0x1003   : > { %v12454_v21 = vand.u32 4294901760, %v6653_v19  ;;  %v6655_v45 = vsel %vm13771_vm4, %v6640_v3, 0  ;;  %v5373_v20 = vsub.f32 %v12486_v44, %v5372_v53  ;;  %v6737_v0 = vand.u32 4294901760, %v12499_v22  ;;  %vm13783_vm4 = vmmov %vm13780_vm3 }
0x1004   : > { %v12465_v25 = vand.u32 4294901760, %v6655_v45  ;;  %v5262_v41 = vpop.permute.xlu0 %5261  ;;  %vm13784_vm11 = vmmov %vm13777_vm13 }
0x1005   : > { %v12471_v23 = vsub.f32 %v6653_v19, %v12454_v21  ;;  %v5260_v9 = vpop.permute.xlu1 %5259  ;;  %7325 = vrot.lane.b32.xlu1 %v7312_v31, %s13531_s0  ;;  %v12542_v19 = vand.u32 4294901760, %v6651_v36  ;;  %v5374_v52 = vand.u32 4294901760, %v5373_v20  ;;  %v8793_v20 = vld [vmem:[#allocation2] ss:$0 sm:$0xff]  ;;  %vm13785_vm8 = vmmov %vm13784_vm11 }
0x1006   : > { %v6769_v46 = vsub.f32 %v6655_v45, %v12465_v25  ;;  %v5264_v12 = vsel %vm13773_vm0, %v5260_v9, %v5262_v41  ;;  %v5383_v45 = vand.u32 4294901760, %v12529_v48  ;;  %vm13786_vm0 = vmmov %vm13780_vm3 }
0x1007   : > { %v5279_v62 = vsel %vm13775_vm15, %v5264_v12, 0  ;;  %v6776_v39 = vand.u32 4294901760, %v12471_v23  ;;  %v12558_v12 = vsub.f32 %v6651_v36, %v12542_v19  ;;  %vm13787_vm7 = vmmov %vm13786_vm0 }
0x1008   : > { %v12489_v60 = vand.u32 4294901760, %v5279_v62  ;;  %6873 = vmatprep.subr.mxu1 %v6769_v46  ;;  %v6770_v59 = vand.u32 4294901760, %v6769_v46  ;;  %vm13788_vm15 = vmmov %vm13786_vm0 }
0x1009   : > { %v5258_v8 = vpop.permute.xlu1 %5257  ;;  %7321 = vrot.lane.b32.xlu1 %v7310_v50, %s13531_s0  ;;  %6876 = vmatpush1.msra.mxu1 %v12471_v23  ;;  %v12504_v42 = vsub.f32 %v12471_v23, %v6776_v39  ;;  %v6748_v23 = vand.u32 4294901760, %v12540_v61  ;;  %vm13791_vm9 = vmmov %vm13785_vm8 }
0x100a   : > { %v12507_v13 = vsub.f32 %v5279_v62, %v12489_v60  ;;  %v5263_v1 = vsel %vm13776_vm14, %v5258_v8, %v5260_v9  ;;  %5282 = vmatprep.subr.mxu0 %v12489_v60  ;;  %6942 = vmatmul.mubr.f32.vlgmr.msra.gmra.mrb[2].mxu1 %v12468_v17  ;;  %v12521_v43 = vsub.f32 %v6769_v46, %v6770_v59  ;;  %vm13789_vm14 = vcmask 556032  }
0x100b   : > { %v5277_v63 = vsel %vm13777_vm13, %v5263_v1, 0  ;;  %6973 = vmatprep.subr.mxu1 %v12465_v25  ;;  %6947 = vmatprep.mubr.f32.mxu1 %v13778_v5  ;;  %vm13790_vm13 = vmmov %vm13786_vm0 }
0x100c   : > { %v12523_v24 = vand.u32 4294901760, %v5277_v63  ;;  %6975 = vmatpush1.msra.mxu1 %v12454_v21  ;;  %v5394_v51 = vand.u32 4294901760, %v12507_v13 }
0x100d   : > { %7078 = vmatprep.subr.mxu1 %v6770_v59  ;;  %v5906_v4 = vpop.permute.xlu1 %5905 }
0x100e   : > { %v12532_v7 = vsub.f32 %v5277_v63, %v12523_v24  ;;  %5284 = vmatpush1.msra.mxu0 %v12523_v24  ;;  %6950 = vmatmul.mubr.f32.gmra.mrb[4].mxu1 %v12499_v22  ;;  %v5395_v11 = vsub.f32 %v12507_v13, %v5394_v51  ;;  %v5908_v29 = vmul.f32 %v5906_v4, %v11992_v14 }
0x100f   : > { %5353 = vmatmul.mubr.f32.vlgmr.msra.gmra.mrb[4].mxu0 %v5352_v34  ;;  %6955 = vmatprep.mubr.f32.mxu1 %v13778_v5  ;;  %v5909_v15 = vmul.f32 %v5906_v4, %v12077_v6  ;;  %v5384_v6 = vsub.f32 %v12529_v48, %v5383_v45  ;;  %v5910_v56 = vmul.f32 %v5906_v4, %v12019_v18  ;;  %v5186_v4 = vld [vmem:[%s13158_s13 + $0x8] sm:$0xff] }
0x1010   : > { %v5400_v3 = vand.u32 4294901760, %v12532_v7  ;;  %5358 = vmatprep.mubr.f32.mxu0 %v13778_v5  ;;  %v5396_v31 = vand.u32 4294901760, %v5395_v11  ;;  %v8648_v11 = vld [vmem:[%s13159_s14 + $0x8] sm:$0xff] }
0x1011   : > { %v5916_v41 = vpop.permute.xlu1 %5915  ;;  %v5385_v18 = vand.u32 4294901760, %v5384_v6 }
0x1012   : > { %v5401_v9 = vsub.f32 %v12532_v7, %v5400_v3  ;;  %v5918_v37 = vadd.f32 %v5916_v41, %v5908_v29  ;;  %v5919_v46 = vadd.f32 %v5916_v41, %v5909_v15  ;;  %5397 = vmatprep.subr.mxu0 %v5396_v31  ;;  %6958 = vmatmul.mubr.f32.gmra.mrb[6].mxu1 %v12540_v61 }
0x1013   : > { %5364 = vmatmul.mubr.f32.gmra.mrb[6].mxu0 %v5363_v35  ;;  %6963 = vmatprep.mubr.f32.mxu1 %v13778_v5  ;;  %v5920_v8 = vadd.f32 %v5916_v41, %v5910_v56  ;;  %v8650_v35 = vld [vmem:[%s13159_s14 + $0x18] sm:$0x1] }
0x1014   : > { %v5402_v14 = vand.u32 4294901760, %v5401_v9  ;;  %5369 = vmatprep.mubr.f32.mxu0 %v13778_v5  ;;  %vm5921_vm2 = vcmp.ge.f32.partialorder %v5918_v37, 0.0  ;;  %vm5922_vm1 = vcmp.ge.f32.partialorder %v5919_v46, 0.0  ;;  %v8814_v9 = vld [vmem:[%s13157_s12 + $0x78] sm:$0x1] }
0x1015   : > { %v5929_v62 = vpop.permute.xlu1 %5928  ;;  %vm5923_vm12 = vcmp.ge.f32.partialorder %v5920_v8, 0.0 }
0x1016   : > { %v5931_v50 = vmul.f32 %v5929_v62, %v5918_v37  ;;  %v5932_v59 = vmul.f32 %v5929_v62, %v5919_v46  ;;  %5403 = vmatpush1.msra.mxu0 %v5402_v14  ;;  %6966 = vmatmul.mubr.f32.gmra.mrb[8].mxu1 %v12558_v12  ;;  %v5933_v63 = vmul.f32 %v5929_v62, %v5920_v8 }
0x1017   : > { %5497 = vmatprep.subr.mxu0 %v12507_v13  ;;  %5375 = vmatmul.mubr.f32.gmra.mrb[8].mxu0 %v5374_v52  ;;  %v7339_v52 = vsel %vm13783_vm4, %v8814_v9, 0 }
0x1018   : > { %v5934_v1 = vsel %vm5921_vm2, %v5918_v37, %v5931_v50  ;;  %v5935_v34 = vsel %vm5922_vm1, %v5919_v46, %v5932_v59  ;;  %7038 = vmatprep.mubr.f32.mxu1 %v13778_v5  ;;  %5380 = vmatprep.mubr.f32.mxu0 %v13778_v5  ;;  %v5936_v36 = vsel %vm5923_vm12, %v5920_v8, %v5933_v63  ;;  %vm13792_vm2 = vmmov %vm13789_vm14 }
0x1019   : > { %5945 = vrot.lane.b32.xlu0 %v5934_v1, %s13528_s25  ;;  %5947 = vrot.lane.b32.xlu1 %v5935_v34, %s13528_s25  ;;  %v12740_v1 = vand.u32 4294901760, %v7339_v52  ;;  %vm13793_vm1 = vmmov %vm13785_vm8 }
0x101a   : > { %7042 = vmatmul.mubr.f32.vlgmr.msra.gmra.mrb[2].mxu1 %v6726_v33  ;;  %vm13794_vm12 = vmmov %vm13786_vm0 }
0x101b   : > { %7082 = vmatpush1.msra.mxu1 %v6776_v39  ;;  %5386 = vmatmul.mubr.f32.gmra.mrb[10].mxu0 %v5385_v18  ;;  %v6759_v39 = vand.u32 4294901760, %v12558_v12 }
0x101c   : > { %7175 = vmatprep.subr.mxu1 %v12465_v25  ;;  %7047 = vmatprep.mubr.f32.mxu1 %v13778_v5 }
0x101d   : > { %5173 = vrot.lane.b32.xlu0 %v12422_v2, %s13531_s0  ;;  %5949 = vrot.lane.b32.xlu1 %v5936_v36, %s13528_s25  ;;  %v5188_v2 = vld [vmem:[%s13158_s13 + $0x18] sm:$0x1]  ;;  %s13800_s25 = sshll.u32 %s13802_s21, 6 }
0x101e   : > { %5466 = vmatprep.mubr.f32.mxu0 %v13778_v5  ;;  %7051 = vmatmul.mubr.f32.gmra.mrb[4].mxu1 %v6737_v0  ;;  %s13128_s30 = scalar_lea.vmem %s13160_s15, %s13800_s25 }
0x101f   : > { %5468 = vmatmul.mubr.f32.vlgmr.msra.gmra.mrb[4].mxu0 %v12426_v16  ;;  %7056 = vmatprep.mubr.f32.mxu1 %v13778_v5 }
0x1020   : > { %5500 = vmatpush1.msra.mxu0 %v12532_v7  ;;  %5473 = vmatprep.mubr.f32.mxu0 %v13778_v5 }
0x1021   : > { %5196 = vperm.xlu0 %9309, %v5186_v4   ;;  %5597 = vmatprep.subr.mxu0 %v12489_v60 }
0x1022   : > { %7060 = vmatmul.mubr.f32.gmra.mrb[6].mxu1 %v6748_v23 }
0x1023   : > { %5475 = vmatmul.mubr.f32.gmra.mrb[6].mxu0 %v12442_v38  ;;  %7065 = vmatprep.mubr.f32.mxu1 %v13778_v5 }
0x1024   : > { %5480 = vmatprep.mubr.f32.mxu0 %v13778_v5 }
0x1025   : > { %5206 = vperm.xlu0 %9309, %v5188_v2   ;;  %v8797_v2 = vld [vmem:[%s13157_s12 + $0x20] sm:$0xff] }
0x1026   : > { %7069 = vmatmul.mubr.f32.gmra.mrb[8].mxu1 %v6759_v39 }
0x1027   : > { %5482 = vmatmul.mubr.f32.gmra.mrb[8].mxu0 %v12463_v32  ;;  %7145 = vmatprep.mubr.f32.mxu1 %v13778_v5 }
0x1028   : > { %5487 = vmatprep.mubr.f32.mxu0 %v13778_v5 }
0x1029   : > { %8658 = vperm.xlu0 %9309, %v8648_v11  }
0x102a   : > { %7147 = vmatmul.mubr.f32.vlgmr.msra.gmra.mrb[2].mxu1 %v12437_v28 }
0x102b   : > { %7177 = vmatpush1.msra.mxu1 %v12454_v21  ;;  %5489 = vmatmul.mubr.f32.gmra.mrb[10].mxu0 %v12494_v27 }
0x102c   : > { %5563 = vmatprep.mubr.f32.mxu0 %v13778_v5  ;;  %7152 = vmatprep.mubr.f32.mxu1 %v13778_v5 }
0x102d   : > { %8668 = vperm.xlu0 %9309, %v8650_v35  }
0x102e   : > { %7154 = vmatmul.mubr.f32.gmra.mrb[4].mxu1 %v12474_v58 }
0x102f   : > { %5566 = vmatmul.mubr.f32.vlgmr.msra.gmra.mrb[4].mxu0 %v12435_v57  ;;  %7159 = vmatprep.mubr.f32.mxu1 %v13778_v5 }
0x1030   : > { %5599 = vmatpush1.msra.mxu0 %v12523_v24  ;;  %5571 = vmatprep.mubr.f32.mxu0 %v13778_v5 }
0x1031   : > { %v5148_v29 = vpop.xlane.xlu0 %5147  ;;  %5702 = vmatprep.subr.mxu0 %v5394_v51 }
0x1032   : > { %v5156_v15 = vadd.f32 %v8793_v20, %v5148_v29  ;;  %7161 = vmatmul.mubr.f32.gmra.mrb[6].mxu1 %v12512_v40  ;;  %v12758_v29 = vsub.f32 %v7339_v52, %v12740_v1 }
0x1033   : > { %5574 = vmatmul.mubr.f32.gmra.mrb[6].mxu0 %v12461_v54  ;;  %7166 = vmatprep.mubr.f32.mxu1 %v13778_v5  ;;  %v8816_v54 = vld [vmem:[%s13155_s10 + $0x20] sm:$0x1f] }
0x1034   : > { %v5157_v41 = vsub.f32 0.0, %v5156_v15  ;;  %5579 = vmatprep.mubr.f32.mxu0 %v13778_v5 }
0x1036   : > { %v5158_v31 = vmul.f32 1.442695, %v5157_v41  ;;  %7168 = vmatmul.mubr.f32.gmra.mrb[8].mxu1 %v12542_v19 }
0x1037   : > { %5582 = vmatmul.mubr.f32.gmra.mrb[8].mxu0 %v12486_v44  ;;  %7240 = vmatprep.mubr.f32.mxu1 %v13778_v5 }
0x1038   : > { %9311 = vpow2.f32 %v5158_v31  ;;  %5587 = vmatprep.mubr.f32.mxu0 %v13778_v5  ;;  %v5954_v31 = vsel %vm13786_vm0, %v8797_v2, 0 }
0x103a   : > { %7242 = vmatmul.mubr.f32.vlgmr.msra.gmra.mrb[2].mxu1 %v12437_v28 }
0x103b   : > { %5590 = vmatmul.mubr.f32.gmra.mrb[10].mxu0 %v12529_v48  ;;  %7247 = vmatprep.mubr.f32.mxu1 %v13778_v5 }
0x103c   : > { %5662 = vmatprep.mubr.f32.mxu0 %v13778_v5 }
0x103e   : > { %7249 = vmatmul.mubr.f32.gmra.mrb[4].mxu1 %v12474_v58 }
0x103f   : > { %5666 = vmatmul.mubr.f32.vlgmr.msra.gmra.mrb[4].mxu0 %v5350_v26  ;;  %7254 = vmatprep.mubr.f32.mxu1 %v13778_v5  ;;  %v8815_v26 = vld [vmem:[%s13154_s9 + $0x20] sm:$0x1f] }
0x1040   : > { %5706 = vmatpush1.msra.mxu0 %v5400_v3  ;;  %5671 = vmatprep.mubr.f32.mxu0 %v13778_v5 }
0x1041   : > { %5799 = vmatprep.subr.mxu0 %v12489_v60 }
0x1042   : > { %v9312_v13 = vpop.eup %9311  ;;  %7256 = vmatmul.mubr.f32.gmra.mrb[6].mxu1 %v12512_v40 }
0x1043   : > { %v5160_v51 = vadd.f32 1.0, %v9312_v13  ;;  %5675 = vmatmul.mubr.f32.gmra.mrb[6].mxu0 %v5361_v49  ;;  %7261 = vmatprep.mubr.f32.mxu1 %v13778_v5  ;;  %v8817_v49 = vld [vmem:[%s13156_s11 + $0x20] sm:$0x1f] }
0x1044   : > { %5680 = vmatprep.mubr.f32.mxu0 %v13778_v5 }
0x1045   : > { %9313 = vrcp.f32 %v5160_v51 }
0x1046   : > { %7263 = vmatmul.mubr.f32.gmra.mrb[8].mxu1 %v12542_v19 }
0x1047   : > { %5684 = vmatmul.mubr.f32.gmra.mrb[8].mxu0 %v5372_v53  ;;  %7411 = vmatprep.mubr.f32.mxu1 %v13778_v5  ;;  %v8813_v53 = vld [vmem:[%s13157_s12 + $0x70] sm:$0xff] }
0x1048   : > { %5689 = vmatprep.mubr.f32.mxu0 %v13778_v5  ;;  %v7336_v3 = vsel %vm13782_vm5, %v8813_v53, 0  ;;  %v8799_v53 = vld [vmem:[%s13157_s12 + $0x30] sm:$0xff] }
0x1049   : > { %v12728_v14 = vand.u32 4294901760, %v7336_v3  ;;  %v5960_v9 = vsel %vm13788_vm15, %v8799_v53, 0 }
0x104b   : > { %5693 = vmatmul.mubr.f32.gmra.mrb[10].mxu0 %v5383_v45  ;;  %v12738_v8 = vsub.f32 %v7336_v3, %v12728_v14 }
0x104c   : > { %5769 = vmatprep.mubr.f32.mxu0 %v13778_v5 }
0x104d   : > { %v7436_v20 = vand.u32 4294901760, %v12738_v8 }
0x104f   : > { %v9314_v57 = vpop.eup %9313  ;;  %5771 = vmatmul.mubr.f32.vlgmr.msra.gmra.mrb[4].mxu0 %v12426_v16 }
0x1050   : > { %5165 = vperm.xlu1 %9310, %v9314_v57   ;;  %5801 = vmatpush1.msra.mxu0 %v12523_v24 }
0x1051   : > { %5776 = vmatprep.mubr.f32.mxu0 %v13778_v5 }
0x1053   : > { %5778 = vmatmul.mubr.f32.gmra.mrb[6].mxu0 %v12442_v38 }
0x1054   : > { %7969 = vperm.xlu1 %9310, %v8815_v26   ;;  %5783 = vmatprep.mubr.f32.mxu0 %v13778_v5  ;;  %v7437_v26 = vsub.f32 %v12738_v8, %v7436_v20 }
0x1057   : > { %5785 = vmatmul.mubr.f32.gmra.mrb[8].mxu0 %v12463_v32 }
0x1058   : > { %7978 = vperm.xlu1 %9310, %v8816_v54   ;;  %5790 = vmatprep.mubr.f32.mxu0 %v13778_v5  ;;  %v7447_v54 = vand.u32 4294901760, %v12758_v29 }
0x105b   : > { %5792 = vmatmul.mubr.f32.gmra.mrb[10].mxu0 %v12494_v27 }
0x105c   : > { %5175 = vrot.lane.b32.xlu1 %v12410_v47, %s13531_s0  ;;  %5864 = vmatprep.mubr.f32.mxu0 %v13778_v5  ;;  %v5185_v47 = vld [vmem:[%s13158_s13] sm:$0xff] }
0x105f   : > { %5866 = vmatmul.mubr.f32.vlgmr.msra.gmra.mrb[4].mxu0 %v12426_v16  ;;  %v5187_v16 = vld [vmem:[%s13158_s13 + $0x10] sm:$0xff] }
0x1060   : > { %5177 = vrot.lane.b32.xlu1 %v12413_v55, %s13531_s0  ;;  %5871 = vmatprep.mubr.f32.mxu0 %v13778_v5  ;;  %v8811_v55 = vld [vmem:[%s13157_s12 + $0x60] sm:$0xff] }
0x1061   : > { %v7330_v44 = vsel %vm13780_vm3, %v8811_v55, 0  ;;  %vm13795_vm3 = vmmov %vm13786_vm0 }
0x1062   : > { %v12701_v60 = vand.u32 4294901760, %v7330_v44 }
0x1063   : > { %5873 = vmatmul.mubr.f32.gmra.mrb[6].mxu0 %v12442_v38  ;;  %v8812_v38 = vld [vmem:[%s13157_s12 + $0x68] sm:$0xff] }
0x1064   : > { %7989 = vperm.xlu1 %9310, %v8817_v49   ;;  %5878 = vmatprep.mubr.f32.mxu0 %v13778_v5  ;;  %v7333_v24 = vsel %vm13781_vm10, %v8812_v38, 0  ;;  %v12713_v48 = vsub.f32 %v7330_v44, %v12701_v60  ;;  %v8798_v49 = vld [vmem:[%s13157_s12 + $0x28] sm:$0xff]  ;;  %vm13796_vm10 = vmmov %vm13786_vm0 }
0x1065   : > { %v12718_v7 = vand.u32 4294901760, %v7333_v24  ;;  %v5957_v38 = vsel %vm13787_vm7, %v8798_v49, 0 }
0x1066   : > { %v7414_v37 = vand.u32 4294901760, %v12713_v48 }
0x1067   : > { %5880 = vmatmul.mubr.f32.gmra.mrb[8].mxu0 %v12463_v32  ;;  %v8647_v32 = vld [vmem:[%s13159_s14] sm:$0xff]  ;;  %v12726_v46 = vsub.f32 %v7333_v24, %v12718_v7  ;;  %v7448_v24 = vsub.f32 %v12758_v29, %v7447_v54 }
0x1068   : > { %5191 = vperm.xlu1 %9310, %v5185_v47   ;;  %5885 = vmatprep.mubr.f32.mxu0 %v13778_v5  ;;  %v7415_v62 = vsub.f32 %v12713_v48, %v7414_v37 }
0x1069   : > { %v7425_v59 = vand.u32 4294901760, %v12726_v46  ;;  %v7449_v52 = vand.u32 4294901760, %v7448_v24 }
0x106a   : > { %v7416_v4 = vand.u32 4294901760, %v7415_v62 }
0x106b   : > { %5887 = vmatmul.mubr.f32.gmra.mrb[10].mxu0 %v12494_v27  ;;  %v8649_v27 = vld [vmem:[%s13159_s14 + $0x10] sm:$0xff]  ;;  %v7426_v35 = vsub.f32 %v12726_v46, %v7425_v59 }
0x106c   : > { %5201 = vperm.xlu1 %9310, %v5187_v16   ;;  %6035 = vmatprep.mubr.f32.mxu0 %v13778_v5  ;;  %v12780_v16 = vand.u32 4294901760, %v5954_v31 }
0x106d   : > { %v7427_v57 = vand.u32 4294901760, %v7426_v35 }
0x106e   : > { %v12794_v3 = vsub.f32 %v5954_v31, %v12780_v16 }
0x1070   : > { %8653 = vperm.xlu1 %9310, %v8647_v32   ;;  %v7438_v32 = vand.u32 4294901760, %v7437_v26 }
0x1073   : > { %v7324_v45 = vpop.permute.xlu1 %7323 }
0x1074   : > { %8663 = vperm.xlu1 %9310, %v8649_v27  }
0x1077   : > { %v7326_v6 = vpop.permute.xlu1 %7325 }
0x1078   : > { %v7328_v56 = vsel %vm3478_vm6, %v7324_v45, %v7326_v6  ;;  %v8800_v6 = vld [vmem:[%s13157_s12 + $0x38] sm:$0x1] }
0x1079   : > { %v7343_v50 = vsel %vm13784_vm11, %v7328_v56, 0  ;;  %v6038_v56 = vand.u32 4294901760, %v12794_v3  ;;  %v5963_v2 = vsel %vm13790_vm13, %v8800_v6, 0  ;;  %vm13798_vm11 = vmmov %vm13793_vm1 }
0x107a   : > { %v12742_v34 = vand.u32 4294901760, %v7343_v50  ;;  %v12823_v26 = vand.u32 4294901760, %v5963_v2 }
0x107b   : > { %v7322_v18 = vpop.permute.xlu1 %7321  ;;  %v6039_v31 = vsub.f32 %v12794_v3, %v6038_v56 }
0x107c   : > { %v12745_v63 = vsub.f32 %v7343_v50, %v12742_v34  ;;  %v7327_v36 = vsel %vm3478_vm6, %v7322_v18, %v7324_v45  ;;  %7346 = vmatprep.subr.mxu1 %v12742_v34  ;;  %v12796_v45 = vand.u32 4294901760, %v5957_v38 }
0x107d   : > { %v7341_v11 = vsel %vm13785_vm8, %v7327_v36, 0  ;;  %v12808_v36 = vand.u32 4294901760, %v5960_v9  ;;  %vm13799_vm8 = vmmov %vm13793_vm1 }
0x107e   : > { %v12760_v15 = vand.u32 4294901760, %v7341_v11  ;;  %v7458_v41 = vand.u32 4294901760, %v12745_v63  ;;  %v12806_v18 = vsub.f32 %v5957_v38, %v12796_v45 }
0x1080   : > { %v12765_v13 = vsub.f32 %v7341_v11, %v12760_v15  ;;  %7348 = vmatpush1.msra.mxu1 %v12760_v15  ;;  %v7459_v51 = vsub.f32 %v12745_v63, %v7458_v41 }
0x1081   : > { %7417 = vmatmul.mubr.f32.vlgmr.msra.gmra.mrb[2].mxu1 %v7416_v4 }
0x1082   : > { %v7464_v47 = vand.u32 4294901760, %v12765_v13  ;;  %7422 = vmatprep.mubr.f32.mxu1 %v13778_v5  ;;  %v7460_v55 = vand.u32 4294901760, %v7459_v51  ;;  %v6049_v51 = vand.u32 4294901760, %v12806_v18 }
0x1084   : > { %7461 = vmatprep.subr.mxu1 %v7460_v55  ;;  %v7465_v44 = vsub.f32 %v12765_v13, %v7464_v47  ;;  %v6050_v53 = vsub.f32 %v12806_v18, %v6049_v51 }
0x1085   : > { %7428 = vmatmul.mubr.f32.gmra.mrb[4].mxu1 %v7427_v57  ;;  %v12821_v57 = vsub.f32 %v5960_v9, %v12808_v36  ;;  %v12841_v9 = vsub.f32 %v5963_v2, %v12823_v26 }
0x1086   : > { %7433 = vmatprep.mubr.f32.mxu1 %v13778_v5  ;;  %v7466_v27 = vand.u32 4294901760, %v7465_v44 }
0x1087   : > { %v6071_v2 = vand.u32 4294901760, %v12841_v9 }
0x1088   : > { %7467 = vmatpush1.msra.mxu1 %v7466_v27  ;;  %v6060_v27 = vand.u32 4294901760, %v12821_v57 }
0x1089   : > { %7439 = vmatmul.mubr.f32.gmra.mrb[6].mxu1 %v7438_v32  ;;  %7561 = vmatprep.subr.mxu1 %v12745_v63  ;;  %v6040_v32 = vand.u32 4294901760, %v6039_v31 }
0x108a   : > { %7444 = vmatprep.mubr.f32.mxu1 %v13778_v5 }
0x108b   : > { %v5948_v62 = vpop.permute.xlu1 %5947  ;;  %v5946_v50 = vpop.permute.xlu0 %5945 }
0x108c   : > { %v5951_v4 = vsel %vm13789_vm14, %v5946_v50, %v5948_v62 }
0x108d   : > { %v5965_v11 = vsel %vm13791_vm9, %v5951_v4, 0  ;;  %7450 = vmatmul.mubr.f32.gmra.mrb[8].mxu1 %v7449_v52  ;;  %v6061_v4 = vsub.f32 %v12821_v57, %v6060_v27 }
0x108e   : > { %v12813_v35 = vand.u32 4294901760, %v5965_v11  ;;  %7530 = vmatprep.mubr.f32.mxu1 %v13778_v5 }
0x108f   : > { %v5950_v55 = vpop.permute.xlu1 %5949 }
0x1090   : > { %v12826_v49 = vsub.f32 %v5965_v11, %v12813_v35  ;;  %v5952_v44 = vsel %vm13792_vm2, %v5948_v62, %v5950_v55  ;;  %v6051_v62 = vand.u32 4294901760, %v6050_v53 }
0x1091   : > { %7532 = vmatmul.mubr.f32.vlgmr.msra.gmra.mrb[2].mxu1 %v12701_v60  ;;  %v5967_v38 = vsel %vm13793_vm1, %v5952_v44, 0  ;;  %v6062_v44 = vand.u32 4294901760, %v6061_v4 }
0x1092   : > { %7564 = vmatpush1.msra.mxu1 %v12765_v13  ;;  %7537 = vmatprep.mubr.f32.mxu1 %v13778_v5  ;;  %v12833_v24 = vand.u32 4294901760, %v5967_v38  ;;  %v6088_v52 = vand.u32 4294901760, %v12826_v49 }
0x1093   : > { %7661 = vmatprep.subr.mxu1 %v12742_v34 }
0x1094   : > { %v6081_v6 = vsub.f32 %v5967_v38, %v12833_v24  ;;  %5970 = vmatprep.subr.mxu0 %v12833_v24  ;;  %v6089_v11 = vsub.f32 %v12826_v49, %v6088_v52  ;;  %v6072_v38 = vsub.f32 %v12841_v9, %v6071_v2 }
0x1095   : > { %7539 = vmatmul.mubr.f32.gmra.mrb[4].mxu1 %v12718_v7  ;;  %5972 = vmatpush1.msra.mxu0 %v12813_v35 }
0x1096   : > { %7544 = vmatprep.mubr.f32.mxu1 %v13778_v5  ;;  %6041 = vmatmul.mubr.f32.vlgmr.msra.gmra.mrb[4].mxu0 %v6040_v32  ;;  %v6082_v50 = vand.u32 4294901760, %v6081_v6  ;;  %v6090_v32 = vand.u32 4294901760, %v6089_v11  ;;  %v6073_v53 = vand.u32 4294901760, %v6072_v38 }
0x1097   : > { %6046 = vmatprep.mubr.f32.mxu0 %v13778_v5 }
0x1098   : > { %v6083_v31 = vsub.f32 %v6081_v6, %v6082_v50 }
0x1099   : > { %7546 = vmatmul.mubr.f32.gmra.mrb[6].mxu1 %v12728_v14 }
0x109a   : > { %7551 = vmatprep.mubr.f32.mxu1 %v13778_v5  ;;  %6052 = vmatmul.mubr.f32.gmra.mrb[6].mxu0 %v6051_v62  ;;  %v6084_v55 = vand.u32 4294901760, %v6083_v31 }
0x109b   : > { %6057 = vmatprep.mubr.f32.mxu0 %v13778_v5 }
0x109c   : > { %6085 = vmatprep.subr.mxu0 %v6084_v55 }
0x109d   : > { %7553 = vmatmul.mubr.f32.gmra.mrb[8].mxu1 %v12740_v1  ;;  %6091 = vmatpush1.msra.mxu0 %v6090_v32 }
0x109e   : > { %7627 = vmatprep.mubr.f32.mxu1 %v13778_v5  ;;  %6063 = vmatmul.mubr.f32.gmra.mrb[8].mxu0 %v6062_v44 }
0x109f   : > { %6185 = vmatprep.subr.mxu0 %v6081_v6  ;;  %6068 = vmatprep.mubr.f32.mxu0 %v13778_v5  ;;  %v6772_v6 = vand.u32 4294901760, %v12521_v43 }
0x10a1   : > { %7630 = vmatmul.mubr.f32.vlgmr.msra.gmra.mrb[2].mxu1 %v12713_v48 }
0x10a2   : > { %7663 = vmatpush1.msra.mxu1 %v12760_v15  ;;  %7635 = vmatprep.mubr.f32.mxu1 %v13778_v5 }
0x10a3   : > { %6074 = vmatmul.mubr.f32.gmra.mrb[10].mxu0 %v6073_v53  ;;  %7766 = vmatprep.subr.mxu1 %v7458_v41 }
0x10a4   : > { %6154 = vmatprep.mubr.f32.mxu0 %v13778_v5 }
0x10a5   : > { %7638 = vmatmul.mubr.f32.gmra.mrb[4].mxu1 %v12726_v46  ;;  %v8818_v46 = vld [vmem:[%s13157_s12 + $0x80] sm:$0xff] }
0x10a6   : > { %7643 = vmatprep.mubr.f32.mxu1 %v13778_v5 }
0x10a7   : > { %6156 = vmatmul.mubr.f32.vlgmr.msra.gmra.mrb[4].mxu0 %v12780_v16 }
0x10a8   : > { %6188 = vmatpush1.msra.mxu0 %v12826_v49  ;;  %6161 = vmatprep.mubr.f32.mxu0 %v13778_v5 }
0x10a9   : > { %6285 = vmatprep.subr.mxu0 %v12833_v24  ;;  %7646 = vmatmul.mubr.f32.gmra.mrb[6].mxu1 %v12738_v8  ;;  %v8819_v8 = vld [vmem:[%s13157_s12 + $0x88] sm:$0xff] }
0x10aa   : > { %7651 = vmatprep.mubr.f32.mxu1 %v13778_v5 }
0x10ab   : > { %6163 = vmatmul.mubr.f32.gmra.mrb[6].mxu0 %v12796_v45 }
0x10ac   : > { %6168 = vmatprep.mubr.f32.mxu0 %v13778_v5 }
0x10ad   : > { %7654 = vmatmul.mubr.f32.gmra.mrb[8].mxu1 %v12758_v29  ;;  %v8005_v29 = vsel %vm13795_vm3, %v8819_v8, 0 }
0x10ae   : > { %7726 = vmatprep.mubr.f32.mxu1 %v13778_v5  ;;  %v12968_v41 = vand.u32 4294901760, %v8005_v29 }
0x10af   : > { %6170 = vmatmul.mubr.f32.gmra.mrb[8].mxu0 %v12808_v36 }
0x10b0   : > { %6175 = vmatprep.mubr.f32.mxu0 %v13778_v5 }
0x10b1   : > { %7730 = vmatmul.mubr.f32.vlgmr.msra.gmra.mrb[2].mxu1 %v7414_v37 }
0x10b2   : > { %7770 = vmatpush1.msra.mxu1 %v7464_v47  ;;  %7735 = vmatprep.mubr.f32.mxu1 %v13778_v5 }
0x10b3   : > { %6177 = vmatmul.mubr.f32.gmra.mrb[10].mxu0 %v12823_v26  ;;  %7863 = vmatprep.subr.mxu1 %v12742_v34  ;;  %v5174_v34 = vpop.permute.xlu0 %5173 }
0x10b4   : > { %6251 = vmatprep.mubr.f32.mxu0 %v13778_v5 }
0x10b5   : > { %7739 = vmatmul.mubr.f32.gmra.mrb[4].mxu1 %v7425_v59 }
0x10b6   : > { %7744 = vmatprep.mubr.f32.mxu1 %v13778_v5 }
0x10b7   : > { %6254 = vmatmul.mubr.f32.vlgmr.msra.gmra.mrb[4].mxu0 %v12794_v3 }
0x10b8   : > { %6287 = vmatpush1.msra.mxu0 %v12813_v35  ;;  %6259 = vmatprep.mubr.f32.mxu0 %v13778_v5 }
0x10b9   : > { %6390 = vmatprep.subr.mxu0 %v6082_v50  ;;  %7748 = vmatmul.mubr.f32.gmra.mrb[6].mxu1 %v7436_v20 }
0x10ba   : > { %7753 = vmatprep.mubr.f32.mxu1 %v13778_v5 }
0x10bb   : > { %6262 = vmatmul.mubr.f32.gmra.mrb[6].mxu0 %v12806_v18 }
0x10bc   : > { %6267 = vmatprep.mubr.f32.mxu0 %v13778_v5 }
0x10bd   : > { %7757 = vmatmul.mubr.f32.gmra.mrb[8].mxu1 %v7447_v54 }
0x10be   : > { %7833 = vmatprep.mubr.f32.mxu1 %v13778_v5 }
0x10bf   : > { %6270 = vmatmul.mubr.f32.gmra.mrb[8].mxu0 %v12821_v57 }
0x10c0   : > { %6275 = vmatprep.mubr.f32.mxu0 %v13778_v5 }
0x10c1   : > { %7835 = vmatmul.mubr.f32.vlgmr.msra.gmra.mrb[2].mxu1 %v12701_v60 }
0x10c2   : > { %7865 = vmatpush1.msra.mxu1 %v12760_v15  ;;  %7840 = vmatprep.mubr.f32.mxu1 %v13778_v5 }
0x10c3   : > { %6278 = vmatmul.mubr.f32.gmra.mrb[10].mxu0 %v12841_v9 }
0x10c4   : > { %6350 = vmatprep.mubr.f32.mxu0 %v13778_v5 }
0x10c5   : > { %7842 = vmatmul.mubr.f32.gmra.mrb[4].mxu1 %v12718_v7 }
0x10c6   : > { %7847 = vmatprep.mubr.f32.mxu1 %v13778_v5 }
0x10c7   : > { %6354 = vmatmul.mubr.f32.vlgmr.msra.gmra.mrb[4].mxu0 %v6038_v56 }
0x10c8   : > { %6394 = vmatpush1.msra.mxu0 %v6088_v52  ;;  %6359 = vmatprep.mubr.f32.mxu0 %v13778_v5 }
0x10c9   : > { %6487 = vmatprep.subr.mxu0 %v12833_v24  ;;  %7849 = vmatmul.mubr.f32.gmra.mrb[6].mxu1 %v12728_v14 }
0x10ca   : > { %7854 = vmatprep.mubr.f32.mxu1 %v13778_v5 }
0x10cb   : > { %6363 = vmatmul.mubr.f32.gmra.mrb[6].mxu0 %v6049_v51 }
0x10cc   : > { %6368 = vmatprep.mubr.f32.mxu0 %v13778_v5 }
0x10cd   : > { %7856 = vmatmul.mubr.f32.gmra.mrb[8].mxu1 %v12740_v1 }
0x10ce   : > { %7928 = vmatprep.mubr.f32.mxu1 %v13778_v5 }
0x10cf   : > { %6372 = vmatmul.mubr.f32.gmra.mrb[8].mxu0 %v6060_v27  ;;  %v5166_v48 = vpop.permute.xlu1 %5165 }
0x10d0   : > { %6377 = vmatprep.mubr.f32.mxu0 %v13778_v5  ;;  %v5168_v63 = vmul.f32 %v5166_v48, %v9899_v30  ;;  %v5169_v13 = vmul.f32 %v5166_v48, %v9901_v10  ;;  %v12980_v10 = vsub.f32 %v8005_v29, %v12968_v41 }
0x10d1   : > { %7930 = vmatmul.mubr.f32.vlgmr.msra.gmra.mrb[2].mxu1 %v12701_v60  ;;  %v8002_v60 = vsel %vm13794_vm12, %v8818_v46, 0 }
0x10d2   : > { %7935 = vmatprep.mubr.f32.mxu1 %v13778_v5  ;;  %v8099_v4 = vand.u32 4294901760, %v12980_v10 }
0x10d3   : > { %6381 = vmatmul.mubr.f32.gmra.mrb[10].mxu0 %v6071_v2  ;;  %v7970_v37 = vpop.permute.xlu1 %7969 }
0x10d4   : > { %6457 = vmatprep.mubr.f32.mxu0 %v13778_v5 }
0x10d5   : > { %7937 = vmatmul.mubr.f32.gmra.mrb[4].mxu1 %v12718_v7  ;;  %v12953_v7 = vand.u32 4294901760, %v8002_v60 }
0x10d6   : > { %7942 = vmatprep.mubr.f32.mxu1 %v13778_v5 }
0x10d7   : > { %6459 = vmatmul.mubr.f32.vlgmr.msra.gmra.mrb[4].mxu0 %v12780_v16  ;;  %v7979_v59 = vpop.permute.xlu1 %7978  ;;  %v12966_v30 = vsub.f32 %v8002_v60, %v12953_v7 }
0x10d8   : > { %6489 = vmatpush1.msra.mxu0 %v12813_v35  ;;  %6464 = vmatprep.mubr.f32.mxu0 %v13778_v5  ;;  %v8821_v35 = vld [vmem:[%s13157_s12 + $0x98] sm:$0x1] }
0x10d9   : > { %6658 = vmatprep.subr.mxu0 %v12465_v25  ;;  %7944 = vmatmul.mubr.f32.gmra.mrb[6].mxu1 %v12728_v14  ;;  %v8820_v25 = vld [vmem:[%s13157_s12 + $0x90] sm:$0xff]  ;;  %v8088_v51 = vand.u32 4294901760, %v12966_v30 }
0x10da   : > { %7949 = vmatprep.mubr.f32.mxu1 %v13778_v5  ;;  %v8008_v3 = vsel %vm13796_vm10, %v8820_v25, 0 }
0x10db   : > { %6466 = vmatmul.mubr.f32.gmra.mrb[6].mxu0 %v12796_v45  ;;  %v5176_v20 = vpop.permute.xlu1 %5175  ;;  %v12982_v57 = vand.u32 4294901760, %v8008_v3  ;;  %v8089_v50 = vsub.f32 %v12966_v30, %v8088_v51 }
0x10dc   : > { %v5179_v15 = vsel %vm3478_vm6, %v5174_v34, %v5176_v20  ;;  %6471 = vmatprep.mubr.f32.mxu0 %v13778_v5 }
0x10dd   : > { %v5183_v14 = vadd.f32 %v5179_v15, %v5168_v63  ;;  %7951 = vmatmul.mubr.f32.gmra.mrb[8].mxu1 %v12740_v1  ;;  %v12993_v2 = vsub.f32 %v8008_v3, %v12982_v57  ;;  %v8090_v32 = vand.u32 4294901760, %v8089_v50  ;;  %v6738_v15 = vsub.f32 %v12499_v22, %v6737_v0  ;;  %v9322_v3 = vld [vmem:[%s9536_s28] sm:$0xff] }
0x10de   : > { %8085 = vmatprep.mubr.f32.mxu1 %v13778_v5  ;;  %v6749_v22 = vsub.f32 %v12540_v61, %v6748_v23 }
0x10df   : > { %v7972_v54 = vmul.f32 %v7970_v37, %v5183_v14  ;;  %6473 = vmatmul.mubr.f32.gmra.mrb[8].mxu0 %v12808_v36  ;;  %v5178_v47 = vpop.permute.xlu1 %5177 }
0x10e0   : > { %v5180_v56 = vsel %vm3478_vm6, %v5176_v20, %v5178_v47  ;;  %6478 = vmatprep.mubr.f32.mxu0 %v13778_v5  ;;  %vm13797_vm6 = vmmov %vm13786_vm0  ;;  %v6750_v0 = vand.u32 4294901760, %v6749_v22 }
0x10e1   : > { %v5184_v1 = vadd.f32 %v5180_v56, %v5169_v13  ;;  %v7981_v18 = vadd.f32 %v7979_v59, %v7972_v54  ;;  %v8011_v9 = vsel %vm13797_vm6, %v8821_v35, 0  ;;  %v6778_v13 = vand.u32 4294901760, %v12504_v42 }
0x10e2   : > { %v12997_v55 = vand.u32 4294901760, %v8011_v9  ;;  %v6760_v42 = vsub.f32 %v12558_v12, %v6759_v39 }
0x10e3   : > { %v7973_v49 = vmul.f32 %v7970_v37, %v5184_v1  ;;  %6480 = vmatmul.mubr.f32.gmra.mrb[10].mxu0 %v12823_v26  ;;  %v7990_v24 = vpop.permute.xlu1 %7989  ;;  %vm7983_vm5 = vcmp.ge.f32.partialorder %v7981_v18, 0.0  ;;  %v9323_v1 = vld [vmem:[%s9536_s28 + $0x8] sm:$0xff] }
0x10e4   : > { %v7992_v27 = vmul.f32 %v7990_v24, %v7981_v18  ;;  %6552 = vmatprep.mubr.f32.mxu0 %v13778_v5  ;;  %v13015_v37 = vsub.f32 %v8011_v9, %v12997_v55  ;;  %v6761_v61 = vand.u32 4294901760, %v6760_v42  ;;  %v9325_v9 = vld [vmem:[%s9536_s28 + $0x18] sm:$0xff] }
0x10e5   : > { %v7982_v52 = vadd.f32 %v7979_v59, %v7973_v49 }
0x10e6   : > { %v7994_v62 = vsel %vm7983_vm5, %v7981_v18, %v7992_v27  ;;  %v8121_v63 = vand.u32 4294901760, %v13015_v37 }
0x10e7   : > { %vm7984_vm4 = vcmp.ge.f32.partialorder %v7982_v52, 0.0  ;;  %v7993_v11 = vmul.f32 %v7990_v24, %v7982_v52  ;;  %v8014_v31 = vsel %vm13798_vm11, %v7994_v62, 0  ;;  %6554 = vmatmul.mubr.f32.vlgmr.msra.gmra.mrb[4].mxu0 %v12780_v16  ;;  %v8110_v16 = vand.u32 4294901760, %v12993_v2 }
0x10e8   : > { %6660 = vmatpush1.msra.mxu0 %v12454_v21  ;;  %6559 = vmatprep.mubr.f32.mxu0 %v13778_v5  ;;  %v13001_v43 = vand.u32 4294901760, %v8014_v31  ;;  %v8100_v21 = vsub.f32 %v12980_v10, %v8099_v4  ;;  %v8122_v25 = vsub.f32 %v13015_v37, %v8121_v63 }
0x10e9   : > { %v7995_v44 = vsel %vm7984_vm4, %v7982_v52, %v7993_v11  ;;  %6773 = vmatprep.subr.mxu0 %v6772_v6  ;;  %v8111_v34 = vsub.f32 %v12993_v2, %v8110_v16 }
0x10ea   : > { %v8017_v38 = vsel %vm13799_vm8, %v7995_v44, 0  ;;  %v13005_v53 = vsub.f32 %v8014_v31, %v13001_v43  ;;  %v8101_v60 = vand.u32 4294901760, %v8100_v21  ;;  %v8123_v54 = vand.u32 4294901760, %v8122_v25 }
0x10eb   : > { %6561 = vmatmul.mubr.f32.gmra.mrb[6].mxu0 %v12796_v45  ;;  %v13008_v48 = vand.u32 4294901760, %v8017_v38  ;;  %v6727_v45 = vsub.f32 %v12468_v17, %v6726_v33  ;;  %v8112_v29 = vand.u32 4294901760, %v8111_v34  ;;  %v9328_v34 = vld [vmem:[%s9536_s28 + $0x30] sm:$0x1] }
0x10ec   : > { %6566 = vmatprep.mubr.f32.mxu0 %v13778_v5  ;;  %v8138_v46 = vand.u32 4294901760, %v13005_v53 }
0x10ed   : > { %8020 = vmatprep.subr.mxu1 %v13008_v48  ;;  %v13021_v59 = vsub.f32 %v8017_v38, %v13008_v48 }
0x10ee   : > { %8022 = vmatpush1.msra.mxu1 %v13001_v43  ;;  %v8139_v17 = vsub.f32 %v13005_v53, %v8138_v46 }
0x10ef   : > { %6568 = vmatmul.mubr.f32.gmra.mrb[8].mxu0 %v12808_v36  ;;  %8091 = vmatmul.mubr.f32.vlgmr.msra.gmra.mrb[2].mxu1 %v8090_v32  ;;  %v8132_v8 = vand.u32 4294901760, %v13021_v59  ;;  %v6728_v36 = vand.u32 4294901760, %v6727_v45 }
0x10f0   : > { %6573 = vmatprep.mubr.f32.mxu0 %v13778_v5  ;;  %8096 = vmatprep.mubr.f32.mxu1 %v13778_v5  ;;  %v8140_v14 = vand.u32 4294901760, %v8139_v17 }
0x10f1   : > { %v8133_v33 = vsub.f32 %v13021_v59, %v8132_v8 }
0x10f3   : > { %6575 = vmatmul.mubr.f32.gmra.mrb[10].mxu0 %v12823_v26  ;;  %8102 = vmatmul.mubr.f32.gmra.mrb[4].mxu1 %v8101_v60  ;;  %v8134_v20 = vand.u32 4294901760, %v8133_v33  ;;  %v6739_v26 = vand.u32 4294901760, %v6738_v15 }
0x10f4   : > { %6723 = vmatprep.mubr.f32.mxu0 %v13778_v5  ;;  %8107 = vmatprep.mubr.f32.mxu1 %v13778_v5 }
0x10f5   : > { %8135 = vmatprep.subr.mxu1 %v8134_v20  ;;  %v9329_v20 = vld [vmem:[%s9536_s28 + $0x38] sm:$0x1] }
0x10f6   : > { %8141 = vmatpush1.msra.mxu1 %v8140_v14 }
0x10f7   : > { %6729 = vmatmul.mubr.f32.vlgmr.msra.gmra.mrb[4].mxu0 %v6728_v36  ;;  %8113 = vmatmul.mubr.f32.gmra.mrb[6].mxu1 %v8112_v29 }
0x10f8   : > { %6779 = vmatpush1.msra.mxu0 %v6778_v13  ;;  %8235 = vmatprep.subr.mxu1 %v13021_v59 }
0x10f9   : > { %6734 = vmatprep.mubr.f32.mxu0 %v13778_v5  ;;  %8118 = vmatprep.mubr.f32.mxu1 %v13778_v5 }
0x10fb   : > { %6740 = vmatmul.mubr.f32.gmra.mrb[6].mxu0 %v6739_v26  ;;  %8124 = vmatmul.mubr.f32.gmra.mrb[8].mxu1 %v8123_v54 }
0x10fc   : > { %6745 = vmatprep.mubr.f32.mxu0 %v13778_v5  ;;  %8204 = vmatprep.mubr.f32.mxu1 %v13778_v5 }
0x10ff   : > { %6751 = vmatmul.mubr.f32.gmra.mrb[8].mxu0 %v6750_v0  ;;  %8206 = vmatmul.mubr.f32.vlgmr.msra.gmra.mrb[2].mxu1 %v12953_v7 }
0x1100   : > { %8238 = vmatpush1.msra.mxu1 %v13005_v53  ;;  %6756 = vmatprep.mubr.f32.mxu0 %v13778_v5 }
0x1101   : > { %8335 = vmatprep.subr.mxu1 %v13008_v48  ;;  %8211 = vmatprep.mubr.f32.mxu1 %v13778_v5 }
0x1103   : > { %6762 = vmatmul.mubr.f32.gmra.mrb[10].mxu0 %v6761_v61  ;;  %8213 = vmatmul.mubr.f32.gmra.mrb[4].mxu1 %v12968_v41 }
0x1104   : > { %6842 = vmatprep.mubr.f32.mxu0 %v13778_v5  ;;  %8218 = vmatprep.mubr.f32.mxu1 %v13778_v5 }
0x1107   : > { %6844 = vmatmul.mubr.f32.vlgmr.msra.gmra.mrb[4].mxu0 %v12437_v28  ;;  %8220 = vmatmul.mubr.f32.gmra.mrb[6].mxu1 %v12982_v57 }
0x1108   : > { %6849 = vmatprep.mubr.f32.mxu0 %v13778_v5  ;;  %8225 = vmatprep.mubr.f32.mxu1 %v13778_v5 }
0x110b   : > { %6851 = vmatmul.mubr.f32.gmra.mrb[6].mxu0 %v12474_v58  ;;  %8227 = vmatmul.mubr.f32.gmra.mrb[8].mxu1 %v12997_v55 }
0x110c   : > { %6856 = vmatprep.mubr.f32.mxu0 %v13778_v5  ;;  %8301 = vmatprep.mubr.f32.mxu1 %v13778_v5 }
0x110f   : > { %6858 = vmatmul.mubr.f32.gmra.mrb[8].mxu0 %v12512_v40  ;;  %8304 = vmatmul.mubr.f32.vlgmr.msra.gmra.mrb[2].mxu1 %v12966_v30  ;;  %v5192_v30 = vpop.permute.xlu1 %5191 }
0x1110   : > { %8337 = vmatpush1.msra.mxu1 %v13001_v43  ;;  %6863 = vmatprep.mubr.f32.mxu0 %v13778_v5  ;;  %v5209_v56 = vadd.f32 %v9322_v3, %v5192_v30 }
0x1111   : > { %8440 = vmatprep.subr.mxu1 %v8132_v8  ;;  %8309 = vmatprep.mubr.f32.mxu1 %v13778_v5 }
0x1113   : > { %6865 = vmatmul.mubr.f32.gmra.mrb[10].mxu0 %v12542_v19  ;;  %8312 = vmatmul.mubr.f32.gmra.mrb[4].mxu1 %v12980_v10  ;;  %v5202_v47 = vpop.permute.xlu1 %5201 }
0x1114   : > { %8317 = vmatprep.mubr.f32.mxu1 %v13778_v5 }
0x1117   : > { %8320 = vmatmul.mubr.f32.gmra.mrb[6].mxu1 %v12993_v2  ;;  %v8654_v6 = vpop.permute.xlu1 %8653 }
0x1118   : > { %8325 = vmatprep.mubr.f32.mxu1 %v13778_v5 }
0x111b   : > { %8328 = vmatmul.mubr.f32.gmra.mrb[8].mxu1 %v13015_v37  ;;  %v8664_v15 = vpop.permute.xlu1 %8663 }
0x111c   : > { %8400 = vmatprep.mubr.f32.mxu1 %v13778_v5 }
0x111f   : > { %8404 = vmatmul.mubr.f32.vlgmr.msra.gmra.mrb[2].mxu1 %v8088_v51 }
0x1120   : > { %8444 = vmatpush1.msra.mxu1 %v8138_v46  ;;  %8409 = vmatprep.mubr.f32.mxu1 %v13778_v5 }
0x1121   : > { %8537 = vmatprep.subr.mxu1 %v13008_v48  ;;  %v9327_v48 = vld [vmem:[%s9536_s28 + $0x28] sm:$0xff] }
0x1122   : > { %v5214_v21 = vadd.f32 %v9327_v48, %v5202_v47 }
0x1123   : > { %8413 = vmatmul.mubr.f32.gmra.mrb[4].mxu1 %v8099_v4 }
0x1124   : > { %8418 = vmatprep.mubr.f32.mxu1 %v13778_v5 }
0x1127   : > { %8422 = vmatmul.mubr.f32.gmra.mrb[6].mxu1 %v8110_v16 }
0x1128   : > { %8427 = vmatprep.mubr.f32.mxu1 %v13778_v5 }
0x112b   : > { %8431 = vmatmul.mubr.f32.gmra.mrb[8].mxu1 %v8121_v63 }
0x112c   : > { %8507 = vmatprep.mubr.f32.mxu1 %v13778_v5 }
0x112f   : > { %8509 = vmatmul.mubr.f32.vlgmr.msra.gmra.mrb[2].mxu1 %v12953_v7 }
0x1130   : > { %8539 = vmatpush1.msra.mxu1 %v13001_v43  ;;  %8514 = vmatprep.mubr.f32.mxu1 %v13778_v5 }
0x1133   : > { %8516 = vmatmul.mubr.f32.gmra.mrb[4].mxu1 %v12968_v41 }
0x1134   : > { %8521 = vmatprep.mubr.f32.mxu1 %v13778_v5 }
0x1137   : > { %8523 = vmatmul.mubr.f32.gmra.mrb[6].mxu1 %v12982_v57 }
0x1138   : > { %8528 = vmatprep.mubr.f32.mxu1 %v13778_v5 }
0x113b   : > { %8530 = vmatmul.mubr.f32.gmra.mrb[8].mxu1 %v12997_v55 }
0x113c   : > { %8602 = vmatprep.mubr.f32.mxu1 %v13778_v5 }
0x113f   : > { %8604 = vmatmul.mubr.f32.vlgmr.msra.gmra.mrb[2].mxu1 %v12953_v7 }
0x1140   : > { %8609 = vmatprep.mubr.f32.mxu1 %v13778_v5 }
0x1143   : > { %8611 = vmatmul.mubr.f32.gmra.mrb[4].mxu1 %v12968_v41  ;;  %v5197_v41 = vpop.permute.xlu0 %5196 }
0x1144   : > { %8616 = vmatprep.mubr.f32.mxu1 %v13778_v5  ;;  %v5212_v52 = vadd.f32 %v9325_v9, %v5197_v41 }
0x1147   : > { %8618 = vmatmul.mubr.f32.gmra.mrb[6].mxu1 %v12982_v57  ;;  %v5207_v35 = vpop.permute.xlu0 %5206  ;;  %v9324_v57 = vld [vmem:[%s9536_s28 + $0x10] sm:$0xff] }
0x1148   : > { %8623 = vmatprep.mubr.f32.mxu1 %v13778_v5  ;;  %v5210_v5 = vadd.f32 %v9323_v1, %v5192_v30  ;;  %v5211_v49 = vadd.f32 %v9324_v57, %v5197_v41  ;;  %v5215_v63 = vadd.f32 %v9328_v34, %v5207_v35  ;;  %v5216_v29 = vadd.f32 %v9329_v20, %v5207_v35 }
0x114b   : > { %8625 = vmatmul.mubr.f32.gmra.mrb[8].mxu1 %v12997_v55  ;;  %v9326_v55 = vld [vmem:[%s9536_s28 + $0x20] sm:$0xff]  ;;  %v8659_v53 = vpop.permute.xlu0 %8658 }
0x114c   : > { %v5213_v43 = vadd.f32 %v9326_v55, %v5202_v47 }
0x11da   : > { %v6845_v28 = vpop.f32.mrb[4].mxu0 }
0x11db   : > { %v6847_v58 = vpop.f32.mrb[5].mxu0  ;;  %v8878_v18 = vadd.f32 %v6845_v28, %v5209_v56 }
0x11dc   : > { %v8880_v51 = vadd.f32 %v6847_v58, %v5210_v5  ;;  %v8669_v58 = vpop.permute.xlu0 %8668 }
0x11de   : > { %v6852_v40 = vpop.f32.mrb[6].mxu0 }
0x11df   : > { %v6854_v19 = vpop.f32.mrb[7].mxu0  ;;  %v8882_v50 = vadd.f32 %v6852_v40, %v5211_v49 }
0x11e0   : > { %v8884_v2 = vadd.f32 %v6854_v19, %v5212_v52 }
0x11e2   : > { %v6859_v12 = vpop.f32.mrb[8].mxu0 }
0x11e3   : > { %v6861_v23 = vpop.f32.mrb[9].mxu0  ;;  %v8886_v46 = vadd.f32 %v6859_v12, %v5213_v43 }
0x11e4   : > { %v8888_v45 = vadd.f32 %v6861_v23, %v5214_v21 }
0x11e6   : > { %v6866_v39 = vpop.f32.mrb[10].mxu0 }
0x11e7   : > { %v6868_v7 = vpop.f32.mrb[11].mxu0  ;;  %v8890_v13 = vadd.f32 %v6866_v39, %v5215_v63 }
0x11e8   : > { %v8892_v54 = vadd.f32 %v6868_v7, %v5216_v29 }
0x1212   : > { %v8605_v10 = vpop.f32.mrb[2].mxu1 }
0x1213   : > { %v8879_v24 = vadd.f32 %v8878_v18, %v8605_v10  ;;  %v8607_v27 = vpop.f32.mrb[3].mxu1 }
0x1214   : > { %v8881_v62 = vadd.f32 %v8880_v51, %v8607_v27 }
0x1215   : > { %vm8639_vm0 = vcmp.ge.f32.partialorder %v8879_v24, 0.0  ;;  %v8671_v4 = vmul.f32 %v8879_v24, %v8654_v6 }
0x1216   : > { %vm8640_vm7 = vcmp.ge.f32.partialorder %v8881_v62, 0.0  ;;  %v8672_v11 = vmul.f32 %v8881_v62, %v8654_v6  ;;  %v8612_v31 = vpop.f32.mrb[4].mxu1 }
0x1217   : > { %v8679_v44 = vsel %vm8639_vm0, %v8879_v24, %v8671_v4  ;;  %v8883_v38 = vadd.f32 %v8882_v50, %v8612_v31  ;;  %v8614_v32 = vpop.f32.mrb[5].mxu1 }
0x1218   : > { %8687 = vst [vmem:[%s13128_s30] sm:$0xff] %v8679_v44  ;;  %v8680_v16 = vsel %vm8640_vm7, %v8881_v62, %v8672_v11  ;;  %v8885_v37 = vadd.f32 %v8884_v2, %v8614_v32 }
0x1219   : > { %8688 = vst [vmem:[%s13128_s30 + $0x8] sm:$0xff] %v8680_v16  ;;  %vm8641_vm15 = vcmp.ge.f32.partialorder %v8883_v38, 0.0  ;;  %v8673_v59 = vmul.f32 %v8883_v38, %v8659_v53 }
0x121a   : > { %vm8642_vm14 = vcmp.ge.f32.partialorder %v8885_v37, 0.0  ;;  %v8674_v60 = vmul.f32 %v8885_v37, %v8659_v53  ;;  %v8619_v8 = vpop.f32.mrb[6].mxu1 }
0x121b   : > { %v8681_v17 = vsel %vm8641_vm15, %v8883_v38, %v8673_v59  ;;  %v8887_v33 = vadd.f32 %v8886_v46, %v8619_v8  ;;  %v8621_v36 = vpop.f32.mrb[7].mxu1 }
0x121c   : > { %8689 = vst [vmem:[%s13128_s30 + $0x10] sm:$0xff] %v8681_v17  ;;  %v8682_v25 = vsel %vm8642_vm14, %v8885_v37, %v8674_v60  ;;  %v8889_v14 = vadd.f32 %v8888_v45, %v8621_v36 }
0x121d   : > { %8690 = vst [vmem:[%s13128_s30 + $0x18] sm:$0xff] %v8682_v25  ;;  %vm8643_vm13 = vcmp.ge.f32.partialorder %v8887_v33, 0.0  ;;  %v8675_v26 = vmul.f32 %v8887_v33, %v8664_v15 }
0x121e   : > { %vm8644_vm9 = vcmp.ge.f32.partialorder %v8889_v14, 0.0  ;;  %v8676_v22 = vmul.f32 %v8889_v14, %v8664_v15  ;;  %v8626_v0 = vpop.f32.mrb[8].mxu1 }
0x121f   : > { %v8683_v42 = vsel %vm8643_vm13, %v8887_v33, %v8675_v26  ;;  %v8891_v61 = vadd.f32 %v8890_v13, %v8626_v0  ;;  %v8628_v28 = vpop.f32.mrb[9].mxu1 }
0x1220   : > { %8691 = vst [vmem:[%s13128_s30 + $0x20] sm:$0xff] %v8683_v42  ;;  %v8684_v40 = vsel %vm8644_vm9, %v8889_v14, %v8676_v22  ;;  %v8893_v19 = vadd.f32 %v8892_v54, %v8628_v28 }
0x1221   : > { %8692 = vst [vmem:[%s13128_s30 + $0x28] sm:$0xff] %v8684_v40  ;;  %vm8645_vm2 = vcmp.ge.f32.partialorder %v8891_v61, 0.0  ;;  %v8677_v12 = vmul.f32 %v8891_v61, %v8669_v58 }
0x1222   : > { %vm8646_vm1 = vcmp.ge.f32.partialorder %v8893_v19, 0.0  ;;  %v8678_v23 = vmul.f32 %v8893_v19, %v8669_v58 }
0x1223   : > { %v8685_v39 = vsel %vm8645_vm2, %v8891_v61, %v8677_v12 }
0x1224   : > { %8693 = vst [vmem:[%s13128_s30 + $0x30] sm:$0x1] %v8685_v39  ;;  %v8686_v7 = vsel %vm8646_vm1, %v8893_v19, %v8678_v23 }
0x1225   : > { %8694 = vst [vmem:[%s13128_s30 + $0x38] sm:$0x1] %v8686_v7 }
0x1226 PF: > { %s27_s20 = sadd.s32 1, %s9336_s20  }
0x1227   : > { %p24_p4 = scmp.ge.s32.totalorder %s27_s20, 4  }
0x1229   :  { %26 = sbr.rel (!%p24_p4) target bundleno = 3 (0x3), region = 135 }

</bundles_post_ra>
